<compile_context>
chip_gen: v5e
topology: v5e:2x2
jax: 0.10.0
libtpu: 0.0.40
codegen_flags: <defaults>
</compile_context>

<pallas_src>
import functools

import jax
import jax.numpy as jnp
from jax.experimental import pallas as pl
from jax.experimental.pallas import tpu as pltpu

_INV_SQRT2 = 0.7071067811865476
_LN_EPS = 1e-5  # torch.nn.LayerNorm default eps


# ---------------------------------------------------------------------------
# helpers
# ---------------------------------------------------------------------------
def _const_spec(shape, single_buffer=True):
    """BlockSpec for an operand whose block never changes across the grid.

    Such blocks gain nothing from double-buffering, so single-buffer them
    (pl.Buffered(1)) and spend the reclaimed VMEM on a larger row tile.
    """
    ndim = len(shape)
    index_map = lambda *_: (0,) * ndim  # noqa: E731
    if single_buffer:
        return pl.BlockSpec(shape, index_map, pipeline_mode=pl.Buffered(1))
    return pl.BlockSpec(shape, index_map)


def _call_with_const_buffering(builder, *args):
    """builder(single_buffer) -> pallas_call callable.

    Prefer single-buffered constant operands; fall back to default
    double-buffering if this jax/libtpu build rejects pipeline_mode."""
    try:
        return builder(True)(*args)
    except Exception:  # compatibility fallback only; real errors re-raise below
        return builder(False)(*args)


def _round_up(x, m):
    return ((x + m - 1) // m) * m


def _vmem_limit(needed_bytes):
    # Explicit scoped-VMEM budget: never below the 32 MiB newer-chip default,
    # scaled up (with margin) when tiles/weights grow.
    return int(min(128 << 20, max(32 << 20, 2 * needed_bytes + (4 << 20))))


# ---------------------------------------------------------------------------
# kernel 1: x + Attention(LayerNorm(x))     (one batch element per grid step)
# ---------------------------------------------------------------------------
def _attn_block_kernel(x_ref, g1_ref, be1_ref, wqkv_ref, wproj_ref, bproj_ref,
                       o_ref, *, num_heads, head_dim, scale):
    x = x_ref[0].astype(jnp.float32)                         # (N, C)

    # LayerNorm (norm1), biased variance like torch.
    mu = jnp.mean(x, axis=-1, keepdims=True)
    var = jnp.mean(jnp.square(x - mu), axis=-1, keepdims=True)
    xn = (x - mu) * jax.lax.rsqrt(var + _LN_EPS)
    xn = xn * g1_ref[...] + be1_ref[...]

    # Fused QKV projection (qkv_bias=False is the Block default).
    qkv = jnp.dot(xn.astype(wqkv_ref.dtype), wqkv_ref[...],
                  preferred_element_type=jnp.float32)        # (N, 3*H*hd)

    ahd = num_heads * head_dim
    q = qkv[:, 0 * ahd:1 * ahd]
    k = qkv[:, 1 * ahd:2 * ahd]
    v = qkv[:, 2 * ahd:3 * ahd]

    n = x.shape[0]
    c = o_ref.shape[-1]
    # proj(concat_h ctx_h) == sum_h ctx_h @ Wproj[h*hd:(h+1)*hd, :], so we
    # accumulate the projected output per head and never materialize the
    # concatenated context (no in-kernel concatenate / 3-D transpose).
    acc = jnp.zeros((n, c), jnp.float32)
    for h in range(num_heads):                               # static unroll
        sl = slice(h * head_dim, (h + 1) * head_dim)
        qh = q[:, sl] * scale
        kh = k[:, sl]
        vh = v[:, sl]
        s = jax.lax.dot_general(qh, kh, (((1,), (1,)), ((), ())),
                                preferred_element_type=jnp.float32)  # (N, N)
        s = s - jnp.max(s, axis=-1, keepdims=True)
        p = jnp.exp(s)
        p = p / jnp.sum(p, axis=-1, keepdims=True)           # softmax; attn_drop(p=0)
        ctx = jnp.dot(p.astype(vh.dtype), vh,
                      preferred_element_type=jnp.float32)    # (N, hd)
        wp_h = wproj_ref[h * head_dim:(h + 1) * head_dim, :]
        acc = acc + jnp.dot(ctx.astype(wp_h.dtype), wp_h,
                            preferred_element_type=jnp.float32)

    out = acc + bproj_ref[...]
    # proj_drop(p=0.0) and DropPath(0.0) are identities; add the residual.
    o_ref[0] = (x + out).astype(o_ref.dtype)


def attn_residual_pallas(x, g1, be1, wqkv, wproj, bproj, *, num_heads):
    """x + Attention(LayerNorm(x)), x: (B, N, C)."""
    B, N, C = x.shape
    three_ahd = wqkv.shape[1]
    ahd = three_ahd // 3
    head_dim = ahd // num_heads
    scale = float(head_dim) ** -0.5

    itemsize = jnp.dtype(x.dtype).itemsize
    # double-buffered x/out blocks + single-buffered weights/biases.
    needed = (4 * N * C + C * three_ahd + ahd * C + 3 * C) * itemsize

    kernel = functools.partial(_attn_block_kernel, num_heads=num_heads,
                               head_dim=head_dim, scale=scale)

    def builder(single_buffer):
        return pl.pallas_call(
            kernel,
            out_shape=jax.ShapeDtypeStruct((B, N, C), x.dtype),
            grid_spec=pltpu.PrefetchScalarGridSpec(
                num_scalar_prefetch=0,
                grid=(B,),
                in_specs=[
                    pl.BlockSpec((1, N, C), lambda b: (b, 0, 0)),
                    _const_spec((1, C), single_buffer),
                    _const_spec((1, C), single_buffer),
                    _const_spec((C, three_ahd), single_buffer),
                    _const_spec((ahd, C), single_buffer),
                    _const_spec((1, C), single_buffer),
                ],
                out_specs=pl.BlockSpec((1, N, C), lambda b: (b, 0, 0)),
            ),
            compiler_params=pltpu.CompilerParams(
                dimension_semantics=("parallel",),
                vmem_limit_bytes=_vmem_limit(needed)),
        )

    return _call_with_const_buffering(
        builder, x, g1.reshape(1, C), be1.reshape(1, C),
        wqkv, wproj, bproj.reshape(1, C))


# ---------------------------------------------------------------------------
# kernel 2: x + Mlp(LayerNorm(x))          (row-tiled over the (B*N, C) slab)
# ---------------------------------------------------------------------------
def _ln_mlp_block_kernel(x_ref, g2_ref, be2_ref, w1_ref, b1_ref, w2_ref, b2_ref,
                         o_ref):
    x = x_ref[...].astype(jnp.float32)                       # (tm, C)

    # LayerNorm (norm2).
    mu = jnp.mean(x, axis=-1, keepdims=True)
    var = jnp.mean(jnp.square(x - mu), axis=-1, keepdims=True)
    xn = (x - mu) * jax.lax.rsqrt(var + _LN_EPS)
    xn = xn * g2_ref[...] + be2_ref[...]

    # fc1 + exact GELU (matches torch nn.GELU default, approximate='none').
    h = jnp.dot(xn.astype(w1_ref.dtype), w1_ref[...],
                preferred_element_type=jnp.float32) + b1_ref[...]
    h = 0.5 * h * (1.0 + jax.lax.erf(h * _INV_SQRT2))

    # fc2
    y = jnp.dot(h.astype(w2_ref.dtype), w2_ref[...],
                preferred_element_type=jnp.float32) + b2_ref[...]

    # Dropout(p=0.0) + DropPath(0.0) are identities; add the residual.
    o_ref[...] = (x + y).astype(o_ref.dtype)


def ln_mlp_residual_pallas(x, g2, be2, w1, b1, w2, b2, *, tm=256):
    """x + Mlp(LayerNorm(x)), x: (B, N, C)."""
    B, N, C = x.shape
    hidden = w1.shape[1]
    M = B * N
    x2d = x.reshape(M, C)

    # Large row tile so the MXU sees >=128 rows per step and the ~0.35us
    # per-grid-step overhead is amortized. Multiple of 8 for f32 (use a
    # multiple of 16 for bf16). v5e: 128-256 is plenty; v6e/v7x: 256+.
    tm = _round_up(max(8, min(tm, _round_up(M, 8))), 8)
    m_pad = _round_up(M, tm)
    if m_pad != M:
        # Pad rows instead of asserting divisibility; padded rows are sliced
        # off below (they never contaminate real rows: everything is row-wise).
        x2d = jnp.pad(x2d, ((0, m_pad - M), (0, 0)))

    itemsize = jnp.dtype(x.dtype).itemsize
    needed = (4 * tm * C + C * hidden + hidden * C + hidden + 3 * C) * itemsize
    # NOTE: for large hidden/C, tile `hidden` with a second (reduction) grid
    # axis + f32 accumulator scratch instead of keeping both weights resident
    # (critical on v7x's 64 MiB VMEM).

    def builder(single_buffer):
        return pl.pallas_call(
            _ln_mlp_block_kernel,
            out_shape=jax.ShapeDtypeStruct((m_pad, C), x.dtype),
            grid_spec=pltpu.PrefetchScalarGridSpec(
                num_scalar_prefetch=0,
                grid=(m_pad // tm,),
                in_specs=[
                    pl.BlockSpec((tm, C), lambda i: (i, 0)),
                    _const_spec((1, C), single_buffer),
                    _const_spec((1, C), single_buffer),
                    _const_spec((C, hidden), single_buffer),
                    _const_spec((1, hidden), single_buffer),
                    _const_spec((hidden, C), single_buffer),
                    _const_spec((1, C), single_buffer),
                ],
                out_specs=pl.BlockSpec((tm, C), lambda i: (i, 0)),
            ),
            compiler_params=pltpu.CompilerParams(
                dimension_semantics=("parallel",),
                vmem_limit_bytes=_vmem_limit(needed)),
        )

    out2d = _call_with_const_buffering(
        builder, x2d, g2.reshape(1, C), be2.reshape(1, C),
        w1, b1.reshape(1, hidden), w2, b2.reshape(1, C))
    return out2d[:M].reshape(B, N, C)


# ---------------------------------------------------------------------------
# full Block forward + pure-JAX reference
# ---------------------------------------------------------------------------
def block_forward_pallas(x, p, *, num_heads, tm=256):
    x = attn_residual_pallas(x, p["norm1_w"], p["norm1_b"], p["qkv_w"],
                             p["proj_w"], p["proj_b"], num_heads=num_heads)
    x = ln_mlp_residual_pallas(x, p["norm2_w"], p["norm2_b"], p["fc1_w"],
                               p["fc1_b"], p["fc2_w"], p["fc2_b"], tm=tm)
    return x


def block_reference(x, p, *, num_heads):
    hp = jax.lax.Precision.HIGHEST

    def ln(v, g, b):
        mu = v.mean(-1, keepdims=True)
        var = jnp.mean(jnp.square(v - mu), -1, keepdims=True)
        return (v - mu) * jax.lax.rsqrt(var + _LN_EPS) * g + b

    B, N, C = x.shape
    ahd = p["qkv_w"].shape[1] // 3
    hd = ahd // num_heads
    scale = float(hd) ** -0.5

    xn = ln(x, p["norm1_w"], p["norm1_b"])
    qkv = jnp.einsum("bnc,cd->bnd", xn, p["qkv_w"], precision=hp)
    qkv = qkv.reshape(B, N, 3, num_heads, hd).transpose(2, 0, 3, 1, 4)
    q, k, v = qkv[0] * scale, qkv[1], qkv[2]
    attn = jax.nn.softmax(
        jnp.einsum("bhqd,bhkd->bhqk", q, k, precision=hp), axis=-1)
    ctx = jnp.einsum("bhqk,bhkd->bhqd", attn, v, precision=hp)
    ctx = ctx.transpose(0, 2, 1, 3).reshape(B, N, ahd)
    x = x + (jnp.einsum("bnd,dc->bnc", ctx, p["proj_w"], precision=hp)
             + p["proj_b"])

    xn = ln(x, p["norm2_w"], p["norm2_b"])
    h = jnp.einsum("bnc,ch->bnh", xn, p["fc1_w"], precision=hp) + p["fc1_b"]
    h = jax.nn.gelu(h, approximate=False)
    x = x + (jnp.einsum("bnh,hc->bnc", h, p["fc2_w"], precision=hp)
             + p["fc2_b"])
    return x


if __name__ == "__main__":
    # Small but lane-dense shapes (every feature dim is a multiple of 128 so
    # output stores are unmasked and vregs carry no lane padding).
    B, N = 2, 128                  # batch, tokens  -> B*N = 256 = one tm tile
    dim = 128                      # embedding dim
    num_heads = 4                  # head_dim = 32, all_head_dim = dim
    mlp_ratio = 4.0
    hidden = int(dim * mlp_ratio)  # 512

    key = jax.random.PRNGKey(0)
    ks = jax.random.split(key, 10)

    x = jax.random.normal(ks[0], (B, N, dim), dtype=jnp.float32)

    # PyTorch nn.Linear stores W as (out, in); we keep the transposed (in, out)
    # layout so every kernel matmul is a plain x @ W on the MXU.
    params = {
        "norm1_w": 1.0 + 0.1 * jax.random.normal(ks[1], (dim,), jnp.float32),
        "norm1_b": 0.1 * jax.random.normal(ks[2], (dim,), jnp.float32),
        "qkv_w": 0.02 * jax.random.normal(ks[3], (dim, 3 * dim), jnp.float32),
        "proj_w": 0.02 * jax.random.normal(ks[4], (dim, dim), jnp.float32),
        "proj_b": 0.02 * jax.random.normal(ks[5], (dim,), jnp.float32),
        "norm2_w": 1.0 + 0.1 * jax.random.normal(ks[6], (dim,), jnp.float32),
        "norm2_b": 0.1 * jax.random.normal(ks[7], (dim,), jnp.float32),
        "fc1_w": 0.02 * jax.random.normal(ks[8], (dim, hidden), jnp.float32),
        "fc1_b": jnp.zeros((hidden,), jnp.float32),
        "fc2_w": 0.02 * jax.random.normal(ks[9], (hidden, dim), jnp.float32),
        "fc2_b": jnp.zeros((dim,), jnp.float32),
    }

    y = block_forward_pallas(x, params, num_heads=num_heads, tm=256)
    y = jax.block_until_ready(y)

    y_ref = block_reference(x, params, num_heads=num_heads)
    assert y.shape == (B, N, dim)
    max_err = float(jnp.max(jnp.abs(y - y_ref)))
    assert jnp.allclose(y, y_ref, atol=5e-4, rtol=5e-4), (
        f"mismatch vs reference, max abs err = {max_err}")

    print("KERNEL_OK")
</pallas_src>

<mosaic_0001>
module attributes {stable_mosaic.version = 11 : i64} {
  func.func @_attn_block_kernel(%arg0: i32, %arg1: memref<1x128x128xf32, #tpu.memory_space<vmem>>, %arg2: memref<1x128xf32, #tpu.memory_space<vmem>>, %arg3: memref<1x128xf32, #tpu.memory_space<vmem>>, %arg4: memref<128x384xf32, #tpu.memory_space<vmem>>, %arg5: memref<128x128xf32, #tpu.memory_space<vmem>>, %arg6: memref<1x128xf32, #tpu.memory_space<vmem>>, %arg7: memref<1x128x128xf32, #tpu.memory_space<vmem>>) attributes {dimension_semantics = [#tpu.dimension_semantics<parallel>], iteration_bounds = array<i64: 2>, scalar_prefetch = 0 : i64, scratch_operands = 0 : i64, tpu.core_type = #tpu.core_type<tc>, window_params = [{transform_indices = @transform_0, window_bounds = array<i64: 1, 128, 128>}, {pipeline_mode = #tpu.pipeline_mode<synchronous>, transform_indices = @transform_1, window_bounds = array<i64: 1, 128>}, {pipeline_mode = #tpu.pipeline_mode<synchronous>, transform_indices = @transform_2, window_bounds = array<i64: 1, 128>}, {pipeline_mode = #tpu.pipeline_mode<synchronous>, transform_indices = @transform_3, window_bounds = array<i64: 128, 384>}, {pipeline_mode = #tpu.pipeline_mode<synchronous>, transform_indices = @transform_4, window_bounds = array<i64: 128, 128>}, {pipeline_mode = #tpu.pipeline_mode<synchronous>, transform_indices = @transform_5, window_bounds = array<i64: 1, 128>}, {transform_indices = @transform_6, window_bounds = array<i64: 1, 128, 128>}]} {
    %c0 = arith.constant 0 : index
    %c0_0 = arith.constant 0 : index
    %c0_1 = arith.constant 0 : index
    %0 = vector.load %arg1[%c0, %c0_0, %c0_1] : memref<1x128x128xf32, #tpu.memory_space<vmem>>, vector<1x128x128xf32>
    %1 = vector.shape_cast %0 : vector<1x128x128xf32> to vector<128x128xf32>
    %cst = arith.constant dense<0.000000e+00> : vector<128xf32>
    %2 = vector.multi_reduction <add>, %1, %cst [1] : vector<128x128xf32> to vector<128xf32>
    %3 = vector.shape_cast %2 : vector<128xf32> to vector<128x1xf32>
    %cst_2 = arith.constant 1.280000e+02 : f32
    %4 = vector.broadcast %cst_2 : f32 to vector<128x1xf32>
    %5 = arith.divf %3, %4 : vector<128x1xf32>
    %6 = vector.broadcast %5 : vector<128x1xf32> to vector<128x128xf32>
    %7 = arith.subf %1, %6 : vector<128x128xf32>
    %8 = arith.mulf %7, %7 : vector<128x128xf32>
    %cst_3 = arith.constant dense<0.000000e+00> : vector<128xf32>
    %9 = vector.multi_reduction <add>, %8, %cst_3 [1] : vector<128x128xf32> to vector<128xf32>
    %10 = vector.shape_cast %9 : vector<128xf32> to vector<128x1xf32>
    %cst_4 = arith.constant 1.280000e+02 : f32
    %11 = vector.broadcast %cst_4 : f32 to vector<128x1xf32>
    %12 = arith.divf %10, %11 : vector<128x1xf32>
    %13 = vector.broadcast %5 : vector<128x1xf32> to vector<128x128xf32>
    %14 = arith.subf %1, %13 : vector<128x128xf32>
    %cst_5 = arith.constant 9.99999974E-6 : f32
    %15 = vector.broadcast %cst_5 : f32 to vector<128x1xf32>
    %16 = arith.addf %12, %15 : vector<128x1xf32>
    %17 = math.rsqrt %16 : vector<128x1xf32>
    %18 = vector.broadcast %17 : vector<128x1xf32> to vector<128x128xf32>
    %19 = arith.mulf %14, %18 : vector<128x128xf32>
    %c0_6 = arith.constant 0 : index
    %c0_7 = arith.constant 0 : index
    %20 = vector.load %arg2[%c0_6, %c0_7] : memref<1x128xf32, #tpu.memory_space<vmem>>, vector<1x128xf32>
    %21 = vector.broadcast %20 : vector<1x128xf32> to vector<128x128xf32>
    %22 = arith.mulf %19, %21 : vector<128x128xf32>
    %c0_8 = arith.constant 0 : index
    %c0_9 = arith.constant 0 : index
    %23 = vector.load %arg3[%c0_8, %c0_9] : memref<1x128xf32, #tpu.memory_space<vmem>>, vector<1x128xf32>
    %24 = vector.broadcast %23 : vector<1x128xf32> to vector<128x128xf32>
    %25 = arith.addf %22, %24 : vector<128x128xf32>
    %c0_10 = arith.constant 0 : index
    %c0_11 = arith.constant 0 : index
    %26 = vector.load %arg4[%c0_10, %c0_11] : memref<128x384xf32, #tpu.memory_space<vmem>>, vector<128x384xf32>
    %cst_12 = arith.constant dense<0.000000e+00> : vector<128x384xf32>
    %27 = tpu.matmul %25, %26, %cst_12 {dimension_numbers = #tpu.dot_dimension_numbers<[1], [0], [0], [1], [0, 0, 1, 1], [], []>} : vector<128x128xf32>, vector<128x384xf32>, vector<128x384xf32> -> vector<128x384xf32>
    %28 = vector.extract_strided_slice %27 {offsets = [0, 0], sizes = [128, 128], strides = [1, 1]} : vector<128x384xf32> to vector<128x128xf32>
    %29 = vector.extract_strided_slice %27 {offsets = [0, 128], sizes = [128, 128], strides = [1, 1]} : vector<128x384xf32> to vector<128x128xf32>
    %30 = vector.extract_strided_slice %27 {offsets = [0, 256], sizes = [128, 128], strides = [1, 1]} : vector<128x384xf32> to vector<128x128xf32>
    %cst_13 = arith.constant 0.000000e+00 : f32
    %31 = vector.broadcast %cst_13 : f32 to vector<128x128xf32>
    %32 = vector.extract_strided_slice %28 {offsets = [0, 0], sizes = [128, 32], strides = [1, 1]} : vector<128x128xf32> to vector<128x32xf32>
    %cst_14 = arith.constant 0.176776692 : f32
    %33 = vector.broadcast %cst_14 : f32 to vector<128x32xf32>
    %34 = arith.mulf %32, %33 : vector<128x32xf32>
    %35 = vector.extract_strided_slice %29 {offsets = [0, 0], sizes = [128, 32], strides = [1, 1]} : vector<128x128xf32> to vector<128x32xf32>
    %36 = vector.extract_strided_slice %30 {offsets = [0, 0], sizes = [128, 32], strides = [1, 1]} : vector<128x128xf32> to vector<128x32xf32>
    %cst_15 = arith.constant dense<0.000000e+00> : vector<128x128xf32>
    %37 = tpu.matmul %34, %35, %cst_15 {dimension_numbers = #tpu.dot_dimension_numbers<[1], [1], [0], [0], [0, 0, 1, 0], [], []>} : vector<128x32xf32>, vector<128x32xf32>, vector<128x128xf32> -> vector<128x128xf32>
    %cst_16 = arith.constant dense<0xFF800000> : vector<128xf32>
    %38 = vector.multi_reduction <maximumf>, %37, %cst_16 [1] : vector<128x128xf32> to vector<128xf32>
    %39 = vector.shape_cast %38 : vector<128xf32> to vector<128x1xf32>
    %40 = vector.broadcast %39 : vector<128x1xf32> to vector<128x128xf32>
    %41 = arith.subf %37, %40 : vector<128x128xf32>
    %42 = math.exp %41 : vector<128x128xf32>
    %cst_17 = arith.constant dense<0.000000e+00> : vector<128xf32>
    %43 = vector.multi_reduction <add>, %42, %cst_17 [1] : vector<128x128xf32> to vector<128xf32>
    %44 = vector.shape_cast %43 : vector<128xf32> to vector<128x1xf32>
    %45 = vector.broadcast %44 : vector<128x1xf32> to vector<128x128xf32>
    %46 = arith.divf %42, %45 : vector<128x128xf32>
    %cst_18 = arith.constant dense<0.000000e+00> : vector<128x32xf32>
    %47 = tpu.matmul %46, %36, %cst_18 {dimension_numbers = #tpu.dot_dimension_numbers<[1], [0], [0], [1], [0, 0, 1, 1], [], []>} : vector<128x128xf32>, vector<128x32xf32>, vector<128x32xf32> -> vector<128x32xf32>
    %c0_19 = arith.constant 0 : index
    %c0_20 = arith.constant 0 : index
    %48 = vector.load %arg5[%c0_19, %c0_20] : memref<128x128xf32, #tpu.memory_space<vmem>>, vector<32x128xf32>
    %cst_21 = arith.constant dense<0.000000e+00> : vector<128x128xf32>
    %49 = tpu.matmul %47, %48, %cst_21 {dimension_numbers = #tpu.dot_dimension_numbers<[1], [0], [0], [1], [0, 0, 1, 1], [], []>} : vector<128x32xf32>, vector<32x128xf32>, vector<128x128xf32> -> vector<128x128xf32>
    %50 = arith.addf %31, %49 : vector<128x128xf32>
    %51 = vector.extract_strided_slice %28 {offsets = [0, 32], sizes = [128, 32], strides = [1, 1]} : vector<128x128xf32> to vector<128x32xf32>
    %cst_22 = arith.constant 0.176776692 : f32
    %52 = vector.broadcast %cst_22 : f32 to vector<128x32xf32>
    %53 = arith.mulf %51, %52 : vector<128x32xf32>
    %54 = vector.extract_strided_slice %29 {offsets = [0, 32], sizes = [128, 32], strides = [1, 1]} : vector<128x128xf32> to vector<128x32xf32>
    %55 = vector.extract_strided_slice %30 {offsets = [0, 32], sizes = [128, 32], strides = [1, 1]} : vector<128x128xf32> to vector<128x32xf32>
    %cst_23 = arith.constant dense<0.000000e+00> : vector<128x128xf32>
    %56 = tpu.matmul %53, %54, %cst_23 {dimension_numbers = #tpu.dot_dimension_numbers<[1], [1], [0], [0], [0, 0, 1, 0], [], []>} : vector<128x32xf32>, vector<128x32xf32>, vector<128x128xf32> -> vector<128x128xf32>
    %cst_24 = arith.constant dense<0xFF800000> : vector<128xf32>
    %57 = vector.multi_reduction <maximumf>, %56, %cst_24 [1] : vector<128x128xf32> to vector<128xf32>
    %58 = vector.shape_cast %57 : vector<128xf32> to vector<128x1xf32>
    %59 = vector.broadcast %58 : vector<128x1xf32> to vector<128x128xf32>
    %60 = arith.subf %56, %59 : vector<128x128xf32>
    %61 = math.exp %60 : vector<128x128xf32>
    %cst_25 = arith.constant dense<0.000000e+00> : vector<128xf32>
    %62 = vector.multi_reduction <add>, %61, %cst_25 [1] : vector<128x128xf32> to vector<128xf32>
    %63 = vector.shape_cast %62 : vector<128xf32> to vector<128x1xf32>
    %64 = vector.broadcast %63 : vector<128x1xf32> to vector<128x128xf32>
    %65 = arith.divf %61, %64 : vector<128x128xf32>
    %cst_26 = arith.constant dense<0.000000e+00> : vector<128x32xf32>
    %66 = tpu.matmul %65, %55, %cst_26 {dimension_numbers = #tpu.dot_dimension_numbers<[1], [0], [0], [1], [0, 0, 1, 1], [], []>} : vector<128x128xf32>, vector<128x32xf32>, vector<128x32xf32> -> vector<128x32xf32>
    %c32 = arith.constant 32 : index
    %c0_27 = arith.constant 0 : index
    %67 = vector.load %arg5[%c32, %c0_27] : memref<128x128xf32, #tpu.memory_space<vmem>>, vector<32x128xf32>
    %cst_28 = arith.constant dense<0.000000e+00> : vector<128x128xf32>
    %68 = tpu.matmul %66, %67, %cst_28 {dimension_numbers = #tpu.dot_dimension_numbers<[1], [0], [0], [1], [0, 0, 1, 1], [], []>} : vector<128x32xf32>, vector<32x128xf32>, vector<128x128xf32> -> vector<128x128xf32>
    %69 = arith.addf %50, %68 : vector<128x128xf32>
    %70 = vector.extract_strided_slice %28 {offsets = [0, 64], sizes = [128, 32], strides = [1, 1]} : vector<128x128xf32> to vector<128x32xf32>
    %cst_29 = arith.constant 0.176776692 : f32
    %71 = vector.broadcast %cst_29 : f32 to vector<128x32xf32>
    %72 = arith.mulf %70, %71 : vector<128x32xf32>
    %73 = vector.extract_strided_slice %29 {offsets = [0, 64], sizes = [128, 32], strides = [1, 1]} : vector<128x128xf32> to vector<128x32xf32>
    %74 = vector.extract_strided_slice %30 {offsets = [0, 64], sizes = [128, 32], strides = [1, 1]} : vector<128x128xf32> to vector<128x32xf32>
    %cst_30 = arith.constant dense<0.000000e+00> : vector<128x128xf32>
    %75 = tpu.matmul %72, %73, %cst_30 {dimension_numbers = #tpu.dot_dimension_numbers<[1], [1], [0], [0], [0, 0, 1, 0], [], []>} : vector<128x32xf32>, vector<128x32xf32>, vector<128x128xf32> -> vector<128x128xf32>
    %cst_31 = arith.constant dense<0xFF800000> : vector<128xf32>
    %76 = vector.multi_reduction <maximumf>, %75, %cst_31 [1] : vector<128x128xf32> to vector<128xf32>
    %77 = vector.shape_cast %76 : vector<128xf32> to vector<128x1xf32>
    %78 = vector.broadcast %77 : vector<128x1xf32> to vector<128x128xf32>
    %79 = arith.subf %75, %78 : vector<128x128xf32>
    %80 = math.exp %79 : vector<128x128xf32>
    %cst_32 = arith.constant dense<0.000000e+00> : vector<128xf32>
    %81 = vector.multi_reduction <add>, %80, %cst_32 [1] : vector<128x128xf32> to vector<128xf32>
    %82 = vector.shape_cast %81 : vector<128xf32> to vector<128x1xf32>
    %83 = vector.broadcast %82 : vector<128x1xf32> to vector<128x128xf32>
    %84 = arith.divf %80, %83 : vector<128x128xf32>
    %cst_33 = arith.constant dense<0.000000e+00> : vector<128x32xf32>
    %85 = tpu.matmul %84, %74, %cst_33 {dimension_numbers = #tpu.dot_dimension_numbers<[1], [0], [0], [1], [0, 0, 1, 1], [], []>} : vector<128x128xf32>, vector<128x32xf32>, vector<128x32xf32> -> vector<128x32xf32>
    %c64 = arith.constant 64 : index
    %c0_34 = arith.constant 0 : index
    %86 = vector.load %arg5[%c64, %c0_34] : memref<128x128xf32, #tpu.memory_space<vmem>>, vector<32x128xf32>
    %cst_35 = arith.constant dense<0.000000e+00> : vector<128x128xf32>
    %87 = tpu.matmul %85, %86, %cst_35 {dimension_numbers = #tpu.dot_dimension_numbers<[1], [0], [0], [1], [0, 0, 1, 1], [], []>} : vector<128x32xf32>, vector<32x128xf32>, vector<128x128xf32> -> vector<128x128xf32>
    %88 = arith.addf %69, %87 : vector<128x128xf32>
    %89 = vector.extract_strided_slice %28 {offsets = [0, 96], sizes = [128, 32], strides = [1, 1]} : vector<128x128xf32> to vector<128x32xf32>
    %cst_36 = arith.constant 0.176776692 : f32
    %90 = vector.broadcast %cst_36 : f32 to vector<128x32xf32>
    %91 = arith.mulf %89, %90 : vector<128x32xf32>
    %92 = vector.extract_strided_slice %29 {offsets = [0, 96], sizes = [128, 32], strides = [1, 1]} : vector<128x128xf32> to vector<128x32xf32>
    %93 = vector.extract_strided_slice %30 {offsets = [0, 96], sizes = [128, 32], strides = [1, 1]} : vector<128x128xf32> to vector<128x32xf32>
    %cst_37 = arith.constant dense<0.000000e+00> : vector<128x128xf32>
    %94 = tpu.matmul %91, %92, %cst_37 {dimension_numbers = #tpu.dot_dimension_numbers<[1], [1], [0], [0], [0, 0, 1, 0], [], []>} : vector<128x32xf32>, vector<128x32xf32>, vector<128x128xf32> -> vector<128x128xf32>
    %cst_38 = arith.constant dense<0xFF800000> : vector<128xf32>
    %95 = vector.multi_reduction <maximumf>, %94, %cst_38 [1] : vector<128x128xf32> to vector<128xf32>
    %96 = vector.shape_cast %95 : vector<128xf32> to vector<128x1xf32>
    %97 = vector.broadcast %96 : vector<128x1xf32> to vector<128x128xf32>
    %98 = arith.subf %94, %97 : vector<128x128xf32>
    %99 = math.exp %98 : vector<128x128xf32>
    %cst_39 = arith.constant dense<0.000000e+00> : vector<128xf32>
    %100 = vector.multi_reduction <add>, %99, %cst_39 [1] : vector<128x128xf32> to vector<128xf32>
    %101 = vector.shape_cast %100 : vector<128xf32> to vector<128x1xf32>
    %102 = vector.broadcast %101 : vector<128x1xf32> to vector<128x128xf32>
    %103 = arith.divf %99, %102 : vector<128x128xf32>
    %cst_40 = arith.constant dense<0.000000e+00> : vector<128x32xf32>
    %104 = tpu.matmul %103, %93, %cst_40 {dimension_numbers = #tpu.dot_dimension_numbers<[1], [0], [0], [1], [0, 0, 1, 1], [], []>} : vector<128x128xf32>, vector<128x32xf32>, vector<128x32xf32> -> vector<128x32xf32>
    %c96 = arith.constant 96 : index
    %c0_41 = arith.constant 0 : index
    %105 = vector.load %arg5[%c96, %c0_41] : memref<128x128xf32, #tpu.memory_space<vmem>>, vector<32x128xf32>
    %cst_42 = arith.constant dense<0.000000e+00> : vector<128x128xf32>
    %106 = tpu.matmul %104, %105, %cst_42 {dimension_numbers = #tpu.dot_dimension_numbers<[1], [0], [0], [1], [0, 0, 1, 1], [], []>} : vector<128x32xf32>, vector<32x128xf32>, vector<128x128xf32> -> vector<128x128xf32>
    %107 = arith.addf %88, %106 : vector<128x128xf32>
    %c0_43 = arith.constant 0 : index
    %c0_44 = arith.constant 0 : index
    %108 = vector.load %arg6[%c0_43, %c0_44] : memref<1x128xf32, #tpu.memory_space<vmem>>, vector<1x128xf32>
    %109 = vector.broadcast %108 : vector<1x128xf32> to vector<128x128xf32>
    %110 = arith.addf %107, %109 : vector<128x128xf32>
    %111 = arith.addf %1, %110 : vector<128x128xf32>
    %c0_45 = arith.constant 0 : index
    %c0_46 = arith.constant 0 : index
    %c0_47 = arith.constant 0 : index
    %112 = vector.load %arg7[%c0_45, %c0_46, %c0_47] : memref<1x128x128xf32, #tpu.memory_space<vmem>>, vector<1x128x128xf32>
    %113 = vector.shape_cast %112 : vector<1x128x128xf32> to vector<128x128xf32>
    %114 = vector.shape_cast %111 : vector<128x128xf32> to vector<1x128x128xf32>
    tpu.vector_store %arg7[%c0_45, %c0_46, %c0_47], %114 {strides = array<i32>} : memref<1x128x128xf32, #tpu.memory_space<vmem>>, vector<1x128x128xf32>,
    return
  }
  func.func @transform_0(%arg0: i32) -> (i32, i32, i32) {
    %c0_i32 = arith.constant 0 : i32
    %c0_i32_0 = arith.constant 0 : i32
    %c0_i32_1 = arith.constant 0 : i32
    return %arg0, %c0_i32, %c0_i32_0 : i32, i32, i32
  }
  func.func @transform_1(%arg0: i32) -> (i32, i32) {
    %c0_i32 = arith.constant 0 : i32
    %c0_i32_0 = arith.constant 0 : i32
    %c0_i32_1 = arith.constant 0 : i32
    return %c0_i32, %c0_i32_0 : i32, i32
  }
  func.func @transform_2(%arg0: i32) -> (i32, i32) {
    %c0_i32 = arith.constant 0 : i32
    %c0_i32_0 = arith.constant 0 : i32
    %c0_i32_1 = arith.constant 0 : i32
    return %c0_i32, %c0_i32_0 : i32, i32
  }
  func.func @transform_3(%arg0: i32) -> (i32, i32) {
    %c0_i32 = arith.constant 0 : i32
    %c0_i32_0 = arith.constant 0 : i32
    %c0_i32_1 = arith.constant 0 : i32
    return %c0_i32, %c0_i32_0 : i32, i32
  }
  func.func @transform_4(%arg0: i32) -> (i32, i32) {
    %c0_i32 = arith.constant 0 : i32
    %c0_i32_0 = arith.constant 0 : i32
    %c0_i32_1 = arith.constant 0 : i32
    return %c0_i32, %c0_i32_0 : i32, i32
  }
  func.func @transform_5(%arg0: i32) -> (i32, i32) {
    %c0_i32 = arith.constant 0 : i32
    %c0_i32_0 = arith.constant 0 : i32
    %c0_i32_1 = arith.constant 0 : i32
    return %c0_i32, %c0_i32_0 : i32, i32
  }
  func.func @transform_6(%arg0: i32) -> (i32, i32, i32) {
    %c0_i32 = arith.constant 0 : i32
    %c0_i32_0 = arith.constant 0 : i32
    %c0_i32_1 = arith.constant 0 : i32
    return %arg0, %c0_i32, %c0_i32_0 : i32, i32, i32
  }
}

module attributes {stable_mosaic.version = 11 : i64} {
  func.func @_attn_block_kernel(%arg0: i32, %arg1: memref<1x128x128xf32, #tpu.memory_space<vmem>>, %arg2: memref<1x128xf32, #tpu.memory_space<vmem>>, %arg3: memref<1x128xf32, #tpu.memory_space<vmem>>, %arg4: memref<128x384xf32, #tpu.memory_space<vmem>>, %arg5: memref<128x128xf32, #tpu.memory_space<vmem>>, %arg6: memref<1x128xf32, #tpu.memory_space<vmem>>, %arg7: memref<1x128x128xf32, #tpu.memory_space<vmem>>) attributes {dimension_semantics = [#tpu.dimension_semantics<parallel>], iteration_bounds = array<i64: 2>, scalar_prefetch = 0 : i64, scratch_operands = 0 : i64, tpu.core_type = #tpu.core_type<tc>, window_params = [{transform_indices = @transform_0, window_bounds = array<i64: 1, 128, 128>}, {pipeline_mode = #tpu.pipeline_mode<synchronous>, transform_indices = @transform_1, window_bounds = array<i64: 1, 128>}, {pipeline_mode = #tpu.pipeline_mode<synchronous>, transform_indices = @transform_2, window_bounds = array<i64: 1, 128>}, {pipeline_mode = #tpu.pipeline_mode<synchronous>, transform_indices = @transform_3, window_bounds = array<i64: 128, 384>}, {pipeline_mode = #tpu.pipeline_mode<synchronous>, transform_indices = @transform_4, window_bounds = array<i64: 128, 128>}, {pipeline_mode = #tpu.pipeline_mode<synchronous>, transform_indices = @transform_5, window_bounds = array<i64: 1, 128>}, {transform_indices = @transform_6, window_bounds = array<i64: 1, 128, 128>}]} {
    %c0 = arith.constant 0 : index
    %c0_0 = arith.constant 0 : index
    %c0_1 = arith.constant 0 : index
    %0 = vector.load %arg1[%c0, %c0_0, %c0_1] : memref<1x128x128xf32, #tpu.memory_space<vmem>>, vector<1x128x128xf32>
    %1 = vector.shape_cast %0 : vector<1x128x128xf32> to vector<128x128xf32>
    %cst = arith.constant dense<0.000000e+00> : vector<128xf32>
    %2 = vector.multi_reduction <add>, %1, %cst [1] : vector<128x128xf32> to vector<128xf32>
    %3 = vector.shape_cast %2 : vector<128xf32> to vector<128x1xf32>
    %cst_2 = arith.constant 1.280000e+02 : f32
    %4 = vector.broadcast %cst_2 : f32 to vector<128x1xf32>
    %5 = arith.divf %3, %4 : vector<128x1xf32>
    %6 = vector.broadcast %5 : vector<128x1xf32> to vector<128x128xf32>
    %7 = arith.subf %1, %6 : vector<128x128xf32>
    %8 = arith.mulf %7, %7 : vector<128x128xf32>
    %cst_3 = arith.constant dense<0.000000e+00> : vector<128xf32>
    %9 = vector.multi_reduction <add>, %8, %cst_3 [1] : vector<128x128xf32> to vector<128xf32>
    %10 = vector.shape_cast %9 : vector<128xf32> to vector<128x1xf32>
    %cst_4 = arith.constant 1.280000e+02 : f32
    %11 = vector.broadcast %cst_4 : f32 to vector<128x1xf32>
    %12 = arith.divf %10, %11 : vector<128x1xf32>
    %13 = vector.broadcast %5 : vector<128x1xf32> to vector<128x128xf32>
    %14 = arith.subf %1, %13 : vector<128x128xf32>
    %cst_5 = arith.constant 9.99999974E-6 : f32
    %15 = vector.broadcast %cst_5 : f32 to vector<128x1xf32>
    %16 = arith.addf %12, %15 : vector<128x1xf32>
    %17 = math.rsqrt %16 : vector<128x1xf32>
    %18 = vector.broadcast %17 : vector<128x1xf32> to vector<128x128xf32>
    %19 = arith.mulf %14, %18 : vector<128x128xf32>
    %c0_6 = arith.constant 0 : index
    %c0_7 = arith.constant 0 : index
    %20 = vector.load %arg2[%c0_6, %c0_7] : memref<1x128xf32, #tpu.memory_space<vmem>>, vector<1x128xf32>
    %21 = vector.broadcast %20 : vector<1x128xf32> to vector<128x128xf32>
    %22 = arith.mulf %19, %21 : vector<128x128xf32>
    %c0_8 = arith.constant 0 : index
    %c0_9 = arith.constant 0 : index
    %23 = vector.load %arg3[%c0_8, %c0_9] : memref<1x128xf32, #tpu.memory_space<vmem>>, vector<1x128xf32>
    %24 = vector.broadcast %23 : vector<1x128xf32> to vector<128x128xf32>
    %25 = arith.addf %22, %24 : vector<128x128xf32>
    %c0_10 = arith.constant 0 : index
    %c0_11 = arith.constant 0 : index
    %26 = vector.load %arg4[%c0_10, %c0_11] : memref<128x384xf32, #tpu.memory_space<vmem>>, vector<128x384xf32>
    %cst_12 = arith.constant dense<0.000000e+00> : vector<128x384xf32>
    %27 = tpu.matmul %25, %26, %cst_12 {dimension_numbers = #tpu.dot_dimension_numbers<[1], [0], [0], [1], [0, 0, 1, 1], [], []>} : vector<128x128xf32>, vector<128x384xf32>, vector<128x384xf32> -> vector<128x384xf32>
    %28 = vector.extract_strided_slice %27 {offsets = [0, 0], sizes = [128, 128], strides = [1, 1]} : vector<128x384xf32> to vector<128x128xf32>
    %29 = vector.extract_strided_slice %27 {offsets = [0, 128], sizes = [128, 128], strides = [1, 1]} : vector<128x384xf32> to vector<128x128xf32>
    %30 = vector.extract_strided_slice %27 {offsets = [0, 256], sizes = [128, 128], strides = [1, 1]} : vector<128x384xf32> to vector<128x128xf32>
    %cst_13 = arith.constant 0.000000e+00 : f32
    %31 = vector.broadcast %cst_13 : f32 to vector<128x128xf32>
    %32 = vector.extract_strided_slice %28 {offsets = [0, 0], sizes = [128, 32], strides = [1, 1]} : vector<128x128xf32> to vector<128x32xf32>
    %cst_14 = arith.constant 0.176776692 : f32
    %33 = vector.broadcast %cst_14 : f32 to vector<128x32xf32>
    %34 = arith.mulf %32, %33 : vector<128x32xf32>
    %35 = vector.extract_strided_slice %29 {offsets = [0, 0], sizes = [128, 32], strides = [1, 1]} : vector<128x128xf32> to vector<128x32xf32>
    %36 = vector.extract_strided_slice %30 {offsets = [0, 0], sizes = [128, 32], strides = [1, 1]} : vector<128x128xf32> to vector<128x32xf32>
    %cst_15 = arith.constant dense<0.000000e+00> : vector<128x128xf32>
    %37 = tpu.matmul %34, %35, %cst_15 {dimension_numbers = #tpu.dot_dimension_numbers<[1], [1], [0], [0], [0, 0, 1, 0], [], []>} : vector<128x32xf32>, vector<128x32xf32>, vector<128x128xf32> -> vector<128x128xf32>
    %cst_16 = arith.constant dense<0xFF800000> : vector<128xf32>
    %38 = vector.multi_reduction <maximumf>, %37, %cst_16 [1] : vector<128x128xf32> to vector<128xf32>
    %39 = vector.shape_cast %38 : vector<128xf32> to vector<128x1xf32>
    %40 = vector.broadcast %39 : vector<128x1xf32> to vector<128x128xf32>
    %41 = arith.subf %37, %40 : vector<128x128xf32>
    %42 = math.exp %41 : vector<128x128xf32>
    %cst_17 = arith.constant dense<0.000000e+00> : vector<128xf32>
    %43 = vector.multi_reduction <add>, %42, %cst_17 [1] : vector<128x128xf32> to vector<128xf32>
    %44 = vector.shape_cast %43 : vector<128xf32> to vector<128x1xf32>
    %45 = vector.broadcast %44 : vector<128x1xf32> to vector<128x128xf32>
    %46 = arith.divf %42, %45 : vector<128x128xf32>
    %cst_18 = arith.constant dense<0.000000e+00> : vector<128x32xf32>
    %47 = tpu.matmul %46, %36, %cst_18 {dimension_numbers = #tpu.dot_dimension_numbers<[1], [0], [0], [1], [0, 0, 1, 1], [], []>} : vector<128x128xf32>, vector<128x32xf32>, vector<128x32xf32> -> vector<128x32xf32>
    %c0_19 = arith.constant 0 : index
    %c0_20 = arith.constant 0 : index
    %48 = vector.load %arg5[%c0_19, %c0_20] : memref<128x128xf32, #tpu.memory_space<vmem>>, vector<32x128xf32>
    %cst_21 = arith.constant dense<0.000000e+00> : vector<128x128xf32>
    %49 = tpu.matmul %47, %48, %cst_21 {dimension_numbers = #tpu.dot_dimension_numbers<[1], [0], [0], [1], [0, 0, 1, 1], [], []>} : vector<128x32xf32>, vector<32x128xf32>, vector<128x128xf32> -> vector<128x128xf32>
    %50 = arith.addf %31, %49 : vector<128x128xf32>
    %51 = vector.extract_strided_slice %28 {offsets = [0, 32], sizes = [128, 32], strides = [1, 1]} : vector<128x128xf32> to vector<128x32xf32>
    %cst_22 = arith.constant 0.176776692 : f32
    %52 = vector.broadcast %cst_22 : f32 to vector<128x32xf32>
    %53 = arith.mulf %51, %52 : vector<128x32xf32>
    %54 = vector.extract_strided_slice %29 {offsets = [0, 32], sizes = [128, 32], strides = [1, 1]} : vector<128x128xf32> to vector<128x32xf32>
    %55 = vector.extract_strided_slice %30 {offsets = [0, 32], sizes = [128, 32], strides = [1, 1]} : vector<128x128xf32> to vector<128x32xf32>
    %cst_23 = arith.constant dense<0.000000e+00> : vector<128x128xf32>
    %56 = tpu.matmul %53, %54, %cst_23 {dimension_numbers = #tpu.dot_dimension_numbers<[1], [1], [0], [0], [0, 0, 1, 0], [], []>} : vector<128x32xf32>, vector<128x32xf32>, vector<128x128xf32> -> vector<128x128xf32>
    %cst_24 = arith.constant dense<0xFF800000> : vector<128xf32>
    %57 = vector.multi_reduction <maximumf>, %56, %cst_24 [1] : vector<128x128xf32> to vector<128xf32>
    %58 = vector.shape_cast %57 : vector<128xf32> to vector<128x1xf32>
    %59 = vector.broadcast %58 : vector<128x1xf32> to vector<128x128xf32>
    %60 = arith.subf %56, %59 : vector<128x128xf32>
    %61 = math.exp %60 : vector<128x128xf32>
    %cst_25 = arith.constant dense<0.000000e+00> : vector<128xf32>
    %62 = vector.multi_reduction <add>, %61, %cst_25 [1] : vector<128x128xf32> to vector<128xf32>
    %63 = vector.shape_cast %62 : vector<128xf32> to vector<128x1xf32>
    %64 = vector.broadcast %63 : vector<128x1xf32> to vector<128x128xf32>
    %65 = arith.divf %61, %64 : vector<128x128xf32>
    %cst_26 = arith.constant dense<0.000000e+00> : vector<128x32xf32>
    %66 = tpu.matmul %65, %55, %cst_26 {dimension_numbers = #tpu.dot_dimension_numbers<[1], [0], [0], [1], [0, 0, 1, 1], [], []>} : vector<128x128xf32>, vector<128x32xf32>, vector<128x32xf32> -> vector<128x32xf32>
    %c32 = arith.constant 32 : index
    %c0_27 = arith.constant 0 : index
    %67 = vector.load %arg5[%c32, %c0_27] : memref<128x128xf32, #tpu.memory_space<vmem>>, vector<32x128xf32>
    %cst_28 = arith.constant dense<0.000000e+00> : vector<128x128xf32>
    %68 = tpu.matmul %66, %67, %cst_28 {dimension_numbers = #tpu.dot_dimension_numbers<[1], [0], [0], [1], [0, 0, 1, 1], [], []>} : vector<128x32xf32>, vector<32x128xf32>, vector<128x128xf32> -> vector<128x128xf32>
    %69 = arith.addf %50, %68 : vector<128x128xf32>
    %70 = vector.extract_strided_slice %28 {offsets = [0, 64], sizes = [128, 32], strides = [1, 1]} : vector<128x128xf32> to vector<128x32xf32>
    %cst_29 = arith.constant 0.176776692 : f32
    %71 = vector.broadcast %cst_29 : f32 to vector<128x32xf32>
    %72 = arith.mulf %70, %71 : vector<128x32xf32>
    %73 = vector.extract_strided_slice %29 {offsets = [0, 64], sizes = [128, 32], strides = [1, 1]} : vector<128x128xf32> to vector<128x32xf32>
    %74 = vector.extract_strided_slice %30 {offsets = [0, 64], sizes = [128, 32], strides = [1, 1]} : vector<128x128xf32> to vector<128x32xf32>
    %cst_30 = arith.constant dense<0.000000e+00> : vector<128x128xf32>
    %75 = tpu.matmul %72, %73, %cst_30 {dimension_numbers = #tpu.dot_dimension_numbers<[1], [1], [0], [0], [0, 0, 1, 0], [], []>} : vector<128x32xf32>, vector<128x32xf32>, vector<128x128xf32> -> vector<128x128xf32>
    %cst_31 = arith.constant dense<0xFF800000> : vector<128xf32>
    %76 = vector.multi_reduction <maximumf>, %75, %cst_31 [1] : vector<128x128xf32> to vector<128xf32>
    %77 = vector.shape_cast %76 : vector<128xf32> to vector<128x1xf32>
    %78 = vector.broadcast %77 : vector<128x1xf32> to vector<128x128xf32>
    %79 = arith.subf %75, %78 : vector<128x128xf32>
    %80 = math.exp %79 : vector<128x128xf32>
    %cst_32 = arith.constant dense<0.000000e+00> : vector<128xf32>
    %81 = vector.multi_reduction <add>, %80, %cst_32 [1] : vector<128x128xf32> to vector<128xf32>
    %82 = vector.shape_cast %81 : vector<128xf32> to vector<128x1xf32>
    %83 = vector.broadcast %82 : vector<128x1xf32> to vector<128x128xf32>
    %84 = arith.divf %80, %83 : vector<128x128xf32>
    %cst_33 = arith.constant dense<0.000000e+00> : vector<128x32xf32>
    %85 = tpu.matmul %84, %74, %cst_33 {dimension_numbers = #tpu.dot_dimension_numbers<[1], [0], [0], [1], [0, 0, 1, 1], [], []>} : vector<128x128xf32>, vector<128x32xf32>, vector<128x32xf32> -> vector<128x32xf32>
    %c64 = arith.constant 64 : index
    %c0_34 = arith.constant 0 : index
    %86 = vector.load %arg5[%c64, %c0_34] : memref<128x128xf32, #tpu.memory_space<vmem>>, vector<32x128xf32>
    %cst_35 = arith.constant dense<0.000000e+00> : vector<128x128xf32>
    %87 = tpu.matmul %85, %86, %cst_35 {dimension_numbers = #tpu.dot_dimension_numbers<[1], [0], [0], [1], [0, 0, 1, 1], [], []>} : vector<128x32xf32>, vector<32x128xf32>, vector<128x128xf32> -> vector<128x128xf32>
    %88 = arith.addf %69, %87 : vector<128x128xf32>
    %89 = vector.extract_strided_slice %28 {offsets = [0, 96], sizes = [128, 32], strides = [1, 1]} : vector<128x128xf32> to vector<128x32xf32>
    %cst_36 = arith.constant 0.176776692 : f32
    %90 = vector.broadcast %cst_36 : f32 to vector<128x32xf32>
    %91 = arith.mulf %89, %90 : vector<128x32xf32>
    %92 = vector.extract_strided_slice %29 {offsets = [0, 96], sizes = [128, 32], strides = [1, 1]} : vector<128x128xf32> to vector<128x32xf32>
    %93 = vector.extract_strided_slice %30 {offsets = [0, 96], sizes = [128, 32], strides = [1, 1]} : vector<128x128xf32> to vector<128x32xf32>
    %cst_37 = arith.constant dense<0.000000e+00> : vector<128x128xf32>
    %94 = tpu.matmul %91, %92, %cst_37 {dimension_numbers = #tpu.dot_dimension_numbers<[1], [1], [0], [0], [0, 0, 1, 0], [], []>} : vector<128x32xf32>, vector<128x32xf32>, vector<128x128xf32> -> vector<128x128xf32>
    %cst_38 = arith.constant dense<0xFF800000> : vector<128xf32>
    %95 = vector.multi_reduction <maximumf>, %94, %cst_38 [1] : vector<128x128xf32> to vector<128xf32>
    %96 = vector.shape_cast %95 : vector<128xf32> to vector<128x1xf32>
    %97 = vector.broadcast %96 : vector<128x1xf32> to vector<128x128xf32>
    %98 = arith.subf %94, %97 : vector<128x128xf32>
    %99 = math.exp %98 : vector<128x128xf32>
    %cst_39 = arith.constant dense<0.000000e+00> : vector<128xf32>
    %100 = vector.multi_reduction <add>, %99, %cst_39 [1] : vector<128x128xf32> to vector<128xf32>
    %101 = vector.shape_cast %100 : vector<128xf32> to vector<128x1xf32>
    %102 = vector.broadcast %101 : vector<128x1xf32> to vector<128x128xf32>
    %103 = arith.divf %99, %102 : vector<128x128xf32>
    %cst_40 = arith.constant dense<0.000000e+00> : vector<128x32xf32>
    %104 = tpu.matmul %103, %93, %cst_40 {dimension_numbers = #tpu.dot_dimension_numbers<[1], [0], [0], [1], [0, 0, 1, 1], [], []>} : vector<128x128xf32>, vector<128x32xf32>, vector<128x32xf32> -> vector<128x32xf32>
    %c96 = arith.constant 96 : index
    %c0_41 = arith.constant 0 : index
    %105 = vector.load %arg5[%c96, %c0_41] : memref<128x128xf32, #tpu.memory_space<vmem>>, vector<32x128xf32>
    %cst_42 = arith.constant dense<0.000000e+00> : vector<128x128xf32>
    %106 = tpu.matmul %104, %105, %cst_42 {dimension_numbers = #tpu.dot_dimension_numbers<[1], [0], [0], [1], [0, 0, 1, 1], [], []>} : vector<128x32xf32>, vector<32x128xf32>, vector<128x128xf32> -> vector<128x128xf32>
    %107 = arith.addf %88, %106 : vector<128x128xf32>
    %c0_43 = arith.constant 0 : index
    %c0_44 = arith.constant 0 : index
    %108 = vector.load %arg6[%c0_43, %c0_44] : memref<1x128xf32, #tpu.memory_space<vmem>>, vector<1x128xf32>
    %109 = vector.broadcast %108 : vector<1x128xf32> to vector<128x128xf32>
    %110 = arith.addf %107, %109 : vector<128x128xf32>
    %111 = arith.addf %1, %110 : vector<128x128xf32>
    %c0_45 = arith.constant 0 : index
    %c0_46 = arith.constant 0 : index
    %c0_47 = arith.constant 0 : index
    %112 = vector.load %arg7[%c0_45, %c0_46, %c0_47] : memref<1x128x128xf32, #tpu.memory_space<vmem>>, vector<1x128x128xf32>
    %113 = vector.shape_cast %112 : vector<1x128x128xf32> to vector<128x128xf32>
    %114 = vector.shape_cast %111 : vector<128x128xf32> to vector<1x128x128xf32>
    tpu.vector_store %arg7[%c0_45, %c0_46, %c0_47], %114 {strides = array<i32>} : memref<1x128x128xf32, #tpu.memory_space<vmem>>, vector<1x128x128xf32>,
    return
  }
  func.func @transform_0(%arg0: i32) -> (i32, i32, i32) {
    %c0_i32 = arith.constant 0 : i32
    %c0_i32_0 = arith.constant 0 : i32
    %c0_i32_1 = arith.constant 0 : i32
    return %arg0, %c0_i32, %c0_i32_0 : i32, i32, i32
  }
  func.func @transform_1(%arg0: i32) -> (i32, i32) {
    %c0_i32 = arith.constant 0 : i32
    %c0_i32_0 = arith.constant 0 : i32
    %c0_i32_1 = arith.constant 0 : i32
    return %c0_i32, %c0_i32_0 : i32, i32
  }
  func.func @transform_2(%arg0: i32) -> (i32, i32) {
    %c0_i32 = arith.constant 0 : i32
    %c0_i32_0 = arith.constant 0 : i32
    %c0_i32_1 = arith.constant 0 : i32
    return %c0_i32, %c0_i32_0 : i32, i32
  }
  func.func @transform_3(%arg0: i32) -> (i32, i32) {
    %c0_i32 = arith.constant 0 : i32
    %c0_i32_0 = arith.constant 0 : i32
    %c0_i32_1 = arith.constant 0 : i32
    return %c0_i32, %c0_i32_0 : i32, i32
  }
  func.func @transform_4(%arg0: i32) -> (i32, i32) {
    %c0_i32 = arith.constant 0 : i32
    %c0_i32_0 = arith.constant 0 : i32
    %c0_i32_1 = arith.constant 0 : i32
    return %c0_i32, %c0_i32_0 : i32, i32
  }
  func.func @transform_5(%arg0: i32) -> (i32, i32) {
    %c0_i32 = arith.constant 0 : i32
    %c0_i32_0 = arith.constant 0 : i32
    %c0_i32_1 = arith.constant 0 : i32
    return %c0_i32, %c0_i32_0 : i32, i32
  }
  func.func @transform_6(%arg0: i32) -> (i32, i32, i32) {
    %c0_i32 = arith.constant 0 : i32
    %c0_i32_0 = arith.constant 0 : i32
    %c0_i32_1 = arith.constant 0 : i32
    return %arg0, %c0_i32, %c0_i32_0 : i32, i32, i32
  }
}

</mosaic_0001>

<bundles_post_ra>
// kernel: tpu_custom_call.1
= control target key start
LH: loop header
LB: loop body
LE: loop exit
PB: predicated region body
PF: predicated region fallthrough
CT: control target
= control target key end

     0   :  { %11 = vsyncpa [#allocation3], 0  ;;  %s7888_s0 = inlined_call_operand.hbm [shape: f32[2,128,128], index: 0, kind: input, shape index: {}]   ;;  %s7889_s1 = inlined_call_operand.hbm [shape: f32[1,128], index: 1, kind: input, shape index: {}]   ;;  %s7890_s2 = inlined_call_operand.vmem [shape: f32[1,128], index: 2, kind: input, shape index: {}]   ;;  %s7891_s3 = inlined_call_operand.hbm [shape: f32[128,384], index: 3, kind: input, shape index: {}]   ;;  %s7892_s4 = inlined_call_operand.hbm [shape: f32[128,128], index: 4, kind: input, shape index: {}]   ;;  %s7893_s5 = inlined_call_operand.vmem [shape: f32[1,128], index: 5, kind: input, shape index: {}]   ;;  %s7894_s6 = inlined_call_operand.hbm [shape: f32[2,128,128], index: 6, kind: output, shape index: {}]  }
   0x1   :  { %13 = vsyncpa [#allocation3 + $0x1], 0 }
   0x2   :  { %14 = vsyncpa [#allocation6], 0 }
   0x3   :  { %15 = vsyncpa [#allocation9], 0 }
   0x4   :  { %16 = vsyncpa [#allocation4], 0 }
   0x5   :  { %18 = vsyncpa [#allocation4 + $0x1], 0  ;;  %s5223_s21 = smov 0   ;;  %s5225_s22 = smov 0  }
   0x6   :  { %s5227_s23 = smov 0   ;;  %s5229_s24 = smov 0  }
   0x7 LB: > { %s5244_s25 = sadd.s32 4294967295, %s5173_s24   ;;  %s4201_s26 = sadd.s32 4294967294, %s5173_s24   ;;  %s5173_s24 = sphi %s5229_s24, %s8090_s24   ;;  %s5169_s23 = sphi %s5227_s23, %s8089_s23   ;;  %s5165_s22 = sphi %s5225_s22, %s8088_s22   ;;  %s5161_s21 = sphi %s5223_s21, %s8087_s21  }
   0x8   : > { %p44_p0 = scmp.ne.s32.totalorder %s5165_s22, %s5161_s21  ;;  %p45_p1 = scmp.eq.s32.totalorder %s5244_s25, 0 }
   0x9   : > { %p173_p2 = scmp.eq.s32.totalorder %s5244_s25, 1  ;;  %p179_p3 = scmp.eq.s32.totalorder %s4201_s26, 1 }
   0xa   : > { %p5253_p4 = por %p45_p1, %p44_p0  ;;  %p4202_p5 = scmp.ge.s32.totalorder %s5173_s24, 1 }
   0xb   : > { %p5258_p6 = por %p179_p3, %p44_p0  ;;  %p186_p7 = scmp.lt.s32.totalorder %s5173_s24, 3 }
   0xc   : > { %s198_s7 = sshll.u32 %s7889_s1, 4  ;;  %s5175_s9 = smov [#allocation5]   ;;  %s199_s7 = int_to_ptr.hbm [resolvable:$true] %s198_s7 }
   0xd   : > { %p5266_p8 = pnand %p4202_p5, %p186_p7  ;;  %s200_s10 = sshll.u32 %s5175_s9, 4  ;;  %s201_s10 = int_to_ptr.vmem [resolvable:$true] %s200_s10 }
   0xe   : > { %s212_s13 = sshll.u32 %s7891_s3, 4  ;;  %s5176_s15 = smov [#allocation7]   ;;  %s213_s13 = int_to_ptr.hbm [resolvable:$true] %s212_s13 }
   0xf   : > { %p4479_p10 = pneg %p5266_p8  ;;  %s214_s16 = sshll.u32 %s5176_s15, 4  ;;  %s215_s16 = int_to_ptr.vmem [resolvable:$true] %s214_s16 }
  0x10   : > { %s5177_s17 = smov 384   ;;  %s5178_s18 = smov 24  }
  0x11   : > { %p5278_p11 = pnand %p4479_p10, %p45_p1  ;;  %s226_s26 = sshll.u32 %s7892_s4, 4  ;;  %s227_s26 = int_to_ptr.hbm [resolvable:$true] %s226_s26 }
  0x12   : > { %s5179_s29 = smov [#allocation8]   ;;  %s7896_s9 = smov 8  }
  0x13   : > { %4482 = dma.hbm_to_vmem [thread:$0]  (!%p5278_p11), %s199_s7, 16, %s201_s10, [#allocation6]  }
  0x14   : > { %4485 = dma.hbm_to_vmem [thread:$0]  (!%p5278_p11), %s213_s13, 6144, %s215_s16, [#allocation6], %s5177_s17, %s5177_s17, %s5178_s18  }
  0x15   : > { %s228_s30 = sshll.u32 %s5179_s29, 4  ;;  %s7895_s7 = smov 128   ;;  %s229_s30 = int_to_ptr.vmem [resolvable:$true] %s228_s30 }
  0x16   : > { %4488 = dma.hbm_to_vmem [thread:$0]  (!%p5278_p11), %s227_s26, 2048, %s229_s30, [#allocation9], %s7895_s7, %s7895_s7, %s7896_s9  }
  0x17   : > { %s5295_s10 = sadd.s32 1, %s5173_s24   ;;  %s31_s12 = sadd.s32 1, %s5169_s23 }
  0x18   : > { %s28_s11 = ssub.s32 %s5173_s24, %s5295_s10  ;;  %p38_p13 = scmp.ne.s32.totalorder %s5169_s23, %s5165_s22 }
  0x19   : > { %p29_p12 = scmp.eq.s32.totalorder %s28_s11, 0  ;;  %p39_p0 = scmp.eq.s32.totalorder %s5173_s24, 0 }
  0x1a   : > { %p5308_p3 = por %p173_p2, %p38_p13  ;;  %p4500_p5 = scmp.lt.s32.totalorder %s5173_s24, 2 }
  0x1b   : > { %s5304_s13 = scalar_select %p29_p12, %s5169_s23, %s31_s12  }
  0x1c   : > { %s245_s14 = sand.u32 1, %s5169_s23   ;;  %s4413_s16 = sshll.u32 %s5173_s24, 7 }
  0x1d   : > { %p40_p7 = por %p39_p0, %p38_p13  ;;  %s4207_s17 = sshll.u32 %s245_s14, 7 }
  0x1e   : > { %s254_s20 = scalar_lea.hbm %s7888_s0, %s4413_s16  ;;  %s249_s29 = scalar_lea.vmem [#allocation2], %s4207_s17 }
  0x1f   : > { %s255_s26 = sshll.u32 %s254_s20, 4  ;;  %s257_s30 = sshll.u32 %s249_s29, 4  ;;  %s256_s26 = int_to_ptr.hbm [resolvable:$true] %s255_s26  ;;  %s258_s30 = int_to_ptr.vmem [resolvable:$true] %s257_s30 }
  0x20   : > { %p5318_p10 = pnand %p4500_p5, %p40_p7  ;;  %s246_s12 = scalar_lea.sflag [#allocation3], %s245_s14 }
  0x21   : > { %s5069_s7 = sshra.s32 %s256_s26, 4  ;;  %s5076_s17 = scalar_lea.hbm %s7888_s0, 256  ;;  %s5070_s7 = int_to_ptr.hbm [resolvable:$true] %s5069_s7 }
  0x22   : > { %s5071_s9 = scalar_lea.hbm %s5070_s7, 128  ;;  %p5073_p11 = pneg %p5318_p10 }
  0x23   : > { %p5072_p2 = scmp.ne.s32.totalorder %s5070_s7, %s5071_s9  ;;  %p5077_p0 = scmp.lt.s32.totalorder %s5070_s7, %s7888_s0 }
  0x24   : > { %p5078_p5 = scmp.lt.s32.totalorder %s5076_s17, %s5071_s9 }
  0x25   : > { %p5074_p12 = pnand %p5073_p11, %p5072_p2 }
  0x26   : > { %p5079_p7 = por %p5078_p5, %p5077_p0 }
  0x27   : > { %p5075_p13 = pneg %p5074_p12 }
  0x29   : > { %p5080_p9 = pnand %p5079_p7, %p5075_p13 }
  0x2b   : > { %5083 = shalt.err (!%p5080_p9)
}
  0x2c   : > { %s7932_s14 = smov 8   ;;  %s7933_s29 = smov 128  }
  0x2d   : > { %4492 = dma.hbm_to_vmem [thread:$0]  (!%p5318_p10), %s256_s26, 2048, %s258_s30, %s246_s12, %s7933_s29, %s7933_s29, %s7932_s14  }
  0x2e   : > { %269 = sbr.rel (%p5266_p8) target bundleno = 2395 (0x95b), region = 44 }
  0x33   : > { %s5338_s16 = sand.u32 1, %s5165_s22  }
  0x34   : > { %s4211_s7 = sshll.u32 %s5338_s16, 7  ;;  %s272_s9 = scalar_lea.sflag [#allocation3], %s5338_s16 }
  0x35   : > { %s5344_s18 = scalar_lea.vmem [#allocation2], %s4211_s7 }
  0x36   : > { %5144 = dma.done.wait (%p5253_p4), %s272_s9, 2048  }
  0x37   : > { %5146 = vsyncadd (%p5253_p4), %s272_s9, 4294965248 }
  0x38   : > { %5148 = dma.done.wait (%p45_p1), [#allocation6], 6160  }
  0x39   : > { %5150 = vsyncadd (%p45_p1), [#allocation6], 4294961136 }
  0x3a   : > { %5152 = dma.done.wait (%p45_p1), [#allocation9], 2048  }
  0x3b   : > { %5154 = vsyncadd (%p45_p1), [#allocation9], 4294965248  ;;  %v320_v0 = vld [vmem:[%s5344_s18] sm:$0xff]  ;;  %v321_v1 = vld [vmem:[%s5344_s18 + $0x8] sm:$0xff]  ;;  %v5182_v14 = vmov 128.0   ;;  %s5183_s26 = smov 96  }
  0x3c   : > { %336 = vadd.xlane.f32.xlu0 %v320_v0  ;;  %338 = vadd.xlane.f32.xlu1 %v321_v1  ;;  %v322_v2 = vld [vmem:[%s5344_s18 + $0x10] sm:$0xff]  ;;  %v328_v3 = vld [vmem:[%s5344_s18 + $0x40] sm:$0xff]  ;;  %v329_v4 = vld [vmem:[%s5344_s18 + $0x48] sm:$0xff]  ;;  %4673 = vrcp.f32 %v5182_v14  ;;  %s5184_s30 = smov 32   ;;  %s5185_s11 = smov 64  }
  0x3d   : > { %340 = vadd.xlane.f32.xlu2 %v322_v2  ;;  %v330_v5 = vld [vmem:[%s5344_s18 + $0x50] sm:$0xff]  ;;  %v323_v6 = vld [vmem:[%s5344_s18 + $0x18] sm:$0xff]  ;;  %v5369_v8 = vld [vmem:[%s5344_s18 + $0x60] sm:$0xff]  ;;  %s7778_s19 = scalar_lea.vmem [#allocation10], %s4211_s7  ;;  %s4414_s20 = sshll.u32 %s5244_s25, 7 }
  0x3e   : > { %v5366_v7 = vld [vmem:[%s5344_s18 + $0x58] sm:$0xff]  ;;  %v333_v9 = vld [vmem:[%s5344_s18 + $0x68] sm:$0xff]  ;;  %v5375_v10 = vld [vmem:[%s5344_s18 + $0x70] sm:$0xff]  ;;  %s4095_s7 = scalar_lea.hbm %s7894_s6, %s4414_s20  ;;  %s4096_s9 = sshll.u32 %s7778_s19, 4  ;;  %s4097_s9 = int_to_ptr.vmem [resolvable:$true] %s4096_s9 }
  0x3f   : > { %v5379_v11 = vld [vmem:[%s5344_s18 + $0x78] sm:$0xff]  ;;  %v5383_v12 = vld [vmem:[%s5344_s18 + $0x20] sm:$0xff]  ;;  %v5387_v13 = vld [vmem:[%s5344_s18 + $0x28] sm:$0xff]  ;;  %s4098_s27 = sshll.u32 %s4095_s7, 4  ;;  %s4084_s25 = scalar_lea.sflag [#allocation4], %s5338_s16  ;;  %s4099_s27 = int_to_ptr.hbm [resolvable:$true] %s4098_s27 }
  0x40   : > { %v748_v59 = vld [vmem:[#allocation7 + $0x168] sm:$0xff]  ;;  %v750_v60 = vld [vmem:[#allocation7 + $0x178] sm:$0xff]  ;;  %v745_v61 = vld [vmem:[#allocation7 + $0x150] sm:$0xff]  ;;  %s5113_s8 = sshra.s32 %s4099_s27, 4  ;;  %s5119_s12 = scalar_lea.hbm %s7894_s6, 256  ;;  %s5114_s8 = int_to_ptr.hbm [resolvable:$true] %s5113_s8 }
  0x41   : > { %751 = vmatpush.msra.mxu0 %v748_v59  ;;  %v747_v63 = vld [vmem:[#allocation7 + $0x160] sm:$0xff]  ;;  %881 = vmatpush.msra.mxu2 %v750_v60  ;;  %v714_v60 = vld [vmem:[#allocation7 + $0x58] sm:$0xff]  ;;  %p5120_p9 = scmp.lt.s32.totalorder %s5114_s8, %s7894_s6 }
  0x42   : > { %v4674_v15 = vpop.eup %4673  ;;  %4415 = vmatpush.msra.mxu3 %v748_v59  ;;  %v725_v59 = vld [vmem:[#allocation7 + $0xb0] sm:$0xff] }
  0x43   : > { %v369_v16 = vmul.f32 128.0, %v4674_v15  ;;  %vm373_vm0 = vweird.f32 %v4674_v15  ;;  %752 = vmatpush.msra.mxu0 %v745_v61  ;;  %882 = vmatpush.msra.mxu2 %v747_v63  ;;  %v711_v63 = vld [vmem:[#allocation7 + $0x40] sm:$0xff] }
  0x44   : > { %352 = vadd.xlane.f32.xlu0 %v328_v3  ;;  %354 = vadd.xlane.f32.xlu1 %v329_v4 }
  0x45   : > { %356 = vadd.xlane.f32.xlu2 %v330_v5  ;;  %v370_v17 = vsub.f32 1.0, %v369_v16  ;;  %4416 = vmatpush.msra.mxu3 %v745_v61  ;;  %v709_v61 = vld [vmem:[#allocation7 + $0x30] sm:$0xff] }
  0x47   : > { %v371_v18 = vmul.f32 %v4674_v15, %v370_v17 }
  0x49   : > { %v372_v19 = vadd.f32 %v4674_v15, %v371_v18 }
  0x4b   : > { %v5390_v20 = vsel %vm373_vm0, %v4674_v15, %v372_v19 }
  0x4c   : > { %342 = vadd.xlane.f32.xlu0 %v323_v6  ;;  %358 = vadd.xlane.f32.xlu1 %v5366_v7 }
  0x4d   : > { %360 = vadd.xlane.f32.xlu2 %v5369_v8 }
  0x54   : > { %362 = vadd.xlane.f32.xlu0 %v333_v9 }
  0x5c   : > { %364 = vadd.xlane.f32.xlu0 %v5375_v10 }
  0x64   : > { %366 = vadd.xlane.f32.xlu0 %v5379_v11 }
  0x6c   : > { %344 = vadd.xlane.f32.xlu0 %v5383_v12 }
  0x74   : > { %346 = vadd.xlane.f32.xlu0 %v5387_v13 }
  0xaf   : > { %v337_v21 = vpop.xlane.xlu0 %336  ;;  %v339_v22 = vpop.xlane.xlu1 %338 }
  0xb0   : > { %v375_v23 = vmul.f32 %v5390_v20, %v337_v21  ;;  %v376_v25 = vmul.f32 %v5390_v20, %v339_v22  ;;  %v341_v26 = vpop.xlane.xlu2 %340  ;;  %v742_v22 = vld [vmem:[#allocation7 + $0x138] sm:$0xff] }
  0xb1   : > { %v377_v34 = vmul.f32 %v5390_v20, %v341_v26  ;;  %753 = vmatpush.msra.mxu0 %v742_v22  ;;  %4417 = vmatpush.msra.mxu3 %v742_v22  ;;  %v736_v26 = vld [vmem:[#allocation7 + $0x108] sm:$0xff] }
  0xb2   : > { %v5393_v24 = vsub.f32 %v320_v0, %v375_v23  ;;  %v5398_v28 = vsub.f32 %v321_v1, %v376_v25  ;;  %v744_v23 = vld [vmem:[#allocation7 + $0x148] sm:$0xff]  ;;  %v741_v25 = vld [vmem:[#allocation7 + $0x130] sm:$0xff] }
  0xb3   : > { %v5409_v38 = vsub.f32 %v322_v2, %v377_v34  ;;  %883 = vmatpush.msra.mxu2 %v744_v23  ;;  %v5482_v34 = vld [vmem:[#allocation7 + $0x140] sm:$0xff] }
  0xb4   : > { %v407_v27 = vmul.f32 %v5393_v24, %v5393_v24  ;;  %v408_v32 = vmul.f32 %v5398_v28, %v5398_v28 }
  0xb5   : > { %v409_v43 = vmul.f32 %v5409_v38, %v5409_v38  ;;  %884 = vmatpush.msra.mxu2 %v741_v25 }
  0xb6   : > { %423 = vadd.xlane.f32.xlu1 %v407_v27  ;;  %v5476_v27 = vld [vmem:[#allocation7 + $0x170] sm:$0xff] }
  0xb7   : > { %v353_v29 = vpop.xlane.xlu0 %352  ;;  %v355_v30 = vpop.xlane.xlu1 %354  ;;  %4431 = vmatpush.msra.mxu1 %v5476_v27 }
  0xb8   : > { %v383_v31 = vmul.f32 %v5390_v20, %v353_v29  ;;  %v384_v35 = vmul.f32 %v5390_v20, %v355_v30  ;;  %v357_v37 = vpop.xlane.xlu2 %356  ;;  %v738_v29 = vld [vmem:[#allocation7 + $0x118] sm:$0xff] }
  0xb9   : > { %v385_v41 = vmul.f32 %v5390_v20, %v357_v37  ;;  %885 = vmatpush.msra.mxu2 %v738_v29  ;;  %v5479_v30 = vld [vmem:[#allocation7 + $0x158] sm:$0xff]  ;;  %v5485_v37 = vld [vmem:[#allocation7 + $0x128] sm:$0xff] }
  0xba   : > { %v5403_v33 = vsub.f32 %v328_v3, %v383_v31  ;;  %v5411_v39 = vsub.f32 %v329_v4, %v384_v35  ;;  %v735_v31 = vld [vmem:[#allocation7 + $0x100] sm:$0xff]  ;;  %4432 = vmatpush.msra.mxu1 %v5479_v30  ;;  %v732_v35 = vld [vmem:[#allocation7 + $0xe8] sm:$0xff] }
  0xbb   : > { %v5419_v45 = vsub.f32 %v330_v5, %v385_v41  ;;  %886 = vmatpush.msra.mxu2 %v735_v31  ;;  %v724_v41 = vld [vmem:[#allocation7 + $0xa8] sm:$0xff] }
  0xbc   : > { %v415_v36 = vmul.f32 %v5403_v33, %v5403_v33  ;;  %v416_v44 = vmul.f32 %v5411_v39, %v5411_v39  ;;  %4433 = vmatpush.msra.mxu1 %v5482_v34 }
  0xbd   : > { %v417_v51 = vmul.f32 %v5419_v45, %v5419_v45  ;;  %887 = vmatpush.msra.mxu2 %v732_v35 }
  0xbe   : > { %425 = vadd.xlane.f32.xlu1 %v408_v32  ;;  %439 = vadd.xlane.f32.xlu2 %v415_v36  ;;  %v730_v32 = vld [vmem:[#allocation7 + $0xd8] sm:$0xff]  ;;  %v727_v36 = vld [vmem:[#allocation7 + $0xc0] sm:$0xff] }
  0xbf   : > { %v343_v40 = vpop.xlane.xlu0 %342  ;;  %v359_v47 = vpop.xlane.xlu1 %358  ;;  %4434 = vmatpush.msra.mxu1 %v5485_v37 }
  0xc0   : > { %v378_v42 = vmul.f32 %v5390_v20, %v343_v40  ;;  %v361_v49 = vpop.xlane.xlu2 %360  ;;  %v386_v55 = vmul.f32 %v5390_v20, %v359_v47  ;;  %v729_v40 = vld [vmem:[#allocation7 + $0xd0] sm:$0xff]  ;;  %v5491_v47 = vld [vmem:[#allocation7 + $0xf8] sm:$0xff] }
  0xc1   : > { %v387_v54 = vmul.f32 %v5390_v20, %v361_v49  ;;  %888 = vmatpush.msra.mxu2 %v729_v40  ;;  %v718_v49 = vld [vmem:[#allocation7 + $0x78] sm:$0xff] }
  0xc2   : > { %v5421_v46 = vsub.f32 %v323_v6, %v378_v42  ;;  %v5435_v57 = vsub.f32 %v5366_v7, %v386_v55  ;;  %v5450_v6 = vld [vmem:[%s5344_s18 + $0x30] sm:$0xff]  ;;  %v5453_v7 = vld [vmem:[%s5344_s18 + $0x38] sm:$0xff] }
  0xc3   : > { %v5438_v58 = vsub.f32 %v5369_v8, %v387_v54  ;;  %v5488_v42 = vld [vmem:[#allocation7 + $0x110] sm:$0xff]  ;;  %v728_v54 = vld [vmem:[#allocation7 + $0xc8] sm:$0xff] }
  0xc4   : > { %v410_v52 = vmul.f32 %v5421_v46, %v5421_v46  ;;  %v418_v0 = vmul.f32 %v5435_v57, %v5435_v57  ;;  %4435 = vmatpush.msra.mxu1 %v5488_v42  ;;  %v717_v55 = vld [vmem:[#allocation7 + $0x70] sm:$0xff] }
  0xc5   : > { %v419_v1 = vmul.f32 %v5438_v58, %v5438_v58 }
  0xc6   : > { %427 = vadd.xlane.f32.xlu1 %v409_v43  ;;  %441 = vadd.xlane.f32.xlu2 %v416_v44  ;;  %v726_v43 = vld [vmem:[#allocation7 + $0xb8] sm:$0xff]  ;;  %v721_v44 = vld [vmem:[#allocation7 + $0x90] sm:$0xff] }
  0xc7   : > { %v363_v48 = vpop.xlane.xlu0 %362  ;;  %889 = vmatpush.msra.mxu2 %v726_v43  ;;  %4436 = vmatpush.msra.mxu1 %v5491_v47 }
  0xc8   : > { %v388_v50 = vmul.f32 %v5390_v20, %v363_v48  ;;  %v723_v48 = vld [vmem:[#allocation7 + $0xa0] sm:$0xff] }
  0xc9   : > { %890 = vmatpush.msra.mxu2 %v723_v48 }
  0xca   : > { %v5428_v53 = vsub.f32 %v333_v9, %v388_v50  ;;  %v5494_v50 = vld [vmem:[#allocation7 + $0xe0] sm:$0xff] }
  0xcb   : > { %4437 = vmatpush.msra.mxu1 %v5494_v50 }
  0xcc   : > { %v420_v56 = vmul.f32 %v5428_v53, %v5428_v53 }
  0xcd   : > { %4438 = vmatpush.msra.mxu1 %v728_v54 }
  0xce   : > { %443 = vadd.xlane.f32.xlu2 %v417_v51  ;;  %429 = vadd.xlane.f32.xlu1 %v410_v52  ;;  %v720_v51 = vld [vmem:[#allocation7 + $0x88] sm:$0xff]  ;;  %v715_v52 = vld [vmem:[#allocation7 + $0x60] sm:$0xff] }
  0xcf   : > { %449 = vadd.xlane.f32.xlu0 %v420_v56  ;;  %v365_v62 = vpop.xlane.xlu0 %364  ;;  %891 = vmatpush.msra.mxu2 %v720_v51  ;;  %v712_v56 = vld [vmem:[#allocation7 + $0x48] sm:$0xff] }
  0xd0   : > { %v389_v4 = vmul.f32 %v5390_v20, %v365_v62  ;;  %4439 = vmatpush.msra.mxu1 %v725_v59  ;;  %v722_v62 = vld [vmem:[#allocation7 + $0x98] sm:$0xff] }
  0xd1   : > { %892 = vmatpush.msra.mxu2 %v717_v55  ;;  %v5535_v55 = vld [vmem:[%s7890_s2] ss:$0 sm:$0xff] }
  0xd2   : > { %v5460_v9 = vsub.f32 %v5375_v10, %v389_v4  ;;  %4440 = vmatpush.msra.mxu1 %v722_v62  ;;  %v716_v4 = vld [vmem:[#allocation7 + $0x68] sm:$0xff] }
  0xd3   : > { %893 = vmatpush.msra.mxu2 %v714_v60 }
  0xd5   : > { %894 = vmatpush.msra.mxu2 %v711_v63 }
  0xd6   : > { %445 = vadd.xlane.f32.xlu2 %v418_v0  ;;  %447 = vadd.xlane.f32.xlu1 %v419_v1  ;;  %v706_v0 = vld [vmem:[#allocation7 + $0x18] sm:$0xff]  ;;  %v719_v1 = vld [vmem:[#allocation7 + $0x80] sm:$0xff] }
  0xd7   : > { %v367_v2 = vpop.xlane.xlu0 %366  ;;  %4441 = vmatpush.msra.mxu1 %v719_v1 }
  0xd8   : > { %v390_v3 = vmul.f32 %v5390_v20, %v367_v2  ;;  %v708_v2 = vld [vmem:[#allocation7 + $0x28] sm:$0xff] }
  0xd9   : > { %895 = vmatpush.msra.mxu2 %v708_v2  ;;  %4442 = vmatpush.msra.mxu1 %v716_v4 }
  0xda   : > { %v5447_v5 = vsub.f32 %v5379_v11, %v390_v3  ;;  %v421_v11 = vmul.f32 %v5460_v9, %v5460_v9  ;;  %v703_v3 = vld [vmem:[#allocation7] sm:$0xff] }
  0xdc   : > { %v422_v8 = vmul.f32 %v5447_v5, %v5447_v5 }
  0xde   : > { %348 = vadd.xlane.f32.xlu2 %v5450_v6  ;;  %350 = vadd.xlane.f32.xlu1 %v5453_v7 }
  0xdf   : > { %453 = vadd.xlane.f32.xlu0 %v422_v8  ;;  %v345_v14 = vpop.xlane.xlu0 %344  ;;  %v705_v8 = vld [vmem:[#allocation7 + $0x10] sm:$0xff] }
  0xe0   : > { %v379_v15 = vmul.f32 %v5390_v20, %v345_v14  ;;  %896 = vmatpush.msra.mxu2 %v705_v8  ;;  %v713_v14 = vld [vmem:[#allocation7 + $0x50] sm:$0xff] }
  0xe1   : > { %4443 = vmatpush.msra.mxu1 %v713_v14 }
  0xe2   : > { %v5466_v16 = vsub.f32 %v5383_v12, %v379_v15  ;;  %v739_v12 = vld [vmem:[#allocation7 + $0x120] sm:$0xff] }
  0xe3   : > { %754 = vmatpush.msra.mxu0 %v739_v12  ;;  %4418 = vmatpush.msra.mxu3 %v739_v12 }
  0xe4   : > { %v411_v17 = vmul.f32 %v5466_v16, %v5466_v16 }
  0xe5   : > { %755 = vmatpush.msra.mxu0 %v736_v26  ;;  %4419 = vmatpush.msra.mxu3 %v736_v26 }
  0xe6   : > { %451 = vadd.xlane.f32.xlu2 %v421_v11  ;;  %431 = vadd.xlane.f32.xlu1 %v411_v17  ;;  %v710_v17 = vld [vmem:[#allocation7 + $0x38] sm:$0xff] }
  0xe7   : > { %v347_v18 = vpop.xlane.xlu0 %346  ;;  %4444 = vmatpush.msra.mxu1 %v710_v17 }
  0xe8   : > { %v380_v19 = vmul.f32 %v5390_v20, %v347_v18 }
  0xea   : > { %v5472_v10 = vsub.f32 %v5387_v13, %v380_v19  ;;  %v733_v13 = vld [vmem:[#allocation7 + $0xf0] sm:$0xff]  ;;  %v5501_v19 = vld [vmem:[#allocation7 + $0x20] sm:$0xff] }
  0xeb   : > { %756 = vmatpush.msra.mxu0 %v733_v13  ;;  %4420 = vmatpush.msra.mxu3 %v733_v13 }
  0xec   : > { %v412_v21 = vmul.f32 %v5472_v10, %v5472_v10  ;;  %4445 = vmatpush.msra.mxu1 %v5501_v19 }
  0xed   : > { %757 = vmatpush.msra.mxu0 %v730_v32  ;;  %4421 = vmatpush.msra.mxu3 %v730_v32 }
  0xee   : > { %433 = vadd.xlane.f32.xlu2 %v412_v21  ;;  %v5505_v21 = vld [vmem:[#allocation7 + $0x8] sm:$0xff] }
  0xef   : > { %758 = vmatpush.msra.mxu0 %v727_v36  ;;  %4422 = vmatpush.msra.mxu3 %v727_v36 }
  0xf0   : > { %4446 = vmatpush.msra.mxu1 %v5505_v21 }
  0xf1   : > { %759 = vmatpush.msra.mxu0 %v724_v41  ;;  %4423 = vmatpush.msra.mxu3 %v724_v41 }
  0xf3   : > { %760 = vmatpush.msra.mxu0 %v721_v44  ;;  %4424 = vmatpush.msra.mxu3 %v721_v44 }
  0xf5   : > { %761 = vmatpush.msra.mxu0 %v718_v49  ;;  %4425 = vmatpush.msra.mxu3 %v718_v49  ;;  %v5528_v49 = vld [vmem:[#allocation5] ss:$0 sm:$0xff] }
  0xf7   : > { %762 = vmatpush.msra.mxu0 %v715_v52  ;;  %4426 = vmatpush.msra.mxu3 %v715_v52 }
  0xf9   : > { %763 = vmatpush.msra.mxu0 %v712_v56  ;;  %4427 = vmatpush.msra.mxu3 %v712_v56 }
  0xfb   : > { %764 = vmatpush.msra.mxu0 %v709_v61  ;;  %4428 = vmatpush.msra.mxu3 %v709_v61 }
  0xfd   : > { %765 = vmatpush.msra.mxu0 %v706_v0  ;;  %4429 = vmatpush.msra.mxu3 %v706_v0 }
  0xff   : > { %766 = vmatpush.msra.mxu0 %v703_v3  ;;  %4430 = vmatpush.msra.mxu3 %v703_v3 }
 0x101   : > { %816 = vmatpush.msrb.mxu0 %v5476_v27 }
 0x103   : > { %817 = vmatpush.msrb.mxu0 %v5479_v30 }
 0x105   : > { %818 = vmatpush.msrb.mxu0 %v5482_v34 }
 0x107   : > { %819 = vmatpush.msrb.mxu0 %v5485_v37 }
 0x109   : > { %820 = vmatpush.msrb.mxu0 %v5488_v42 }
 0x10b   : > { %821 = vmatpush.msrb.mxu0 %v5491_v47 }
 0x10d   : > { %822 = vmatpush.msrb.mxu0 %v5494_v50 }
 0x10f   : > { %823 = vmatpush.msrb.mxu0 %v728_v54 }
 0x111   : > { %824 = vmatpush.msrb.mxu0 %v725_v59 }
 0x113   : > { %825 = vmatpush.msrb.mxu0 %v722_v62 }
 0x115   : > { %826 = vmatpush.msrb.mxu0 %v719_v1 }
 0x117   : > { %827 = vmatpush.msrb.mxu0 %v716_v4 }
 0x119   : > { %828 = vmatpush.msrb.mxu0 %v713_v14 }
 0x11b   : > { %829 = vmatpush.msrb.mxu0 %v710_v17 }
 0x11d   : > { %830 = vmatpush.msrb.mxu0 %v5501_v19 }
 0x11f   : > { %831 = vmatpush.msrb.mxu0 %v5505_v21 }
 0x129   : > { %v424_v15 = vpop.xlane.xlu1 %423 }
 0x12a   : > { %v455_v11 = vmul.f32 %v424_v15, %v5390_v20 }
 0x12c   : > { %v471_v18 = vadd.f32 1e-05, %v455_v11 }
 0x12e   : > { %4675 = vrsqrt.f32 %v471_v18  ;;  %vm493_vm2 = vweird.f32 %v471_v18 }
 0x131   : > { %v426_v22 = vpop.xlane.xlu1 %425  ;;  %v440_v23 = vpop.xlane.xlu2 %439 }
 0x132   : > { %v456_v12 = vmul.f32 %v426_v22, %v5390_v20  ;;  %v463_v25 = vmul.f32 %v440_v23, %v5390_v20 }
 0x134   : > { %v4676_v26 = vpop.eup %4675  ;;  %v5512_v27 = vadd.f32 1e-05, %v456_v12  ;;  %v5514_v29 = vadd.f32 1e-05, %v463_v25 }
 0x135   : > { %v488_v13 = vmul.f32 %v4676_v26, %v471_v18  ;;  %vm494_vm1 = vweird.f32 %v4676_v26 }
 0x136   : > { %4677 = vrsqrt.f32 %v5512_v27  ;;  %vm495_vm3 = vmor %vm493_vm2, %vm494_vm1  ;;  %vm503_vm6 = vweird.f32 %v5512_v27  ;;  %vm573_vm8 = vweird.f32 %v5514_v29 }
 0x137   : > { %v489_v30 = vmul.f32 %v4676_v26, %v488_v13  ;;  %4679 = vrsqrt.f32 %v5514_v29 }
 0x139   : > { %v490_v31 = vmul.f32 0.5, %v489_v30  ;;  %v428_v32 = vpop.xlane.xlu1 %427  ;;  %v442_v34 = vpop.xlane.xlu2 %441 }
 0x13a   : > { %v457_v35 = vmul.f32 %v428_v32, %v5390_v20  ;;  %v464_v36 = vmul.f32 %v442_v34, %v5390_v20 }
 0x13b   : > { %v491_v37 = vsub.f32 1.5, %v490_v31 }
 0x13c   : > { %v4678_v40 = vpop.eup %4677  ;;  %v5521_v41 = vadd.f32 1e-05, %v457_v35  ;;  %v5523_v42 = vadd.f32 1e-05, %v464_v36 }
 0x13d   : > { %v4680_v43 = vpop.eup %4679  ;;  %v492_v44 = vmul.f32 %v4676_v26, %v491_v37  ;;  %v498_v47 = vmul.f32 %v4678_v40, %v5512_v27  ;;  %vm504_vm4 = vweird.f32 %v4678_v40 }
 0x13e   : > { %v568_v48 = vmul.f32 %v4680_v43, %v5514_v29  ;;  %4681 = vrsqrt.f32 %v5521_v41  ;;  %vm574_vm5 = vweird.f32 %v4680_v43  ;;  %vm505_vm7 = vmor %vm503_vm6, %vm504_vm4  ;;  %vm513_vm12 = vweird.f32 %v5521_v41 }
 0x13f   : > { %v499_v50 = vmul.f32 %v4678_v40, %v498_v47  ;;  %4683 = vrsqrt.f32 %v5523_v42  ;;  %v496_v51 = vsel %vm495_vm3, %v4676_v26, %v492_v44  ;;  %vm575_vm9 = vmor %vm573_vm8, %vm574_vm5  ;;  %vm583_vm14 = vweird.f32 %v5523_v42 }
 0x140   : > { %v569_v52 = vmul.f32 %v4680_v43, %v568_v48  ;;  %v647_v54 = vmul.f32 %v496_v51, %v5393_v24 }
 0x141   : > { %v500_v56 = vmul.f32 0.5, %v499_v50  ;;  %v444_v59 = vpop.xlane.xlu2 %443  ;;  %v430_v60 = vpop.xlane.xlu1 %429 }
 0x142   : > { %v570_v61 = vmul.f32 0.5, %v569_v52  ;;  %v465_v62 = vmul.f32 %v444_v59, %v5390_v20  ;;  %v458_v63 = vmul.f32 %v430_v60, %v5390_v20  ;;  %v450_v0 = vpop.xlane.xlu0 %449  ;;  %v667_v1 = vmul.f32 %v5528_v49, %v647_v54 }
 0x143   : > { %v501_v2 = vsub.f32 1.5, %v500_v56  ;;  %v468_v18 = vmul.f32 %v450_v0, %v5390_v20 }
 0x144   : > { %v5540_v24 = vpop.eup %4681  ;;  %v571_v3 = vsub.f32 1.5, %v570_v61  ;;  %v5542_v4 = vadd.f32 1e-05, %v465_v62  ;;  %v5544_v8 = vadd.f32 1e-05, %v458_v63  ;;  %v5547_v14 = vadd.f32 %v5535_v55, %v667_v1 }
 0x145   : > { %v5550_v15 = vpop.eup %4683  ;;  %v502_v11 = vmul.f32 %v4678_v40, %v501_v2  ;;  %v508_v17 = vmul.f32 %v5540_v24, %v5521_v41  ;;  %v5567_v27 = vadd.f32 1e-05, %v468_v18  ;;  %vm514_vm10 = vweird.f32 %v5540_v24 }
 0x146   : > { %v572_v22 = vmul.f32 %v4680_v43, %v571_v3  ;;  %v578_v23 = vmul.f32 %v5550_v15, %v5523_v42  ;;  %4685 = vrsqrt.f32 %v5542_v4  ;;  %767 = vmatmul.f32.vlgmr.msra.gmra.mxu0 %v5547_v14  ;;  %897 = vmatmul.f32.vlgmr.msra.gmra.mxu2 %v5547_v14  ;;  %vm584_vm11 = vweird.f32 %v5550_v15  ;;  %vm5599_vm13 = vmor %vm513_vm12, %vm514_vm10 }
 0x147   : > { %v509_v19 = vmul.f32 %v5540_v24, %v508_v17  ;;  %4687 = vrsqrt.f32 %v5544_v8  ;;  %v506_v25 = vsel %vm505_vm7, %v4678_v40, %v502_v11  ;;  %vm5609_vm15 = vmor %vm583_vm14, %vm584_vm11  ;;  %vm523_vm0 = vweird.f32 %v5544_v8 }
 0x148   : > { %v579_v12 = vmul.f32 %v5550_v15, %v578_v23  ;;  %v648_v31 = vmul.f32 %v506_v25, %v5398_v28  ;;  %v576_v32 = vsel %vm575_vm9, %v4680_v43, %v572_v22  ;;  %4689 = vrsqrt.f32 %v5567_v27 }
 0x149   : > { %v510_v26 = vmul.f32 0.5, %v509_v19  ;;  %v446_v13 = vpop.xlane.xlu2 %445  ;;  %v448_v30 = vpop.xlane.xlu1 %447  ;;  %v655_v36 = vmul.f32 %v576_v32, %v5403_v33  ;;  %vm593_vm4 = vweird.f32 %v5542_v4  ;;  %vm623_vm12 = vweird.f32 %v5567_v27 }
 0x14a   : > { %v580_v34 = vmul.f32 0.5, %v579_v12  ;;  %v466_v29 = vmul.f32 %v446_v13, %v5390_v20  ;;  %v467_v35 = vmul.f32 %v448_v30, %v5390_v20  ;;  %v668_v37 = vmul.f32 %v5528_v49, %v648_v31 }
 0x14b   : > { %v511_v21 = vsub.f32 1.5, %v510_v26  ;;  %v675_v43 = vmul.f32 %v5528_v49, %v655_v36 }
 0x14c   : > { %v5576_v40 = vpop.eup %4685  ;;  %v581_v44 = vsub.f32 1.5, %v580_v34  ;;  %v5578_v47 = vadd.f32 1e-05, %v466_v29  ;;  %v5580_v28 = vadd.f32 1e-05, %v467_v35  ;;  %v5590_v51 = vadd.f32 %v5535_v55, %v668_v37 }
 0x14d   : > { %v5583_v48 = vpop.eup %4687  ;;  %v512_v33 = vmul.f32 %v5540_v24, %v511_v21  ;;  %v588_v50 = vmul.f32 %v5576_v40, %v5542_v4  ;;  %v5616_v61 = vadd.f32 %v5535_v55, %v675_v43  ;;  %vm594_vm2 = vweird.f32 %v5576_v40 }
 0x14e   : > { %v582_v52 = vmul.f32 %v5550_v15, %v581_v44  ;;  %v518_v54 = vmul.f32 %v5583_v48, %v5544_v8  ;;  %4691 = vrsqrt.f32 %v5578_v47  ;;  %770 = vmatmul.f32.gmra.mxu0 %v5590_v51  ;;  %900 = vmatmul.f32.gmra.mxu2 %v5590_v51  ;;  %v5628_v18 = vpop.eup %4689  ;;  %vm524_vm1 = vweird.f32 %v5583_v48  ;;  %vm595_vm5 = vmor %vm593_vm4, %vm594_vm2 }
 0x14f   : > { %v589_v59 = vmul.f32 %v5576_v40, %v588_v50  ;;  %4693 = vrsqrt.f32 %v5580_v28  ;;  %v516_v0 = vsel %vm5599_vm13, %v5540_v24, %v512_v33  ;;  %856 = vmatmul.f32.vlgmr.msra.gmra.mxu1 %v5616_v61  ;;  %vm5645_vm3 = vmor %vm523_vm0, %vm524_vm1  ;;  %vm603_vm7 = vweird.f32 %v5578_v47 }
 0x150   : > { %v519_v60 = vmul.f32 %v5583_v48, %v518_v54  ;;  %v586_v1 = vsel %vm5609_vm15, %v5550_v15, %v582_v52  ;;  %v649_v17 = vmul.f32 %v516_v0, %v5409_v38  ;;  %vm613_vm9 = vweird.f32 %v5580_v28 }
 0x151   : > { %v590_v42 = vmul.f32 0.5, %v589_v59  ;;  %v349_v62 = vpop.xlane.xlu2 %348  ;;  %v351_v63 = vpop.xlane.xlu1 %350  ;;  %v656_v24 = vmul.f32 %v586_v1, %v5411_v39  ;;  %vm624_vm13 = vweird.f32 %v5628_v18 }
 0x152   : > { %v520_v2 = vmul.f32 0.5, %v519_v60  ;;  %v381_v3 = vmul.f32 %v5390_v20, %v349_v62  ;;  %v382_v11 = vmul.f32 %v5390_v20, %v351_v63  ;;  %v669_v19 = vmul.f32 %v5528_v49, %v649_v17  ;;  %v454_v26 = vpop.xlane.xlu0 %453  ;;  %vm5730_vm0 = vmor %vm623_vm12, %vm624_vm13 }
 0x153   : > { %v591_v22 = vsub.f32 1.5, %v590_v42  ;;  %v470_v29 = vmul.f32 %v454_v26, %v5390_v20 }
 0x154   : > { %v4692_v23 = vpop.eup %4691  ;;  %v521_v15 = vsub.f32 1.5, %v520_v2  ;;  %v5635_v12 = vsub.f32 %v5450_v6, %v381_v3  ;;  %v5639_v38 = vsub.f32 %v5453_v7, %v382_v11  ;;  %v5650_v30 = vadd.f32 %v5535_v55, %v669_v19 }
 0x155   : > { %v598_v25 = vmul.f32 %v4692_v23, %v5578_v47  ;;  %v5641_v13 = vpop.eup %4693  ;;  %v676_v6 = vmul.f32 %v5528_v49, %v656_v24  ;;  %v592_v31 = vmul.f32 %v5576_v40, %v591_v22  ;;  %v618_v7 = vmul.f32 %v5628_v18, %v5567_v27 }
 0x156   : > { %v522_v8 = vmul.f32 %v5583_v48, %v521_v15  ;;  %v608_v34 = vmul.f32 %v5641_v13, %v5580_v28  ;;  %773 = vmatmul.f32.gmra.mxu0 %v5650_v30  ;;  %903 = vmatmul.f32.gmra.mxu2 %v5650_v30  ;;  %v413_v36 = vmul.f32 %v5635_v12, %v5635_v12  ;;  %vm604_vm6 = vweird.f32 %v4692_v23 }
 0x157   : > { %v599_v32 = vmul.f32 %v4692_v23, %v598_v25  ;;  %v5662_v35 = vadd.f32 %v5535_v55, %v676_v6  ;;  %v414_v44 = vmul.f32 %v5639_v38, %v5639_v38  ;;  %v596_v41 = vsel %vm595_vm5, %v5576_v40, %v592_v31  ;;  %vm605_vm8 = vmor %vm603_vm7, %vm604_vm6 }
 0x158   : > { %v609_v37 = vmul.f32 %v5641_v13, %v608_v34  ;;  %v526_v33 = vsel %vm5645_vm3, %v5583_v48, %v522_v8  ;;  %435 = vadd.xlane.f32.xlu0 %v413_v36  ;;  %v657_v62 = vmul.f32 %v596_v41, %v5419_v45  ;;  %v5685_v0 = vadd.f32 1e-05, %v470_v29 }
 0x159   : > { %v600_v21 = vmul.f32 0.5, %v599_v32  ;;  %v452_v43 = vpop.xlane.xlu2 %451  ;;  %v432_v4 = vpop.xlane.xlu1 %431  ;;  %859 = vmatmul.f32.gmra.mxu1 %v5662_v35  ;;  %v650_v54 = vmul.f32 %v526_v33, %v5421_v46  ;;  %437 = vadd.xlane.f32.xlu1 %v414_v44  ;;  %v619_v1 = vmul.f32 %v5628_v18, %v618_v7  ;;  %vm614_vm10 = vweird.f32 %v5641_v13 }
 0x15a   : > { %v469_v50 = vmul.f32 %v452_v43, %v5390_v20  ;;  %v459_v52 = vmul.f32 %v432_v4, %v5390_v20  ;;  %v610_v59 = vmul.f32 0.5, %v609_v37  ;;  %v677_v2 = vmul.f32 %v5528_v49, %v657_v62  ;;  %vm5706_vm11 = vmor %vm613_vm9, %vm614_vm10 }
 0x15b   : > { %v601_v56 = vsub.f32 1.5, %v600_v21  ;;  %v670_v42 = vmul.f32 %v5528_v49, %v650_v54  ;;  %v620_v22 = vmul.f32 0.5, %v619_v1 }
 0x15c   : > { %v5680_v60 = vadd.f32 1e-05, %v469_v50  ;;  %v475_v48 = vadd.f32 1e-05, %v459_v52  ;;  %v611_v40 = vsub.f32 1.5, %v610_v59  ;;  %v5700_v11 = vadd.f32 %v5535_v55, %v677_v2 }
 0x15d   : > { %v602_v63 = vmul.f32 %v4692_v23, %v601_v56  ;;  %v5689_v46 = vadd.f32 %v5535_v55, %v670_v42  ;;  %v621_v8 = vsub.f32 1.5, %v620_v22 }
 0x15e   : > { %4695 = vrsqrt.f32 %v5680_v60  ;;  %v612_v24 = vmul.f32 %v5641_v13, %v611_v40  ;;  %vm533_vm14 = vweird.f32 %v475_v48  ;;  %vm633_vm2 = vweird.f32 %v5680_v60 }
 0x15f   : > { %4697 = vrsqrt.f32 %v475_v48  ;;  %776 = vmatmul.f32.gmra.mxu0 %v5689_v46  ;;  %906 = vmatmul.f32.gmra.mxu2 %v5689_v46  ;;  %v606_v45 = vsel %vm605_vm8, %v4692_v23, %v602_v63  ;;  %v622_v36 = vmul.f32 %v5628_v18, %v621_v8  ;;  %vm643_vm8 = vweird.f32 %v5685_v0 }
 0x160   : > { %v658_v3 = vmul.f32 %v606_v45, %v5435_v57  ;;  %4699 = vrsqrt.f32 %v5685_v0  ;;  %v616_v6 = vsel %vm5706_vm11, %v5641_v13, %v612_v24 }
 0x161   : > { %v434_v47 = vpop.xlane.xlu2 %433  ;;  %862 = vmatmul.f32.gmra.mxu1 %v5700_v11  ;;  %v659_v29 = vmul.f32 %v616_v6, %v5438_v58  ;;  %v626_v52 = vsel %vm5730_vm0, %v5628_v18, %v622_v36 }
 0x162   : > { %v460_v17 = vmul.f32 %v434_v47, %v5390_v20  ;;  %v678_v57 = vmul.f32 %v5528_v49, %v658_v3 }
 0x163   : > { %v679_v4 = vmul.f32 %v5528_v49, %v659_v29 }
 0x164   : > { %v5704_v15 = vpop.eup %4695  ;;  %v476_v28 = vadd.f32 1e-05, %v460_v17  ;;  %v5722_v32 = vadd.f32 %v5535_v55, %v678_v57 }
 0x165   : > { %v4698_v19 = vpop.eup %4697  ;;  %v628_v25 = vmul.f32 %v5704_v15, %v5680_v60  ;;  %vm634_vm3 = vweird.f32 %v5704_v15  ;;  %v5745_v41 = vadd.f32 %v5535_v55, %v679_v4 }
 0x166   : > { %v528_v26 = vmul.f32 %v4698_v19, %v475_v48  ;;  %4701 = vrsqrt.f32 %v476_v28  ;;  %v5718_v31 = vpop.eup %4699  ;;  %vm534_vm15 = vweird.f32 %v4698_v19  ;;  %vm543_vm4 = vweird.f32 %v476_v28  ;;  %vm5749_vm6 = vmor %vm633_vm2, %vm634_vm3 }
 0x167   : > { %v629_v39 = vmul.f32 %v5704_v15, %v628_v25  ;;  %832 = vmatmul.f32.vlgmr.msrb.gmra.mxu0 %v5547_v14  ;;  %v638_v13 = vmul.f32 %v5718_v31, %v5685_v0  ;;  %vm535_vm1 = vmor %vm533_vm14, %vm534_vm15  ;;  %v660_v48 = vmul.f32 %v626_v52, %v5428_v53  ;;  %vm644_vm9 = vweird.f32 %v5718_v31 }
 0x168   : > { %v529_v7 = vmul.f32 %v4698_v19, %v528_v26  ;;  %vm645_vm10 = vmor %vm643_vm8, %vm644_vm9 }
 0x169   : > { %v630_v21 = vmul.f32 0.5, %v629_v39  ;;  %865 = vmatmul.f32.gmra.mxu1 %v5722_v32  ;;  %v639_v58 = vmul.f32 %v5718_v31, %v638_v13  ;;  %v680_v1 = vmul.f32 %v5528_v49, %v660_v48 }
 0x16a   : > { %v530_v34 = vmul.f32 0.5, %v529_v7 }
 0x16b   : > { %v631_v33 = vsub.f32 1.5, %v630_v21  ;;  %v640_v42 = vmul.f32 0.5, %v639_v58  ;;  %v5765_v47 = vadd.f32 %v5535_v55, %v680_v1 }
 0x16c   : > { %v4702_v37 = vpop.eup %4701  ;;  %v531_v44 = vsub.f32 1.5, %v530_v34 }
 0x16d   : > { %v538_v27 = vmul.f32 %v4702_v37, %v476_v28  ;;  %vm544_vm5 = vweird.f32 %v4702_v37  ;;  %v632_v18 = vmul.f32 %v5704_v15, %v631_v33  ;;  %v641_v40 = vsub.f32 1.5, %v640_v42 }
 0x16e   : > { %v532_v43 = vmul.f32 %v4698_v19, %v531_v44  ;;  %vm545_vm7 = vmor %vm543_vm4, %vm544_vm5 }
 0x16f   : > { %v539_v50 = vmul.f32 %v4702_v37, %v538_v27  ;;  %835 = vmatmul.f32.gmra.mxu0 %v5590_v51  ;;  %v636_v2 = vsel %vm5749_vm6, %v5704_v15, %v632_v18  ;;  %v642_v22 = vmul.f32 %v5718_v31, %v641_v40 }
 0x170   : > { %v536_v54 = vsel %vm535_vm1, %v4698_v19, %v532_v43  ;;  %v661_v17 = vmul.f32 %v636_v2, %v5460_v9  ;;  %vm962_vm1 = vcmask 261120  }
 0x171   : > { %v540_v56 = vmul.f32 0.5, %v539_v50  ;;  %v651_v59 = vmul.f32 %v536_v54, %v5466_v16  ;;  %868 = vmatmul.f32.gmra.mxu1 %v5745_v41  ;;  %v646_v0 = vsel %vm645_vm10, %v5718_v31, %v642_v22 }
 0x172   : > { %v662_v9 = vmul.f32 %v646_v0, %v5447_v5 }
 0x173   : > { %v541_v62 = vsub.f32 1.5, %v540_v56  ;;  %v671_v51 = vmul.f32 %v5528_v49, %v651_v59 }
 0x174   : > { %v682_v15 = vmul.f32 %v5528_v49, %v662_v9 }
 0x175   : > { %v542_v63 = vmul.f32 %v4702_v37, %v541_v62  ;;  %v691_v16 = vadd.f32 %v5535_v55, %v671_v51 }
 0x176   : > { %v5782_v23 = vadd.f32 %v5535_v55, %v682_v15 }
 0x177   : > { %779 = vmatmul.f32.vlgmr.msra.gmra.mxu3 %v691_v16  ;;  %909 = vmatmul.f32.gmra.mxu2 %v691_v16  ;;  %v546_v53 = vsel %vm545_vm7, %v4702_v37, %v542_v63 }
 0x178   : > { %838 = vmatmul.f32.gmra.mxu0 %v5650_v30  ;;  %v652_v45 = vmul.f32 %v546_v53, %v5472_v10  ;;  %v681_v10 = vmul.f32 %v5528_v49, %v661_v17 }
 0x179   : > { %871 = vmatmul.f32.gmra.mxu1 %v5765_v47 }
 0x17a   : > { %v672_v3 = vmul.f32 %v5528_v49, %v652_v45  ;;  %v5776_v24 = vadd.f32 %v5535_v55, %v681_v10 }
 0x17c   : > { %v692_v30 = vadd.f32 %v5535_v55, %v672_v3 }
 0x17f   : > { %782 = vmatmul.f32.gmra.mxu3 %v692_v30  ;;  %912 = vmatmul.f32.gmra.mxu2 %v692_v30 }
 0x180   : > { %841 = vmatmul.f32.gmra.mxu0 %v5689_v46 }
 0x181   : > { %874 = vmatmul.f32.gmra.mxu1 %v5776_v24 }
 0x188   : > { %844 = vmatmul.f32.gmra.mxu0 %v691_v16 }
 0x189   : > { %877 = vmatmul.f32.gmra.mxu1 %v5782_v23 }
 0x190   : > { %847 = vmatmul.f32.gmra.mxu0 %v692_v30 }
 0x1c3   : > { %v768_v28 = vpop.f32.mrf.mxu0 }
 0x1c4   : > { %v5785_v57 = vmul.f32 0.17677669, %v768_v28 }
 0x1c6   : > { %1545 = vrot.lane.b32.xlu1 %v5785_v57, %s5183_s26 }
 0x1c9   : > { %v5797_v6 = vpop.f32.mrf.mxu2 }
 0x1cb   : > { %v436_v46 = vpop.xlane.xlu0 %435  ;;  %v771_v33 = vpop.f32.mrf.mxu0 }
 0x1cc   : > { %v438_v5 = vpop.xlane.xlu1 %437  ;;  %v461_v19 = vmul.f32 %v436_v46, %v5390_v20  ;;  %v5790_v25 = vpop.f32.mrf.mxu1  ;;  %v5856_v1 = vmul.f32 0.17677669, %v771_v33 }
 0x1cd   : > { %v462_v26 = vmul.f32 %v438_v5, %v5390_v20  ;;  %1593 = vrot.lane.b32.xlu0 %v5790_v25, %s5183_s26  ;;  %3288 = vrot.lane.b32.xlu2 %v5790_v25, %s5184_s30 }
 0x1ce   : > { %v477_v8 = vadd.f32 1e-05, %v461_v19 }
 0x1cf   : > { %v478_v39 = vadd.f32 1e-05, %v462_v26 }
 0x1d0   : > { %4703 = vrsqrt.f32 %v477_v8  ;;  %vm553_vm14 = vweird.f32 %v477_v8 }
 0x1d1   : > { %4705 = vrsqrt.f32 %v478_v39  ;;  %v5807_v21 = vpop.f32.mrf.mxu2  ;;  %vm563_vm12 = vweird.f32 %v478_v39 }
 0x1d2   : > { %v5811_v27 = vpack.i.bf16 %v5797_v6, %v5807_v21 }
 0x1d3   : > { %v774_v60 = vpop.f32.mrf.mxu0 }
 0x1d4   : > { %7946 = vst [vmem:[#allocation15_spill] sm:$0xff] %v5811_v27  ;;  %v5830_v62 = vmul.f32 0.17677669, %v774_v60 }
 0x1d5   : > { %2497 = vrot.lane.b32.xlu0 %v5790_v25, %s5185_s11 }
 0x1d6   : > { %v5799_v31 = vpop.f32.mrf.mxu1  ;;  %v4704_v7 = vpop.eup %4703 }
 0x1d7   : > { %1595 = vrot.lane.b32.xlu1 %v5799_v31, %s5183_s26  ;;  %v4706_v20 = vpop.eup %4705  ;;  %v548_v34 = vmul.f32 %v4704_v7, %v477_v8  ;;  %2499 = vrot.lane.b32.xlu2 %v5799_v31, %s5185_s11  ;;  %vm554_vm11 = vweird.f32 %v4704_v7 }
 0x1d8   : > { %v558_v29 = vmul.f32 %v4706_v20, %v478_v39  ;;  %vm564_vm13 = vweird.f32 %v4706_v20  ;;  %vm555_vm15 = vmor %vm553_vm14, %vm554_vm11 }
 0x1d9   : > { %v549_v36 = vmul.f32 %v4704_v7, %v548_v34  ;;  %vm565_vm0 = vmor %vm563_vm12, %vm564_vm13  ;;  %v5919_v2 = vpop.f32.mrf.mxu2 }
 0x1da   : > { %v559_v13 = vmul.f32 %v4706_v20, %v558_v29 }
 0x1db   : > { %v550_v37 = vmul.f32 0.5, %v549_v36 }
 0x1dc   : > { %v560_v14 = vmul.f32 0.5, %v559_v13 }
 0x1dd   : > { %v551_v44 = vsub.f32 1.5, %v550_v37  ;;  %2449 = vrot.lane.b32.xlu0 %v5785_v57, %s5185_s11 }
 0x1de   : > { %v561_v43 = vsub.f32 1.5, %v560_v14  ;;  %v5815_v58 = vpop.f32.mrf.mxu1 }
 0x1df   : > { %v552_v4 = vmul.f32 %v4704_v7, %v551_v44  ;;  %4551 = vrot.lane.b32.xlu2 %v5811_v27, %s5183_s26 }
 0x1e0   : > { %v562_v50 = vmul.f32 %v4706_v20, %v561_v43 }
 0x1e1   : > { %v556_v52 = vsel %vm555_vm15, %v4704_v7, %v552_v4 }
 0x1e2   : > { %v653_v54 = vmul.f32 %v556_v52, %v5635_v12  ;;  %v566_v56 = vsel %vm565_vm0, %v4706_v20, %v562_v50 }
 0x1e3   : > { %v654_v42 = vmul.f32 %v566_v56, %v5639_v38 }
 0x1e4   : > { %v673_v59 = vmul.f32 %v5528_v49, %v653_v54 }
 0x1e5   : > { %3240 = vrot.lane.b32.xlu0 %v5785_v57, %s5184_s30  ;;  %v674_v12 = vmul.f32 %v5528_v49, %v654_v42 }
 0x1e6   : > { %v693_v48 = vadd.f32 %v5535_v55, %v673_v59  ;;  %v5825_v18 = vpop.f32.mrf.mxu1 }
 0x1e7   : > { %1597 = vrot.lane.b32.xlu2 %v5815_v58, %s5183_s26  ;;  %v694_v51 = vadd.f32 %v5535_v55, %v674_v12 }
 0x1e8   : > { %785 = vmatmul.f32.gmra.mxu3 %v693_v48  ;;  %850 = vmatmul.f32.gmra.mxu0 %v693_v48 }
 0x1e9   : > { %915 = vmatmul.f32.gmra.mxu2 %v693_v48 }
 0x1ed   : > { %3290 = vrot.lane.b32.xlu0 %v5799_v31, %s5184_s30 }
 0x1ee   : > { %v5835_v63 = vpop.f32.mrf.mxu1 }
 0x1ef   : > { %1549 = vrot.lane.b32.xlu2 %v5830_v62, %s5183_s26 }
 0x1f0   : > { %788 = vmatmul.f32.gmra.mxu3 %v694_v51  ;;  %853 = vmatmul.f32.gmra.mxu0 %v694_v51 }
 0x1f1   : > { %918 = vmatmul.f32.gmra.mxu2 %v694_v51 }
 0x1f6   : > { %v5839_v38 = vpop.f32.mrf.mxu1 }
 0x1f7   : > { %3244 = vrot.lane.b32.xlu2 %v5830_v62, %s5184_s30 }
 0x1f8   : > { %791 = vmatmul.f32.gmra.mxu3 %v5616_v61 }
 0x1f9   : > { %921 = vmatmul.f32.gmra.mxu2 %v5616_v61 }
 0x1fa   : > { %v780_v49 = vpop.f32.mrf.mxu3 }
 0x1fb   : > { %v5845_v16 = vmul.f32 0.17677669, %v780_v49 }
 0x1fd   : > { %2457 = vrot.lane.b32.xlu0 %v5845_v16, %s5185_s11  ;;  %1553 = vrot.lane.b32.xlu1 %v5845_v16, %s5183_s26 }
 0x1fe   : > { %v5851_v55 = vpop.f32.mrf.mxu1 }
 0x1ff   : > { %2503 = vrot.lane.b32.xlu2 %v5825_v18, %s5185_s11 }
 0x200   : > { %794 = vmatmul.f32.gmra.mxu3 %v5662_v35 }
 0x201   : > { %924 = vmatmul.f32.gmra.mxu2 %v5662_v35  ;;  %v777_v35 = vpop.f32.mrf.mxu0 }
 0x202   : > { %v783_v61 = vpop.f32.mrf.mxu3  ;;  %v949_v28 = vmul.f32 0.17677669, %v777_v35 }
 0x203   : > { %v5867_v53 = vmul.f32 0.17677669, %v783_v61 }
 0x205   : > { %2451 = vrot.lane.b32.xlu0 %v5856_v1, %s5185_s11  ;;  %3248 = vrot.lane.b32.xlu1 %v5845_v16, %s5184_s30 }
 0x206   : > { %v5863_v40 = vpop.f32.mrf.mxu1 }
 0x207   : > { %4216 = vmatpush.xpose.msk.msrb.mxu3 %vm962_vm1, %v5863_v40 }
 0x208   : > { %797 = vmatmul.f32.gmra.mxu3 %v5700_v11 }
 0x209   : > { %927 = vmatmul.f32.gmra.mxu2 %v5700_v11  ;;  %v5907_v11 = vpop.f32.mrf.mxu0 }
 0x20b   : > { %4217 = vmatpush.xpose.msk.msrb.mxu3 %vm962_vm1, %v5851_v55 }
 0x20d   : > { %1547 = vrot.lane.b32.xlu1 %v5856_v1, %s5183_s26  ;;  %1555 = vrot.lane.b32.xlu0 %v5867_v53, %s5183_s26 }
 0x20f   : > { %4218 = vmatpush.xpose.msk.msrb.mxu3 %vm962_vm1, %v5839_v38 }
 0x210   : > { %800 = vmatmul.f32.gmra.mxu3 %v5722_v32 }
 0x211   : > { %930 = vmatmul.f32.gmra.mxu2 %v5722_v32  ;;  %v5915_v32 = vpop.f32.mrf.mxu0 }
 0x213   : > { %4219 = vmatpush.xpose.msk.msrb.mxu3 %vm962_vm1, %v5835_v63 }
 0x215   : > { %3242 = vrot.lane.b32.xlu1 %v5856_v1, %s5184_s30  ;;  %2501 = vrot.lane.b32.xlu0 %v5815_v58, %s5185_s11 }
 0x217   : > { %4220 = vmatpush.xpose.msk.msrb.mxu3 %vm962_vm1, %v5825_v18 }
 0x218   : > { %803 = vmatmul.f32.gmra.mxu3 %v5745_v41 }
 0x219   : > { %933 = vmatmul.f32.gmra.mxu2 %v5745_v41  ;;  %v5917_v41 = vpop.f32.mrf.mxu0 }
 0x21b   : > { %4221 = vmatpush.xpose.msk.msrb.mxu3 %vm962_vm1, %v5815_v58 }
 0x21d   : > { %3250 = vrot.lane.b32.xlu1 %v5867_v53, %s5184_s30  ;;  %3292 = vrot.lane.b32.xlu0 %v5815_v58, %s5184_s30 }
 0x21f   : > { %4222 = vmatpush.xpose.msk.msrb.mxu3 %vm962_vm1, %v5799_v31 }
 0x220   : > { %806 = vmatmul.f32.gmra.mxu3 %v5765_v47 }
 0x221   : > { %936 = vmatmul.f32.gmra.mxu2 %v5765_v47  ;;  %v5921_v45 = vpop.f32.mrf.mxu0  ;;  %v5923_v47 = vpop.f32.mrf.mxu2 }
 0x223   : > { %4223 = vmatpush.xpose.msk.msrb.mxu3 %vm962_vm1, %v5790_v25  ;;  %v5966_v25 = vpack.i.bf16 %v5919_v2, %v5923_v47 }
 0x225   : > { %2459 = vrot.lane.b32.xlu0 %v5867_v53, %s5185_s11  ;;  %7947 = vst [vmem:[#allocation16_spill] sm:$0xff] %v5966_v25 }
 0x227   : > { %v5991_v39 = vpop.permute.xlu2 %3288 }
 0x228   : > { %809 = vmatmul.f32.gmra.mxu3 %v5776_v24  ;;  %7948 = vst [vmem:[#allocation17_spill] sm:$0xff] %v5991_v39 }
 0x229   : > { %939 = vmatmul.f32.gmra.mxu2 %v5776_v24  ;;  %v5925_v3 = vpop.f32.mrf.mxu0  ;;  %v5927_v17 = vpop.f32.mrf.mxu2 }
 0x22d   : > { %2453 = vrot.lane.b32.xlu0 %v5830_v62, %s5185_s11 }
 0x230   : > { %812 = vmatmul.f32.gmra.mxu3 %v5782_v23 }
 0x231   : > { %942 = vmatmul.f32.gmra.mxu2 %v5782_v23  ;;  %v5929_v22 = vpop.f32.mrf.mxu0  ;;  %v5931_v30 = vpop.f32.mrf.mxu2 }
 0x232   : > { %v6008_v20 = vpop.permute.xlu2 %2499 }
 0x235   : > { %1599 = vrot.lane.b32.xlu0 %v5825_v18, %s5183_s26 }
 0x238   : > { %v6026_v29 = vpop.permute.xlu1 %1545 }
 0x23a   : > { %v6028_v36 = vpop.permute.xlu2 %4551 }
 0x23f   : > { %v6000_v31 = vpop.permute.xlu0 %1593 }
 0x242   : > { %v6043_v43 = vpop.permute.xlu2 %1597 }
 0x247   : > { %v6018_v34 = vpop.permute.xlu0 %2497 }
 0x249   : > { %v6039_v14 = vpop.permute.xlu1 %1595 }
 0x24a   : > { %v6060_v56 = vpop.permute.xlu2 %1549 }
 0x24f   : > { %v6041_v44 = vpop.permute.xlu0 %2449 }
 0x257   : > { %v6056_v52 = vpop.permute.xlu0 %3240 }
 0x258   : > { %7949 = vst [vmem:[#allocation18_spill] sm:$0xff] %v6056_v52 }
 0x25f   : > { %v6076_v42 = vpop.permute.xlu0 %3290 }
 0x260   : > { %7951 = vst [vmem:[#allocation20_spill] sm:$0xff] %v6076_v42 }
 0x265   : > { %v5933_v10 = vpop.f32.mrf.mxu0 }
 0x26b   : > { %v786_v0 = vpop.f32.mrf.mxu3 }
 0x26c   : > { %v5935_v24 = vmul.f32 0.17677669, %v786_v0  ;;  %v5937_v9 = vpop.f32.mrf.mxu2 }
 0x26d   : > { %v5939_v15 = vpop.f32.mrf.mxu0 }
 0x26e   : > { %4224 = vmatpush.xpose.msk.msrb.mxu3 %vm962_vm1, %v5939_v15  ;;  %3252 = vrot.lane.b32.xlu0 %v5935_v24, %s5184_s30 }
 0x26f   : > { %1557 = vrot.lane.b32.xlu1 %v5935_v24, %s5183_s26  ;;  %v6054_v33 = vpop.permute.xlu1 %1553  ;;  %v6091_v60 = vpop.permute.xlu0 %2457 }
 0x272   : > { %4225 = vmatpush.xpose.msk.msrb.mxu3 %vm962_vm1, %v5933_v10 }
 0x273   : > { %v789_v23 = vpop.f32.mrf.mxu3 }
 0x274   : > { %v5949_v46 = vmul.f32 0.17677669, %v789_v23  ;;  %v5951_v5 = vpop.f32.mrf.mxu2 }
 0x275   : > { %v6179_v23 = vpack.i.bf16 %v5937_v9, %v5951_v5 }
 0x276   : > { %4226 = vmatpush.xpose.msk.msrb.mxu3 %vm962_vm1, %v5929_v22  ;;  %2455 = vrot.lane.b32.xlu0 %v949_v28, %s5185_s11 }
 0x277   : > { %3294 = vrot.lane.b32.xlu1 %v5825_v18, %s5184_s30  ;;  %1559 = vrot.lane.b32.xlu2 %v5949_v46, %s5183_s26  ;;  %v6073_v59 = vpop.permute.xlu1 %3248  ;;  %v6083_v18 = vpop.permute.xlu2 %3244  ;;  %7961 = vst [vmem:[#allocation30_spill] sm:$0xff] %v6179_v23 }
 0x278   : > { %7950 = vst [vmem:[#allocation19_spill] sm:$0xff] %v6073_v59 }
 0x279   : > { %7952 = vst [vmem:[#allocation21_spill] sm:$0xff] %v6083_v18 }
 0x27a   : > { %4227 = vmatpush.xpose.msk.msrb.mxu3 %vm962_vm1, %v5925_v3 }
 0x27b   : > { %v792_v37 = vpop.f32.mrf.mxu3 }
 0x27c   : > { %v5962_v19 = vpop.f32.mrf.mxu2  ;;  %v954_v58 = vmul.f32 0.17677669, %v792_v37 }
 0x27e   : > { %4228 = vmatpush.xpose.msk.msrb.mxu3 %vm962_vm1, %v5921_v45  ;;  %4556 = vrot.lane.b32.xlu0 %v5966_v25, %s5183_s26 }
 0x27f   : > { %2461 = vrot.lane.b32.xlu1 %v5935_v24, %s5185_s11  ;;  %3272 = vrot.lane.b32.xlu2 %v5907_v11, %s5184_s30  ;;  %v6093_v12 = vpop.permute.xlu1 %1547  ;;  %v6104_v51 = vpop.permute.xlu2 %2503 }
 0x282   : > { %4229 = vmatpush.xpose.msk.msrb.mxu3 %vm962_vm1, %v5917_v41 }
 0x283   : > { %v795_v50 = vpop.f32.mrf.mxu3 }
 0x284   : > { %v5978_v26 = vpop.f32.mrf.mxu2 }
 0x286   : > { %4230 = vmatpush.xpose.msk.msrb.mxu3 %vm962_vm1, %v5915_v32  ;;  %1577 = vrot.lane.b32.xlu0 %v5907_v11, %s5183_s26 }
 0x287   : > { %1551 = vrot.lane.b32.xlu1 %v949_v28, %s5183_s26  ;;  %2463 = vrot.lane.b32.xlu2 %v5949_v46, %s5185_s11  ;;  %v6114_v49 = vpop.permute.xlu1 %3242 }
 0x288   : > { %7953 = vst [vmem:[#allocation22_spill] sm:$0xff] %v6114_v49 }
 0x28a   : > { %4231 = vmatpush.xpose.msk.msrb.mxu3 %vm962_vm1, %v5907_v11 }
 0x28b   : > { %v798_v48 = vpop.f32.mrf.mxu3 }
 0x28c   : > { %v5989_v8 = vpop.f32.mrf.mxu2 }
 0x28d   : > { %4232 = vmatmul.msk.f32.vlgmr.msrb.gmra.mxu3 %vm962_vm1, %v5785_v57 }
 0x28e   : > { %2505 = vrot.lane.b32.xlu0 %v5835_v63, %s5185_s11 }
 0x28f   : > { %3246 = vrot.lane.b32.xlu1 %v949_v28, %s5184_s30  ;;  %1579 = vrot.lane.b32.xlu2 %v5915_v32, %s5183_s26 }
 0x294   : > { %v6002_v7 = vpop.f32.mrf.mxu2 }
 0x295   : > { %4233 = vmatmul.msk.f32.gmra.mxu3 %vm962_vm1, %v5856_v1 }
 0x296   : > { %3254 = vrot.lane.b32.xlu0 %v5949_v46, %s5184_s30 }
 0x297   : > { %1601 = vrot.lane.b32.xlu1 %v5835_v63, %s5183_s26  ;;  %2507 = vrot.lane.b32.xlu2 %v5839_v38, %s5185_s11 }
 0x29c   : > { %v6014_v57 = vpop.f32.mrf.mxu2 }
 0x29d   : > { %4234 = vmatmul.msk.f32.gmra.mxu3 %vm962_vm1, %v5830_v62  ;;  %v801_v62 = vpop.f32.mrf.mxu3 }
 0x29e   : > { %1603 = vrot.lane.b32.xlu0 %v5839_v38, %s5183_s26 }
 0x29f   : > { %3296 = vrot.lane.b32.xlu1 %v5835_v63, %s5184_s30  ;;  %3298 = vrot.lane.b32.xlu2 %v5839_v38, %s5184_s30  ;;  %v6108_v63 = vmul.f32 0.17677669, %v801_v62  ;;  %v6112_v38 = vpop.permute.xlu0 %2451 }
 0x2a4   : > { %v6030_v13 = vpop.f32.mrf.mxu2 }
 0x2a5   : > { %4235 = vmatmul.msk.f32.gmra.mxu3 %vm962_vm1, %v949_v28  ;;  %v804_v1 = vpop.f32.mrf.mxu3 }
 0x2a6   : > { %1581 = vrot.lane.b32.xlu0 %v5917_v41, %s5183_s26  ;;  %v6131_v35 = vmul.f32 0.17677669, %v804_v1 }
 0x2a7   : > { %2481 = vrot.lane.b32.xlu1 %v5907_v11, %s5185_s11  ;;  %2483 = vrot.lane.b32.xlu2 %v5915_v32, %s5185_s11  ;;  %v6138_v11 = vpop.permute.xlu0 %1555 }
 0x2ac   : > { %v6045_v4 = vpop.f32.mrf.mxu2 }
 0x2ad   : > { %4236 = vmatmul.msk.f32.gmra.mxu3 %vm962_vm1, %v5845_v16  ;;  %v6118_v16 = vpack.i.bf16 %v5927_v17, %v5931_v30 }
 0x2ae   : > { %2509 = vrot.lane.b32.xlu0 %v5851_v55, %s5185_s11 }
 0x2af   : > { %3300 = vrot.lane.b32.xlu2 %v5851_v55, %s5184_s30  ;;  %1561 = vrot.lane.b32.xlu1 %v954_v58, %s5183_s26  ;;  %7954 = vst [vmem:[#allocation23_spill] sm:$0xff] %v6118_v16 }
 0x2b4   : > { %v6058_v54 = vpop.f32.mrf.mxu2 }
 0x2b5   : > { %1476 = vmatpush.msra.mxu0 %v6058_v54  ;;  %4237 = vmatmul.msk.f32.gmra.mxu3 %vm962_vm1, %v5867_v53  ;;  %v955_v53 = vmul.f32 0.17677669, %v795_v50 }
 0x2b6   : > { %3302 = vrot.lane.b32.xlu0 %v5863_v40, %s5184_s30 }
 0x2b7   : > { %1477 = vmatpush.msra.mxu0 %v6045_v4  ;;  %2485 = vrot.lane.b32.xlu2 %v5917_v41, %s5185_s11 }
 0x2b8   : > { %3274 = vrot.lane.b32.xlu1 %v5915_v32, %s5184_s30  ;;  %v6140_v32 = vpop.permute.xlu1 %3250 }
 0x2b9   : > { %1478 = vmatpush.msra.mxu0 %v6030_v13  ;;  %7955 = vst [vmem:[#allocation24_spill] sm:$0xff] %v6140_v32 }
 0x2bb   : > { %1479 = vmatpush.msra.mxu0 %v6014_v57 }
 0x2bd   : > { %1480 = vmatpush.msra.mxu0 %v6002_v7  ;;  %4238 = vmatmul.msk.f32.gmra.mxu3 %vm962_vm1, %v5935_v24  ;;  %v6173_v24 = vpack.i.bf16 %v6014_v57, %v6030_v13 }
 0x2be   : > { %2487 = vrot.lane.b32.xlu0 %v5921_v45, %s5185_s11 }
 0x2bf   : > { %1481 = vmatpush.msra.mxu0 %v5989_v8  ;;  %3276 = vrot.lane.b32.xlu2 %v5917_v41, %s5184_s30  ;;  %7960 = vst [vmem:[#allocation29_spill] sm:$0xff] %v6173_v24 }
 0x2c0   : > { %2465 = vrot.lane.b32.xlu1 %v954_v58, %s5185_s11 }
 0x2c1   : > { %1482 = vmatpush.msra.mxu0 %v5978_v26 }
 0x2c3   : > { %1483 = vmatpush.msra.mxu0 %v5962_v19 }
 0x2c5   : > { %1484 = vmatpush.msra.mxu0 %v5951_v5  ;;  %4239 = vmatmul.msk.f32.gmra.mxu3 %vm962_vm1, %v5949_v46 }
 0x2c6   : > { %2489 = vrot.lane.b32.xlu0 %v5925_v3, %s5185_s11 }
 0x2c7   : > { %1485 = vmatpush.msra.mxu0 %v5937_v9  ;;  %1607 = vrot.lane.b32.xlu2 %v5863_v40, %s5183_s26 }
 0x2c8   : > { %3256 = vrot.lane.b32.xlu1 %v954_v58, %s5184_s30 }
 0x2c9   : > { %1486 = vmatpush.msra.mxu0 %v5931_v30 }
 0x2cb   : > { %1487 = vmatpush.msra.mxu0 %v5927_v17 }
 0x2cd   : > { %1488 = vmatpush.msra.mxu0 %v5923_v47  ;;  %4240 = vmatmul.msk.f32.gmra.mxu3 %vm962_vm1, %v954_v58 }
 0x2ce   : > { %3262 = vrot.lane.b32.xlu0 %v6108_v63, %s5184_s30 }
 0x2cf   : > { %1489 = vmatpush.msra.mxu0 %v5919_v2  ;;  %1583 = vrot.lane.b32.xlu2 %v5921_v45, %s5183_s26 }
 0x2d0   : > { %4561 = vrot.lane.b32.xlu1 %v6118_v16, %s5183_s26 }
 0x2d1   : > { %1490 = vmatpush.msra.mxu0 %v5807_v21  ;;  %v6128_v61 = vpop.permute.xlu2 %1559  ;;  %v807_v21 = vpop.f32.mrf.mxu3 }
 0x2d2   : > { %v6146_v2 = vmul.f32 0.17677669, %v807_v21 }
 0x2d3   : > { %1491 = vmatpush.msra.mxu0 %v5797_v6  ;;  %v956_v6 = vmul.f32 0.17677669, %v798_v48 }
 0x2d4   : > { %7957 = vst [vmem:[#allocation26_spill] sm:$0xff] %v6146_v2 }
 0x2d5   : > { %4241 = vmatmul.msk.f32.gmra.mxu3 %vm962_vm1, %v955_v53 }
 0x2d6   : > { %3264 = vrot.lane.b32.xlu0 %v6131_v35, %s5184_s30 }
 0x2d7   : > { %2511 = vrot.lane.b32.xlu2 %v5863_v40, %s5185_s11 }
 0x2d8   : > { %1605 = vrot.lane.b32.xlu1 %v5851_v55, %s5183_s26  ;;  %v6157_v55 = vpop.permute.xlu0 %2501 }
 0x2d9   : > { %v6144_v41 = vpop.permute.xlu2 %3272  ;;  %v810_v13 = vpop.f32.mrf.mxu3 }
 0x2da   : > { %7956 = vst [vmem:[#allocation25_spill] sm:$0xff] %v6144_v41  ;;  %v6201_v37 = vmul.f32 0.17677669, %v810_v13 }
 0x2dc   : > { %7963 = vst [vmem:[#allocation32_spill] sm:$0xff] %v6201_v37 }
 0x2dd   : > { %4242 = vmatmul.msk.f32.gmra.mxu3 %vm962_vm1, %v956_v6 }
 0x2de   : > { %1571 = vrot.lane.b32.xlu0 %v6146_v2, %s5183_s26 }
 0x2df   : > { %2469 = vrot.lane.b32.xlu2 %v956_v6, %s5185_s11 }
 0x2e0   : > { %1563 = vrot.lane.b32.xlu1 %v955_v53, %s5183_s26  ;;  %v6169_v0 = vpop.permute.xlu0 %3292 }
 0x2e1   : > { %v6153_v40 = vpop.permute.xlu1 %1557  ;;  %v6155_v47 = vpop.permute.xlu2 %2463  ;;  %7959 = vst [vmem:[#allocation28_spill] sm:$0xff] %v6169_v0 }
 0x2e2   : > { %v813_v50 = vpop.f32.mrf.mxu3 }
 0x2e3   : > { %v6215_v1 = vmul.f32 0.17677669, %v813_v50 }
 0x2e5   : > { %4243 = vmatmul.msk.f32.gmra.mxu3 %vm962_vm1, %v6108_v63  ;;  %7965 = vst [vmem:[#allocation34_spill] sm:$0xff] %v6215_v1 }
 0x2e6   : > { %2475 = vrot.lane.b32.xlu0 %v6146_v2, %s5185_s11 }
 0x2e7   : > { %3260 = vrot.lane.b32.xlu2 %v956_v6, %s5184_s30 }
 0x2e8   : > { %2467 = vrot.lane.b32.xlu1 %v955_v53, %s5185_s11  ;;  %v6192_v57 = vpop.permute.xlu0 %2459 }
 0x2e9   : > { %v6165_v17 = vpop.permute.xlu1 %3294  ;;  %v6167_v30 = vpop.permute.xlu2 %1579 }
 0x2ea   : > { %7958 = vst [vmem:[#allocation27_spill] sm:$0xff] %v6165_v17 }
 0x2ed   : > { %4244 = vmatmul.msk.f32.gmra.mxu3 %vm962_vm1, %v6131_v35 }
 0x2ee   : > { %4581 = vrot.lane.b32.xlu0 %v6173_v24, %s5183_s26 }
 0x2ef   : > { %4566 = vrot.lane.b32.xlu2 %v6179_v23, %s5183_s26 }
 0x2f0   : > { %3258 = vrot.lane.b32.xlu1 %v955_v53, %s5184_s30  ;;  %v6207_v58 = vpop.permute.xlu0 %2453 }
 0x2f1   : > { %v6186_v28 = vpop.permute.xlu1 %2461  ;;  %v6188_v46 = vpop.permute.xlu2 %2507 }
 0x2f5   : > { %4245 = vmatmul.msk.f32.gmra.mxu3 %vm962_vm1, %v6146_v2 }
 0x2f7   : > { %3280 = vrot.lane.b32.xlu2 %v5925_v3, %s5184_s30 }
 0x2f8   : > { %1565 = vrot.lane.b32.xlu1 %v956_v6, %s5183_s26  ;;  %v1600_v6 = vpop.permute.xlu0 %1599 }
 0x2f9   : > { %v6197_v9 = vpop.permute.xlu1 %1551  ;;  %v6199_v5 = vpop.permute.xlu2 %3298 }
 0x2fa   : > { %7962 = vst [vmem:[#allocation31_spill] sm:$0xff] %v6199_v5 }
 0x2fd   : > { %4246 = vmatmul.msk.f32.gmra.mxu3 %vm962_vm1, %v6201_v37 }
 0x2ff   : > { %2471 = vrot.lane.b32.xlu2 %v6108_v63, %s5185_s11 }
 0x300   : > { %3278 = vrot.lane.b32.xlu1 %v5921_v45, %s5184_s30  ;;  %v6227_v45 = vpack.i.bf16 %v5962_v19, %v5978_v26 }
 0x301   : > { %v6211_v48 = vpop.permute.xlu1 %3246  ;;  %v6213_v62 = vpop.permute.xlu2 %2483 }
 0x302   : > { %7964 = vst [vmem:[#allocation33_spill] sm:$0xff] %v6211_v48 }
 0x303   : > { %7967 = vst [vmem:[#allocation36_spill] sm:$0xff] %v6227_v45 }
 0x305   : > { %4247 = vmatmul.msk.f32.gmra.mxu3 %vm962_vm1, %v6215_v1 }
 0x307   : > { %2473 = vrot.lane.b32.xlu2 %v6131_v35, %s5185_s11 }
 0x308   : > { %1585 = vrot.lane.b32.xlu1 %v5925_v3, %s5183_s26  ;;  %v6239_v3 = vpop.permute.xlu0 %3252 }
 0x309   : > { %v1602_v53 = vpop.permute.xlu1 %1601  ;;  %v6223_v21 = vpop.permute.xlu2 %3300  ;;  %7969 = vst [vmem:[#allocation38_spill] sm:$0xff] %v6239_v3 }
 0x30a   : > { %7966 = vst [vmem:[#allocation35_spill] sm:$0xff] %v6223_v21 }
 0x30f   : > { %4571 = vrot.lane.b32.xlu2 %v6227_v45, %s5183_s26 }
 0x310   : > { %1567 = vrot.lane.b32.xlu1 %v6108_v63, %s5183_s26  ;;  %v6233_v13 = vpop.f32.mrf.mxu3  ;;  %v6252_v63 = vpop.permute.xlu0 %2455 }
 0x311   : > { %v6235_v50 = vpop.permute.xlu1 %3296  ;;  %v6237_v32 = vpop.permute.xlu2 %2485 }
 0x312   : > { %7968 = vst [vmem:[#allocation37_spill] sm:$0xff] %v6235_v50 }
 0x317   : > { %3284 = vrot.lane.b32.xlu2 %v5933_v10, %s5184_s30 }
 0x318   : > { %1587 = vrot.lane.b32.xlu1 %v5929_v22, %s5183_s26  ;;  %v6245_v19 = vpop.f32.mrf.mxu3  ;;  %v6263_v49 = vpop.permute.xlu0 %4556 }
 0x319   : > { %v6247_v26 = vpop.permute.xlu1 %2481  ;;  %v6249_v59 = vpop.permute.xlu2 %3276  ;;  %1126 = vmax.xlane.f32.xlu0 %v6245_v19 }
 0x31a   : > { %7970 = vst [vmem:[#allocation39_spill] sm:$0xff] %v6249_v59 }
 0x31f   : > { %2495 = vrot.lane.b32.xlu2 %v5939_v15, %s5185_s11 }
 0x320   : > { %1569 = vrot.lane.b32.xlu1 %v6131_v35, %s5183_s26  ;;  %v6258_v3 = vpop.f32.mrf.mxu3  ;;  %v6275_v35 = vpack.i.bf16 %v5989_v8, %v6002_v7 }
 0x321   : > { %v1608_v48 = vpop.permute.xlu2 %1607  ;;  %v6260_v18 = vpop.permute.xlu1 %1561 }
 0x322   : > { %4248 = vmatpush.xpose.msk.msrb.mxu1 %vm962_vm1, %v1608_v48  ;;  %7972 = vst [vmem:[#allocation41_spill] sm:$0xff] %v6275_v35  ;;  %v6279_v48 = vpop.permute.xlu0 %1577 }
 0x327   : > { %1573 = vrot.lane.b32.xlu2 %v6201_v37, %s5183_s26 }
 0x328   : > { %2491 = vrot.lane.b32.xlu1 %v5929_v22, %s5185_s11  ;;  %v6269_v52 = vpop.f32.mrf.mxu3 }
 0x32a   : > { %v6271_v25 = vpop.permute.xlu1 %3274  ;;  %v6292_v8 = vpop.permute.xlu0 %2505 }
 0x32b   : > { %7971 = vst [vmem:[#allocation40_spill] sm:$0xff] %v6271_v25 }
 0x32f   : > { %4576 = vrot.lane.b32.xlu2 %v6275_v35, %s5183_s26 }
 0x330   : > { %3282 = vrot.lane.b32.xlu1 %v5929_v22, %s5184_s30  ;;  %v6283_v27 = vpop.f32.mrf.mxu3 }
 0x331   : > { %1132 = vmax.xlane.f32.xlu0 %v6283_v27 }
 0x332   : > { %v6286_v16 = vpop.permute.xlu1 %2465  ;;  %v6302_v24 = vpop.permute.xlu0 %3254 }
 0x333   : > { %7973 = vst [vmem:[#allocation42_spill] sm:$0xff] %v6286_v16 }
 0x334   : > { %7975 = vst [vmem:[#allocation44_spill] sm:$0xff] %v6302_v24 }
 0x338   : > { %1589 = vrot.lane.b32.xlu1 %v5933_v10, %s5183_s26  ;;  %v6290_v45 = vpop.f32.mrf.mxu3 }
 0x33a   : > { %v6294_v7 = vpop.permute.xlu1 %3256  ;;  %v1604_v25 = vpop.permute.xlu0 %1603 }
 0x33b   : > { %7974 = vst [vmem:[#allocation43_spill] sm:$0xff] %v6294_v7 }
 0x340   : > { %2493 = vrot.lane.b32.xlu1 %v5933_v10, %s5185_s11  ;;  %v6298_v23 = vpop.f32.mrf.mxu3 }
 0x342   : > { %v6300_v22 = vpop.permute.xlu1 %4561 }
 0x348   : > { %1591 = vrot.lane.b32.xlu1 %v5939_v15, %s5183_s26  ;;  %v6306_v35 = vpop.f32.mrf.mxu3 }
 0x349   : > { %7976 = vst [vmem:[#allocation45_spill] sm:$0xff] %v6306_v35 }
 0x34a   : > { %v1606_v41 = vpop.permute.xlu1 %1605 }
 0x34b   : > { %4249 = vmatpush.xpose.msk.msrb.mxu1 %vm962_vm1, %v1606_v41 }
 0x34f   : > { %4250 = vmatpush.xpose.msk.msrb.mxu1 %vm962_vm1, %v1604_v25 }
 0x350   : > { %3286 = vrot.lane.b32.xlu1 %v5939_v15, %s5184_s30  ;;  %v6312_v10 = vpop.f32.mrf.mxu3  ;;  %v6330_v15 = vpack.i.bf16 %v6045_v4, %v6058_v54 }
 0x351   : > { %1140 = vmax.xlane.f32.xlu0 %v6312_v10 }
 0x352   : > { %v6315_v7 = vpop.permute.xlu1 %1563  ;;  %7979 = vst [vmem:[#allocation48_spill] sm:$0xff] %v6330_v15 }
 0x353   : > { %4251 = vmatpush.xpose.msk.msrb.mxu1 %vm962_vm1, %v1602_v53  ;;  %v1584_v53 = vpop.permute.xlu2 %1583 }
 0x357   : > { %4252 = vmatpush.xpose.msk.msrb.mxu1 %vm962_vm1, %v1600_v6 }
 0x358   : > { %1575 = vrot.lane.b32.xlu1 %v6215_v1, %s5183_s26  ;;  %1124 = vmax.xlane.f32.xlu2 %v6233_v13  ;;  %v6322_v41 = vpop.f32.mrf.mxu3 }
 0x359   : > { %7977 = vst [vmem:[#allocation46_spill] sm:$0xff] %v6322_v41 }
 0x35a   : > { %v6324_v25 = vpop.permute.xlu1 %2467 }
 0x35b   : > { %7978 = vst [vmem:[#allocation47_spill] sm:$0xff] %v6324_v25  ;;  %4253 = vmatpush.xpose.msk.msrb.mxu1 %vm962_vm1, %v6043_v43 }
 0x35f   : > { %4254 = vmatpush.xpose.msk.msrb.mxu1 %vm962_vm1, %v6039_v14  ;;  %v2512_v14 = vpop.permute.xlu2 %2511 }
 0x360   : > { %4586 = vrot.lane.b32.xlu1 %v6330_v15, %s5183_s26  ;;  %1130 = vmax.xlane.f32.xlu2 %v6269_v52  ;;  %v6337_v6 = vpop.f32.mrf.mxu3  ;;  %s5115_s26 = scalar_lea.hbm %s5114_s8, 128 }
 0x361   : > { %7980 = vst [vmem:[#allocation49_spill] sm:$0xff] %v6337_v6  ;;  %p5116_p1 = scmp.ne.s32.totalorder %s5114_s8, %s5115_s26  ;;  %p5121_p10 = scmp.lt.s32.totalorder %s5119_s12, %s5115_s26 }
 0x362   : > { %v6339_v24 = vpop.permute.xlu1 %3258 }
 0x363   : > { %7981 = vst [vmem:[#allocation50_spill] sm:$0xff] %v6339_v24  ;;  %4255 = vmatpush.xpose.msk.msrb.mxu1 %vm962_vm1, %v6000_v31  ;;  %v1582_v24 = vpop.permute.xlu0 %1581  ;;  %p5117_p4 = pnand %p5116_p1, %p5308_p3  ;;  %p5122_p2 = por %p5121_p10, %p5120_p9 }
 0x365   : > { %p5118_p8 = pneg %p5117_p4 }
 0x367   : > { %v6354_v15 = vpop.permute.xlu2 %2469  ;;  %p5123_p11 = pnand %p5122_p2, %p5118_p8 }
 0x368   : > { %1136 = vmax.xlane.f32.xlu2 %v6298_v23  ;;  %v6344_v43 = vpop.f32.mrf.mxu3  ;;  %7985 = vst [vmem:[#allocation54_spill] sm:$0xff] %v6354_v15 }
 0x369   : > { %7982 = vst [vmem:[#allocation51_spill] sm:$0xff] %v6344_v43  ;;  %1146 = vmax.xlane.f32.xlu0 %v6344_v43 }
 0x36a   : > { %v6347_v4 = vpop.permute.xlu1 %1565 }
 0x36b   : > { %v2510_v50 = vpop.permute.xlu0 %2509 }
 0x36f   : > { %v6359_v42 = vpop.permute.xlu2 %3260 }
 0x370   : > { %1142 = vmax.xlane.f32.xlu2 %v6322_v41  ;;  %v6350_v54 = vpop.f32.mrf.mxu3  ;;  %7987 = vst [vmem:[#allocation56_spill] sm:$0xff] %v6359_v42 }
 0x371   : > { %7983 = vst [vmem:[#allocation52_spill] sm:$0xff] %v6350_v54 }
 0x372   : > { %v6352_v59 = vpop.permute.xlu1 %3278 }
 0x373   : > { %7984 = vst [vmem:[#allocation53_spill] sm:$0xff] %v6352_v59  ;;  %v6369_v21 = vpop.permute.xlu0 %3302 }
 0x374   : > { %7989 = vst [vmem:[#allocation58_spill] sm:$0xff] %v6369_v21 }
 0x377   : > { %v6366_v5 = vpop.permute.xlu2 %4566 }
 0x378   : > { %1148 = vmax.xlane.f32.xlu2 %v6350_v54  ;;  %v6357_v31 = vpop.f32.mrf.mxu3 }
 0x379   : > { %7986 = vst [vmem:[#allocation55_spill] sm:$0xff] %v6357_v31 }
 0x37a   : > { %v1586_v39 = vpop.permute.xlu1 %1585 }
 0x37b   : > { %v6376_v42 = vpop.permute.xlu0 %2487 }
 0x37f   : > { %v6371_v2 = vpop.permute.xlu2 %3280 }
 0x380   : > { %v6361_v0 = vpop.f32.mrf.mxu3  ;;  %7990 = vst [vmem:[#allocation59_spill] sm:$0xff] %v6371_v2 }
 0x381   : > { %7988 = vst [vmem:[#allocation57_spill] sm:$0xff] %v6361_v0  ;;  %1152 = vmax.xlane.f32.xlu0 %v6361_v0 }
 0x382   : > { %v6364_v17 = vpop.permute.xlu1 %1567 }
 0x383   : > { %v6383_v0 = vpop.permute.xlu0 %2489 }
 0x387   : > { %v6381_v15 = vpop.permute.xlu2 %2471 }
 0x388   : > { %7991 = vst [vmem:[#allocation60_spill] sm:$0xff] %v6381_v15  ;;  %v6393_v41 = vpop.f32.mrf.mxu3 }
 0x389   : > { %7995 = vst [vmem:[#allocation64_spill] sm:$0xff] %v6393_v41 }
 0x38a   : > { %v1588_v59 = vpop.permute.xlu1 %1587  ;;  %1128 = vmax.xlane.f32.xlu1 %v6258_v3 }
 0x38b   : > { %v6391_v25 = vpop.permute.xlu0 %3262 }
 0x38c   : > { %7994 = vst [vmem:[#allocation63_spill] sm:$0xff] %v6391_v25 }
 0x38f   : > { %v6388_v21 = vpop.permute.xlu2 %2473 }
 0x390   : > { %7993 = vst [vmem:[#allocation62_spill] sm:$0xff] %v6388_v21 }
 0x392   : > { %v6373_v1 = vpop.permute.xlu1 %1569  ;;  %1134 = vmax.xlane.f32.xlu1 %v6290_v45 }
 0x393   : > { %v6398_v15 = vpop.permute.xlu0 %3264 }
 0x394   : > { %7996 = vst [vmem:[#allocation65_spill] sm:$0xff] %v6398_v15 }
 0x397   : > { %v4572_v54 = vpop.permute.xlu2 %4571 }
 0x39a   : > { %v6378_v37 = vpop.permute.xlu1 %2491  ;;  %1138 = vmax.xlane.f32.xlu1 %v6306_v35 }
 0x39b   : > { %v6404_v21 = vpop.permute.xlu0 %1571 }
 0x39f   : > { %v6400_v35 = vpop.permute.xlu2 %3284 }
 0x3a0   : > { %7997 = vst [vmem:[#allocation66_spill] sm:$0xff] %v6400_v35 }
 0x3a2   : > { %v6385_v43 = vpop.permute.xlu1 %3282  ;;  %1144 = vmax.xlane.f32.xlu1 %v6337_v6 }
 0x3a3   : > { %7992 = vst [vmem:[#allocation61_spill] sm:$0xff] %v6385_v43  ;;  %v6410_v6 = vpop.permute.xlu0 %2475 }
 0x3a7   : > { %v2496_v25 = vpop.permute.xlu2 %2495 }
 0x3aa   : > { %v1590_v2 = vpop.permute.xlu1 %1589  ;;  %1150 = vmax.xlane.f32.xlu1 %v6357_v31 }
 0x3ab   : > { %v4582_v35 = vpop.permute.xlu0 %4581 }
 0x3af   : > { %v6415_v15 = vpop.permute.xlu2 %1573 }
 0x3b2   : > { %v6395_v16 = vpop.permute.xlu1 %2493  ;;  %1154 = vmax.xlane.f32.xlu1 %v6393_v41 }
 0x3ba   : > { %v1592_v43 = vpop.permute.xlu1 %1591 }
 0x3bb   : > { %4256 = vmatpush.xpose.msk.msrb.mxu1 %vm962_vm1, %v1592_v43 }
 0x3bf   : > { %4257 = vmatpush.xpose.msk.msrb.mxu1 %vm962_vm1, %v1590_v2 }
 0x3c2   : > { %v6406_v31 = vpop.permute.xlu1 %3286 }
 0x3c3   : > { %7998 = vst [vmem:[#allocation67_spill] sm:$0xff] %v6406_v31  ;;  %4258 = vmatpush.xpose.msk.msrb.mxu1 %vm962_vm1, %v1588_v59  ;;  %v4577_v31 = vpop.permute.xlu2 %4576 }
 0x3c7   : > { %4259 = vmatpush.xpose.msk.msrb.mxu1 %vm962_vm1, %v1586_v39  ;;  %v4583_v39 = vunpack.i.l.bf16 %v4582_v35 }
 0x3ca   : > { %v6412_v41 = vpop.permute.xlu1 %1575 }
 0x3cb   : > { %4260 = vmatpush.xpose.msk.msrb.mxu1 %vm962_vm1, %v1584_v53  ;;  %v4584_v53 = vunpack.i.h.bf16 %v4582_v35  ;;  %v4568_v35 = vunpack.i.l.bf16 %v6366_v5 }
 0x3cf   : > { %4261 = vmatpush.xpose.msk.msrb.mxu1 %vm962_vm1, %v1582_v24  ;;  %v4578_v24 = vunpack.i.l.bf16 %v4577_v31 }
 0x3d2   : > { %v4587_v2 = vpop.permute.xlu1 %4586 }
 0x3d3   : > { %4262 = vmatpush.xpose.msk.msrb.mxu1 %vm962_vm1, %v6167_v30  ;;  %v4588_v43 = vunpack.i.l.bf16 %v4587_v2  ;;  %v4589_v59 = vunpack.i.h.bf16 %v4587_v2  ;;  %v4579_v30 = vunpack.i.h.bf16 %v4577_v31  ;;  %v4573_v2 = vunpack.i.l.bf16 %v4572_v54 }
 0x3d5   : > { %2154 = vmatpush.msrb.mxu2 %v4588_v43  ;;  %v8000_v43 = vld [vmem:[#allocation49_spill] sm:$0xff] }
 0x3d7   : > { %4263 = vmatpush.xpose.msk.msrb.mxu1 %vm962_vm1, %v6279_v48  ;;  %2155 = vmatpush.msrb.mxu2 %v4589_v59  ;;  %v4574_v48 = vunpack.i.h.bf16 %v4572_v54  ;;  %v8001_v59 = vld [vmem:[#allocation42_spill] sm:$0xff] }
 0x3d9   : > { %2156 = vmatpush.msrb.mxu2 %v4583_v39 }
 0x3da   : > { %4264 = vmatmul.msk.f32.vlgmr.msrb.gmra.mxu1 %vm962_vm1, %v6026_v29  ;;  %v4569_v29 = vunpack.i.h.bf16 %v6366_v5  ;;  %v4559_v5 = vunpack.i.h.bf16 %v6263_v49 }
 0x3db   : > { %4312 = vmatpush.xpose.msk.msra.mxu1 %vm962_vm1, %v2512_v14  ;;  %2157 = vmatpush.msrb.mxu2 %v4584_v53 }
 0x3dd   : > { %2158 = vmatpush.msrb.mxu2 %v4578_v24 }
 0x3df   : > { %4313 = vmatpush.xpose.msk.msra.mxu1 %vm962_vm1, %v2510_v50  ;;  %2159 = vmatpush.msrb.mxu2 %v4579_v30  ;;  %v4563_v50 = vunpack.i.l.bf16 %v6300_v22 }
 0x3e1   : > { %2160 = vmatpush.msrb.mxu2 %v4573_v2 }
 0x3e2   : > { %4265 = vmatmul.msk.f32.gmra.mxu1 %vm962_vm1, %v6093_v12  ;;  %v4558_v12 = vunpack.i.l.bf16 %v6263_v49 }
 0x3e3   : > { %4314 = vmatpush.xpose.msk.msra.mxu1 %vm962_vm1, %v6188_v46  ;;  %2161 = vmatpush.msrb.mxu2 %v4574_v48  ;;  %v4564_v46 = vunpack.i.h.bf16 %v6300_v22  ;;  %v8002_v48 = vld [vmem:[#allocation46_spill] sm:$0xff] }
 0x3e5   : > { %2162 = vmatpush.msrb.mxu2 %v4568_v35 }
 0x3e7   : > { %4315 = vmatpush.xpose.msk.msra.mxu1 %vm962_vm1, %v6292_v8  ;;  %2163 = vmatpush.msrb.mxu2 %v4569_v29  ;;  %v4553_v8 = vunpack.i.l.bf16 %v6028_v36  ;;  %v8003_v29 = vld [vmem:[#allocation52_spill] sm:$0xff] }
 0x3e9   : > { %2164 = vmatpush.msrb.mxu2 %v4563_v50 }
 0x3ea   : > { %4266 = vmatmul.msk.f32.gmra.mxu1 %vm962_vm1, %v6060_v56 }
 0x3eb   : > { %4316 = vmatpush.xpose.msk.msra.mxu1 %vm962_vm1, %v6104_v51  ;;  %2165 = vmatpush.msrb.mxu2 %v4564_v46  ;;  %v4554_v51 = vunpack.i.h.bf16 %v6028_v36  ;;  %v8004_v46 = vld [vmem:[#allocation47_spill] sm:$0xff] }
 0x3ed   : > { %2166 = vmatpush.msrb.mxu2 %v4558_v12 }
 0x3ef   : > { %4317 = vmatpush.xpose.msk.msra.mxu1 %vm962_vm1, %v6157_v55  ;;  %2167 = vmatpush.msrb.mxu2 %v4559_v5 }
 0x3f1   : > { %2168 = vmatpush.msrb.mxu2 %v4553_v8 }
 0x3f2   : > { %4267 = vmatmul.msk.f32.gmra.mxu1 %vm962_vm1, %v6197_v9 }
 0x3f3   : > { %4318 = vmatpush.xpose.msk.msra.mxu1 %vm962_vm1, %v6008_v20  ;;  %2169 = vmatpush.msrb.mxu2 %v4554_v51  ;;  %v1125_v20 = vpop.xlane.xlu2 %1124 }
 0x3f4   : > { %v1156_v36 = vsub.f32 %v6233_v13, %v1125_v20 }
 0x3f7   : > { %4319 = vmatpush.xpose.msk.msra.mxu1 %vm962_vm1, %v6018_v34 }
 0x3fa   : > { %4268 = vmatmul.msk.f32.gmra.mxu1 %vm962_vm1, %v6054_v33  ;;  %v1172_v33 = vmul.f32 1.442695, %v1156_v36  ;;  %v8005_v36 = vld [vmem:[#allocation51_spill] sm:$0xff] }
 0x3fb   : > { %4320 = vmatpush.xpose.msk.msra.mxu1 %vm962_vm1, %v2496_v25 }
 0x3fc   : > { %4707 = vpow2.f32 %v1172_v33 }
 0x3fd   : > { %v1129_v56 = vpop.xlane.xlu1 %1128 }
 0x3ff   : > { %4321 = vmatpush.xpose.msk.msra.mxu1 %vm962_vm1, %v6395_v16  ;;  %v1127_v16 = vpop.xlane.xlu0 %1126 }
 0x402   : > { %4269 = vmatmul.msk.f32.gmra.mxu1 %vm962_vm1, %v6138_v11 }
 0x403   : > { %4322 = vmatpush.xpose.msk.msra.mxu1 %vm962_vm1, %v6378_v37 }
 0x407   : > { %4323 = vmatpush.xpose.msk.msra.mxu1 %vm962_vm1, %v6383_v0 }
 0x40a   : > { %4270 = vmatmul.msk.f32.gmra.mxu1 %vm962_vm1, %v6153_v40 }
 0x40b   : > { %4324 = vmatpush.xpose.msk.msra.mxu1 %vm962_vm1, %v6376_v42 }
 0x40f   : > { %4325 = vmatpush.xpose.msk.msra.mxu1 %vm962_vm1, %v6237_v32  ;;  %v1131_v32 = vpop.xlane.xlu2 %1130 }
 0x412   : > { %4271 = vmatmul.msk.f32.gmra.mxu1 %vm962_vm1, %v6128_v61  ;;  %v6503_v61 = vpop.eup %4707 }
 0x413   : > { %4326 = vmatpush.xpose.msk.msra.mxu1 %vm962_vm1, %v6213_v62 }
 0x417   : > { %4327 = vmatpush.xpose.msk.msra.mxu1 %vm962_vm1, %v6247_v26  ;;  %v1137_v9 = vpop.xlane.xlu2 %1136  ;;  %v1135_v26 = vpop.xlane.xlu1 %1134 }
 0x41a   : > { %4272 = vmatmul.msk.f32.gmra.mxu1 %vm962_vm1, %v6260_v18  ;;  %v1158_v18 = vsub.f32 %v6258_v3, %v1129_v56  ;;  %v8006_v56 = vld [vmem:[#allocation57_spill] sm:$0xff] }
 0x41c   : > { %v1176_v49 = vmul.f32 1.442695, %v1158_v18 }
 0x41e   : > { %4709 = vpow2.f32 %v1176_v49  ;;  %v8007_v49 = vld [vmem:[#allocation54_spill] sm:$0xff] }
 0x422   : > { %4273 = vmatmul.msk.f32.gmra.mxu1 %vm962_vm1, %v6315_v7  ;;  %v1139_v7 = vpop.xlane.xlu1 %1138 }
 0x424   : > { %v6512_v55 = vpop.eup %4709 }
 0x42a   : > { %4274 = vmatmul.msk.f32.gmra.mxu1 %vm962_vm1, %v6347_v4  ;;  %v1145_v14 = vpop.xlane.xlu1 %1144 }
 0x432   : > { %4275 = vmatmul.msk.f32.gmra.mxu1 %vm962_vm1, %v6364_v17  ;;  %v1159_v17 = vsub.f32 %v6269_v52, %v1131_v32 }
 0x434   : > { %v1178_v0 = vmul.f32 1.442695, %v1159_v17  ;;  %v8008_v17 = vld [vmem:[#allocation32_spill] sm:$0xff] }
 0x43a   : > { %4276 = vmatmul.msk.f32.gmra.mxu1 %vm962_vm1, %v6373_v1  ;;  %v1162_v1 = vsub.f32 %v6298_v23, %v1137_v9 }
 0x43c   : > { %v1184_v52 = vmul.f32 1.442695, %v1162_v1 }
 0x442   : > { %4277 = vmatmul.msk.f32.gmra.mxu1 %vm962_vm1, %v6404_v21 }
 0x44a   : > { %4278 = vmatmul.msk.f32.gmra.mxu1 %vm962_vm1, %v6415_v15  ;;  %v1143_v15 = vpop.xlane.xlu2 %1142 }
 0x44b   : > { %v1165_v35 = vsub.f32 %v8002_v48, %v1143_v15 }
 0x44d   : > { %v1190_v12 = vmul.f32 1.442695, %v1165_v35 }
 0x452   : > { %4279 = vmatmul.msk.f32.gmra.mxu1 %vm962_vm1, %v6412_v41  ;;  %v1149_v24 = vpop.xlane.xlu2 %1148 }
 0x453   : > { %v1168_v50 = vsub.f32 %v8003_v29, %v1149_v24 }
 0x455   : > { %v1196_v5 = vmul.f32 1.442695, %v1168_v50 }
 0x457   : > { %v6491_v34 = vpop.f32.mrf.mxu1 }
 0x458   : > { %1738 = vmax.xlane.f32.xlu2 %v6491_v34 }
 0x45a   : > { %4328 = vmatmul.msk.f32.vlgmr.msra.gmra.mxu1 %vm962_vm1, %v6041_v44  ;;  %v1157_v44 = vsub.f32 %v6245_v19, %v1127_v16 }
 0x45c   : > { %v1174_v40 = vmul.f32 1.442695, %v1157_v44 }
 0x45e   : > { %4711 = vpow2.f32 %v1174_v40 }
 0x45f   : > { %v6497_v42 = vpop.f32.mrf.mxu1  ;;  %4713 = vpow2.f32 %v1178_v0  ;;  %v8009_v0 = vld [vmem:[#allocation60_spill] sm:$0xff] }
 0x460   : > { %1740 = vmax.xlane.f32.xlu0 %v6497_v42  ;;  %4715 = vpow2.f32 %v1184_v52  ;;  %v1151_v52 = vpop.xlane.xlu1 %1150 }
 0x462   : > { %4329 = vmatmul.msk.f32.gmra.mxu1 %vm962_vm1, %v6112_v38 }
 0x464   : > { %v6521_v37 = vpop.eup %4711 }
 0x465   : > { %v6531_v3 = vpop.eup %4713 }
 0x467   : > { %v6505_v11 = vpop.f32.mrf.mxu1 }
 0x468   : > { %1204 = vadd.xlane.f32.xlu0 %v6503_v61  ;;  %1742 = vmax.xlane.f32.xlu1 %v6505_v11  ;;  %v1155_v15 = vpop.xlane.xlu1 %1154 }
 0x46a   : > { %4330 = vmatmul.msk.f32.gmra.mxu1 %vm962_vm1, %v6207_v58  ;;  %v1133_v58 = vpop.xlane.xlu0 %1132 }
 0x46b   : > { %v1160_v21 = vsub.f32 %v6283_v27, %v1133_v58  ;;  %v6539_v27 = vpop.eup %4715 }
 0x46d   : > { %v1180_v13 = vmul.f32 1.442695, %v1160_v21  ;;  %v8010_v21 = vld [vmem:[#allocation62_spill] sm:$0xff] }
 0x46f   : > { %v6514_v38 = vpop.f32.mrf.mxu1  ;;  %4717 = vpow2.f32 %v1180_v13 }
 0x470   : > { %1208 = vadd.xlane.f32.xlu1 %v6512_v55  ;;  %1744 = vmax.xlane.f32.xlu2 %v6514_v38 }
 0x472   : > { %4331 = vmatmul.msk.f32.gmra.mxu1 %vm962_vm1, %v6252_v63  ;;  %v1161_v63 = vsub.f32 %v6290_v45, %v1135_v26  ;;  %v1544_v26 = vld [vmem:[#allocation8 + $0x18] sm:$0xff] }
 0x473   : > { %2396 = vmatpush.msrb.mxu0 %v1544_v26 }
 0x474   : > { %v1182_v22 = vmul.f32 1.442695, %v1161_v63 }
 0x476   : > { %4719 = vpow2.f32 %v1182_v22  ;;  %v8011_v22 = vld [vmem:[#allocation55_spill] sm:$0xff] }
 0x477   : > { %v6523_v62 = vpop.f32.mrf.mxu1 }
 0x478   : > { %1746 = vmax.xlane.f32.xlu0 %v6523_v62  ;;  %1206 = vadd.xlane.f32.xlu2 %v6521_v37 }
 0x47a   : > { %4332 = vmatmul.msk.f32.gmra.mxu1 %vm962_vm1, %v6091_v60  ;;  %v6543_v60 = vpop.eup %4717 }
 0x47c   : > { %v6557_v4 = vpop.eup %4719 }
 0x47f   : > { %v6533_v19 = vpop.f32.mrf.mxu1 }
 0x480   : > { %1210 = vadd.xlane.f32.xlu0 %v6531_v3  ;;  %1748 = vmax.xlane.f32.xlu2 %v6533_v19 }
 0x482   : > { %4333 = vmatmul.msk.f32.gmra.mxu1 %vm962_vm1, %v6192_v57  ;;  %v1141_v57 = vpop.xlane.xlu0 %1140 }
 0x483   : > { %v1164_v25 = vsub.f32 %v6312_v10, %v1141_v57  ;;  %v1166_v10 = vsub.f32 %v8000_v43, %v1145_v14  ;;  %v1169_v57 = vsub.f32 %v8011_v22, %v1151_v52  ;;  %v8012_v43 = vld [vmem:[#allocation64_spill] sm:$0xff] }
 0x485   : > { %v1188_v45 = vmul.f32 1.442695, %v1164_v25  ;;  %v1192_v39 = vmul.f32 1.442695, %v1166_v10  ;;  %v1171_v10 = vsub.f32 %v8012_v43, %v1155_v15 }
 0x487   : > { %v6541_v23 = vpop.f32.mrf.mxu1  ;;  %4721 = vpow2.f32 %v1188_v45  ;;  %v1542_v45 = vld [vmem:[#allocation8 + $0x8] sm:$0xff] }
 0x488   : > { %1216 = vadd.xlane.f32.xlu0 %v6539_v27  ;;  %1750 = vmax.xlane.f32.xlu1 %v6541_v23 }
 0x489   : > { %1212 = vadd.xlane.f32.xlu2 %v6543_v60 }
 0x48a   : > { %4334 = vmatmul.msk.f32.gmra.mxu1 %vm962_vm1, %v6186_v28  ;;  %v7999_v28 = vld [vmem:[#allocation45_spill] sm:$0xff]  ;;  %v1147_v53 = vpop.xlane.xlu0 %1146 }
 0x48b   : > { %v1163_v31 = vsub.f32 %v7999_v28, %v1139_v7  ;;  %v1167_v33 = vsub.f32 %v8005_v36, %v1147_v53  ;;  %v1543_v7 = vld [vmem:[#allocation8 + $0x10] sm:$0xff] }
 0x48c   : > { %2397 = vmatpush.msrb.mxu0 %v1543_v7 }
 0x48d   : > { %v6567_v30 = vpop.eup %4721  ;;  %v1194_v16 = vmul.f32 1.442695, %v1167_v33 }
 0x48e   : > { %2398 = vmatpush.msrb.mxu0 %v1542_v45 }
 0x48f   : > { %v6551_v41 = vpop.f32.mrf.mxu1 }
 0x490   : > { %1752 = vmax.xlane.f32.xlu1 %v6551_v41 }
 0x492   : > { %4335 = vmatmul.msk.f32.gmra.mxu1 %vm962_vm1, %v6155_v47  ;;  %v1186_v47 = vmul.f32 1.442695, %v1163_v31  ;;  %v1153_v51 = vpop.xlane.xlu0 %1152  ;;  %v1541_v31 = vld [vmem:[#allocation8] sm:$0xff] }
 0x493   : > { %v1170_v18 = vsub.f32 %v8006_v56, %v1153_v51  ;;  %2399 = vmatpush.msrb.mxu0 %v1541_v31 }
 0x494   : > { %4723 = vpow2.f32 %v1186_v47 }
 0x495   : > { %4725 = vpow2.f32 %v1192_v39  ;;  %v1200_v44 = vmul.f32 1.442695, %v1170_v18  ;;  %v1202_v39 = vmul.f32 1.442695, %v1171_v10  ;;  %v8016_v10 = vld [vmem:[#allocation35_spill] sm:$0xff] }
 0x496   : > { %4727 = vpow2.f32 %v1190_v12 }
 0x497   : > { %v6559_v54 = vpop.f32.mrf.mxu1  ;;  %4729 = vpow2.f32 %v1196_v5 }
 0x498   : > { %1214 = vadd.xlane.f32.xlu1 %v6557_v4  ;;  %1754 = vmax.xlane.f32.xlu2 %v6559_v54  ;;  %4731 = vpow2.f32 %v1194_v16 }
 0x499   : > { %4733 = vpow2.f32 %v1200_v44 }
 0x49a   : > { %4336 = vmatmul.msk.f32.gmra.mxu1 %vm962_vm1, %v8001_v59  ;;  %v6577_v8 = vpop.eup %4723  ;;  %v8013_v59 = vld [vmem:[#allocation34_spill] sm:$0xff] }
 0x49b   : > { %v6579_v20 = vpop.eup %4725 }
 0x49c   : > { %v6587_v32 = vpop.eup %4727 }
 0x49d   : > { %v6589_v40 = vpop.eup %4729 }
 0x49e   : > { %v6597_v9 = vpop.eup %4731 }
 0x49f   : > { %v6569_v2 = vpop.f32.mrf.mxu1  ;;  %v6599_v58 = vpop.eup %4733 }
 0x4a0   : > { %1756 = vmax.xlane.f32.xlu0 %v6569_v2  ;;  %1220 = vadd.xlane.f32.xlu2 %v6567_v30 }
 0x4a2   : > { %4337 = vmatmul.msk.f32.gmra.mxu1 %vm962_vm1, %v8004_v46 }
 0x4a7   : > { %v6603_v1 = vpop.f32.mrf.mxu1 }
 0x4a8   : > { %1218 = vadd.xlane.f32.xlu0 %v6577_v8  ;;  %1224 = vadd.xlane.f32.xlu2 %v6579_v20 }
 0x4aa   : > { %4338 = vmatmul.msk.f32.gmra.mxu1 %vm962_vm1, %v8007_v49 }
 0x4af   : > { %v6609_v13 = vpop.f32.mrf.mxu1 }
 0x4b0   : > { %1222 = vadd.xlane.f32.xlu0 %v6587_v32  ;;  %1228 = vadd.xlane.f32.xlu2 %v6589_v40 }
 0x4b1   : > { %2477 = vrot.lane.b32.xlu1 %v8008_v17, %s5185_s11 }
 0x4b2   : > { %4339 = vmatmul.msk.f32.gmra.mxu1 %vm962_vm1, %v8009_v0 }
 0x4b7   : > { %v6613_v14 = vpop.f32.mrf.mxu1 }
 0x4b8   : > { %1226 = vadd.xlane.f32.xlu0 %v6597_v9  ;;  %1232 = vadd.xlane.f32.xlu2 %v6599_v58 }
 0x4ba   : > { %4340 = vmatmul.msk.f32.gmra.mxu1 %vm962_vm1, %v8010_v21 }
 0x4bf   : > { %v6622_v48 = vpop.f32.mrf.mxu1 }
 0x4c2   : > { %4341 = vmatmul.msk.f32.gmra.mxu1 %vm962_vm1, %v6410_v6  ;;  %v1198_v6 = vmul.f32 1.442695, %v1169_v57 }
 0x4c7   : > { %v6636_v5 = vpop.f32.mrf.mxu1 }
 0x4cb   : > { %v1739_v63 = vpop.xlane.xlu2 %1738 }
 0x4cc   : > { %v1770_v25 = vsub.f32 %v6491_v34, %v1739_v63 }
 0x4ce   : > { %v1786_v28 = vmul.f32 1.442695, %v1770_v25  ;;  %v8014_v25 = vld [vmem:[#allocation58_spill] sm:$0xff] }
 0x4cf   : > { %v6647_v63 = vpop.f32.mrf.mxu1 }
 0x4d0   : > { %4735 = vpow2.f32 %v1786_v28  ;;  %2479 = vrot.lane.b32.xlu2 %v8013_v59, %s5185_s11 }
 0x4d1   : > { %4737 = vpow2.f32 %v1198_v6  ;;  %v8015_v6 = vld [vmem:[#allocation26_spill] sm:$0xff] }
 0x4d2   : > { %4739 = vpow2.f32 %v1202_v39 }
 0x4d3   : > { %v1741_v47 = vpop.xlane.xlu0 %1740 }
 0x4d4   : > { %v1771_v34 = vsub.f32 %v6497_v42, %v1741_v47 }
 0x4d6   : > { %v6619_v53 = vpop.eup %4735  ;;  %v1788_v24 = vmul.f32 1.442695, %v1771_v34 }
 0x4d7   : > { %1818 = vadd.xlane.f32.xlu0 %v6619_v53  ;;  %v6626_v35 = vpop.eup %4737  ;;  %v6660_v47 = vpop.f32.mrf.mxu1 }
 0x4d8   : > { %3268 = vrot.lane.b32.xlu2 %v8008_v17, %s5184_s30  ;;  %4741 = vpow2.f32 %v1788_v24  ;;  %v6631_v42 = vpop.eup %4739 }
 0x4db   : > { %v6628_v29 = vpop.xlane.xlu1 %1742  ;;  %1230 = vadd.xlane.f32.xlu1 %v6626_v35  ;;  %v1205_v50 = vpop.xlane.xlu0 %1204 }
 0x4dc   : > { %4743 = vrcp.f32 %v1205_v50  ;;  %v1247_v18 = vand.u32 2147483648, %v1205_v50  ;;  %v1245_v16 = vand.u32 2147483647, %v1205_v50  ;;  %vm1241_vm3 = vweird.f32 %v1205_v50 }
 0x4de   : > { %v6634_v46 = vpop.eup %4741  ;;  %v1248_v17 = vor.u32 1.1754944e-38, %v1247_v18  ;;  %vm1246_vm5 = vcmp.eq.f32.partialorder %v1245_v16, 8.507059e+37 }
 0x4df   : > { %1234 = vadd.xlane.f32.xlu0 %v6631_v42 }
 0x4e2   : > { %v4744_v12 = vpop.eup %4743 }
 0x4e3   : > { %v1237_v51 = vmul.f32 %v4744_v12, %v1205_v50  ;;  %v6638_v36 = vpop.xlane.xlu1 %1208  ;;  %v6640_v33 = vpop.xlane.xlu2 %1744  ;;  %1820 = vadd.xlane.f32.xlu1 %v6634_v46  ;;  %vm1242_vm2 = vweird.f32 %v4744_v12 }
 0x4e4   : > { %4745 = vrcp.f32 %v6638_v36  ;;  %vm1243_vm4 = vmor %vm1241_vm3, %vm1242_vm2  ;;  %vm1271_vm11 = vweird.f32 %v6638_v36 }
 0x4e5   : > { %v1238_v56 = vsub.f32 1.0, %v1237_v51 }
 0x4e7   : > { %v1239_v49 = vmul.f32 %v4744_v12, %v1238_v56 }
 0x4e9   : > { %v1240_v44 = vadd.f32 %v4744_v12, %v1239_v49 }
 0x4ea   : > { %v4746_v26 = vpop.eup %4745 }
 0x4eb   : > { %v1207_v0 = vpop.xlane.xlu2 %1206  ;;  %1758 = vmax.xlane.f32.xlu1 %v6603_v1  ;;  %v6645_v21 = vpop.xlane.xlu0 %1746  ;;  %v1244_v52 = vsel %vm1243_vm4, %v4744_v12, %v1240_v44  ;;  %v1267_v57 = vmul.f32 %v4746_v26, %v6638_v36  ;;  %v8017_v12 = vld [vmem:[#allocation31_spill] sm:$0xff]  ;;  %vm1272_vm9 = vweird.f32 %v4746_v26 }
 0x4ec   : > { %4747 = vrcp.f32 %v1207_v0  ;;  %v1249_v7 = vsel %vm1246_vm5, %v1248_v17, %v1244_v52  ;;  %v1262_v39 = vand.u32 2147483648, %v1207_v0  ;;  %v1260_v50 = vand.u32 2147483647, %v1207_v0  ;;  %vm1273_vm12 = vmor %vm1271_vm11, %vm1272_vm9 }
 0x4ed   : > { %v1250_v22 = vmul.f32 %v6503_v61, %v1249_v7  ;;  %v1268_v45 = vsub.f32 1.0, %v1267_v57  ;;  %vm1256_vm7 = vweird.f32 %v1207_v0  ;;  %v8018_v7 = vld [vmem:[#allocation37_spill] sm:$0xff]  ;;  %v1277_v57 = vand.u32 2147483648, %v6638_v36 }
 0x4ee   : > { %v1263_v18 = vor.u32 1.1754944e-38, %v1262_v39  ;;  %vm1261_vm10 = vcmp.eq.f32.partialorder %v1260_v50, 8.507059e+37 }
 0x4ef   : > { %1492 = vmatmul.f32.vlgmr.msra.gmra.mxu0 %v1250_v22  ;;  %v1269_v34 = vmul.f32 %v4746_v26, %v1268_v45  ;;  %v1275_v45 = vand.u32 2147483647, %v6638_v36 }
 0x4f0   : > { %4360 = vmatpush.xpose.msk.msra.mxu0 %vm962_vm1, %v8014_v25 }
 0x4f1   : > { %v1270_v17 = vadd.f32 %v4746_v26, %v1269_v34  ;;  %vm1276_vm13 = vcmp.eq.f32.partialorder %v1275_v45, 8.507059e+37  ;;  %v8022_v45 = vld [vmem:[#allocation17_spill] sm:$0xff] }
 0x4f2   : > { %v4748_v15 = vpop.eup %4747 }
 0x4f3   : > { %v1252_v28 = vmul.f32 %v4748_v15, %v1207_v0  ;;  %v6653_v31 = vpop.xlane.xlu2 %1748  ;;  %3266 = vrot.lane.b32.xlu0 %v8015_v6, %s5184_s30  ;;  %1760 = vmax.xlane.f32.xlu1 %v6609_v13  ;;  %v1211_v43 = vpop.xlane.xlu0 %1210  ;;  %vm1257_vm6 = vweird.f32 %v4748_v15 }
 0x4f4   : > { %4361 = vmatpush.xpose.msk.msra.mxu0 %vm962_vm1, %v8016_v10  ;;  %4749 = vrcp.f32 %v1211_v43  ;;  %vm1258_vm8 = vmor %vm1256_vm7, %vm1257_vm6  ;;  %v6673_v6 = vpop.f32.mrf.mxu1  ;;  %v8019_v10 = vld [vmem:[#allocation27_spill] sm:$0xff]  ;;  %vm1286_vm15 = vweird.f32 %v1211_v43 }
 0x4f5   : > { %v1253_v61 = vsub.f32 1.0, %v1252_v28  ;;  %v1274_v28 = vsel %vm1273_vm12, %v4746_v26, %v1270_v17  ;;  %v1292_v26 = vand.u32 2147483648, %v1211_v43 }
 0x4f7   : > { %v1254_v24 = vmul.f32 %v4748_v15, %v1253_v61  ;;  %v1278_v61 = vor.u32 1.1754944e-38, %v1277_v57 }
 0x4f8   : > { %4362 = vmatpush.xpose.msk.msra.mxu0 %vm962_vm1, %v8017_v12  ;;  %v8020_v12 = vld [vmem:[#allocation28_spill] sm:$0xff] }
 0x4f9   : > { %v1255_v51 = vadd.f32 %v4748_v15, %v1254_v24  ;;  %v1279_v39 = vsel %vm1276_vm13, %v1278_v61, %v1274_v28 }
 0x4fa   : > { %v4750_v56 = vpop.eup %4749 }
 0x4fb   : > { %v1282_v49 = vmul.f32 %v4750_v56, %v1211_v43  ;;  %v6664_v16 = vpop.xlane.xlu1 %1750  ;;  %v1259_v44 = vsel %vm1258_vm8, %v4748_v15, %v1255_v51  ;;  %v6678_v24 = vpop.xlane.xlu0 %1216  ;;  %vm1287_vm14 = vweird.f32 %v4750_v56  ;;  %v1280_v51 = vmul.f32 %v6512_v55, %v1279_v39  ;;  %v8023_v39 = vld [vmem:[#allocation67_spill] sm:$0xff] }
 0x4fc   : > { %v1213_v52 = vpop.xlane.xlu2 %1212  ;;  %4363 = vmatpush.xpose.msk.msra.mxu0 %vm962_vm1, %v8018_v7  ;;  %v1264_v22 = vsel %vm1261_vm10, %v1263_v18, %v1259_v44  ;;  %v1290_v18 = vand.u32 2147483647, %v1211_v43  ;;  %vm1288_vm0 = vmor %vm1286_vm15, %vm1287_vm14  ;;  %v8021_v7 = vld [vmem:[#allocation20_spill] sm:$0xff]  ;;  %vm1331_vm12 = vweird.f32 %v6678_v24 }
 0x4fd   : > { %v1283_v0 = vsub.f32 1.0, %v1282_v49  ;;  %4751 = vrcp.f32 %v1213_v52  ;;  %v1265_v25 = vmul.f32 %v6521_v37, %v1264_v22  ;;  %v1293_v22 = vor.u32 1.1754944e-38, %v1292_v26 }
 0x4fe   : > { %4753 = vrcp.f32 %v6678_v24  ;;  %vm1291_vm2 = vcmp.eq.f32.partialorder %v1290_v18, 8.507059e+37  ;;  %vm1301_vm4 = vweird.f32 %v1213_v52  ;;  %v1305_v28 = vand.u32 2147483647, %v1213_v52 }
 0x4ff   : > { %v1284_v15 = vmul.f32 %v4750_v56, %v1283_v0  ;;  %1495 = vmatmul.f32.gmra.mxu0 %v1265_v25 }
 0x500   : > { %4364 = vmatpush.xpose.msk.msra.mxu0 %vm962_vm1, %v8019_v10  ;;  %vm1306_vm6 = vcmp.eq.f32.partialorder %v1305_v28, 8.507059e+37  ;;  %v8026_v28 = vld [vmem:[#allocation59_spill] sm:$0xff] }
 0x501   : > { %2644 = vmax.xlane.f32.xlu2 %v6673_v6  ;;  %v1285_v36 = vadd.f32 %v4750_v56, %v1284_v15 }
 0x503   : > { %v4752_v34 = vpop.eup %4751  ;;  %v6680_v37 = vpop.xlane.xlu1 %1752  ;;  %v1289_v44 = vsel %vm1288_vm0, %v4750_v56, %v1285_v36  ;;  %v1307_v56 = vand.u32 2147483648, %v1213_v52 }
 0x504   : > { %v1297_v50 = vmul.f32 %v4752_v34, %v1213_v52  ;;  %4365 = vmatpush.xpose.msk.msra.mxu0 %vm962_vm1, %v8020_v12  ;;  %v1294_v57 = vsel %vm1291_vm2, %v1293_v22, %v1289_v44  ;;  %vm1302_vm3 = vweird.f32 %v4752_v34  ;;  %v4754_v43 = vpop.eup %4753  ;;  %v8025_v22 = vld [vmem:[#allocation61_spill] sm:$0xff] }
 0x505   : > { %v1295_v15 = vmul.f32 %v6531_v3, %v1294_v57  ;;  %vm1303_vm5 = vmor %vm1301_vm4, %vm1302_vm3  ;;  %v1327_v10 = vmul.f32 %v4754_v43, %v6678_v24  ;;  %v1308_v36 = vor.u32 1.1754944e-38, %v1307_v56  ;;  %v8024_v3 = vld [vmem:[#allocation66_spill] sm:$0xff]  ;;  %vm1332_vm11 = vweird.f32 %v4754_v43 }
 0x506   : > { %v1298_v49 = vsub.f32 1.0, %v1297_v50  ;;  %vm1333_vm13 = vmor %vm1331_vm12, %vm1332_vm11 }
 0x507   : > { %1498 = vmatmul.f32.gmra.mxu0 %v1280_v51  ;;  %v1328_v26 = vsub.f32 1.0, %v1327_v10 }
 0x508   : > { %v1299_v17 = vmul.f32 %v4752_v34, %v1298_v49  ;;  %4366 = vmatpush.xpose.msk.msra.mxu0 %vm962_vm1, %v8021_v7 }
 0x509   : > { %1768 = vmax.xlane.f32.xlu2 %v6647_v63  ;;  %v1329_v44 = vmul.f32 %v4754_v43, %v1328_v26 }
 0x50a   : > { %v1300_v55 = vadd.f32 %v4752_v34, %v1299_v17 }
 0x50b   : > { %v1215_v0 = vpop.xlane.xlu1 %1214  ;;  %v6689_v25 = vpop.xlane.xlu2 %1754 }
 0x50c   : > { %4755 = vrcp.f32 %v1215_v0  ;;  %4367 = vmatpush.xpose.msk.msra.mxu0 %vm962_vm1, %v8022_v45  ;;  %3270 = vrot.lane.b32.xlu1 %v8013_v59, %s5184_s30  ;;  %v1304_v61 = vsel %vm1303_vm5, %v4752_v34, %v1300_v55  ;;  %v1322_v34 = vand.u32 2147483648, %v1215_v0  ;;  %v1320_v7 = vand.u32 2147483647, %v1215_v0 }
 0x50d   : > { %v1309_v12 = vsel %vm1306_vm6, %v1308_v36, %v1304_v61  ;;  %vm1316_vm8 = vweird.f32 %v1215_v0  ;;  %v1337_v61 = vand.u32 2147483648, %v6678_v24 }
 0x50e   : > { %v1310_v49 = vmul.f32 %v6543_v60, %v1309_v12  ;;  %v1323_v55 = vor.u32 1.1754944e-38, %v1322_v34  ;;  %vm1321_vm10 = vcmp.eq.f32.partialorder %v1320_v7, 8.507059e+37  ;;  %v1330_v60 = vadd.f32 %v4754_v43, %v1329_v44  ;;  %v8027_v12 = vld [vmem:[#allocation53_spill] sm:$0xff]  ;;  %v8029_v44 = vld [vmem:[#allocation39_spill] sm:$0xff] }
 0x50f   : > { %1501 = vmatmul.f32.gmra.mxu0 %v1295_v15  ;;  %v1338_v26 = vor.u32 1.1754944e-38, %v1337_v61 }
 0x510   : > { %4368 = vmatpush.xpose.msk.msra.mxu0 %vm962_vm1, %v8023_v39  ;;  %v1335_v39 = vand.u32 2147483647, %v6678_v24 }
 0x512   : > { %v4756_v50 = vpop.eup %4755  ;;  %vm1336_vm14 = vcmp.eq.f32.partialorder %v1335_v39, 8.507059e+37  ;;  %v8031_v39 = vld [vmem:[#allocation25_spill] sm:$0xff] }
 0x513   : > { %v1312_v51 = vmul.f32 %v4756_v50, %v1215_v0  ;;  %v6699_v59 = vpop.xlane.xlu2 %1220  ;;  %v6701_v18 = vpop.xlane.xlu0 %1756  ;;  %vm1317_vm7 = vweird.f32 %v4756_v50 }
 0x514   : > { %4369 = vmatpush.xpose.msk.msra.mxu0 %vm962_vm1, %v8024_v3  ;;  %4757 = vrcp.f32 %v6699_v59  ;;  %vm1318_vm9 = vmor %vm1316_vm8, %vm1317_vm7  ;;  %v8028_v3 = vld [vmem:[#allocation48_spill] sm:$0xff]  ;;  %vm1361_vm5 = vweird.f32 %v6699_v59 }
 0x515   : > { %v1313_v52 = vsub.f32 1.0, %v1312_v51 }
 0x517   : > { %v1314_v17 = vmul.f32 %v4756_v50, %v1313_v52  ;;  %1504 = vmatmul.f32.gmra.mxu0 %v1310_v49 }
 0x518   : > { %4370 = vmatpush.xpose.msk.msra.mxu0 %vm962_vm1, %v8025_v22 }
 0x519   : > { %v1315_v57 = vadd.f32 %v4756_v50, %v1314_v17 }
 0x51a   : > { %v6718_v36 = vpop.eup %4757 }
 0x51b   : > { %v6709_v45 = vpop.xlane.xlu2 %1224  ;;  %v1219_v56 = vpop.xlane.xlu0 %1218  ;;  %v1319_v15 = vsel %vm1318_vm9, %v4756_v50, %v1315_v57  ;;  %v1334_v50 = vsel %vm1333_vm13, %v4754_v43, %v1330_v60  ;;  %v1357_v51 = vmul.f32 %v6718_v36, %v6699_v59  ;;  %vm1362_vm4 = vweird.f32 %v6718_v36 }
 0x51c   : > { %4371 = vmatpush.xpose.msk.msra.mxu0 %vm962_vm1, %v8026_v28  ;;  %v1324_v10 = vsel %vm1321_vm10, %v1323_v55, %v1319_v15  ;;  %4759 = vrcp.f32 %v1219_v56  ;;  %v8030_v55 = vld [vmem:[#allocation40_spill] sm:$0xff]  ;;  %v1352_v15 = vand.u32 2147483648, %v1219_v56  ;;  %v1350_v28 = vand.u32 2147483647, %v1219_v56  ;;  %vm1363_vm6 = vmor %vm1361_vm5, %vm1362_vm4 }
 0x51d   : > { %1762 = vmax.xlane.f32.xlu0 %v6613_v14  ;;  %v1325_v0 = vmul.f32 %v6557_v4, %v1324_v10  ;;  %v1339_v4 = vsel %vm1336_vm14, %v1338_v26, %v1334_v50  ;;  %v1358_v17 = vsub.f32 1.0, %v1357_v51  ;;  %vm1346_vm0 = vweird.f32 %v1219_v56 }
 0x51e   : > { %v1340_v7 = vmul.f32 %v6539_v27, %v1339_v4  ;;  %v1353_v50 = vor.u32 1.1754944e-38, %v1352_v15  ;;  %vm1351_vm3 = vcmp.eq.f32.partialorder %v1350_v28, 8.507059e+37  ;;  %vm1391_vm13 = vweird.f32 %v6709_v45 }
 0x51f   : > { %1507 = vmatmul.f32.gmra.mxu0 %v1325_v0  ;;  %v1359_v60 = vmul.f32 %v6718_v36, %v1358_v17 }
 0x520   : > { %4372 = vmatpush.xpose.msk.msra.mxu0 %vm962_vm1, %v8027_v12 }
 0x521   : > { %4591 = vrot.lane.b32.xlu2 %v8028_v3, %s5185_s11  ;;  %v1360_v51 = vadd.f32 %v6718_v36, %v1359_v60 }
 0x522   : > { %v4760_v52 = vpop.eup %4759 }
 0x523   : > { %v2478_v49 = vpop.permute.xlu1 %2477  ;;  %v6726_v24 = vpop.xlane.xlu2 %1228  ;;  %v1342_v34 = vmul.f32 %v4760_v52, %v1219_v56  ;;  %vm1347_vm15 = vweird.f32 %v4760_v52 }
 0x524   : > { %4373 = vmatpush.xpose.msk.msra.mxu0 %vm962_vm1, %v8029_v44  ;;  %v6730_v43 = vpop.xlane.xlu0 %1222  ;;  %4342 = vmatmul.msk.f32.gmra.mxu1 %vm962_vm1, %v2478_v49  ;;  %vm1348_vm2 = vmor %vm1346_vm0, %vm1347_vm15  ;;  %v1772_v44 = vsub.f32 %v6505_v11, %v6628_v29 }
 0x525   : > { %4761 = vrcp.f32 %v6730_v43  ;;  %1764 = vmax.xlane.f32.xlu0 %v6622_v48  ;;  %v1343_v22 = vsub.f32 1.0, %v1342_v34  ;;  %v1367_v34 = vand.u32 2147483648, %v6699_v59  ;;  %v1382_v28 = vand.u32 2147483648, %v6730_v43 }
 0x526   : > { %4763 = vrcp.f32 %v6709_v45  ;;  %v1790_v15 = vmul.f32 1.442695, %v1772_v44  ;;  %vm1376_vm9 = vweird.f32 %v6730_v43  ;;  %v1397_v44 = vand.u32 2147483648, %v6709_v45 }
 0x527   : > { %1510 = vmatmul.f32.gmra.mxu0 %v1340_v7  ;;  %v1344_v57 = vmul.f32 %v4760_v52, %v1343_v22 }
 0x528   : > { %4374 = vmatpush.xpose.msk.msra.mxu0 %vm962_vm1, %v8030_v55  ;;  %v1368_v55 = vor.u32 1.1754944e-38, %v1367_v34 }
 0x529   : > { %v1345_v10 = vadd.f32 %v4760_v52, %v1344_v57  ;;  %v1364_v57 = vsel %vm1363_vm6, %v6718_v36, %v1360_v51  ;;  %v1380_v36 = vand.u32 2147483647, %v6730_v43  ;;  %v1773_v51 = vsub.f32 %v6514_v38, %v6640_v33 }
 0x52a   : > { %v1395_v38 = vand.u32 2147483647, %v6709_v45  ;;  %vm1421_vm6 = vweird.f32 %v6726_v24 }
 0x52b   : > { %v4762_v61 = vpop.eup %4761  ;;  %v6740_v0 = vpop.xlane.xlu2 %1232  ;;  %v1349_v26 = vsel %vm1348_vm2, %v4760_v52, %v1345_v10  ;;  %v1365_v52 = vand.u32 2147483647, %v6699_v59  ;;  %vm1381_vm11 = vcmp.eq.f32.partialorder %v1380_v36, 8.507059e+37 }
 0x52c   : > { %v1372_v27 = vmul.f32 %v4762_v61, %v6730_v43  ;;  %4375 = vmatpush.xpose.msk.msra.mxu0 %vm962_vm1, %v8031_v39  ;;  %v6745_v12 = vpop.xlane.xlu0 %1226  ;;  %v6750_v4 = vpop.eup %4763  ;;  %v1354_v49 = vsel %vm1351_vm3, %v1353_v50, %v1349_v26  ;;  %vm1377_vm8 = vweird.f32 %v4762_v61  ;;  %v1383_v26 = vor.u32 1.1754944e-38, %v1382_v28 }
 0x52d   : > { %1766 = vmax.xlane.f32.xlu0 %v6636_v5  ;;  %v1355_v17 = vmul.f32 %v6577_v8, %v1354_v49  ;;  %4765 = vrcp.f32 %v6745_v12  ;;  %v1387_v7 = vmul.f32 %v6750_v4, %v6709_v45  ;;  %vm1366_vm7 = vcmp.eq.f32.partialorder %v1365_v52, 8.507059e+37  ;;  %vm1378_vm10 = vmor %vm1376_vm9, %vm1377_vm8 }
 0x52e   : > { %v1373_v56 = vsub.f32 1.0, %v1372_v27  ;;  %v1369_v11 = vsel %vm1366_vm7, %v1368_v55, %v1364_v57  ;;  %4767 = vpow2.f32 %v1790_v15  ;;  %vm1392_vm12 = vweird.f32 %v6750_v4 }
 0x52f   : > { %1513 = vmatmul.f32.gmra.mxu0 %v1355_v17  ;;  %v1388_v8 = vsub.f32 1.0, %v1387_v7  ;;  %v1370_v10 = vmul.f32 %v6567_v30, %v1369_v11  ;;  %4769 = vrcp.f32 %v6726_v24  ;;  %vm1393_vm14 = vmor %vm1391_vm13, %vm1392_vm12  ;;  %v8032_v7 = vld [vmem:[#allocation41_spill] sm:$0xff]  ;;  %v1775_v57 = vsub.f32 %v6533_v19, %v6653_v31 }
 0x530   : > { %v1374_v22 = vmul.f32 %v4762_v61, %v1373_v56  ;;  %v1398_v55 = vor.u32 1.1754944e-38, %v1397_v44  ;;  %vm1396_vm15 = vcmp.eq.f32.partialorder %v1395_v38, 8.507059e+37  ;;  %v1412_v11 = vand.u32 2147483648, %v6745_v12 }
 0x531   : > { %v1389_v27 = vmul.f32 %v6750_v4, %v1388_v8  ;;  %vm1406_vm2 = vweird.f32 %v6745_v12 }
 0x532   : > { %v1375_v29 = vadd.f32 %v4762_v61, %v1374_v22 }
 0x533   : > { %v2480_v60 = vpop.permute.xlu2 %2479  ;;  %v4766_v59 = vpop.eup %4765  ;;  %v1390_v43 = vadd.f32 %v6750_v4, %v1389_v27 }
 0x534   : > { %4343 = vmatmul.msk.f32.gmra.mxu1 %vm962_vm1, %v2480_v60  ;;  %v1402_v39 = vmul.f32 %v4766_v59, %v6745_v12  ;;  %v1379_v50 = vsel %vm1378_vm10, %v4762_v61, %v1375_v29  ;;  %v6773_v30 = vpop.eup %4767  ;;  %v1792_v61 = vmul.f32 1.442695, %v1773_v51  ;;  %vm1407_vm0 = vweird.f32 %v4766_v59 }
 0x535   : > { %v1384_v56 = vsel %vm1381_vm11, %v1383_v26, %v1379_v50  ;;  %v6777_v34 = vpop.eup %4769  ;;  %v1394_v22 = vsel %vm1393_vm14, %v6750_v4, %v1390_v43  ;;  %v1796_v60 = vmul.f32 1.442695, %v1775_v57  ;;  %v1410_v4 = vand.u32 2147483647, %v6745_v12  ;;  %vm1408_vm3 = vmor %vm1406_vm2, %vm1407_vm0 }
 0x536   : > { %2642 = vmax.xlane.f32.xlu1 %v6660_v47  ;;  %v1403_v49 = vsub.f32 1.0, %v1402_v39  ;;  %v1385_v17 = vmul.f32 %v6587_v32, %v1384_v56  ;;  %v1417_v33 = vmul.f32 %v6777_v34, %v6726_v24  ;;  %4771 = vpow2.f32 %v1792_v61 }
 0x537   : > { %1516 = vmatmul.f32.gmra.mxu0 %v1370_v10  ;;  %v1399_v32 = vsel %vm1396_vm15, %v1398_v55, %v1394_v22  ;;  %4773 = vrcp.f32 %v6740_v0  ;;  %v1413_v10 = vor.u32 1.1754944e-38, %v1412_v11  ;;  %vm1411_vm4 = vcmp.eq.f32.partialorder %v1410_v4, 8.507059e+37 }
 0x538   : > { %v1404_v52 = vmul.f32 %v4766_v59, %v1403_v49  ;;  %v1418_v15 = vsub.f32 1.0, %v1417_v33  ;;  %v1400_v8 = vmul.f32 %v6579_v20, %v1399_v32  ;;  %4775 = vpow2.f32 %v1796_v60 }
 0x539   : > { %vm1422_vm5 = vweird.f32 %v6777_v34  ;;  %v1427_v12 = vand.u32 2147483648, %v6726_v24  ;;  %v1425_v50 = vand.u32 2147483647, %v6726_v24 }
 0x53a   : > { %v1405_v45 = vadd.f32 %v4766_v59, %v1404_v52  ;;  %v1419_v31 = vmul.f32 %v6777_v34, %v1418_v15  ;;  %vm1423_vm7 = vmor %vm1421_vm6, %vm1422_vm5 }
 0x53b   : > { %v1428_v43 = vor.u32 1.1754944e-38, %v1427_v12  ;;  %vm1426_vm8 = vcmp.eq.f32.partialorder %v1425_v50, 8.507059e+37 }
 0x53c   : > { %v6796_v19 = vpop.eup %4771  ;;  %v1409_v29 = vsel %vm1408_vm3, %v4766_v59, %v1405_v45  ;;  %v1420_v27 = vadd.f32 %v6777_v34, %v1419_v31  ;;  %vm1451_vm3 = vweird.f32 %v6740_v0 }
 0x53d   : > { %v1414_v36 = vsel %vm1411_vm4, %v1413_v10, %v1409_v29  ;;  %v6800_v20 = vpop.eup %4773 }
 0x53e   : > { %1822 = vadd.xlane.f32.xlu1 %v6773_v30  ;;  %v1415_v59 = vmul.f32 %v6597_v9, %v1414_v36  ;;  %v6808_v26 = vpop.eup %4775  ;;  %v1447_v51 = vmul.f32 %v6800_v20, %v6740_v0  ;;  %v1424_v49 = vsel %vm1423_vm7, %v6777_v34, %v1420_v27  ;;  %v8033_v34 = vld [vmem:[#allocation29_spill] sm:$0xff]  ;;  %vm1452_vm0 = vweird.f32 %v6800_v20 }
 0x53f   : > { %1519 = vmatmul.f32.gmra.mxu0 %v1385_v17  ;;  %v1429_v17 = vsel %vm1426_vm8, %v1428_v43, %v1424_v49  ;;  %vm1453_vm4 = vmor %vm1451_vm3, %vm1452_vm0 }
 0x540   : > { %v1448_v9 = vsub.f32 1.0, %v1447_v51  ;;  %v1430_v32 = vmul.f32 %v6589_v40, %v1429_v17 }
 0x541   : > { %4601 = vrot.lane.b32.xlu0 %v8032_v7, %s5185_s11 }
 0x542   : > { %v1449_v15 = vmul.f32 %v6800_v20, %v1448_v9 }
 0x544   : > { %v1450_v50 = vadd.f32 %v6800_v20, %v1449_v15 }
 0x546   : > { %v1454_v17 = vsel %vm1453_vm4, %v6800_v20, %v1450_v50 }
 0x547   : > { %1522 = vmatmul.f32.gmra.mxu0 %v1400_v8 }
 0x54a   : > { %1824 = vadd.xlane.f32.xlu2 %v6796_v19  ;;  %v1819_v28 = vpop.xlane.xlu0 %1818 }
 0x54b   : > { %4777 = vrcp.f32 %v1819_v28  ;;  %v1861_v33 = vand.u32 2147483648, %v1819_v28  ;;  %v1859_v52 = vand.u32 2147483647, %v1819_v28  ;;  %vm1855_vm10 = vweird.f32 %v1819_v28 }
 0x54d   : > { %v1862_v8 = vor.u32 1.1754944e-38, %v1861_v33  ;;  %vm1860_vm12 = vcmp.eq.f32.partialorder %v1859_v52, 8.507059e+37 }
 0x54e   : > { %v1231_v39 = vpop.xlane.xlu1 %1230 }
 0x54f   : > { %4779 = vrcp.f32 %v1231_v39  ;;  %1525 = vmatmul.f32.gmra.mxu0 %v1415_v59  ;;  %v1442_v4 = vand.u32 2147483648, %v1231_v39  ;;  %v1440_v31 = vand.u32 2147483647, %v1231_v39  ;;  %vm1436_vm14 = vweird.f32 %v1231_v39 }
 0x551   : > { %v4778_v56 = vpop.eup %4777  ;;  %v1443_v59 = vor.u32 1.1754944e-38, %v1442_v4  ;;  %vm1441_vm2 = vcmp.eq.f32.partialorder %v1440_v31, 8.507059e+37 }
 0x552   : > { %v1851_v44 = vmul.f32 %v4778_v56, %v1819_v28  ;;  %1828 = vadd.xlane.f32.xlu2 %v6808_v26  ;;  %v6814_v61 = vpop.xlane.xlu0 %1234  ;;  %vm1856_vm9 = vweird.f32 %v4778_v56 }
 0x553   : > { %4781 = vrcp.f32 %v6814_v61  ;;  %vm1857_vm11 = vmor %vm1855_vm10, %vm1856_vm9  ;;  %v1472_v20 = vand.u32 2147483648, %v6814_v61  ;;  %v1470_v31 = vand.u32 2147483647, %v6814_v61 }
 0x554   : > { %v1852_v24 = vsub.f32 1.0, %v1851_v44 }
 0x555   : > { %v4780_v38 = vpop.eup %4779 }
 0x556   : > { %v1853_v22 = vmul.f32 %v4778_v56, %v1852_v24  ;;  %v1432_v57 = vmul.f32 %v4780_v38, %v1231_v39  ;;  %v1821_v55 = vpop.xlane.xlu1 %1820  ;;  %vm1437_vm13 = vweird.f32 %v4780_v38  ;;  %v8034_v39 = vld [vmem:[#allocation30_spill] sm:$0xff]  ;;  %v1455_v24 = vand.u32 2147483647, %v6740_v0 }
 0x557   : > { %4783 = vrcp.f32 %v1821_v55  ;;  %4596 = vrot.lane.b32.xlu1 %v8033_v34, %s5185_s11  ;;  %1528 = vmatmul.f32.gmra.mxu0 %v1430_v32  ;;  %vm1438_vm15 = vmor %vm1436_vm14, %vm1437_vm13  ;;  %v1876_v33 = vand.u32 2147483648, %v1821_v55  ;;  %vm1870_vm7 = vweird.f32 %v1821_v55  ;;  %vm1471_vm13 = vcmp.eq.f32.partialorder %v1470_v31, 8.507059e+37 }
 0x558   : > { %v1433_v45 = vsub.f32 1.0, %v1432_v57  ;;  %v1854_v60 = vadd.f32 %v4778_v56, %v1853_v22  ;;  %v1874_v22 = vand.u32 2147483647, %v1821_v55  ;;  %vm1456_vm6 = vcmp.eq.f32.partialorder %v1455_v24, 8.507059e+37 }
 0x559   : > { %v6821_v11 = vpop.eup %4781 }
 0x55a   : > { %v1434_v29 = vmul.f32 %v4780_v38, %v1433_v45  ;;  %v1462_v10 = vmul.f32 %v6821_v11, %v6814_v61  ;;  %v1858_v36 = vsel %vm1857_vm11, %v4778_v56, %v1854_v60  ;;  %v1457_v56 = vand.u32 2147483648, %v6740_v0 }
 0x55b   : > { %v1863_v40 = vsel %vm1860_vm12, %v1862_v8, %v1858_v36  ;;  %v1877_v45 = vor.u32 1.1754944e-38, %v1876_v33  ;;  %vm1875_vm9 = vcmp.eq.f32.partialorder %v1874_v22, 8.507059e+37  ;;  %vm1467_vm10 = vweird.f32 %v6821_v11  ;;  %v6839_v8 = vpop.f32.mrf.mxu1 }
 0x55c   : > { %v1864_v28 = vmul.f32 %v6619_v53, %v1863_v40  ;;  %v1435_v27 = vadd.f32 %v4780_v38, %v1434_v29  ;;  %v1463_v51 = vsub.f32 1.0, %v1462_v10  ;;  %v1458_v57 = vor.u32 1.1754944e-38, %v1457_v56  ;;  %v8035_v29 = vld [vmem:[#allocation36_spill] sm:$0xff] }
 0x55d   : > { %v4784_v12 = vpop.eup %4783  ;;  %vm1466_vm11 = vweird.f32 %v6814_v61  ;;  %v1473_v36 = vor.u32 1.1754944e-38, %v1472_v20  ;;  %v1774_v40 = vsub.f32 %v6523_v62, %v6645_v21  ;;  %v1776_v62 = vsub.f32 %v6541_v23, %v6664_v16 }
 0x55e   : > { %v1866_v49 = vmul.f32 %v4784_v12, %v1821_v55  ;;  %2170 = vmatmul.f32.vlgmr.msrb.gmra.mxu2 %v1864_v28  ;;  %v1439_v43 = vsel %vm1438_vm15, %v4780_v38, %v1435_v27  ;;  %v1464_v38 = vmul.f32 %v6821_v11, %v1463_v51  ;;  %vm1871_vm5 = vweird.f32 %v4784_v12  ;;  %vm1468_vm12 = vmor %vm1466_vm11, %vm1467_vm10  ;;  %v6851_v28 = vpop.permute.xlu2 %3268 }
 0x55f   : > { %4611 = vrot.lane.b32.xlu1 %v8034_v39, %s5185_s11  ;;  %v1444_v53 = vsel %vm1441_vm2, %v1443_v59, %v1439_v43  ;;  %v1459_v15 = vsel %vm1456_vm6, %v1458_v57, %v1454_v17  ;;  %vm1872_vm8 = vmor %vm1870_vm7, %vm1871_vm5  ;;  %v1798_v50 = vmul.f32 1.442695, %v1776_v62  ;;  %v1779_v43 = vsub.f32 %v6569_v2, %v6701_v18 }
 0x560   : > { %v1867_v44 = vsub.f32 1.0, %v1866_v49  ;;  %v1445_v9 = vmul.f32 %v6626_v35, %v1444_v53  ;;  %v1465_v0 = vadd.f32 %v6821_v11, %v1464_v38  ;;  %v1460_v4 = vmul.f32 %v6599_v58, %v1459_v15 }
 0x561   : > { %v1777_v49 = vsub.f32 %v6551_v41, %v6680_v37  ;;  %v1804_v24 = vmul.f32 1.442695, %v1779_v43  ;;  %v1778_v2 = vsub.f32 %v6559_v54, %v6689_v25 }
 0x562   : > { %v1868_v52 = vmul.f32 %v4784_v12, %v1867_v44  ;;  %1531 = vmatmul.f32.gmra.mxu0 %v1445_v9  ;;  %v1469_v10 = vsel %vm1468_vm12, %v6821_v11, %v1465_v0  ;;  %v1759_v44 = vpop.xlane.xlu1 %1758 }
 0x563   : > { %v1474_v58 = vsel %vm1471_vm13, %v1473_v36, %v1469_v10  ;;  %v6854_v27 = vpop.f32.mrf.mxu1  ;;  %v1800_v16 = vmul.f32 1.442695, %v1777_v49  ;;  %v1780_v37 = vsub.f32 %v6603_v1, %v1759_v44  ;;  %v1802_v33 = vmul.f32 1.442695, %v1778_v2  ;;  %v2221_v44 = vld [vmem:[#allocation8 + $0x30] sm:$0xff] }
 0x564   : > { %v1869_v32 = vadd.f32 %v4784_v12, %v1868_v52  ;;  %v1475_v61 = vmul.f32 %v6631_v42, %v1474_v58 }
 0x565   : > { %v6875_v17 = vpop.permute.xlu0 %3266  ;;  %v1806_v38 = vmul.f32 1.442695, %v1780_v37 }
 0x566   : > { %v1873_v35 = vsel %vm1872_vm8, %v4784_v12, %v1869_v32 }
 0x567   : > { %v1878_v60 = vsel %vm1875_vm9, %v1877_v45, %v1873_v35 }
 0x568   : > { %v1879_v55 = vmul.f32 %v6634_v46, %v1878_v60  ;;  %v1794_v46 = vmul.f32 1.442695, %v1774_v40 }
 0x56a   : > { %4606 = vrot.lane.b32.xlu2 %v8035_v29, %s5185_s11  ;;  %1534 = vmatmul.f32.gmra.mxu0 %v1460_v4  ;;  %4785 = vpow2.f32 %v1794_v46  ;;  %v1761_v57 = vpop.xlane.xlu1 %1760 }
 0x56b   : > { %2173 = vmatmul.f32.gmra.mxu2 %v1879_v55  ;;  %2646 = vmax.xlane.f32.xlu0 %v6839_v8  ;;  %v6867_v51 = vpop.f32.mrf.mxu1  ;;  %4787 = vpow2.f32 %v1798_v50  ;;  %v1781_v54 = vsub.f32 %v6609_v13, %v1761_v57 }
 0x56c   : > { %v1493_v11 = vpop.f32.mrf.mxu0  ;;  %4789 = vpow2.f32 %v1800_v16  ;;  %v2222_v16 = vld [vmem:[#allocation8 + $0x38] sm:$0xff] }
 0x56d   : > { %4791 = vpow2.f32 %v1804_v24  ;;  %v1808_v25 = vmul.f32 1.442695, %v1781_v54  ;;  %2283 = vmatpush.msra.mxu3 %v2222_v16  ;;  %v2220_v54 = vld [vmem:[#allocation8 + $0x28] sm:$0xff] }
 0x56e   : > { %4793 = vpow2.f32 %v1802_v33 }
 0x56f   : > { %4795 = vpow2.f32 %v1806_v38  ;;  %2284 = vmatpush.msra.mxu3 %v2221_v44 }
 0x570   : > { %v6859_v59 = vpop.eup %4785  ;;  %4797 = vpow2.f32 %v1808_v25  ;;  %v2219_v25 = vld [vmem:[#allocation8 + $0x20] sm:$0xff] }
 0x571   : > { %v6877_v41 = vpop.eup %4787  ;;  %2285 = vmatpush.msra.mxu3 %v2220_v54 }
 0x572   : > { %1537 = vmatmul.f32.gmra.mxu0 %v1475_v61  ;;  %v6884_v22 = vpop.eup %4789 }
 0x573   : > { %2648 = vmax.xlane.f32.xlu0 %v6854_v27  ;;  %v6886_v32 = vpop.eup %4791  ;;  %2286 = vmatpush.msra.mxu3 %v2219_v25 }
 0x574   : > { %v6857_v12 = vpop.xlane.xlu2 %2644  ;;  %v6892_v45 = vpop.eup %4793 }
 0x575   : > { %v6894_v35 = vpop.eup %4795 }
 0x576   : > { %v6903_v31 = vpop.eup %4797 }
 0x57a   : > { %4296 = vmatmul.msk.f32.vlgmr.msrb.gmra.mxu0 %vm962_vm1, %v1493_v11 }
 0x57b   : > { %1826 = vadd.xlane.f32.xlu0 %v6859_v59 }
 0x57c   : > { %v6865_v21 = vpop.xlane.xlu2 %1768  ;;  %v1496_v42 = vpop.f32.mrf.mxu0 }
 0x57e   : > { %v6900_v13 = vpop.permute.xlu1 %3270 }
 0x582   : > { %4297 = vmatmul.msk.f32.gmra.mxu0 %vm962_vm1, %v1496_v42 }
 0x583   : > { %2650 = vmax.xlane.f32.xlu0 %v6867_v51 }
 0x584   : > { %v4592_v56 = vpop.permute.xlu2 %4591  ;;  %v1499_v53 = vpop.f32.mrf.mxu0 }
 0x585   : > { %v4593_v23 = vunpack.i.l.bf16 %v4592_v56  ;;  %v4594_v9 = vunpack.i.h.bf16 %v4592_v56 }
 0x587   : > { %3042 = vmatpush.msrb.mxu1 %v4593_v23  ;;  %4447 = vmatpush.msra.mxu2 %v4593_v23 }
 0x589   : > { %3043 = vmatpush.msrb.mxu1 %v4594_v9  ;;  %4448 = vmatpush.msra.mxu2 %v4594_v9 }
 0x58a   : > { %4298 = vmatmul.msk.f32.gmra.mxu0 %vm962_vm1, %v1499_v53  ;;  %v6928_v53 = vpop.f32.mrf.mxu1 }
 0x58b   : > { %1830 = vadd.xlane.f32.xlu0 %v6877_v41 }
 0x58c   : > { %v1502_v18 = vpop.f32.mrf.mxu0 }
 0x590   : > { %v1763_v52 = vpop.xlane.xlu0 %1762 }
 0x591   : > { %v1782_v0 = vsub.f32 %v6613_v14, %v1763_v52  ;;  %v1785_v14 = vsub.f32 %v6647_v63, %v6865_v21 }
 0x592   : > { %4299 = vmatmul.msk.f32.gmra.mxu0 %vm962_vm1, %v1502_v18 }
 0x593   : > { %1832 = vadd.xlane.f32.xlu0 %v6884_v22  ;;  %1836 = vadd.xlane.f32.xlu2 %v6886_v32  ;;  %v1810_v60 = vmul.f32 1.442695, %v1782_v0  ;;  %v1816_v46 = vmul.f32 1.442695, %v1785_v14  ;;  %v6934_v0 = vpop.f32.mrf.mxu1 }
 0x594   : > { %v1505_v1 = vpop.f32.mrf.mxu0 }
 0x595   : > { %4799 = vpow2.f32 %v1810_v60 }
 0x598   : > { %v1765_v15 = vpop.xlane.xlu0 %1764 }
 0x599   : > { %v1783_v36 = vsub.f32 %v6622_v48, %v1765_v15 }
 0x59a   : > { %4300 = vmatmul.msk.f32.gmra.mxu0 %vm962_vm1, %v1505_v1 }
 0x59b   : > { %1834 = vadd.xlane.f32.xlu0 %v6892_v45  ;;  %1838 = vadd.xlane.f32.xlu2 %v6894_v35  ;;  %v1812_v58 = vmul.f32 1.442695, %v1783_v36  ;;  %v6910_v11 = vpop.eup %4799 }
 0x59c   : > { %v1508_v20 = vpop.f32.mrf.mxu0 }
 0x5a0   : > { %v1767_v4 = vpop.xlane.xlu0 %1766 }
 0x5a1   : > { %v1784_v55 = vsub.f32 %v6636_v5, %v1767_v4 }
 0x5a2   : > { %4301 = vmatmul.msk.f32.gmra.mxu0 %vm962_vm1, %v1508_v20 }
 0x5a3   : > { %v1814_v10 = vmul.f32 1.442695, %v1784_v55  ;;  %1840 = vadd.xlane.f32.xlu0 %v6903_v31 }
 0x5a4   : > { %v1511_v40 = vpop.f32.mrf.mxu0 }
 0x5a5   : > { %4801 = vpow2.f32 %v1814_v10  ;;  %v8036_v10 = vld [vmem:[#allocation23_spill] sm:$0xff] }
 0x5a6   : > { %4803 = vpow2.f32 %v1812_v58 }
 0x5a7   : > { %4805 = vpow2.f32 %v1816_v46 }
 0x5a9   : > { %v2643_v61 = vpop.xlane.xlu1 %2642 }
 0x5aa   : > { %v2674_v5 = vsub.f32 %v6660_v47, %v2643_v61  ;;  %4302 = vmatmul.msk.f32.gmra.mxu0 %vm962_vm1, %v1511_v40 }
 0x5ab   : > { %v6914_v62 = vpop.eup %4801  ;;  %1842 = vadd.xlane.f32.xlu0 %v6910_v11 }
 0x5ac   : > { %v2690_v48 = vmul.f32 1.442695, %v2674_v5  ;;  %1846 = vadd.xlane.f32.xlu2 %v6914_v62  ;;  %v1514_v63 = vpop.f32.mrf.mxu0  ;;  %v6918_v42 = vpop.eup %4803 }
 0x5ad   : > { %v6921_v47 = vpop.eup %4805 }
 0x5ae   : > { %4807 = vpow2.f32 %v2690_v48  ;;  %v8037_v48 = vld [vmem:[#allocation15_spill] sm:$0xff] }
 0x5b1   : > { %v1823_v21 = vpop.xlane.xlu1 %1822 }
 0x5b2   : > { %4809 = vrcp.f32 %v1823_v21  ;;  %4303 = vmatmul.msk.f32.gmra.mxu0 %vm962_vm1, %v1514_v63  ;;  %v1891_v9 = vand.u32 2147483648, %v1823_v21  ;;  %v1889_v37 = vand.u32 2147483647, %v1823_v21  ;;  %vm1885_vm15 = vweird.f32 %v1823_v21 }
 0x5b3   : > { %1844 = vadd.xlane.f32.xlu0 %v6918_v42  ;;  %v4602_v46 = vpop.permute.xlu0 %4601 }
 0x5b4   : > { %v6924_v50 = vpop.eup %4807  ;;  %1848 = vadd.xlane.f32.xlu2 %v6921_v47  ;;  %v1517_v49 = vpop.f32.mrf.mxu0  ;;  %v1892_v38 = vor.u32 1.1754944e-38, %v1891_v9  ;;  %vm1890_vm2 = vcmp.eq.f32.partialorder %v1889_v37, 8.507059e+37  ;;  %v4604_v9 = vunpack.i.h.bf16 %v4602_v46 }
 0x5b5   : > { %2722 = vadd.xlane.f32.xlu1 %v6924_v50 }
 0x5b8   : > { %v4810_v43 = vpop.eup %4809 }
 0x5b9   : > { %v1881_v56 = vmul.f32 %v4810_v43, %v1823_v21  ;;  %vm1886_vm14 = vweird.f32 %v4810_v43 }
 0x5ba   : > { %4304 = vmatmul.msk.f32.gmra.mxu0 %vm962_vm1, %v1517_v49  ;;  %vm1887_vm0 = vmor %vm1885_vm15, %vm1886_vm14  ;;  %v4603_v49 = vunpack.i.l.bf16 %v4602_v46 }
 0x5bb   : > { %v1882_v23 = vsub.f32 1.0, %v1881_v56 }
 0x5bc   : > { %v1520_v18 = vpop.f32.mrf.mxu0 }
 0x5bd   : > { %v1883_v24 = vmul.f32 %v4810_v43, %v1882_v23  ;;  %v1825_v2 = vpop.xlane.xlu2 %1824  ;;  %2652 = vmax.xlane.f32.xlu1 %v6928_v53  ;;  %v8038_v23 = vld [vmem:[#allocation16_spill] sm:$0xff] }
 0x5be   : > { %4811 = vrcp.f32 %v1825_v2  ;;  %v1906_v36 = vand.u32 2147483648, %v1825_v2  ;;  %v1904_v14 = vand.u32 2147483647, %v1825_v2  ;;  %vm1900_vm4 = vweird.f32 %v1825_v2 }
 0x5bf   : > { %v1884_v33 = vadd.f32 %v4810_v43, %v1883_v24 }
 0x5c0   : > { %v1907_v63 = vor.u32 1.1754944e-38, %v1906_v36  ;;  %vm1905_vm6 = vcmp.eq.f32.partialorder %v1904_v14, 8.507059e+37 }
 0x5c1   : > { %v1888_v52 = vsel %vm1887_vm0, %v4810_v43, %v1884_v33 }
 0x5c2   : > { %4305 = vmatmul.msk.f32.gmra.mxu0 %vm962_vm1, %v1520_v18  ;;  %v1893_v57 = vsel %vm1890_vm2, %v1892_v38, %v1888_v52 }
 0x5c3   : > { %v1894_v1 = vmul.f32 %v6773_v30, %v1893_v57 }
 0x5c4   : > { %v4812_v15 = vpop.eup %4811  ;;  %v1523_v60 = vpop.f32.mrf.mxu0 }
 0x5c5   : > { %v1896_v20 = vmul.f32 %v4812_v15, %v1825_v2  ;;  %2654 = vmax.xlane.f32.xlu1 %v6934_v0  ;;  %2176 = vmatmul.f32.gmra.mxu2 %v1894_v1  ;;  %v6937_v4 = vpop.xlane.xlu2 %1828  ;;  %vm1901_vm3 = vweird.f32 %v4812_v15 }
 0x5c6   : > { %vm1902_vm5 = vmor %vm1900_vm4, %vm1901_vm3  ;;  %4813 = vrcp.f32 %v6937_v4  ;;  %vm1930_vm12 = vweird.f32 %v6937_v4 }
 0x5c7   : > { %v1897_v55 = vsub.f32 1.0, %v1896_v20  ;;  %4616 = vrot.lane.b32.xlu0 %v8036_v10, %s5185_s11 }
 0x5c9   : > { %v1898_v40 = vmul.f32 %v4812_v15, %v1897_v55  ;;  %v4597_v30 = vpop.permute.xlu1 %4596 }
 0x5ca   : > { %v4598_v58 = vunpack.i.l.bf16 %v4597_v30  ;;  %4306 = vmatmul.msk.f32.gmra.mxu0 %vm962_vm1, %v1523_v60  ;;  %v4599_v5 = vunpack.i.h.bf16 %v4597_v30 }
 0x5cb   : > { %v1899_v61 = vadd.f32 %v4812_v15, %v1898_v40 }
 0x5cc   : > { %3044 = vmatpush.msrb.mxu1 %v4598_v58  ;;  %4626 = vrot.lane.b32.xlu2 %v8037_v48, %s5185_s11  ;;  %v1526_v43 = vpop.f32.mrf.mxu0  ;;  %v4814_v40 = vpop.eup %4813 }
 0x5cd   : > { %4449 = vmatpush.msra.mxu2 %v4598_v58  ;;  %v1903_v21 = vsel %vm1902_vm5, %v4812_v15, %v1899_v61  ;;  %v4607_v44 = vpop.permute.xlu2 %4606  ;;  %v2675_v15 = vsub.f32 %v6673_v6, %v6857_v12  ;;  %v1926_v30 = vmul.f32 %v4814_v40, %v6937_v4  ;;  %vm1931_vm11 = vweird.f32 %v4814_v40 }
 0x5ce   : > { %3045 = vmatpush.msrb.mxu1 %v4599_v5  ;;  %v1908_v56 = vsel %vm1905_vm6, %v1907_v63, %v1903_v21  ;;  %v4608_v24 = vunpack.i.l.bf16 %v4607_v44  ;;  %v4609_v37 = vunpack.i.h.bf16 %v4607_v44  ;;  %vm1932_vm13 = vmor %vm1930_vm12, %vm1931_vm11 }
 0x5cf   : > { %4450 = vmatpush.msra.mxu2 %v4599_v5  ;;  %4621 = vrot.lane.b32.xlu0 %v8038_v23, %s5185_s11  ;;  %v1909_v16 = vmul.f32 %v6796_v19, %v1908_v56  ;;  %v1927_v58 = vsub.f32 1.0, %v1926_v30  ;;  %v8039_v56 = vld [vmem:[#allocation18_spill] sm:$0xff] }
 0x5d0   : > { %3046 = vmatpush.msrb.mxu1 %v4603_v49 }
 0x5d1   : > { %4451 = vmatpush.msra.mxu2 %v4603_v49  ;;  %v4612_v2 = vpop.permute.xlu1 %4611  ;;  %v1928_v49 = vmul.f32 %v4814_v40, %v1927_v58 }
 0x5d2   : > { %2179 = vmatmul.f32.gmra.mxu2 %v1909_v16  ;;  %4307 = vmatmul.msk.f32.gmra.mxu0 %vm962_vm1, %v1526_v43  ;;  %v4613_v18 = vunpack.i.l.bf16 %v4612_v2  ;;  %v4614_v38 = vunpack.i.h.bf16 %v4612_v2 }
 0x5d3   : > { %3047 = vmatpush.msrb.mxu1 %v4604_v9  ;;  %4452 = vmatpush.msra.mxu2 %v4604_v9 }
 0x5d4   : > { %v1529_v33 = vpop.f32.mrf.mxu0 }
 0x5d5   : > { %3048 = vmatpush.msrb.mxu1 %v4608_v24  ;;  %4453 = vmatpush.msra.mxu2 %v4608_v24 }
 0x5d7   : > { %3049 = vmatpush.msrb.mxu1 %v4609_v37  ;;  %4454 = vmatpush.msra.mxu2 %v4609_v37 }
 0x5d9   : > { %3050 = vmatpush.msrb.mxu1 %v4613_v18  ;;  %4455 = vmatpush.msra.mxu2 %v4613_v18  ;;  %v1929_v18 = vadd.f32 %v4814_v40, %v1928_v49 }
 0x5da   : > { %4308 = vmatmul.msk.f32.gmra.mxu0 %vm962_vm1, %v1529_v33 }
 0x5db   : > { %3051 = vmatpush.msrb.mxu1 %v4614_v38  ;;  %4456 = vmatpush.msra.mxu2 %v4614_v38 }
 0x5de   : > { %4631 = vrot.lane.b32.xlu1 %v8028_v3, %s5184_s30  ;;  %v2647_v19 = vpop.xlane.xlu0 %2646  ;;  %v2692_v3 = vmul.f32 1.442695, %v2675_v15 }
 0x5df   : > { %v1532_v52 = vpop.f32.mrf.mxu0  ;;  %v2676_v54 = vsub.f32 %v6839_v8, %v2647_v19  ;;  %v1936_v19 = vand.u32 2147483648, %v6937_v4 }
 0x5e1   : > { %v2171_v57 = vpop.f32.mrf.mxu2  ;;  %v2694_v20 = vmul.f32 1.442695, %v2676_v54  ;;  %v8040_v54 = vld [vmem:[#allocation22_spill] sm:$0xff] }
 0x5e2   : > { %4280 = vmatmul.msk.f32.vlgmr.msra.gmra.mxu3 %vm962_vm1, %v2171_v57  ;;  %4309 = vmatmul.msk.f32.gmra.mxu0 %vm962_vm1, %v1532_v52  ;;  %v1934_v57 = vand.u32 2147483647, %v6937_v4 }
 0x5e3   : > { %4815 = vpow2.f32 %v2694_v20 }
 0x5e4   : > { %vm1935_vm14 = vcmp.eq.f32.partialorder %v1934_v57, 8.507059e+37 }
 0x5e6   : > { %v2649_v1 = vpop.xlane.xlu0 %2648 }
 0x5e7   : > { %v1535_v25 = vpop.f32.mrf.mxu0  ;;  %v2677_v60 = vsub.f32 %v6854_v27, %v2649_v1  ;;  %v1933_v1 = vsel %vm1932_vm13, %v4814_v40, %v1929_v18  ;;  %v8041_v40 = vld [vmem:[#allocation21_spill] sm:$0xff] }
 0x5e9   : > { %v2696_v14 = vmul.f32 1.442695, %v2677_v60  ;;  %v6962_v6 = vpop.eup %4815 }
 0x5ea   : > { %4310 = vmatmul.msk.f32.gmra.mxu0 %vm962_vm1, %v1535_v25  ;;  %v1937_v25 = vor.u32 1.1754944e-38, %v1936_v19 }
 0x5ec   : > { %v1938_v20 = vsel %vm1935_vm14, %v1937_v25, %v1933_v1 }
 0x5ed   : > { %v1939_v4 = vmul.f32 %v6808_v26, %v1938_v20 }
 0x5ee   : > { %v2174_v55 = vpop.f32.mrf.mxu2  ;;  %v1827_v36 = vpop.xlane.xlu0 %1826 }
 0x5ef   : > { %4817 = vrcp.f32 %v1827_v36  ;;  %4281 = vmatmul.msk.f32.gmra.mxu3 %vm962_vm1, %v2174_v55  ;;  %v1538_v8 = vpop.f32.mrf.mxu0  ;;  %v1921_v21 = vand.u32 2147483648, %v1827_v36  ;;  %v1919_v16 = vand.u32 2147483647, %v1827_v36  ;;  %vm1915_vm8 = vweird.f32 %v1827_v36 }
 0x5f0   : > { %4819 = vpow2.f32 %v2692_v3 }
 0x5f1   : > { %4821 = vpow2.f32 %v2696_v14  ;;  %v1922_v24 = vor.u32 1.1754944e-38, %v1921_v21  ;;  %vm1920_vm10 = vcmp.eq.f32.partialorder %v1919_v16, 8.507059e+37 }
 0x5f2   : > { %4311 = vmatmul.msk.f32.gmra.mxu0 %vm962_vm1, %v1538_v8 }
 0x5f5   : > { %v4818_v12 = vpop.eup %4817  ;;  %2726 = vadd.xlane.f32.xlu2 %v6962_v6 }
 0x5f6   : > { %v1911_v27 = vmul.f32 %v4818_v12, %v1827_v36  ;;  %v6965_v46 = vpop.xlane.xlu0 %2650  ;;  %v6969_v5 = vpop.eup %4819  ;;  %vm1916_vm7 = vweird.f32 %v4818_v12 }
 0x5f7   : > { %v6967_v61 = vpop.f32.mrf.mxu0  ;;  %v6974_v44 = vpop.eup %4821  ;;  %vm1917_vm9 = vmor %vm1915_vm8, %vm1916_vm7 }
 0x5f8   : > { %v1912_v63 = vsub.f32 1.0, %v1911_v27  ;;  %v6987_v36 = vpop.f32.mrf.mxu1 }
 0x5f9   : > { %2724 = vadd.xlane.f32.xlu0 %v6969_v5 }
 0x5fa   : > { %v1913_v43 = vmul.f32 %v4818_v12, %v1912_v63  ;;  %4376 = vmatmul.msk.f32.vlgmr.msra.gmra.mxu0 %vm962_vm1, %v8039_v56 }
 0x5fc   : > { %v1914_v9 = vadd.f32 %v4818_v12, %v1913_v43 }
 0x5fd   : > { %2728 = vadd.xlane.f32.xlu2 %v6974_v44 }
 0x5fe   : > { %v1831_v2 = vpop.xlane.xlu0 %1830  ;;  %v1918_v37 = vsel %vm1917_vm9, %v4818_v12, %v1914_v9 }
 0x5ff   : > { %4823 = vrcp.f32 %v1831_v2  ;;  %v6977_v33 = vpop.f32.mrf.mxu0  ;;  %v1923_v38 = vsel %vm1920_vm10, %v1922_v24, %v1918_v37  ;;  %v1951_v14 = vand.u32 2147483648, %v1831_v2  ;;  %vm1945_vm0 = vweird.f32 %v1831_v2  ;;  %v8042_v37 = vld [vmem:[#allocation33_spill] sm:$0xff] }
 0x600   : > { %v1924_v52 = vmul.f32 %v6859_v59, %v1923_v38  ;;  %v1949_v58 = vand.u32 2147483647, %v1831_v2 }
 0x601   : > { %v1952_v43 = vor.u32 1.1754944e-38, %v1951_v14 }
 0x602   : > { %2182 = vmatmul.f32.gmra.mxu2 %v1924_v52  ;;  %4377 = vmatmul.msk.f32.gmra.mxu0 %vm962_vm1, %v8040_v54  ;;  %vm1950_vm3 = vcmp.eq.f32.partialorder %v1949_v58, 8.507059e+37 }
 0x605   : > { %v4824_v15 = vpop.eup %4823 }
 0x606   : > { %v1941_v3 = vmul.f32 %v4824_v15, %v1831_v2  ;;  %v6985_v60 = vpop.xlane.xlu2 %1836  ;;  %v1833_v55 = vpop.xlane.xlu0 %1832  ;;  %vm1946_vm15 = vweird.f32 %v4824_v15 }
 0x607   : > { %v6989_v59 = vpop.f32.mrf.mxu0  ;;  %4825 = vrcp.f32 %v1833_v55  ;;  %vm1947_vm2 = vmor %vm1945_vm0, %vm1946_vm15  ;;  %v1966_v18 = vand.u32 2147483648, %v1833_v55  ;;  %v1964_v19 = vand.u32 2147483647, %v1833_v55  ;;  %vm1960_vm5 = vweird.f32 %v1833_v55 }
 0x608   : > { %v1942_v8 = vsub.f32 1.0, %v1941_v3  ;;  %2656 = vmax.xlane.f32.xlu1 %v6987_v36  ;;  %4827 = vrcp.f32 %v6985_v60  ;;  %vm1990_vm13 = vweird.f32 %v6985_v60 }
 0x609   : > { %v1967_v25 = vor.u32 1.1754944e-38, %v1966_v18  ;;  %vm1965_vm7 = vcmp.eq.f32.partialorder %v1964_v19, 8.507059e+37  ;;  %v1994_v18 = vand.u32 2147483647, %v6985_v60 }
 0x60a   : > { %v1943_v30 = vmul.f32 %v4824_v15, %v1942_v8  ;;  %2185 = vmatmul.f32.gmra.mxu2 %v1939_v4  ;;  %4378 = vmatmul.msk.f32.gmra.mxu0 %vm962_vm1, %v8041_v40 }
 0x60b   : > { %vm1995_vm15 = vcmp.eq.f32.partialorder %v1994_v18, 8.507059e+37 }
 0x60c   : > { %v1944_v12 = vadd.f32 %v4824_v15, %v1943_v30 }
 0x60d   : > { %4636 = vrot.lane.b32.xlu0 %v8033_v34, %s5184_s30  ;;  %v4826_v27 = vpop.eup %4825 }
 0x60e   : > { %v1835_v63 = vpop.xlane.xlu0 %1834  ;;  %v1948_v21 = vsel %vm1947_vm2, %v4824_v15, %v1944_v12  ;;  %v1956_v26 = vmul.f32 %v4826_v27, %v1833_v55  ;;  %v7000_v56 = vpop.xlane.xlu2 %1838  ;;  %vm1961_vm4 = vweird.f32 %v4826_v27 }
 0x60f   : > { %v6998_v49 = vpop.f32.mrf.mxu0  ;;  %4829 = vrcp.f32 %v1835_v63  ;;  %v7002_v16 = vpop.eup %4827  ;;  %v1953_v24 = vsel %vm1950_vm3, %v1952_v43, %v1948_v21  ;;  %vm1962_vm6 = vmor %vm1960_vm5, %vm1961_vm4  ;;  %v1981_v40 = vand.u32 2147483648, %v1835_v63  ;;  %v1979_v12 = vand.u32 2147483647, %v1835_v63 }
 0x610   : > { %v1957_v9 = vsub.f32 1.0, %v1956_v26  ;;  %v1954_v2 = vmul.f32 %v6877_v41, %v1953_v24  ;;  %4831 = vrcp.f32 %v7000_v56  ;;  %v1986_v38 = vmul.f32 %v7002_v16, %v6985_v60 }
 0x611   : > { %vm1975_vm9 = vweird.f32 %v1835_v63  ;;  %vm1980_vm11 = vcmp.eq.f32.partialorder %v1979_v12, 8.507059e+37  ;;  %vm1991_vm12 = vweird.f32 %v7002_v16  ;;  %vm2005_vm2 = vweird.f32 %v7000_v56 }
 0x612   : > { %4379 = vmatmul.msk.f32.gmra.mxu0 %vm962_vm1, %v8042_v37  ;;  %v1958_v34 = vmul.f32 %v4826_v27, %v1957_v9  ;;  %2188 = vmatmul.f32.gmra.mxu2 %v1954_v2  ;;  %v1987_v15 = vsub.f32 1.0, %v1986_v38  ;;  %v1996_v2 = vand.u32 2147483648, %v6985_v60  ;;  %vm1992_vm14 = vmor %vm1990_vm13, %vm1991_vm12 }
 0x614   : > { %v1959_v41 = vadd.f32 %v4826_v27, %v1958_v34  ;;  %v1988_v55 = vmul.f32 %v7002_v16, %v1987_v15  ;;  %v8044_v34 = vld [vmem:[#allocation24_spill] sm:$0xff] }
 0x615   : > { %4646 = vrot.lane.b32.xlu0 %v8035_v29, %s5184_s30  ;;  %4641 = vrot.lane.b32.xlu2 %v8032_v7, %s5184_s30  ;;  %v4830_v52 = vpop.eup %4829  ;;  %v8043_v7 = vld [vmem:[#allocation19_spill] sm:$0xff] }
 0x616   : > { %v7014_v57 = vpop.xlane.xlu0 %1840  ;;  %v1971_v54 = vmul.f32 %v4830_v52, %v1835_v63  ;;  %v1963_v20 = vsel %vm1962_vm6, %v4826_v27, %v1959_v41  ;;  %v7018_v3 = vpop.eup %4831  ;;  %vm1976_vm8 = vweird.f32 %v4830_v52  ;;  %v1989_v9 = vadd.f32 %v7002_v16, %v1988_v55 }
 0x617   : > { %v7016_v1 = vpop.f32.mrf.mxu0  ;;  %v1968_v29 = vsel %vm1965_vm7, %v1967_v25, %v1963_v20  ;;  %4833 = vrcp.f32 %v7014_v57  ;;  %v2001_v14 = vmul.f32 %v7018_v3, %v7000_v56  ;;  %vm1977_vm10 = vmor %vm1975_vm9, %vm1976_vm8  ;;  %v1997_v41 = vor.u32 1.1754944e-38, %v1996_v2 }
 0x618   : > { %v1972_v8 = vsub.f32 1.0, %v1971_v54  ;;  %v1969_v4 = vmul.f32 %v6884_v22, %v1968_v29  ;;  %v1982_v22 = vor.u32 1.1754944e-38, %v1981_v40  ;;  %vm2006_vm0 = vweird.f32 %v7018_v3  ;;  %v8045_v29 = vld [vmem:[#allocation38_spill] sm:$0xff] }
 0x619   : > { %v2002_v43 = vsub.f32 1.0, %v2001_v14  ;;  %vm2007_vm3 = vmor %vm2005_vm2, %vm2006_vm0  ;;  %vm2020_vm6 = vweird.f32 %v7014_v57 }
 0x61a   : > { %4380 = vmatmul.msk.f32.gmra.mxu0 %vm962_vm1, %v8043_v7  ;;  %v1973_v30 = vmul.f32 %v4830_v52, %v1972_v8  ;;  %2191 = vmatmul.f32.gmra.mxu2 %v1969_v4  ;;  %v2011_v8 = vand.u32 2147483648, %v7000_v56  ;;  %v2009_v4 = vand.u32 2147483647, %v7000_v56 }
 0x61b   : > { %v2003_v38 = vmul.f32 %v7018_v3, %v2002_v43  ;;  %v8046_v43 = vld [vmem:[#allocation44_spill] sm:$0xff] }
 0x61c   : > { %v1974_v58 = vadd.f32 %v4830_v52, %v1973_v30  ;;  %v2012_v40 = vor.u32 1.1754944e-38, %v2011_v8  ;;  %vm2010_vm4 = vcmp.eq.f32.partialorder %v2009_v4, 8.507059e+37  ;;  %v7109_v4 = vpop.f32.mrf.mxu1 }
 0x61d   : > { %v7033_v24 = vpop.eup %4833  ;;  %v2004_v15 = vadd.f32 %v7018_v3, %v2003_v38 }
 0x61e   : > { %v7027_v27 = vpop.xlane.xlu0 %1842  ;;  %v1978_v26 = vsel %vm1977_vm10, %v4830_v52, %v1974_v58  ;;  %v2016_v19 = vmul.f32 %v7033_v24, %v7014_v57  ;;  %vm2021_vm5 = vweird.f32 %v7033_v24 }
 0x61f   : > { %v7029_v21 = vpop.f32.mrf.mxu0  ;;  %v1983_v63 = vsel %vm1980_vm11, %v1982_v22, %v1978_v26  ;;  %4835 = vrcp.f32 %v7027_v27  ;;  %v7072_v55 = vpop.xlane.xlu2 %1846  ;;  %v2026_v26 = vand.u32 2147483648, %v7014_v57  ;;  %vm2022_vm7 = vmor %vm2020_vm6, %vm2021_vm5  ;;  %vm2035_vm10 = vweird.f32 %v7027_v27 }
 0x620   : > { %v1984_v37 = vmul.f32 %v6892_v45, %v1983_v63  ;;  %v2017_v54 = vsub.f32 1.0, %v2016_v19 }
 0x621   : > { %4651 = vrot.lane.b32.xlu1 %v8034_v39, %s5184_s30  ;;  %v1993_v39 = vsel %vm1992_vm14, %v7002_v16, %v1989_v9  ;;  %v2024_v9 = vand.u32 2147483647, %v7014_v57  ;;  %v2027_v18 = vor.u32 1.1754944e-38, %v2026_v26 }
 0x622   : > { %4381 = vmatmul.msk.f32.gmra.mxu0 %vm962_vm1, %v8044_v34  ;;  %2194 = vmatmul.f32.gmra.mxu2 %v1984_v37  ;;  %v1998_v45 = vsel %vm1995_vm15, %v1997_v41, %v1993_v39  ;;  %v2018_v7 = vmul.f32 %v7033_v24, %v2017_v54  ;;  %v2041_v54 = vand.u32 2147483648, %v7027_v27 }
 0x623   : > { %v1999_v16 = vmul.f32 %v6886_v32, %v1998_v45  ;;  %vm2025_vm8 = vcmp.eq.f32.partialorder %v2024_v9, 8.507059e+37 }
 0x624   : > { %v2019_v58 = vadd.f32 %v7033_v24, %v2018_v7 }
 0x625   : > { %v7056_v20 = vpop.eup %4835 }
 0x626   : > { %v7050_v25 = vpop.xlane.xlu0 %1844  ;;  %v2031_v30 = vmul.f32 %v7056_v20, %v7027_v27  ;;  %v2023_v34 = vsel %vm2022_vm7, %v7033_v24, %v2019_v58  ;;  %vm2036_vm9 = vweird.f32 %v7056_v20  ;;  %vm2065_vm7 = vweird.f32 %v7072_v55 }
 0x627   : > { %v7048_v52 = vpop.f32.mrf.mxu0  ;;  %v2028_v19 = vsel %vm2025_vm8, %v2027_v18, %v2023_v34  ;;  %v7099_v41 = vpop.xlane.xlu2 %1848  ;;  %vm7115_vm11 = vmor %vm2035_vm10, %vm2036_vm9  ;;  %vm2050_vm0 = vweird.f32 %v7050_v25 }
 0x628   : > { %v7052_v60 = vpop.xlane.xlu1 %2722  ;;  %v2032_v56 = vsub.f32 1.0, %v2031_v30  ;;  %v2029_v8 = vmul.f32 %v6903_v31, %v2028_v19 }
 0x629   : > { %4656 = vrot.lane.b32.xlu1 %v8036_v10, %s5184_s30  ;;  %4837 = vrcp.f32 %v7052_v60  ;;  %v2008_v10 = vsel %vm2007_vm3, %v7018_v3, %v2004_v15  ;;  %v2765_v9 = vand.u32 2147483648, %v7052_v60  ;;  %vm2759_vm15 = vweird.f32 %v7052_v60 }
 0x62a   : > { %4382 = vmatmul.msk.f32.gmra.mxu0 %vm962_vm1, %v8045_v29  ;;  %4839 = vrcp.f32 %v7050_v25  ;;  %2197 = vmatmul.f32.gmra.mxu2 %v1999_v16  ;;  %v2013_v14 = vsel %vm2010_vm4, %v2012_v40, %v2008_v10  ;;  %v2033_v63 = vmul.f32 %v7056_v20, %v2032_v56  ;;  %v8047_v16 = vld [vmem:[#allocation43_spill] sm:$0xff]  ;;  %v2039_v29 = vand.u32 2147483647, %v7027_v27 }
 0x62b   : > { %4841 = vrcp.f32 %v7072_v55  ;;  %v2014_v3 = vmul.f32 %v6894_v35, %v2013_v14  ;;  %v2042_v14 = vor.u32 1.1754944e-38, %v2041_v54 }
 0x62c   : > { %v2034_v45 = vadd.f32 %v7056_v20, %v2033_v63  ;;  %4843 = vrcp.f32 %v7099_v41  ;;  %vm2040_vm12 = vcmp.eq.f32.partialorder %v2039_v29, 8.507059e+37  ;;  %v2056_v63 = vand.u32 2147483648, %v7050_v25  ;;  %v7162_v29 = vpop.f32.mrf.mxu1 }
 0x62e   : > { %v2038_v27 = vsel %vm7115_vm11, %v7056_v20, %v2034_v45  ;;  %v2054_v45 = vand.u32 2147483647, %v7050_v25  ;;  %vm2080_vm11 = vweird.f32 %v7099_v41 }
 0x62f   : > { %v7074_v32 = vpop.f32.mrf.mxu0  ;;  %v7076_v12 = vpop.eup %4837 }
 0x630   : > { %v7080_v22 = vpop.eup %4839  ;;  %v2755_v2 = vmul.f32 %v7076_v12, %v7052_v60  ;;  %v7123_v56 = vpop.xlane.xlu1 %2652  ;;  %vm2760_vm13 = vweird.f32 %v7076_v12  ;;  %vm2055_vm5 = vcmp.eq.f32.partialorder %v2054_v45, 8.507059e+37 }
 0x631   : > { %v2046_v37 = vmul.f32 %v7080_v22, %v7050_v25  ;;  %v7097_v39 = vpop.eup %4841  ;;  %vm2051_vm14 = vweird.f32 %v7080_v22  ;;  %vm7139_vm2 = vmor %vm2759_vm15, %vm2760_vm13 }
 0x632   : > { %4383 = vmatmul.msk.f32.gmra.mxu0 %vm962_vm1, %v8046_v43  ;;  %2200 = vmatmul.f32.gmra.mxu2 %v2014_v3  ;;  %v2756_v35 = vsub.f32 1.0, %v2755_v2  ;;  %v2061_v7 = vmul.f32 %v7097_v39, %v7072_v55  ;;  %v2043_v43 = vsel %vm2040_vm12, %v2042_v14, %v2038_v27  ;;  %v7133_v2 = vpop.eup %4843  ;;  %vm7153_vm3 = vmor %vm2050_vm0, %vm2051_vm14  ;;  %vm2066_vm6 = vweird.f32 %v7097_v39 }
 0x633   : > { %v2047_v57 = vsub.f32 1.0, %v2046_v37  ;;  %v2763_v37 = vand.u32 2147483647, %v7052_v60  ;;  %v2044_v19 = vmul.f32 %v6910_v11, %v2043_v43  ;;  %v2076_v11 = vmul.f32 %v7133_v2, %v7099_v41  ;;  %vm2067_vm8 = vmor %vm2065_vm7, %vm2066_vm6 }
 0x634   : > { %v2757_v30 = vmul.f32 %v7076_v12, %v2756_v35  ;;  %v2062_v58 = vsub.f32 1.0, %v2061_v7  ;;  %vm2081_vm10 = vweird.f32 %v7133_v2 }
 0x635   : > { %v2048_v31 = vmul.f32 %v7080_v22, %v2047_v57  ;;  %v8052_v57 = vld [vmem:[#allocation50_spill] sm:$0xff]  ;;  %vm2764_vm4 = vcmp.eq.f32.partialorder %v2763_v37, 8.507059e+37  ;;  %vm2082_vm12 = vmor %vm2080_vm11, %vm2081_vm10 }
 0x636   : > { %v2758_v26 = vadd.f32 %v7076_v12, %v2757_v30  ;;  %v2063_v54 = vmul.f32 %v7097_v39, %v2062_v58 }
 0x637   : > { %v7095_v38 = vpop.f32.mrf.mxu0  ;;  %v2049_v20 = vadd.f32 %v7080_v22, %v2048_v31 }
 0x638   : > { %v2762_v60 = vsel %vm7139_vm2, %v7076_v12, %v2758_v26  ;;  %v2057_v12 = vor.u32 1.1754944e-38, %v2056_v63  ;;  %v7167_v14 = vpop.xlane.xlu1 %2654  ;;  %v2064_v58 = vadd.f32 %v7097_v39, %v2063_v54  ;;  %v2071_v26 = vand.u32 2147483648, %v7072_v55  ;;  %v8058_v54 = vld [vmem:[#allocation63_spill] sm:$0xff] }
 0x639   : > { %v4617_v15 = vpop.permute.xlu0 %4616  ;;  %v2053_v25 = vsel %vm7153_vm3, %v7080_v22, %v2049_v20  ;;  %v8056_v20 = vld [vmem:[#allocation56_spill] sm:$0xff]  ;;  %v2069_v63 = vand.u32 2147483647, %v7072_v55  ;;  %v2086_v55 = vand.u32 2147483648, %v7099_v41 }
 0x63a   : > { %v4618_v24 = vunpack.i.l.bf16 %v4617_v15  ;;  %4384 = vmatmul.msk.f32.gmra.mxu0 %vm962_vm1, %v8047_v16  ;;  %v4619_v40 = vunpack.i.h.bf16 %v4617_v15  ;;  %2203 = vmatmul.f32.gmra.mxu2 %v2029_v8  ;;  %v4627_v15 = vpop.permute.xlu2 %4626  ;;  %v2766_v8 = vor.u32 1.1754944e-38, %v2765_v9  ;;  %v2058_v31 = vsel %vm2055_vm5, %v2057_v12, %v2053_v25  ;;  %v8060_v25 = vld [vmem:[#allocation65_spill] sm:$0xff] }
 0x63b   : > { %v4628_v30 = vunpack.i.l.bf16 %v4627_v15  ;;  %v4629_v27 = vunpack.i.h.bf16 %v4627_v15  ;;  %v2059_v9 = vmul.f32 %v6918_v42, %v2058_v31  ;;  %v2072_v18 = vor.u32 1.1754944e-38, %v2071_v26 }
 0x63c   : > { %3052 = vmatpush.msrb.mxu1 %v4618_v24  ;;  %4457 = vmatpush.msra.mxu2 %v4618_v24  ;;  %v2767_v7 = vsel %vm2764_vm4, %v2766_v8, %v2762_v60  ;;  %vm2070_vm9 = vcmp.eq.f32.partialorder %v2069_v63, 8.507059e+37  ;;  %v2087_v24 = vor.u32 1.1754944e-38, %v2086_v55 }
 0x63d   : > { %v2768_v43 = vmul.f32 %v6924_v50, %v2767_v7 }
 0x63e   : > { %2658 = vmax.xlane.f32.xlu2 %v7109_v4  ;;  %3053 = vmatpush.msrb.mxu1 %v4619_v40 }
 0x63f   : > { %4458 = vmatpush.msra.mxu2 %v4619_v40  ;;  %v7128_v3 = vpop.f32.mrf.mxu0  ;;  %v2077_v40 = vsub.f32 1.0, %v2076_v11 }
 0x641   : > { %v4622_v34 = vpop.permute.xlu0 %4621  ;;  %v2078_v37 = vmul.f32 %v7133_v2, %v2077_v40 }
 0x642   : > { %v4623_v35 = vunpack.i.l.bf16 %v4622_v34  ;;  %4385 = vmatmul.msk.f32.gmra.mxu0 %vm962_vm1, %v8052_v57  ;;  %v4624_v16 = vunpack.i.h.bf16 %v4622_v34  ;;  %2206 = vmatmul.f32.gmra.mxu2 %v2044_v19  ;;  %v2068_v34 = vsel %vm2067_vm8, %v7097_v39, %v2064_v58  ;;  %v2084_v39 = vand.u32 2147483647, %v7099_v41 }
 0x643   : > { %v2079_v19 = vadd.f32 %v7133_v2, %v2078_v37 }
 0x644   : > { %3054 = vmatpush.msrb.mxu1 %v4623_v35  ;;  %4459 = vmatpush.msra.mxu2 %v4623_v35  ;;  %v2073_v35 = vsel %vm2070_vm9, %v2072_v18, %v2068_v34  ;;  %vm2085_vm13 = vcmp.eq.f32.partialorder %v2084_v39, 8.507059e+37 }
 0x645   : > { %v2074_v45 = vmul.f32 %v6914_v62, %v2073_v35  ;;  %v2083_v15 = vsel %vm2082_vm12, %v7133_v2, %v2079_v19 }
 0x646   : > { %2660 = vmax.xlane.f32.xlu2 %v7162_v29  ;;  %3055 = vmatpush.msrb.mxu1 %v4624_v16  ;;  %v2088_v62 = vsel %vm2085_vm13, %v2087_v24, %v2083_v15 }
 0x647   : > { %4460 = vmatpush.msra.mxu2 %v4624_v16  ;;  %v7165_v10 = vpop.f32.mrf.mxu0  ;;  %v2089_v16 = vmul.f32 %v6921_v47, %v2088_v62 }
 0x648   : > { %8055 = vst [vmem:[#allocation45_spill] sm:$0xff] %v7165_v10  ;;  %v2177_v22 = vpop.f32.mrf.mxu2  ;;  %3056 = vmatpush.msrb.mxu1 %v4628_v30 }
 0x649   : > { %4461 = vmatpush.msra.mxu2 %v4628_v30  ;;  %4282 = vmatmul.msk.f32.gmra.mxu3 %vm962_vm1, %v2177_v22 }
 0x64a   : > { %3057 = vmatpush.msrb.mxu1 %v4629_v27  ;;  %4386 = vmatmul.msk.f32.gmra.mxu0 %vm962_vm1, %v8056_v20 }
 0x64b   : > { %4462 = vmatpush.msra.mxu2 %v4629_v27  ;;  %3058 = vmatmul.f32.vlgmr.msrb.gmra.mxu1 %v2768_v43 }
 0x64c   : > { %2209 = vmatmul.f32.gmra.mxu2 %v2059_v9 }
 0x64f   : > { %v7181_v50 = vpop.f32.mrf.mxu0 }
 0x650   : > { %8057 = vst [vmem:[#allocation49_spill] sm:$0xff] %v7181_v50  ;;  %v4632_v42 = vpop.permute.xlu1 %4631 }
 0x651   : > { %v4633_v57 = vunpack.i.l.bf16 %v4632_v42  ;;  %v4634_v60 = vunpack.i.h.bf16 %v4632_v42 }
 0x652   : > { %4387 = vmatmul.msk.f32.gmra.mxu0 %vm962_vm1, %v8058_v54 }
 0x653   : > { %3833 = vmatpush.msra.mxu1 %v4633_v57 }
 0x654   : > { %2212 = vmatmul.f32.gmra.mxu2 %v2074_v45 }
 0x655   : > { %v2180_v11 = vpop.f32.mrf.mxu2  ;;  %3834 = vmatpush.msra.mxu1 %v4634_v60 }
 0x656   : > { %4283 = vmatmul.msk.f32.gmra.mxu3 %vm962_vm1, %v2180_v11 }
 0x657   : > { %v7193_v8 = vpop.f32.mrf.mxu0 }
 0x658   : > { %8059 = vst [vmem:[#allocation42_spill] sm:$0xff] %v7193_v8 }
 0x65a   : > { %4388 = vmatmul.msk.f32.gmra.mxu0 %vm962_vm1, %v8060_v25 }
 0x65c   : > { %2215 = vmatmul.f32.gmra.mxu2 %v2089_v16 }
 0x65f   : > { %v7198_v41 = vpop.f32.mrf.mxu0 }
 0x660   : > { %8061 = vst [vmem:[#allocation46_spill] sm:$0xff] %v7198_v41 }
 0x662   : > { %4389 = vmatmul.msk.f32.gmra.mxu0 %vm962_vm1, %v6875_v17 }
 0x667   : > { %v7202_v2 = vpop.f32.mrf.mxu0 }
 0x668   : > { %8062 = vst [vmem:[#allocation52_spill] sm:$0xff] %v7202_v2  ;;  %v2727_v12 = vpop.xlane.xlu2 %2726 }
 0x669   : > { %4845 = vrcp.f32 %v2727_v12  ;;  %v2795_v19 = vand.u32 2147483648, %v2727_v12  ;;  %vm2789_vm4 = vweird.f32 %v2727_v12  ;;  %v2793_v45 = vand.u32 2147483647, %v2727_v12 }
 0x66a   : > { %4390 = vmatmul.msk.f32.gmra.mxu0 %vm962_vm1, %v6851_v28 }
 0x66b   : > { %v2796_v11 = vor.u32 1.1754944e-38, %v2795_v19  ;;  %vm2794_vm6 = vcmp.eq.f32.partialorder %v2793_v45, 8.507059e+37 }
 0x66c   : > { %v2725_v7 = vpop.xlane.xlu0 %2724 }
 0x66d   : > { %4847 = vrcp.f32 %v2725_v7  ;;  %v2780_v28 = vand.u32 2147483648, %v2725_v7  ;;  %v2778_v9 = vand.u32 2147483647, %v2725_v7  ;;  %vm2774_vm15 = vweird.f32 %v2725_v7 }
 0x66f   : > { %v4846_v30 = vpop.eup %4845  ;;  %v7206_v47 = vpop.f32.mrf.mxu0  ;;  %v2781_v34 = vor.u32 1.1754944e-38, %v2780_v28  ;;  %vm2779_vm2 = vcmp.eq.f32.partialorder %v2778_v9, 8.507059e+37 }
 0x670   : > { %8063 = vst [vmem:[#allocation47_spill] sm:$0xff] %v7206_v47  ;;  %v2785_v31 = vmul.f32 %v4846_v30, %v2727_v12  ;;  %v7208_v40 = vpop.xlane.xlu2 %2728  ;;  %vm2790_vm3 = vweird.f32 %v4846_v30 }
 0x671   : > { %4849 = vrcp.f32 %v7208_v40  ;;  %vm2791_vm5 = vmor %vm2789_vm4, %vm2790_vm3  ;;  %v2810_v12 = vand.u32 2147483648, %v7208_v40  ;;  %vm2804_vm8 = vweird.f32 %v7208_v40 }
 0x672   : > { %4391 = vmatmul.msk.f32.gmra.mxu0 %vm962_vm1, %v6900_v13  ;;  %v2786_v27 = vsub.f32 1.0, %v2785_v31 }
 0x673   : > { %v4848_v17 = vpop.eup %4847 }
 0x674   : > { %v2770_v22 = vmul.f32 %v4848_v17, %v2725_v7  ;;  %v2787_v20 = vmul.f32 %v4846_v30, %v2786_v27  ;;  %vm2775_vm14 = vweird.f32 %v4848_v17 }
 0x675   : > { %vm2776_vm0 = vmor %vm2774_vm15, %vm2775_vm14 }
 0x676   : > { %v2771_v58 = vsub.f32 1.0, %v2770_v22  ;;  %v2788_v42 = vadd.f32 %v4846_v30, %v2787_v20  ;;  %v2811_v20 = vor.u32 1.1754944e-38, %v2810_v12  ;;  %v3110_v12 = vld [vmem:[#allocation8 + $0x58] sm:$0xff] }
 0x677   : > { %v7213_v26 = vpop.eup %4849  ;;  %v7215_v43 = vpop.f32.mrf.mxu0  ;;  %3171 = vmatpush.msrb.mxu3 %v3110_v12 }
 0x678   : > { %v2772_v63 = vmul.f32 %v4848_v17, %v2771_v58  ;;  %v2800_v37 = vmul.f32 %v7213_v26, %v7208_v40  ;;  %3433 = vmax.xlane.f32.xlu1 %v7215_v43  ;;  %v2792_v24 = vsel %vm2791_vm5, %v4846_v30, %v2788_v42  ;;  %v4642_v62 = vpop.permute.xlu2 %4641  ;;  %vm2805_vm7 = vweird.f32 %v7213_v26 }
 0x679   : > { %v2797_v25 = vsel %vm2794_vm6, %v2796_v11, %v2792_v24  ;;  %v4643_v7 = vunpack.i.l.bf16 %v4642_v62  ;;  %v4644_v27 = vunpack.i.h.bf16 %v4642_v62  ;;  %vm2806_vm9 = vmor %vm2804_vm8, %vm2805_vm7  ;;  %v7259_v62 = vpop.f32.mrf.mxu1 }
 0x67a   : > { %v2773_v13 = vadd.f32 %v4848_v17, %v2772_v63  ;;  %v2801_v18 = vsub.f32 1.0, %v2800_v37  ;;  %v2798_v30 = vmul.f32 %v6962_v6, %v2797_v25 }
 0x67b   : > { %v7236_v63 = vpop.xlane.xlu1 %2656 }
 0x67c   : > { %v2777_v35 = vsel %vm2776_vm0, %v4848_v17, %v2773_v13  ;;  %v2802_v60 = vmul.f32 %v7213_v26, %v2801_v18  ;;  %v2808_v17 = vand.u32 2147483647, %v7208_v40 }
 0x67d   : > { %v2782_v55 = vsel %vm2779_vm2, %v2781_v34, %v2777_v35 }
 0x67e   : > { %v2783_v57 = vmul.f32 %v6969_v5, %v2782_v55  ;;  %v2803_v5 = vadd.f32 %v7213_v26, %v2802_v60  ;;  %vm2809_vm10 = vcmp.eq.f32.partialorder %v2808_v17, 8.507059e+37  ;;  %v2679_v17 = vsub.f32 %v6928_v53, %v7123_v56 }
 0x67f   : > { %v7221_v54 = vpop.f32.mrf.mxu0  ;;  %v4637_v39 = vpop.permute.xlu0 %4636  ;;  %v2680_v53 = vsub.f32 %v6934_v0, %v7167_v14 }
 0x680   : > { %v4638_v15 = vunpack.i.l.bf16 %v4637_v39  ;;  %3435 = vmax.xlane.f32.xlu1 %v7221_v54  ;;  %3061 = vmatmul.f32.gmra.mxu1 %v2783_v57  ;;  %v4639_v16 = vunpack.i.h.bf16 %v4637_v39  ;;  %v2807_v9 = vsel %vm2806_vm9, %v7213_v26, %v2803_v5 }
 0x681   : > { %v2812_v6 = vsel %vm2809_vm10, %v2811_v20, %v2807_v9 }
 0x682   : > { %3835 = vmatpush.msra.mxu1 %v4638_v15  ;;  %v2813_v13 = vmul.f32 %v6974_v44, %v2812_v6 }
 0x684   : > { %3836 = vmatpush.msra.mxu1 %v4639_v16 }
 0x685   : > { %v2183_v31 = vpop.f32.mrf.mxu2 }
 0x686   : > { %4284 = vmatmul.msk.f32.gmra.mxu3 %vm962_vm1, %v2183_v31  ;;  %3837 = vmatpush.msra.mxu1 %v4643_v7  ;;  %v3109_v31 = vld [vmem:[#allocation8 + $0x50] sm:$0xff] }
 0x687   : > { %v7232_v22 = vpop.f32.mrf.mxu0  ;;  %v4647_v58 = vpop.permute.xlu0 %4646  ;;  %3172 = vmatpush.msrb.mxu3 %v3109_v31 }
 0x688   : > { %v4648_v28 = vunpack.i.l.bf16 %v4647_v58  ;;  %3437 = vmax.xlane.f32.xlu2 %v7232_v22  ;;  %3064 = vmatmul.f32.gmra.mxu1 %v2798_v30  ;;  %v4649_v37 = vunpack.i.h.bf16 %v4647_v58  ;;  %v3108_v30 = vld [vmem:[#allocation8 + $0x48] sm:$0xff]  ;;  %v3107_v58 = vld [vmem:[#allocation8 + $0x40] sm:$0xff] }
 0x689   : > { %3838 = vmatpush.msra.mxu1 %v4644_v27  ;;  %3173 = vmatpush.msrb.mxu3 %v3108_v30 }
 0x68b   : > { %3839 = vmatpush.msra.mxu1 %v4648_v28  ;;  %3174 = vmatpush.msrb.mxu3 %v3107_v58 }
 0x68d   : > { %3840 = vmatpush.msra.mxu1 %v4649_v37  ;;  %v2186_v40 = vpop.f32.mrf.mxu2 }
 0x68e   : > { %4285 = vmatmul.msk.f32.gmra.mxu3 %vm962_vm1, %v2186_v40  ;;  %v2702_v40 = vmul.f32 1.442695, %v2680_v53 }
 0x68f   : > { %v7240_v34 = vpop.f32.mrf.mxu0 }
 0x690   : > { %3439 = vmax.xlane.f32.xlu0 %v7240_v34  ;;  %3067 = vmatmul.f32.gmra.mxu1 %v2813_v13 }
 0x693   : > { %v4652_v26 = vpop.permute.xlu1 %4651 }
 0x694   : > { %v4653_v18 = vunpack.i.l.bf16 %v4652_v26  ;;  %v4654_v35 = vunpack.i.h.bf16 %v4652_v26 }
 0x695   : > { %v2189_v42 = vpop.f32.mrf.mxu2 }
 0x696   : > { %3841 = vmatpush.msra.mxu1 %v4653_v18  ;;  %4286 = vmatmul.msk.f32.gmra.mxu3 %vm962_vm1, %v2189_v42 }
 0x697   : > { %v7243_v19 = vpop.f32.mrf.mxu0 }
 0x698   : > { %3441 = vmax.xlane.f32.xlu0 %v7243_v19  ;;  %3842 = vmatpush.msra.mxu1 %v4654_v35 }
 0x69b   : > { %v4657_v55 = vpop.permute.xlu1 %4656 }
 0x69c   : > { %v4658_v57 = vunpack.i.l.bf16 %v4657_v55  ;;  %v4659_v44 = vunpack.i.h.bf16 %v4657_v55 }
 0x69d   : > { %v2192_v45 = vpop.f32.mrf.mxu2 }
 0x69e   : > { %3843 = vmatpush.msra.mxu1 %v4658_v57  ;;  %4287 = vmatmul.msk.f32.gmra.mxu3 %vm962_vm1, %v2192_v45 }
 0x69f   : > { %v7247_v39 = vpop.f32.mrf.mxu0 }
 0x6a0   : > { %3443 = vmax.xlane.f32.xlu1 %v7247_v39  ;;  %4661 = vrot.lane.b32.xlu2 %v8038_v23, %s5184_s30  ;;  %v7267_v23 = vpop.f32.mrf.mxu1 }
 0x6a1   : > { %3844 = vmatpush.msra.mxu1 %v4659_v44 }
 0x6a5   : > { %v2195_v60 = vpop.f32.mrf.mxu2 }
 0x6a6   : > { %4288 = vmatmul.msk.f32.gmra.mxu3 %vm962_vm1, %v2195_v60 }
 0x6a7   : > { %v7253_v15 = vpop.f32.mrf.mxu0 }
 0x6a8   : > { %3445 = vmax.xlane.f32.xlu0 %v7253_v15  ;;  %v7277_v27 = vpop.f32.mrf.mxu1 }
 0x6ad   : > { %v2198_v24 = vpop.f32.mrf.mxu2 }
 0x6ae   : > { %4289 = vmatmul.msk.f32.gmra.mxu3 %vm962_vm1, %v2198_v24 }
 0x6af   : > { %v7257_v11 = vpop.f32.mrf.mxu0 }
 0x6b0   : > { %3447 = vmax.xlane.f32.xlu1 %v7257_v11  ;;  %v7281_v9 = vpop.f32.mrf.mxu1 }
 0x6b1   : > { %v7304_v14 = vpop.xlane.xlu2 %2658 }
 0x6b5   : > { %v2201_v16 = vpop.f32.mrf.mxu2 }
 0x6b6   : > { %4290 = vmatmul.msk.f32.gmra.mxu3 %vm962_vm1, %v2201_v16 }
 0x6b7   : > { %v7263_v25 = vpop.f32.mrf.mxu0 }
 0x6b8   : > { %3449 = vmax.xlane.f32.xlu1 %v7263_v25  ;;  %v7291_v6 = vpop.f32.mrf.mxu1 }
 0x6b9   : > { %v7311_v60 = vpop.xlane.xlu2 %2660 }
 0x6bc   : > { %4666 = vrot.lane.b32.xlu0 %v8037_v48, %s5184_s30  ;;  %v2700_v48 = vmul.f32 1.442695, %v2679_v17 }
 0x6bd   : > { %v2204_v7 = vpop.f32.mrf.mxu2 }
 0x6be   : > { %4291 = vmatmul.msk.f32.gmra.mxu3 %vm962_vm1, %v2204_v7  ;;  %4851 = vpow2.f32 %v2700_v48 }
 0x6bf   : > { %v7271_v5 = vpop.f32.mrf.mxu0  ;;  %4853 = vpow2.f32 %v2702_v40 }
 0x6c0   : > { %3451 = vmax.xlane.f32.xlu1 %v7271_v5  ;;  %v7295_v26 = vpop.f32.mrf.mxu1 }
 0x6c4   : > { %v7284_v37 = vpop.eup %4851 }
 0x6c5   : > { %v2207_v28 = vpop.f32.mrf.mxu2  ;;  %v7300_v42 = vpop.eup %4853 }
 0x6c6   : > { %4292 = vmatmul.msk.f32.gmra.mxu3 %vm962_vm1, %v2207_v28 }
 0x6c7   : > { %v7289_v56 = vpop.f32.mrf.mxu0 }
 0x6c8   : > { %v3059_v0 = vpop.f32.mrf.mxu1 }
 0x6c9   : > { %2662 = vmax.xlane.f32.xlu2 %v7259_v62 }
 0x6cf   : > { %v2210_v20 = vpop.f32.mrf.mxu2  ;;  %v7297_v18 = vpop.f32.mrf.mxu0 }
 0x6d0   : > { %4293 = vmatmul.msk.f32.gmra.mxu3 %vm962_vm1, %v2210_v20 }
 0x6d1   : > { %2732 = vadd.xlane.f32.xlu2 %v7284_v37 }
 0x6d7   : > { %v2213_v13 = vpop.f32.mrf.mxu2  ;;  %v7306_v55 = vpop.f32.mrf.mxu0 }
 0x6d8   : > { %4294 = vmatmul.msk.f32.gmra.mxu3 %vm962_vm1, %v2213_v13 }
 0x6d9   : > { %2666 = vmax.xlane.f32.xlu2 %v7277_v27 }
 0x6df   : > { %v2216_v35 = vpop.f32.mrf.mxu2 }
 0x6e0   : > { %4295 = vmatmul.msk.f32.gmra.mxu3 %vm962_vm1, %v2216_v35  ;;  %v2681_v35 = vsub.f32 %v6987_v36, %v7236_v63 }
 0x6e1   : > { %2734 = vadd.xlane.f32.xlu2 %v7300_v42 }
 0x6e8   : > { %4344 = vmatmul.msk.f32.vlgmr.msrb.gmra.mxu3 %vm962_vm1, %v3059_v0 }
 0x6e9   : > { %3457 = vmax.xlane.f32.xlu2 %v7306_v55 }
 0x6eb   : > { %v3434_v57 = vpop.xlane.xlu1 %3433 }
 0x6ec   : > { %v3465_v44 = vsub.f32 %v7215_v43, %v3434_v57 }
 0x6ee   : > { %v3481_v45 = vmul.f32 1.442695, %v3465_v44 }
 0x6f0   : > { %4855 = vpow2.f32 %v3481_v45 }
 0x6f1   : > { %2670 = vmax.xlane.f32.xlu2 %v7291_v6 }
 0x6f3   : > { %v3436_v24 = vpop.xlane.xlu1 %3435 }
 0x6f4   : > { %v3466_v16 = vsub.f32 %v7221_v54, %v3436_v24  ;;  %v2678_v54 = vsub.f32 %v6867_v51, %v6965_v46  ;;  %v2704_v46 = vmul.f32 1.442695, %v2681_v35 }
 0x6f6   : > { %v7314_v7 = vpop.eup %4855  ;;  %v3483_v12 = vmul.f32 1.442695, %v3466_v16  ;;  %v2698_v20 = vmul.f32 1.442695, %v2678_v54 }
 0x6f7   : > { %3513 = vadd.xlane.f32.xlu1 %v7314_v7 }
 0x6f8   : > { %4857 = vpow2.f32 %v3483_v12 }
 0x6fb   : > { %v3438_v31 = vpop.xlane.xlu2 %3437 }
 0x6fc   : > { %v3467_v30 = vsub.f32 %v7232_v22, %v3438_v31 }
 0x6fd   : > { %v3062_v17 = vpop.f32.mrf.mxu1 }
 0x6fe   : > { %v7318_v43 = vpop.eup %4857  ;;  %v3485_v58 = vmul.f32 1.442695, %v3467_v30  ;;  %4345 = vmatmul.msk.f32.gmra.mxu3 %vm962_vm1, %v3062_v17 }
 0x6ff   : > { %2664 = vmax.xlane.f32.xlu1 %v7267_v23  ;;  %3515 = vadd.xlane.f32.xlu0 %v7318_v43 }
 0x700   : > { %4859 = vpow2.f32 %v3485_v58 }
 0x701   : > { %4861 = vpow2.f32 %v2698_v20 }
 0x702   : > { %4863 = vpow2.f32 %v2704_v46 }
 0x703   : > { %v4662_v48 = vpop.permute.xlu2 %4661  ;;  %v3440_v28 = vpop.xlane.xlu0 %3439 }
 0x704   : > { %v4663_v53 = vunpack.i.l.bf16 %v4662_v48  ;;  %v4664_v13 = vunpack.i.h.bf16 %v4662_v48  ;;  %v3468_v51 = vsub.f32 %v7240_v34, %v3440_v28  ;;  %v7354_v28 = vpop.f32.mrf.mxu0 }
 0x705   : > { %v3065_v40 = vpop.f32.mrf.mxu1 }
 0x706   : > { %v7325_v22 = vpop.eup %4859  ;;  %4346 = vmatmul.msk.f32.gmra.mxu3 %vm962_vm1, %v3065_v40  ;;  %3845 = vmatpush.msra.mxu1 %v4663_v53  ;;  %v3487_v0 = vmul.f32 1.442695, %v3468_v51  ;;  %v2683_v53 = vsub.f32 %v7162_v29, %v7311_v60  ;;  %v2682_v40 = vsub.f32 %v7109_v4, %v7304_v14 }
 0x707   : > { %3453 = vmax.xlane.f32.xlu1 %v7289_v56  ;;  %3517 = vadd.xlane.f32.xlu0 %v7325_v22  ;;  %v7333_v45 = vpop.eup %4861 }
 0x708   : > { %3846 = vmatpush.msra.mxu1 %v4664_v13  ;;  %4865 = vpow2.f32 %v3487_v0  ;;  %v7340_v16 = vpop.eup %4863  ;;  %v2706_v35 = vmul.f32 1.442695, %v2682_v40 }
 0x70b   : > { %v3442_v57 = vpop.xlane.xlu0 %3441 }
 0x70c   : > { %v3469_v24 = vsub.f32 %v7243_v19, %v3442_v57 }
 0x70d   : > { %v3068_v44 = vpop.f32.mrf.mxu1 }
 0x70e   : > { %4347 = vmatmul.msk.f32.gmra.mxu3 %vm962_vm1, %v3068_v44  ;;  %v3489_v36 = vmul.f32 1.442695, %v3469_v24  ;;  %v7342_v12 = vpop.eup %4865 }
 0x70f   : > { %3455 = vmax.xlane.f32.xlu1 %v7297_v18  ;;  %2730 = vadd.xlane.f32.xlu0 %v7333_v45 }
 0x710   : > { %4867 = vpow2.f32 %v3489_v36 }
 0x713   : > { %v3444_v63 = vpop.xlane.xlu1 %3443 }
 0x714   : > { %v3470_v34 = vsub.f32 %v7247_v39, %v3444_v63  ;;  %v7380_v63 = vpop.f32.mrf.mxu0 }
 0x716   : > { %v3491_v31 = vmul.f32 1.442695, %v3470_v34  ;;  %v7346_v19 = vpop.eup %4867 }
 0x717   : > { %2736 = vadd.xlane.f32.xlu0 %v7340_v16  ;;  %3519 = vadd.xlane.f32.xlu1 %v7342_v12 }
 0x718   : > { %4869 = vpow2.f32 %v3491_v31 }
 0x71b   : > { %v3446_v17 = vpop.xlane.xlu0 %3445 }
 0x71c   : > { %v3471_v39 = vsub.f32 %v7253_v15, %v3446_v17  ;;  %v2708_v15 = vmul.f32 1.442695, %v2683_v53 }
 0x71e   : > { %v7348_v30 = vpop.eup %4869  ;;  %v3493_v48 = vmul.f32 1.442695, %v3471_v39 }
 0x71f   : > { %3523 = vadd.xlane.f32.xlu0 %v7348_v30  ;;  %3521 = vadd.xlane.f32.xlu1 %v7346_v19 }
 0x723   : > { %v3448_v58 = vpop.xlane.xlu1 %3447 }
 0x724   : > { %v3472_v54 = vsub.f32 %v7257_v11, %v3448_v58  ;;  %v7389_v58 = vpop.f32.mrf.mxu0 }
 0x726   : > { %v3495_v20 = vmul.f32 1.442695, %v3472_v54 }
 0x727   : > { %3459 = vmax.xlane.f32.xlu0 %v7354_v28  ;;  %2668 = vmax.xlane.f32.xlu1 %v7281_v9 }
 0x728   : > { %4871 = vpow2.f32 %v3495_v20 }
 0x729   : > { %4873 = vpow2.f32 %v3493_v48 }
 0x72a   : > { %4875 = vpow2.f32 %v2708_v15 }
 0x72b   : > { %v3450_v13 = vpop.xlane.xlu1 %3449 }
 0x72c   : > { %v3473_v11 = vsub.f32 %v7263_v25, %v3450_v13 }
 0x72e   : > { %v7363_v51 = vpop.eup %4871  ;;  %v3497_v46 = vmul.f32 1.442695, %v3473_v11  ;;  %v4667_v0 = vpop.permute.xlu0 %4666 }
 0x72f   : > { %v7365_v57 = vpop.eup %4873  ;;  %v4668_v29 = vunpack.i.l.bf16 %v4667_v0  ;;  %3527 = vadd.xlane.f32.xlu2 %v7363_v51  ;;  %2672 = vmax.xlane.f32.xlu0 %v7295_v26  ;;  %v4669_v4 = vunpack.i.h.bf16 %v4667_v0 }
 0x730   : > { %4877 = vpow2.f32 %v3497_v46  ;;  %3525 = vadd.xlane.f32.xlu1 %v7365_v57  ;;  %v7371_v60 = vpop.eup %4875 }
 0x731   : > { %4879 = vpow2.f32 %v2706_v35  ;;  %3847 = vmatpush.msra.mxu1 %v4668_v29 }
 0x733   : > { %v3452_v25 = vpop.xlane.xlu1 %3451  ;;  %3848 = vmatpush.msra.mxu1 %v4669_v4 }
 0x734   : > { %v3474_v14 = vsub.f32 %v7271_v5, %v3452_v25 }
 0x736   : > { %v7373_v44 = vpop.eup %4877  ;;  %v3499_v24 = vmul.f32 1.442695, %v3474_v14 }
 0x737   : > { %v7375_v36 = vpop.eup %4879  ;;  %2740 = vadd.xlane.f32.xlu2 %v7371_v60  ;;  %3529 = vadd.xlane.f32.xlu0 %v7373_v44 }
 0x738   : > { %4881 = vpow2.f32 %v3499_v24  ;;  %2738 = vadd.xlane.f32.xlu1 %v7375_v36 }
 0x73c   : > { %v2663_v34 = vpop.xlane.xlu2 %2662 }
 0x73d   : > { %v2684_v5 = vsub.f32 %v7259_v62, %v2663_v34 }
 0x73e   : > { %v7382_v31 = vpop.eup %4881 }
 0x73f   : > { %3531 = vadd.xlane.f32.xlu0 %v7382_v31  ;;  %v2710_v17 = vmul.f32 1.442695, %v2684_v5 }
 0x740   : > { %3461 = vmax.xlane.f32.xlu1 %v7380_v63 }
 0x741   : > { %4883 = vpow2.f32 %v2710_v17 }
 0x744   : > { %v7387_v39 = vpop.xlane.xlu2 %2732 }
 0x747   : > { %v7391_v54 = vpop.eup %4883 }
 0x748   : > { %3463 = vmax.xlane.f32.xlu1 %v7389_v58  ;;  %2742 = vadd.xlane.f32.xlu2 %v7391_v54 }
 0x74c   : > { %v2667_v48 = vpop.xlane.xlu2 %2666 }
 0x74d   : > { %v2686_v20 = vsub.f32 %v7277_v27, %v2667_v48 }
 0x74f   : > { %v2714_v62 = vmul.f32 1.442695, %v2686_v20 }
 0x751   : > { %4885 = vpow2.f32 %v2714_v62 }
 0x754   : > { %v7396_v53 = vpop.xlane.xlu2 %2734 }
 0x757   : > { %v7398_v40 = vpop.eup %4885 }
 0x758   : > { %2746 = vadd.xlane.f32.xlu0 %v7398_v40 }
 0x75c   : > { %v3458_v15 = vpop.xlane.xlu2 %3457 }
 0x75d   : > { %v3477_v13 = vsub.f32 %v7306_v55, %v3458_v15 }
 0x75f   : > { %v3505_v11 = vmul.f32 1.442695, %v3477_v13 }
 0x761   : > { %4887 = vpow2.f32 %v3505_v11 }
 0x767   : > { %v7402_v35 = vpop.eup %4887 }
 0x768   : > { %3537 = vadd.xlane.f32.xlu0 %v7402_v35 }
 0x76a   : > { %v3514_v46 = vpop.xlane.xlu1 %3513 }
 0x76b   : > { %4889 = vrcp.f32 %v3514_v46  ;;  %v3556_v24 = vand.u32 2147483648, %v3514_v46  ;;  %v3554_v55 = vand.u32 2147483647, %v3514_v46  ;;  %vm3550_vm12 = vweird.f32 %v3514_v46 }
 0x76d   : > { %v3557_v20 = vor.u32 1.1754944e-38, %v3556_v24  ;;  %vm3555_vm14 = vcmp.eq.f32.partialorder %v3554_v55, 8.507059e+37 }
 0x771   : > { %v4890_v27 = vpop.eup %4889 }
 0x772   : > { %v3546_v0 = vmul.f32 %v4890_v27, %v3514_v46  ;;  %v2665_v29 = vpop.xlane.xlu1 %2664  ;;  %v3516_v4 = vpop.xlane.xlu0 %3515  ;;  %vm3551_vm11 = vweird.f32 %v4890_v27 }
 0x773   : > { %v2685_v25 = vsub.f32 %v7267_v23, %v2665_v29  ;;  %4891 = vrcp.f32 %v3516_v4  ;;  %vm3552_vm13 = vmor %vm3550_vm12, %vm3551_vm11  ;;  %vm3565_vm0 = vweird.f32 %v3516_v4  ;;  %vm2834_vm12 = vweird.f32 %v7387_v39 }
 0x774   : > { %v3547_v14 = vsub.f32 1.0, %v3546_v0 }
 0x775   : > { %v2712_v34 = vmul.f32 1.442695, %v2685_v25 }
 0x776   : > { %v3548_v5 = vmul.f32 %v4890_v27, %v3547_v14 }
 0x777   : > { %4893 = vpow2.f32 %v2712_v34 }
 0x778   : > { %v3549_v17 = vadd.f32 %v4890_v27, %v3548_v5  ;;  %4895 = vrcp.f32 %v7387_v39  ;;  %v3571_v5 = vand.u32 2147483648, %v3516_v4 }
 0x779   : > { %v4892_v48 = vpop.eup %4891 }
 0x77a   : > { %v3553_v62 = vsel %vm3552_vm13, %v4890_v27, %v3549_v17  ;;  %v3561_v15 = vmul.f32 %v4892_v48, %v3516_v4  ;;  %v3454_v13 = vpop.xlane.xlu1 %3453  ;;  %v3518_v23 = vpop.xlane.xlu0 %3517  ;;  %vm3566_vm15 = vweird.f32 %v4892_v48  ;;  %v3569_v27 = vand.u32 2147483647, %v3516_v4 }
 0x77b   : > { %v3558_v11 = vsel %vm3555_vm14, %v3557_v20, %v3553_v62  ;;  %v3475_v0 = vsub.f32 %v7289_v56, %v3454_v13  ;;  %4897 = vrcp.f32 %v3518_v23  ;;  %vm3567_vm2 = vmor %vm3565_vm0, %vm3566_vm15  ;;  %v3586_v2 = vand.u32 2147483648, %v3518_v23 }
 0x77c   : > { %v3562_v29 = vsub.f32 1.0, %v3561_v15  ;;  %v3559_v25 = vmul.f32 %v7314_v7, %v3558_v11  ;;  %v3572_v7 = vor.u32 1.1754944e-38, %v3571_v5  ;;  %vm3570_vm3 = vcmp.eq.f32.partialorder %v3569_v27, 8.507059e+37 }
 0x77d   : > { %v7409_v14 = vpop.eup %4893  ;;  %v3501_v46 = vmul.f32 1.442695, %v3475_v0  ;;  %v2671_v0 = vpop.xlane.xlu2 %2670  ;;  %vm3580_vm5 = vweird.f32 %v3518_v23 }
 0x77e   : > { %v3563_v34 = vmul.f32 %v4892_v48, %v3562_v29  ;;  %2744 = vadd.xlane.f32.xlu1 %v7409_v14  ;;  %3849 = vmatmul.f32.vlgmr.msra.gmra.mxu1 %v3559_v25  ;;  %v7412_v24 = vpop.eup %4895 }
 0x77f   : > { %4899 = vpow2.f32 %v3501_v46  ;;  %v2830_v11 = vmul.f32 %v7412_v24, %v7387_v39  ;;  %vm2835_vm10 = vweird.f32 %v7412_v24 }
 0x780   : > { %4901 = vrcp.f32 %v7396_v53  ;;  %v3564_v56 = vadd.f32 %v4892_v48, %v3563_v34  ;;  %vm7453_vm14 = vmor %vm2834_vm12, %vm2835_vm10 }
 0x781   : > { %v4898_v55 = vpop.eup %4897  ;;  %v2831_v27 = vsub.f32 1.0, %v2830_v11 }
 0x782   : > { %v3576_v17 = vmul.f32 %v4898_v55, %v3518_v23  ;;  %v3456_v20 = vpop.xlane.xlu1 %3455  ;;  %v2731_v62 = vpop.xlane.xlu0 %2730  ;;  %v3568_v15 = vsel %vm3567_vm2, %v4892_v48, %v3564_v56  ;;  %vm3581_vm4 = vweird.f32 %v4898_v55  ;;  %v3584_v48 = vand.u32 2147483647, %v3518_v23 }
 0x783   : > { %v3476_v13 = vsub.f32 %v7297_v18, %v3456_v20  ;;  %4903 = vrcp.f32 %v2731_v62  ;;  %v3573_v25 = vsel %vm3570_vm3, %v3572_v7, %v3568_v15  ;;  %v2688_v18 = vsub.f32 %v7291_v6, %v2671_v0  ;;  %vm3582_vm6 = vmor %vm3580_vm5, %vm3581_vm4 }
 0x784   : > { %v3577_v29 = vsub.f32 1.0, %v3576_v17  ;;  %v3574_v34 = vmul.f32 %v7318_v43, %v3573_v25  ;;  %v3587_v43 = vor.u32 1.1754944e-38, %v3586_v2  ;;  %vm3585_vm7 = vcmp.eq.f32.partialorder %v3584_v48, 8.507059e+37 }
 0x785   : > { %v7418_v46 = vpop.eup %4899  ;;  %v3503_v4 = vmul.f32 1.442695, %v3476_v13  ;;  %v2718_v25 = vmul.f32 1.442695, %v2688_v18  ;;  %v2832_v6 = vmul.f32 %v7412_v24, %v2831_v27  ;;  %v2823_v41 = vand.u32 2147483647, %v2731_v62 }
 0x786   : > { %v7421_v5 = vpop.eup %4901  ;;  %v3578_v47 = vmul.f32 %v4898_v55, %v3577_v29  ;;  %3533 = vadd.xlane.f32.xlu2 %v7418_v46  ;;  %3852 = vmatmul.f32.gmra.mxu1 %v3574_v34  ;;  %vm2819_vm9 = vweird.f32 %v2731_v62  ;;  %vm2849_vm2 = vweird.f32 %v7396_v53 }
 0x787   : > { %4905 = vpow2.f32 %v3503_v4  ;;  %v2845_v17 = vmul.f32 %v7421_v5, %v7396_v53  ;;  %v2825_v4 = vand.u32 2147483648, %v2731_v62  ;;  %v2833_v18 = vadd.f32 %v7412_v24, %v2832_v6 }
 0x788   : > { %v3579_v56 = vadd.f32 %v4898_v55, %v3578_v47  ;;  %vm2824_vm13 = vcmp.eq.f32.partialorder %v2823_v41, 8.507059e+37  ;;  %v2838_v41 = vand.u32 2147483647, %v7387_v39  ;;  %vm2850_vm15 = vweird.f32 %v7421_v5 }
 0x789   : > { %v4904_v7 = vpop.eup %4903  ;;  %v2846_v0 = vsub.f32 1.0, %v2845_v17  ;;  %vm7476_vm5 = vmor %vm2849_vm2, %vm2850_vm15 }
 0x78a   : > { %v2815_v20 = vmul.f32 %v4904_v7, %v2731_v62  ;;  %v7427_v15 = vpop.xlane.xlu1 %3519  ;;  %v7429_v13 = vpop.xlane.xlu0 %2736  ;;  %v3583_v29 = vsel %vm3582_vm6, %v4898_v55, %v3579_v56  ;;  %vm2820_vm8 = vweird.f32 %v4904_v7  ;;  %v2826_v56 = vor.u32 1.1754944e-38, %v2825_v4 }
 0x78b   : > { %4907 = vrcp.f32 %v7427_v15  ;;  %v3588_v47 = vsel %vm3585_vm7, %v3587_v43, %v3583_v29  ;;  %v2847_v27 = vmul.f32 %v7421_v5, %v2846_v0  ;;  %vm2821_vm11 = vmor %vm2819_vm9, %vm2820_vm8  ;;  %v2840_v29 = vand.u32 2147483648, %v7387_v39 }
 0x78c   : > { %v2816_v23 = vsub.f32 1.0, %v2815_v20  ;;  %4909 = vrcp.f32 %v7429_v13  ;;  %v3589_v2 = vmul.f32 %v7325_v22, %v3588_v47  ;;  %v2837_v47 = vsel %vm7453_vm14, %v7412_v24, %v2833_v18 }
 0x78d   : > { %v7433_v11 = vpop.eup %4905  ;;  %4911 = vpow2.f32 %v2718_v25  ;;  %v3601_v4 = vand.u32 2147483648, %v7427_v15  ;;  %v2841_v24 = vor.u32 1.1754944e-38, %v2840_v29  ;;  %v2853_v18 = vand.u32 2147483647, %v7396_v53 }
 0x78e   : > { %v2817_v34 = vmul.f32 %v4904_v7, %v2816_v23  ;;  %3535 = vadd.xlane.f32.xlu1 %v7433_v11  ;;  %3855 = vmatmul.f32.gmra.mxu1 %v3589_v2  ;;  %vm3595_vm3 = vweird.f32 %v7427_v15  ;;  %vm2839_vm4 = vcmp.eq.f32.partialorder %v2838_v41, 8.507059e+37 }
 0x78f   : > { %v2842_v6 = vsel %vm2839_vm4, %v2841_v24, %v2837_v47  ;;  %vm2854_vm8 = vcmp.eq.f32.partialorder %v2853_v18, 8.507059e+37 }
 0x790   : > { %v2818_v55 = vadd.f32 %v4904_v7, %v2817_v34  ;;  %v2848_v34 = vadd.f32 %v7421_v5, %v2847_v27  ;;  %v2843_v24 = vmul.f32 %v7284_v37, %v2842_v6 }
 0x791   : > { %v4908_v48 = vpop.eup %4907 }
 0x792   : > { %v2822_v22 = vsel %vm2821_vm11, %v4904_v7, %v2818_v55  ;;  %v3591_v17 = vmul.f32 %v4908_v48, %v7427_v15  ;;  %v7443_v43 = vpop.xlane.xlu1 %3521  ;;  %v7445_v20 = vpop.xlane.xlu0 %3523  ;;  %v2855_v7 = vand.u32 2147483648, %v7396_v53  ;;  %vm3596_vm0 = vweird.f32 %v4908_v48 }
 0x793   : > { %v7447_v62 = vpop.eup %4909  ;;  %v2827_v25 = vsel %vm2824_vm13, %v2826_v56, %v2822_v22  ;;  %4913 = vrcp.f32 %v7443_v43  ;;  %v3599_v56 = vand.u32 2147483647, %v7427_v15  ;;  %vm3597_vm6 = vmor %vm3595_vm3, %vm3596_vm0  ;;  %v2852_v29 = vsel %vm7476_vm5, %v7421_v5, %v2848_v34 }
 0x794   : > { %v3592_v23 = vsub.f32 1.0, %v3591_v17  ;;  %4915 = vrcp.f32 %v7445_v20  ;;  %v7463_v0 = vpop.eup %4911  ;;  %v2828_v2 = vmul.f32 %v7333_v45, %v2827_v25  ;;  %v2860_v55 = vmul.f32 %v7447_v62, %v7429_v13 }
 0x795   : > { %v2856_v17 = vor.u32 1.1754944e-38, %v2855_v7  ;;  %v3602_v25 = vor.u32 1.1754944e-38, %v3601_v4  ;;  %vm3600_vm7 = vcmp.eq.f32.partialorder %v3599_v56, 8.507059e+37  ;;  %vm3610_vm10 = vweird.f32 %v7443_v43 }
 0x796   : > { %v3593_v39 = vmul.f32 %v4908_v48, %v3592_v23  ;;  %2750 = vadd.xlane.f32.xlu1 %v7463_v0  ;;  %3070 = vmatmul.f32.vlgmr.msra.gmra.mxu2 %v2828_v2  ;;  %v2861_v53 = vsub.f32 1.0, %v2860_v55  ;;  %v3616_v55 = vand.u32 2147483648, %v7443_v43  ;;  %vm2864_vm11 = vweird.f32 %v7429_v13 }
 0x797   : > { %v2857_v34 = vsel %vm2854_vm8, %v2856_v17, %v2852_v29  ;;  %vm2865_vm13 = vweird.f32 %v7447_v62  ;;  %vm3625_vm0 = vweird.f32 %v7445_v20 }
 0x798   : > { %v3594_v45 = vadd.f32 %v4908_v48, %v3593_v39  ;;  %v2862_v56 = vmul.f32 %v7447_v62, %v2861_v53  ;;  %v2858_v37 = vmul.f32 %v7300_v42, %v2857_v34  ;;  %v3617_v18 = vor.u32 1.1754944e-38, %v3616_v55  ;;  %vm7527_vm2 = vmor %vm2864_vm11, %vm2865_vm13 }
 0x799   : > { %v4914_v22 = vpop.eup %4913 }
 0x79a   : > { %v7483_v23 = vpop.eup %4915  ;;  %v3606_v15 = vmul.f32 %v4914_v22, %v7443_v43  ;;  %v2669_v41 = vpop.xlane.xlu1 %2668  ;;  %v3598_v39 = vsel %vm3597_vm6, %v4908_v48, %v3594_v45  ;;  %v3614_v48 = vand.u32 2147483647, %v7443_v43  ;;  %vm3611_vm9 = vweird.f32 %v4914_v22 }
 0x79b   : > { %v3460_v2 = vpop.xlane.xlu0 %3459  ;;  %v3621_v8 = vmul.f32 %v7483_v23, %v7445_v20  ;;  %v2687_v7 = vsub.f32 %v7281_v9, %v2669_v41  ;;  %v3603_v47 = vsel %vm3600_vm7, %v3602_v25, %v3598_v39  ;;  %vm7500_vm12 = vmor %vm3610_vm10, %vm3611_vm9  ;;  %v2863_v42 = vadd.f32 %v7447_v62, %v2862_v56 }
 0x79c   : > { %v3607_v4 = vsub.f32 1.0, %v3606_v15  ;;  %v3604_v5 = vmul.f32 %v7342_v12, %v3603_v47  ;;  %v3478_v10 = vsub.f32 %v7354_v28, %v3460_v2  ;;  %vm3615_vm14 = vcmp.eq.f32.partialorder %v3614_v48, 8.507059e+37 }
 0x79d   : > { %v3622_v27 = vsub.f32 1.0, %v3621_v8  ;;  %v2716_v50 = vmul.f32 1.442695, %v2687_v7  ;;  %v2870_v8 = vand.u32 2147483648, %v7429_v13  ;;  %vm3626_vm15 = vweird.f32 %v7483_v23 }
 0x79e   : > { %v3608_v45 = vmul.f32 %v4914_v22, %v3607_v4  ;;  %3858 = vmatmul.f32.gmra.mxu1 %v3604_v5  ;;  %3073 = vmatmul.f32.gmra.mxu2 %v2843_v24  ;;  %v3507_v28 = vmul.f32 1.442695, %v3478_v10  ;;  %v3631_v10 = vand.u32 2147483648, %v7445_v20  ;;  %v3629_v7 = vand.u32 2147483647, %v7445_v20  ;;  %vm7533_vm3 = vmor %vm3625_vm0, %vm3626_vm15 }
 0x79f   : > { %v3623_v9 = vmul.f32 %v7483_v23, %v3622_v27  ;;  %4917 = vpow2.f32 %v2716_v50  ;;  %v2871_v4 = vor.u32 1.1754944e-38, %v2870_v8 }
 0x7a0   : > { %v3609_v12 = vadd.f32 %v4914_v22, %v3608_v45  ;;  %v3632_v20 = vor.u32 1.1754944e-38, %v3631_v10  ;;  %vm3630_vm5 = vcmp.eq.f32.partialorder %v3629_v7, 8.507059e+37 }
 0x7a1   : > { %v3624_v53 = vadd.f32 %v7483_v23, %v3623_v9 }
 0x7a2   : > { %v7505_v25 = vpop.xlane.xlu2 %3527  ;;  %v3613_v43 = vsel %vm7500_vm12, %v4914_v22, %v3609_v12  ;;  %v2868_v22 = vand.u32 2147483647, %v7429_v13 }
 0x7a3   : > { %v2673_v50 = vpop.xlane.xlu0 %2672  ;;  %4919 = vrcp.f32 %v7505_v25  ;;  %v7511_v6 = vpop.xlane.xlu1 %3525  ;;  %v3618_v15 = vsel %vm3615_vm14, %v3617_v18, %v3613_v43  ;;  %v3628_v13 = vsel %vm7533_vm3, %v7483_v23, %v3624_v53  ;;  %vm3655_vm11 = vweird.f32 %v7505_v25 }
 0x7a4   : > { %v2689_v29 = vsub.f32 %v7295_v26, %v2673_v50  ;;  %4921 = vrcp.f32 %v7511_v6  ;;  %v3619_v39 = vmul.f32 %v7346_v19, %v3618_v15  ;;  %v2867_v19 = vsel %vm7527_vm2, %v7447_v62, %v2863_v42 }
 0x7a5   : > { %v7519_v41 = vpop.eup %4917  ;;  %4923 = vpow2.f32 %v3507_v28  ;;  %vm2869_vm4 = vcmp.eq.f32.partialorder %v2868_v22, 8.507059e+37  ;;  %v3633_v62 = vsel %vm3630_vm5, %v3632_v20, %v3628_v13  ;;  %v3646_v17 = vand.u32 2147483648, %v7511_v6 }
 0x7a6   : > { %v2720_v2 = vmul.f32 1.442695, %v2689_v29  ;;  %2748 = vadd.xlane.f32.xlu2 %v7519_v41  ;;  %3076 = vmatmul.f32.gmra.mxu2 %v2858_v37  ;;  %v2872_v48 = vsel %vm2869_vm4, %v2871_v4, %v2867_v19  ;;  %v3634_v18 = vmul.f32 %v7348_v30, %v3633_v62  ;;  %v3644_v28 = vand.u32 2147483647, %v7511_v6 }
 0x7a7   : > { %3861 = vmatmul.f32.gmra.mxu1 %v3619_v39  ;;  %v2873_v8 = vmul.f32 %v7340_v16, %v2872_v48  ;;  %v3661_v16 = vand.u32 2147483648, %v7505_v25  ;;  %vm3640_vm7 = vweird.f32 %v7511_v6  ;;  %v3647_v53 = vor.u32 1.1754944e-38, %v3646_v17 }
 0x7a8   : > { %4925 = vpow2.f32 %v2720_v2  ;;  %vm7576_vm8 = vcmp.eq.f32.partialorder %v3644_v28, 8.507059e+37  ;;  %v3659_v2 = vand.u32 2147483647, %v7505_v25 }
 0x7a9   : > { %v7543_v24 = vpop.eup %4919 }
 0x7aa   : > { %v4922_v5 = vpop.eup %4921  ;;  %v3651_v34 = vmul.f32 %v7543_v24, %v7505_v25  ;;  %v7547_v55 = vpop.xlane.xlu2 %2740  ;;  %vm3656_vm10 = vweird.f32 %v7543_v24  ;;  %vm3660_vm14 = vcmp.eq.f32.partialorder %v3659_v2, 8.507059e+37 }
 0x7ab   : > { %v7549_v27 = vpop.xlane.xlu0 %3529  ;;  %v3636_v56 = vmul.f32 %v4922_v5, %v7511_v6  ;;  %4927 = vrcp.f32 %v7547_v55  ;;  %v7553_v23 = vpop.xlane.xlu1 %2738  ;;  %vm3641_vm6 = vweird.f32 %v4922_v5  ;;  %vm7600_vm13 = vmor %vm3655_vm11, %vm3656_vm10  ;;  %vm2894_vm15 = vweird.f32 %v7547_v55 }
 0x7ac   : > { %v7555_v45 = vpop.eup %4923  ;;  %v3652_v9 = vsub.f32 1.0, %v3651_v34  ;;  %4929 = vrcp.f32 %v7553_v23  ;;  %vm3642_vm9 = vmor %vm3640_vm7, %vm3641_vm6  ;;  %v2885_v34 = vand.u32 2147483648, %v7553_v23  ;;  %v2900_v28 = vand.u32 2147483648, %v7547_v55 }
 0x7ad   : > { %v3637_v12 = vsub.f32 1.0, %v3636_v56  ;;  %4931 = vrcp.f32 %v7549_v27  ;;  %vm2879_vm0 = vweird.f32 %v7553_v23  ;;  %vm3670_vm6 = vweird.f32 %v7549_v27 }
 0x7ae   : > { %v7558_v37 = vpop.eup %4925  ;;  %3539 = vadd.xlane.f32.xlu2 %v7555_v45  ;;  %v3653_v50 = vmul.f32 %v7543_v24, %v3652_v9  ;;  %3079 = vmatmul.f32.gmra.mxu2 %v2873_v8  ;;  %v3662_v8 = vor.u32 1.1754944e-38, %v3661_v16 }
 0x7af   : > { %2752 = vadd.xlane.f32.xlu0 %v7558_v37  ;;  %v3638_v43 = vmul.f32 %v4922_v5, %v3637_v12  ;;  %3864 = vmatmul.f32.gmra.mxu1 %v3634_v18  ;;  %v2883_v12 = vand.u32 2147483647, %v7553_v23 }
 0x7b0   : > { %v3654_v6 = vadd.f32 %v7543_v24, %v3653_v50 }
 0x7b1   : > { %v7568_v42 = vpop.eup %4927  ;;  %v3639_v30 = vadd.f32 %v4922_v5, %v3638_v43  ;;  %v2886_v43 = vor.u32 1.1754944e-38, %v2885_v34  ;;  %vm2884_vm3 = vcmp.eq.f32.partialorder %v2883_v12, 8.507059e+37 }
 0x7b2   : > { %v4930_v29 = vpop.eup %4929  ;;  %v2890_v10 = vmul.f32 %v7568_v42, %v7547_v55  ;;  %vm2895_vm4 = vweird.f32 %v7568_v42 }
 0x7b3   : > { %v7574_v15 = vpop.xlane.xlu0 %3531  ;;  %v7581_v39 = vpop.eup %4931  ;;  %v2875_v26 = vmul.f32 %v4930_v29, %v7553_v23  ;;  %v3643_v4 = vsel %vm3642_vm9, %v4922_v5, %v3639_v30  ;;  %vm2880_vm12 = vweird.f32 %v4930_v29  ;;  %vm2896_vm7 = vmor %vm2894_vm15, %vm2895_vm4 }
 0x7b4   : > { %v3462_v7 = vpop.xlane.xlu1 %3461  ;;  %4933 = vrcp.f32 %v7574_v15  ;;  %v2891_v47 = vsub.f32 1.0, %v2890_v10  ;;  %v3666_v19 = vmul.f32 %v7581_v39, %v7549_v27  ;;  %v3648_v48 = vsel %vm7576_vm8, %v3647_v53, %v3643_v4  ;;  %vm2881_vm2 = vmor %vm2879_vm0, %vm2880_vm12 }
 0x7b5   : > { %v3479_v13 = vsub.f32 %v7380_v63, %v3462_v7  ;;  %v2876_v20 = vsub.f32 1.0, %v2875_v26  ;;  %v3649_v9 = vmul.f32 %v7365_v57, %v3648_v48  ;;  %v3658_v57 = vsel %vm7600_vm13, %v7543_v24, %v3654_v6 }
 0x7b6   : > { %v3667_v62 = vsub.f32 1.0, %v3666_v19  ;;  %v2892_v18 = vmul.f32 %v7568_v42, %v2891_v47  ;;  %v3663_v53 = vsel %vm3660_vm14, %v3662_v8, %v3658_v57  ;;  %vm3671_vm5 = vweird.f32 %v7581_v39 }
 0x7b7   : > { %v3509_v56 = vmul.f32 1.442695, %v3479_v13  ;;  %v2877_v17 = vmul.f32 %v4930_v29, %v2876_v20  ;;  %3867 = vmatmul.f32.gmra.mxu1 %v3649_v9  ;;  %v3676_v6 = vand.u32 2147483648, %v7549_v27  ;;  %v2898_v19 = vand.u32 2147483647, %v7547_v55  ;;  %vm3672_vm8 = vmor %vm3670_vm6, %vm3671_vm5 }
 0x7b8   : > { %v3668_v25 = vmul.f32 %v7581_v39, %v3667_v62  ;;  %v2893_v10 = vadd.f32 %v7568_v42, %v2892_v18  ;;  %v3664_v4 = vmul.f32 %v7363_v51, %v3663_v53  ;;  %v2901_v20 = vor.u32 1.1754944e-38, %v2900_v28  ;;  %v3901_v53 = vld [vmem:[#allocation8 + $0x78] sm:$0xff] }
 0x7b9   : > { %4935 = vpow2.f32 %v3509_v56  ;;  %v2878_v50 = vadd.f32 %v4930_v29, %v2877_v17  ;;  %v3677_v48 = vor.u32 1.1754944e-38, %v3676_v6  ;;  %vm2899_vm9 = vcmp.eq.f32.partialorder %v2898_v19, 8.507059e+37  ;;  %3962 = vmatpush.msrb.mxu2 %v3901_v53 }
 0x7ba   : > { %v7608_v5 = vpop.eup %4933  ;;  %v3669_v7 = vadd.f32 %v7581_v39, %v3668_v25  ;;  %vm3685_vm12 = vweird.f32 %v7574_v15  ;;  %v3689_v17 = vand.u32 2147483647, %v7574_v15 }
 0x7bb   : > { %v3681_v16 = vmul.f32 %v7608_v5, %v7574_v15  ;;  %v2882_v24 = vsel %vm2881_vm2, %v4930_v29, %v2878_v50  ;;  %v2743_v23 = vpop.xlane.xlu2 %2742  ;;  %vm3686_vm11 = vweird.f32 %v7608_v5 }
 0x7bc   : > { %v3464_v30 = vpop.xlane.xlu1 %3463  ;;  %v2887_v26 = vsel %vm2884_vm3, %v2886_v43, %v2882_v24  ;;  %4937 = vrcp.f32 %v2743_v23  ;;  %v3673_v51 = vsel %vm3672_vm8, %v7581_v39, %v3669_v7  ;;  %v2915_v63 = vand.u32 2147483648, %v2743_v23  ;;  %vm3687_vm13 = vmor %vm3685_vm12, %vm3686_vm11 }
 0x7bd   : > { %v3682_v22 = vsub.f32 1.0, %v3681_v16  ;;  %v3480_v2 = vsub.f32 %v7389_v58, %v3464_v30  ;;  %v2888_v47 = vmul.f32 %v7375_v36, %v2887_v26  ;;  %v3674_v58 = vand.u32 2147483647, %v7549_v27 }
 0x7be   : > { %v2897_v36 = vsel %vm2896_vm7, %v7568_v42, %v2893_v10  ;;  %v3691_v42 = vand.u32 2147483648, %v7574_v15  ;;  %vm2909_vm15 = vweird.f32 %v2743_v23  ;;  %vm3690_vm0 = vcmp.eq.f32.partialorder %v3689_v17, 8.507059e+37 }
 0x7bf   : > { %v7623_v29 = vpop.eup %4935  ;;  %v3511_v13 = vmul.f32 1.442695, %v3480_v2  ;;  %3082 = vmatmul.f32.gmra.mxu2 %v2888_v47  ;;  %v3683_v34 = vmul.f32 %v7608_v5, %v3682_v22  ;;  %3870 = vmatmul.f32.gmra.mxu1 %v3664_v4  ;;  %v2902_v55 = vsel %vm2899_vm9, %v2901_v20, %v2897_v36  ;;  %vm3675_vm10 = vcmp.eq.f32.partialorder %v3674_v58, 8.507059e+37 }
 0x7c0   : > { %3541 = vadd.xlane.f32.xlu1 %v7623_v29  ;;  %v3678_v62 = vsel %vm3675_vm10, %v3677_v48, %v3673_v51  ;;  %v2903_v12 = vmul.f32 %v7371_v60, %v2902_v55  ;;  %v2913_v60 = vand.u32 2147483647, %v2743_v23  ;;  %v3692_v28 = vor.u32 1.1754944e-38, %v3691_v42 }
 0x7c1   : > { %4939 = vpow2.f32 %v3511_v13  ;;  %v3684_v9 = vadd.f32 %v7608_v5, %v3683_v34  ;;  %v3679_v18 = vmul.f32 %v7373_v44, %v3678_v62  ;;  %v2916_v43 = vor.u32 1.1754944e-38, %v2915_v63 }
 0x7c2   : > { %v4938_v27 = vpop.eup %4937  ;;  %vm2914_vm3 = vcmp.eq.f32.partialorder %v2913_v60, 8.507059e+37 }
 0x7c3   : > { %v2905_v56 = vmul.f32 %v4938_v27, %v2743_v23  ;;  %v3688_v57 = vsel %vm3687_vm13, %v7608_v5, %v3684_v9  ;;  %vm2910_vm14 = vweird.f32 %v4938_v27  ;;  %v3900_v23 = vld [vmem:[#allocation8 + $0x70] sm:$0xff] }
 0x7c4   : > { %v3693_v16 = vsel %vm3690_vm0, %v3692_v28, %v3688_v57  ;;  %vm2911_vm2 = vmor %vm2909_vm15, %vm2910_vm14  ;;  %3963 = vmatpush.msrb.mxu2 %v3900_v23 }
 0x7c5   : > { %v2906_v39 = vsub.f32 1.0, %v2905_v56  ;;  %v3694_v30 = vmul.f32 %v7382_v31, %v3693_v16 }
 0x7c7   : > { %v7642_v8 = vpop.eup %4939  ;;  %3085 = vmatmul.f32.gmra.mxu2 %v2903_v12  ;;  %v2907_v25 = vmul.f32 %v4938_v27, %v2906_v39  ;;  %3873 = vmatmul.f32.gmra.mxu1 %v3679_v18 }
 0x7c8   : > { %3543 = vadd.xlane.f32.xlu2 %v7642_v8 }
 0x7c9   : > { %v2908_v50 = vadd.f32 %v4938_v27, %v2907_v25 }
 0x7cb   : > { %v2912_v44 = vsel %vm2911_vm2, %v4938_v27, %v2908_v50  ;;  %v2747_v5 = vpop.xlane.xlu0 %2746 }
 0x7cc   : > { %v2917_v15 = vsel %vm2914_vm3, %v2916_v43, %v2912_v44  ;;  %4941 = vrcp.f32 %v2747_v5  ;;  %vm2939_vm9 = vweird.f32 %v2747_v5  ;;  %v2945_v56 = vand.u32 2147483648, %v2747_v5 }
 0x7cd   : > { %v2918_v24 = vmul.f32 %v7391_v54, %v2917_v15  ;;  %v2943_v18 = vand.u32 2147483647, %v2747_v5 }
 0x7ce   : > { %v2946_v28 = vor.u32 1.1754944e-38, %v2945_v56 }
 0x7cf   : > { %3876 = vmatmul.f32.gmra.mxu1 %v3694_v30  ;;  %3088 = vmatmul.f32.gmra.mxu2 %v2918_v24  ;;  %vm2944_vm13 = vcmp.eq.f32.partialorder %v2943_v18, 8.507059e+37 }
 0x7d2   : > { %v4942_v10 = vpop.eup %4941 }
 0x7d3   : > { %v2935_v2 = vmul.f32 %v4942_v10, %v2747_v5  ;;  %vm2940_vm7 = vweird.f32 %v4942_v10 }
 0x7d4   : > { %vm7657_vm10 = vmor %vm2939_vm9, %vm2940_vm7 }
 0x7d5   : > { %v2936_v7 = vsub.f32 1.0, %v2935_v2 }
 0x7d7   : > { %v2937_v19 = vmul.f32 %v4942_v10, %v2936_v7 }
 0x7d9   : > { %v2938_v51 = vadd.f32 %v4942_v10, %v2937_v19 }
 0x7db   : > { %v7651_v6 = vpop.xlane.xlu0 %3537  ;;  %v2942_v63 = vsel %vm7657_vm10, %v4942_v10, %v2938_v51 }
 0x7dc   : > { %v2947_v16 = vsel %vm2944_vm13, %v2946_v28, %v2942_v63 }
 0x7dd   : > { %v2948_v5 = vmul.f32 %v7398_v40, %v2947_v16 }
 0x7f1   : > { %v2745_v22 = vpop.xlane.xlu1 %2744 }
 0x7f2   : > { %4943 = vrcp.f32 %v2745_v22  ;;  %v2930_v13 = vand.u32 2147483648, %v2745_v22  ;;  %v2928_v58 = vand.u32 2147483647, %v2745_v22  ;;  %vm2924_vm5 = vweird.f32 %v2745_v22 }
 0x7f4   : > { %v2931_v34 = vor.u32 1.1754944e-38, %v2930_v13  ;;  %vm2929_vm8 = vcmp.eq.f32.partialorder %v2928_v58, 8.507059e+37  ;;  %v3734_v58 = vand.u32 2147483647, %v7651_v6 }
 0x7f8   : > { %v4944_v26 = vpop.eup %4943 }
 0x7f9   : > { %v2920_v47 = vmul.f32 %v4944_v26, %v2745_v22  ;;  %v3534_v31 = vpop.xlane.xlu2 %3533  ;;  %vm2925_vm4 = vweird.f32 %v4944_v26 }
 0x7fa   : > { %4945 = vrcp.f32 %v3534_v31  ;;  %vm2926_vm6 = vmor %vm2924_vm5, %vm2925_vm4  ;;  %v3706_v17 = vand.u32 2147483648, %v3534_v31  ;;  %v3704_v60 = vand.u32 2147483647, %v3534_v31  ;;  %vm3700_vm12 = vweird.f32 %v3534_v31 }
 0x7fb   : > { %v2921_v54 = vsub.f32 1.0, %v2920_v47  ;;  %4947 = vrcp.f32 %v7651_v6 }
 0x7fc   : > { %v3707_v43 = vor.u32 1.1754944e-38, %v3706_v17  ;;  %vm3705_vm15 = vcmp.eq.f32.partialorder %v3704_v60, 8.507059e+37 }
 0x7fd   : > { %v2922_v4 = vmul.f32 %v4944_v26, %v2921_v54 }
 0x7ff   : > { %v2923_v36 = vadd.f32 %v4944_v26, %v2922_v4 }
 0x800   : > { %v4946_v20 = vpop.eup %4945 }
 0x801   : > { %v3696_v48 = vmul.f32 %v4946_v20, %v3534_v31  ;;  %v3536_v55 = vpop.xlane.xlu1 %3535  ;;  %v2927_v27 = vsel %vm2926_vm6, %v4944_v26, %v2923_v36  ;;  %v7654_v62 = vpop.eup %4947  ;;  %vm3701_vm11 = vweird.f32 %v4946_v20  ;;  %v3899_v31 = vld [vmem:[#allocation8 + $0x68] sm:$0xff]  ;;  %vm3730_vm6 = vweird.f32 %v7651_v6 }
 0x802   : > { %4949 = vrcp.f32 %v3536_v55  ;;  %v2932_v9 = vsel %vm2929_vm8, %v2931_v34, %v2927_v27  ;;  %v3726_v25 = vmul.f32 %v7654_v62, %v7651_v6  ;;  %vm3702_vm14 = vmor %vm3700_vm12, %vm3701_vm11  ;;  %v3721_v22 = vand.u32 2147483648, %v3536_v55  ;;  %3964 = vmatpush.msrb.mxu2 %v3899_v31  ;;  %v7682_v27 = vpop.f32.mrf.mxu3 }
 0x803   : > { %v3697_v42 = vsub.f32 1.0, %v3696_v48  ;;  %v2933_v12 = vmul.f32 %v7409_v14, %v2932_v9  ;;  %v3719_v26 = vand.u32 2147483647, %v3536_v55  ;;  %vm3715_vm2 = vweird.f32 %v3536_v55 }
 0x804   : > { %v3727_v44 = vsub.f32 1.0, %v3726_v25  ;;  %v3722_v47 = vor.u32 1.1754944e-38, %v3721_v22  ;;  %vm3731_vm5 = vweird.f32 %v7654_v62  ;;  %vm3735_vm8 = vcmp.eq.f32.partialorder %v3734_v58, 8.507059e+37 }
 0x805   : > { %v3698_v57 = vmul.f32 %v4946_v20, %v3697_v42  ;;  %3091 = vmatmul.f32.gmra.mxu2 %v2933_v12  ;;  %vm3720_vm4 = vcmp.eq.f32.partialorder %v3719_v26, 8.507059e+37  ;;  %vm3732_vm7 = vmor %vm3730_vm6, %vm3731_vm5 }
 0x806   : > { %v3728_v2 = vmul.f32 %v7654_v62, %v3727_v44 }
 0x807   : > { %v3699_v14 = vadd.f32 %v4946_v20, %v3698_v57 }
 0x808   : > { %v4950_v50 = vpop.eup %4949  ;;  %v3729_v40 = vadd.f32 %v7654_v62, %v3728_v2 }
 0x809   : > { %v3711_v15 = vmul.f32 %v4950_v50, %v3536_v55  ;;  %v3703_v30 = vsel %vm3702_vm14, %v4946_v20, %v3699_v14  ;;  %vm3716_vm0 = vweird.f32 %v4950_v50  ;;  %v7668_v54 = vpop.xlane.xlu1 %2750 }
 0x80a   : > { %v3708_v24 = vsel %vm3705_vm15, %v3707_v43, %v3703_v30  ;;  %vm3717_vm3 = vmor %vm3715_vm2, %vm3716_vm0  ;;  %4951 = vrcp.f32 %v7668_v54  ;;  %v3733_v36 = vsel %vm3732_vm7, %v7654_v62, %v3729_v40  ;;  %v2975_v30 = vand.u32 2147483648, %v7668_v54 }
 0x80b   : > { %v3712_v53 = vsub.f32 1.0, %v3711_v15  ;;  %v3709_v10 = vmul.f32 %v7418_v46, %v3708_v24  ;;  %v3736_v46 = vand.u32 2147483648, %v7651_v6  ;;  %vm2969_vm14 = vweird.f32 %v7668_v54 }
 0x80c   : > { %v2973_v2 = vand.u32 2147483647, %v7668_v54  ;;  %v2976_v40 = vor.u32 1.1754944e-38, %v2975_v30 }
 0x80d   : > { %v3713_v23 = vmul.f32 %v4950_v50, %v3712_v53  ;;  %3094 = vmatmul.f32.gmra.mxu2 %v2948_v5  ;;  %3879 = vmatmul.f32.gmra.mxu1 %v3709_v10  ;;  %v3737_v20 = vor.u32 1.1754944e-38, %v3736_v46 }
 0x80f   : > { %v3714_v7 = vadd.f32 %v4950_v50, %v3713_v23  ;;  %v3738_v34 = vsel %vm3735_vm8, %v3737_v20, %v3733_v36 }
 0x810   : > { %v7678_v48 = vpop.eup %4951 }
 0x811   : > { %v3718_v19 = vsel %vm3717_vm3, %v4950_v50, %v3714_v7  ;;  %v2965_v6 = vmul.f32 %v7678_v48, %v7668_v54  ;;  %vm2970_vm12 = vweird.f32 %v7678_v48  ;;  %v3898_v50 = vld [vmem:[#allocation8 + $0x60] sm:$0xff]  ;;  %vm2974_vm3 = vcmp.eq.f32.partialorder %v2973_v2, 8.507059e+37 }
 0x812   : > { %v3723_v13 = vsel %vm3720_vm4, %v3722_v47, %v3718_v19  ;;  %3965 = vmatpush.msrb.mxu2 %v3898_v50  ;;  %vm2971_vm15 = vmor %vm2969_vm14, %vm2970_vm12 }
 0x813   : > { %v3724_v4 = vmul.f32 %v7433_v11, %v3723_v13  ;;  %v3739_v11 = vmul.f32 %v7402_v35, %v3738_v34  ;;  %v2966_v62 = vsub.f32 1.0, %v2965_v6  ;;  %v7690_v35 = vpop.f32.mrf.mxu3  ;;  %v3850_v13 = vpop.f32.mrf.mxu1 }
 0x815   : > { %3882 = vmatmul.f32.gmra.mxu1 %v3724_v4  ;;  %v2967_v63 = vmul.f32 %v7678_v48, %v2966_v62 }
 0x817   : > { %v2968_v15 = vadd.f32 %v7678_v48, %v2967_v63 }
 0x819   : > { %v2749_v51 = vpop.xlane.xlu2 %2748  ;;  %v3071_v55 = vpop.f32.mrf.mxu2  ;;  %v2972_v31 = vsel %vm2971_vm15, %v7678_v48, %v2968_v15 }
 0x81a   : > { %4953 = vrcp.f32 %v2749_v51  ;;  %4348 = vmatmul.msk.f32.gmra.mxu3 %vm962_vm1, %v3071_v55  ;;  %v2960_v17 = vand.u32 2147483648, %v2749_v51  ;;  %v2958_v57 = vand.u32 2147483647, %v2749_v51  ;;  %vm2954_vm10 = vweird.f32 %v2749_v51 }
 0x81b   : > { %v7701_v23 = vpop.f32.mrf.mxu3  ;;  %v2977_v4 = vsel %vm2974_vm3, %v2976_v40, %v2972_v31 }
 0x81c   : > { %v2961_v14 = vor.u32 1.1754944e-38, %v2960_v17  ;;  %vm2959_vm13 = vcmp.eq.f32.partialorder %v2958_v57, 8.507059e+37 }
 0x81d   : > { %3885 = vmatmul.f32.gmra.mxu1 %v3739_v11  ;;  %v2978_v11 = vmul.f32 %v7463_v0, %v2977_v4 }
 0x820   : > { %v4954_v56 = vpop.eup %4953 }
 0x821   : > { %v2950_v9 = vmul.f32 %v4954_v56, %v2749_v51  ;;  %v3540_v42 = vpop.xlane.xlu2 %3539  ;;  %v3074_v39 = vpop.f32.mrf.mxu2  ;;  %vm2955_vm9 = vweird.f32 %v4954_v56 }
 0x822   : > { %v7686_v12 = vpop.xlane.xlu0 %2752  ;;  %4955 = vrcp.f32 %v3540_v42  ;;  %4349 = vmatmul.msk.f32.gmra.mxu3 %vm962_vm1, %v3074_v39  ;;  %vm2956_vm11 = vmor %vm2954_vm10, %vm2955_vm9  ;;  %v3751_v26 = vand.u32 2147483648, %v3540_v42  ;;  %v3749_v19 = vand.u32 2147483647, %v3540_v42  ;;  %vm3745_vm2 = vweird.f32 %v3540_v42 }
 0x823   : > { %v2951_v18 = vsub.f32 1.0, %v2950_v9  ;;  %4957 = vrcp.f32 %v7686_v12  ;;  %v2990_v20 = vand.u32 2147483648, %v7686_v12  ;;  %vm2984_vm7 = vweird.f32 %v7686_v12  ;;  %v7711_v6 = vpop.f32.mrf.mxu3 }
 0x824   : > { %v3752_v54 = vor.u32 1.1754944e-38, %v3751_v26  ;;  %vm3750_vm6 = vcmp.eq.f32.partialorder %v3749_v19, 8.507059e+37  ;;  %v2988_v55 = vand.u32 2147483647, %v7686_v12 }
 0x825   : > { %v2952_v25 = vmul.f32 %v4954_v56, %v2951_v18  ;;  %v2991_v9 = vor.u32 1.1754944e-38, %v2990_v20  ;;  %v3853_v18 = vpop.f32.mrf.mxu1 }
 0x826   : > { %vm2989_vm9 = vcmp.eq.f32.partialorder %v2988_v55, 8.507059e+37 }
 0x827   : > { %v2953_v60 = vadd.f32 %v4954_v56, %v2952_v25 }
 0x828   : > { %v4956_v28 = vpop.eup %4955 }
 0x829   : > { %v4958_v43 = vpop.eup %4957  ;;  %v3741_v16 = vmul.f32 %v4956_v28, %v3540_v42  ;;  %v2957_v44 = vsel %vm2956_vm11, %v4954_v56, %v2953_v60  ;;  %v3077_v53 = vpop.f32.mrf.mxu2  ;;  %vm3746_vm0 = vweird.f32 %v4956_v28 }
 0x82a   : > { %v2980_v24 = vmul.f32 %v4958_v43, %v7686_v12  ;;  %v2962_v5 = vsel %vm2959_vm13, %v2961_v14, %v2957_v44  ;;  %4350 = vmatmul.msk.f32.gmra.mxu3 %vm962_vm1, %v3077_v53  ;;  %vm3747_vm4 = vmor %vm3745_vm2, %vm3746_vm0  ;;  %vm2985_vm5 = vweird.f32 %v4958_v43 }
 0x82b   : > { %v3742_v10 = vsub.f32 1.0, %v3741_v16  ;;  %v2963_v22 = vmul.f32 %v7519_v41, %v2962_v5  ;;  %vm2986_vm8 = vmor %vm2984_vm7, %vm2985_vm5  ;;  %v7715_v25 = vpop.f32.mrf.mxu3 }
 0x82c   : > { %v2981_v7 = vsub.f32 1.0, %v2980_v24 }
 0x82d   : > { %v3743_v47 = vmul.f32 %v4956_v28, %v3742_v10  ;;  %3097 = vmatmul.f32.gmra.mxu2 %v2963_v22  ;;  %v3856_v15 = vpop.f32.mrf.mxu1 }
 0x82e   : > { %v2982_v46 = vmul.f32 %v4958_v43, %v2981_v7 }
 0x82f   : > { %v3744_v41 = vadd.f32 %v4956_v28, %v3743_v47 }
 0x830   : > { %v2983_v58 = vadd.f32 %v4958_v43, %v2982_v46 }
 0x831   : > { %v3748_v36 = vsel %vm3747_vm4, %v4956_v28, %v3744_v41  ;;  %v3080_v51 = vpop.f32.mrf.mxu2 }
 0x832   : > { %v3753_v48 = vsel %vm3750_vm6, %v3752_v54, %v3748_v36  ;;  %4351 = vmatmul.msk.f32.gmra.mxu3 %vm962_vm1, %v3080_v51  ;;  %v2987_v62 = vsel %vm2986_vm8, %v4958_v43, %v2983_v58 }
 0x833   : > { %v3542_v34 = vpop.xlane.xlu1 %3541  ;;  %v3754_v56 = vmul.f32 %v7555_v45, %v3753_v48  ;;  %v2992_v42 = vsel %vm2989_vm9, %v2991_v9, %v2987_v62  ;;  %v7720_v5 = vpop.f32.mrf.mxu3 }
 0x834   : > { %4959 = vrcp.f32 %v3542_v34  ;;  %v2993_v63 = vmul.f32 %v7558_v37, %v2992_v42  ;;  %v3766_v57 = vand.u32 2147483648, %v3542_v34  ;;  %v3764_v45 = vand.u32 2147483647, %v3542_v34 }
 0x835   : > { %3100 = vmatmul.f32.gmra.mxu2 %v2978_v11  ;;  %3888 = vmatmul.f32.gmra.mxu1 %v3754_v56  ;;  %vm3760_vm11 = vweird.f32 %v3542_v34 }
 0x836   : > { %v3767_v50 = vor.u32 1.1754944e-38, %v3766_v57  ;;  %vm3765_vm13 = vcmp.eq.f32.partialorder %v3764_v45, 8.507059e+37 }
 0x83a   : > { %v4960_v39 = vpop.eup %4959 }
 0x83b   : > { %v3756_v17 = vmul.f32 %v4960_v39, %v3542_v34  ;;  %v3544_v12 = vpop.xlane.xlu2 %3543  ;;  %vm3761_vm10 = vweird.f32 %v4960_v39  ;;  %v7725_v40 = vpop.f32.mrf.mxu3 }
 0x83c   : > { %4961 = vrcp.f32 %v3544_v12  ;;  %vm3762_vm12 = vmor %vm3760_vm11, %vm3761_vm10  ;;  %v3781_v53 = vand.u32 2147483648, %v3544_v12  ;;  %v3779_v22 = vand.u32 2147483647, %v3544_v12  ;;  %vm3775_vm15 = vweird.f32 %v3544_v12 }
 0x83d   : > { %v3757_v0 = vsub.f32 1.0, %v3756_v17  ;;  %3103 = vmatmul.f32.gmra.mxu2 %v2993_v63 }
 0x83e   : > { %v3782_v26 = vor.u32 1.1754944e-38, %v3781_v53  ;;  %vm3780_vm2 = vcmp.eq.f32.partialorder %v3779_v22, 8.507059e+37  ;;  %v4963_v53 = vld [vmem:[%s5344_s18] sm:$0xff] }
 0x83f   : > { %v3758_v60 = vmul.f32 %v4960_v39, %v3757_v0 }
 0x841   : > { %v3759_v28 = vadd.f32 %v4960_v39, %v3758_v60 }
 0x842   : > { %v4962_v14 = vpop.eup %4961  ;;  %v3083_v16 = vpop.f32.mrf.mxu2 }
 0x843   : > { %v3771_v43 = vmul.f32 %v4962_v14, %v3544_v12  ;;  %v3763_v44 = vsel %vm3762_vm12, %v4960_v39, %v3759_v28  ;;  %4352 = vmatmul.msk.f32.gmra.mxu3 %vm962_vm1, %v3083_v16  ;;  %vm3776_vm14 = vweird.f32 %v4962_v14  ;;  %v7769_v16 = vld [vmem:[%s7893_s5] ss:$0 sm:$0xff] }
 0x844   : > { %v3768_v37 = vsel %vm3765_vm13, %v3767_v50, %v3763_v44  ;;  %vm3777_vm0 = vmor %vm3775_vm15, %vm3776_vm14 }
 0x845   : > { %v3772_v30 = vsub.f32 1.0, %v3771_v43  ;;  %v3769_v24 = vmul.f32 %v7623_v29, %v3768_v37  ;;  %4392 = vmatmul.msk.f32.vlgmr.msrb.gmra.mxu2 %vm962_vm1, %v3850_v13  ;;  %v3859_v29 = vpop.f32.mrf.mxu1  ;;  %v7729_v13 = vpop.f32.mrf.mxu3 }
 0x847   : > { %v3773_v10 = vmul.f32 %v4962_v14, %v3772_v30  ;;  %3891 = vmatmul.f32.gmra.mxu1 %v3769_v24  ;;  %v2405_v24 = vadd.f32 %v6977_v33, %v7690_v35  ;;  %v4964_v33 = vld [vmem:[%s5344_s18 + $0x8] sm:$0xff] }
 0x849   : > { %v3774_v2 = vadd.f32 %v4962_v14, %v3773_v10 }
 0x84a   : > { %v3086_v7 = vpop.f32.mrf.mxu2 }
 0x84b   : > { %v3778_v47 = vsel %vm3777_vm0, %v4962_v14, %v3774_v2  ;;  %4353 = vmatmul.msk.f32.gmra.mxu3 %vm962_vm1, %v3086_v7  ;;  %v2402_v14 = vadd.f32 %v6967_v61, %v7682_v27  ;;  %v2408_v7 = vadd.f32 %v6989_v59, %v7701_v23 }
 0x84c   : > { %v3783_v31 = vsel %vm3780_vm2, %v3782_v26, %v3778_v47 }
 0x84d   : > { %v3784_v19 = vmul.f32 %v7642_v8, %v3783_v31  ;;  %4393 = vmatmul.msk.f32.gmra.mxu2 %vm962_vm1, %v3853_v18  ;;  %v3862_v41 = vpop.f32.mrf.mxu1  ;;  %v7732_v4 = vpop.f32.mrf.mxu3 }
 0x84f   : > { %3894 = vmatmul.f32.gmra.mxu1 %v3784_v19 }
 0x852   : > { %v3089_v46 = vpop.f32.mrf.mxu2 }
 0x853   : > { %4354 = vmatmul.msk.f32.gmra.mxu3 %vm962_vm1, %v3089_v46 }
 0x855   : > { %4394 = vmatmul.msk.f32.gmra.mxu2 %vm962_vm1, %v3856_v15  ;;  %v3865_v54 = vpop.f32.mrf.mxu1  ;;  %v7736_v58 = vpop.f32.mrf.mxu3 }
 0x85d   : > { %4395 = vmatmul.msk.f32.gmra.mxu2 %vm962_vm1, %v3859_v29  ;;  %v3868_v8 = vpop.f32.mrf.mxu1  ;;  %v7739_v20 = vpop.f32.mrf.mxu3 }
 0x865   : > { %4396 = vmatmul.msk.f32.gmra.mxu2 %vm962_vm1, %v3862_v41  ;;  %v3871_v36 = vpop.f32.mrf.mxu1  ;;  %v7742_v51 = vpop.f32.mrf.mxu3  ;;  %v2411_v41 = vadd.f32 %v6998_v49, %v7711_v6 }
 0x86d   : > { %4397 = vmatmul.msk.f32.gmra.mxu2 %vm962_vm1, %v3865_v54  ;;  %v3874_v34 = vpop.f32.mrf.mxu1  ;;  %v7746_v11 = vpop.f32.mrf.mxu3  ;;  %v4965_v54 = vld [vmem:[%s5344_s18 + $0x10] sm:$0xff] }
 0x875   : > { %4398 = vmatmul.msk.f32.gmra.mxu2 %vm962_vm1, %v3868_v8  ;;  %v3877_v48 = vpop.f32.mrf.mxu1  ;;  %v7751_v9 = vpop.f32.mrf.mxu3 }
 0x87d   : > { %4399 = vmatmul.msk.f32.gmra.mxu2 %vm962_vm1, %v3871_v36  ;;  %v7754_v39 = vpop.f32.mrf.mxu3 }
 0x885   : > { %4400 = vmatmul.msk.f32.gmra.mxu2 %vm962_vm1, %v3874_v34  ;;  %v7757_v17 = vpop.f32.mrf.mxu3 }
 0x888   : > { %v3092_v55 = vpop.f32.mrf.mxu2 }
 0x889   : > { %4355 = vmatmul.msk.f32.gmra.mxu3 %vm962_vm1, %v3092_v55  ;;  %v2414_v55 = vadd.f32 %v7016_v1, %v7715_v25 }
 0x88a   : > { %v3880_v56 = vpop.f32.mrf.mxu1 }
 0x88d   : > { %4401 = vmatmul.msk.f32.gmra.mxu2 %vm962_vm1, %v3877_v48  ;;  %v3176_v0 = vpop.f32.mrf.mxu3 }
 0x88e   : > { %v3224_v43 = vadd.f32 %v3176_v0, %v2402_v14  ;;  %v4967_v0 = vld [vmem:[%s5344_s18 + $0x20] sm:$0xff]  ;;  %v4968_v14 = vld [vmem:[%s5344_s18 + $0x28] sm:$0xff] }
 0x890   : > { %v3095_v62 = vpop.f32.mrf.mxu2 }
 0x891   : > { %4356 = vmatmul.msk.f32.gmra.mxu3 %vm962_vm1, %v3095_v62 }
 0x892   : > { %v3883_v42 = vpop.f32.mrf.mxu1 }
 0x895   : > { %4402 = vmatmul.msk.f32.gmra.mxu2 %vm962_vm1, %v3880_v56  ;;  %v3179_v60 = vpop.f32.mrf.mxu3  ;;  %v4966_v56 = vld [vmem:[%s5344_s18 + $0x18] sm:$0xff] }
 0x896   : > { %v3225_v27 = vadd.f32 %v3179_v60, %v2405_v24 }
 0x89a   : > { %v3886_v18 = vpop.f32.mrf.mxu1 }
 0x89d   : > { %4403 = vmatmul.msk.f32.gmra.mxu2 %vm962_vm1, %v3883_v42  ;;  %v3182_v50 = vpop.f32.mrf.mxu3 }
 0x89e   : > { %v3226_v47 = vadd.f32 %v3182_v50, %v2408_v7 }
 0x8a5   : > { %4404 = vmatmul.msk.f32.gmra.mxu2 %vm962_vm1, %v3886_v18  ;;  %v3185_v10 = vpop.f32.mrf.mxu3 }
 0x8a6   : > { %v3227_v36 = vadd.f32 %v3185_v10, %v2411_v41  ;;  %v2426_v10 = vadd.f32 %v7095_v38, %v7732_v4  ;;  %v8080_v41 = vld [vmem:[#allocation45_spill] sm:$0xff] }
 0x8ad   : > { %v3188_v31 = vpop.f32.mrf.mxu3 }
 0x8ae   : > { %v3228_v42 = vadd.f32 %v3188_v31, %v2414_v55 }
 0x8b0   : > { %v3098_v12 = vpop.f32.mrf.mxu2 }
 0x8b1   : > { %4357 = vmatmul.msk.f32.gmra.mxu3 %vm962_vm1, %v3098_v12 }
 0x8b2   : > { %v3889_v63 = vpop.f32.mrf.mxu1 }
 0x8b3   : > { %4405 = vmatmul.msk.f32.gmra.mxu2 %vm962_vm1, %v3889_v63  ;;  %v2417_v63 = vadd.f32 %v7029_v21, %v7720_v5 }
 0x8b5   : > { %v3191_v34 = vpop.f32.mrf.mxu3 }
 0x8b6   : > { %v3229_v60 = vadd.f32 %v3191_v34, %v2417_v63 }
 0x8b8   : > { %v3101_v57 = vpop.f32.mrf.mxu2 }
 0x8b9   : > { %4358 = vmatmul.msk.f32.gmra.mxu3 %vm962_vm1, %v3101_v57 }
 0x8bd   : > { %v3194_v12 = vpop.f32.mrf.mxu3 }
 0x8c0   : > { %v3104_v45 = vpop.f32.mrf.mxu2 }
 0x8c1   : > { %4359 = vmatmul.msk.f32.gmra.mxu3 %vm962_vm1, %v3104_v45 }
 0x8c4   : > { %v3892_v28 = vpop.f32.mrf.mxu1 }
 0x8c5   : > { %4406 = vmatmul.msk.f32.gmra.mxu2 %vm962_vm1, %v3892_v28  ;;  %v2420_v28 = vadd.f32 %v7048_v52, %v7725_v40 }
 0x8c8   : > { %v3967_v44 = vpop.f32.mrf.mxu2 }
 0x8c9   : > { %v4015_v37 = vadd.f32 %v3967_v44, %v3224_v43  ;;  %v3197_v43 = vpop.f32.mrf.mxu3  ;;  %v3230_v44 = vadd.f32 %v3194_v12, %v2420_v28  ;;  %v8082_v12 = vld [vmem:[#allocation42_spill] sm:$0xff] }
 0x8ca   : > { %v2438_v63 = vadd.f32 %v8082_v12, %v7746_v11 }
 0x8cb   : > { %v4035_v15 = vadd.f32 %v7769_v16, %v4015_v37 }
 0x8cc   : > { %v3895_v30 = vpop.f32.mrf.mxu1 }
 0x8cd   : > { %4407 = vmatmul.msk.f32.gmra.mxu2 %vm962_vm1, %v3895_v30  ;;  %v4051_v61 = vadd.f32 %v4963_v53, %v4035_v15  ;;  %v2423_v15 = vadd.f32 %v7074_v32, %v7729_v13  ;;  %v4969_v30 = vld [vmem:[%s5344_s18 + $0x30] sm:$0xff] }
 0x8cf   : > { %4067 = vst [vmem:[%s7778_s19] sm:$0xff] %v4051_v61  ;;  %v3231_v61 = vadd.f32 %v3197_v43, %v2423_v15 }
 0x8d0   : > { %v3970_v22 = vpop.f32.mrf.mxu2 }
 0x8d1   : > { %v4016_v2 = vadd.f32 %v3970_v22, %v3225_v27  ;;  %v3200_v53 = vpop.f32.mrf.mxu3  ;;  %v4970_v22 = vld [vmem:[%s5344_s18 + $0x38] sm:$0xff] }
 0x8d3   : > { %v4036_v26 = vadd.f32 %v7769_v16, %v4016_v2 }
 0x8d5   : > { %v4052_v35 = vadd.f32 %v4964_v33, %v4036_v26  ;;  %v3232_v26 = vadd.f32 %v3200_v53, %v2426_v10  ;;  %v8085_v10 = vld [vmem:[#allocation47_spill] sm:$0xff] }
 0x8d7   : > { %4068 = vst [vmem:[%s7778_s19 + $0x8] sm:$0xff] %v4052_v35  ;;  %v2429_v35 = vadd.f32 %v7128_v3, %v7736_v58 }
 0x8d8   : > { %v3973_v29 = vpop.f32.mrf.mxu2 }
 0x8d9   : > { %v4017_v19 = vadd.f32 %v3973_v29, %v3226_v47  ;;  %v3203_v32 = vpop.f32.mrf.mxu3  ;;  %v4971_v47 = vld [vmem:[%s5344_s18 + $0x40] sm:$0xff] }
 0x8da   : > { %v3233_v29 = vadd.f32 %v3203_v32, %v2429_v35 }
 0x8db   : > { %v4037_v46 = vadd.f32 %v7769_v16, %v4017_v19 }
 0x8dd   : > { %v4053_v8 = vadd.f32 %v4965_v54, %v4037_v46  ;;  %v2432_v54 = vadd.f32 %v8080_v41, %v7739_v20 }
 0x8df   : > { %4069 = vst [vmem:[%s7778_s19 + $0x10] sm:$0xff] %v4053_v8  ;;  %v4972_v8 = vld [vmem:[%s5344_s18 + $0x48] sm:$0xff] }
 0x8e0   : > { %v3976_v59 = vpop.f32.mrf.mxu2 }
 0x8e1   : > { %v4018_v23 = vadd.f32 %v3976_v59, %v3227_v36  ;;  %v3206_v19 = vpop.f32.mrf.mxu3 }
 0x8e2   : > { %v3234_v59 = vadd.f32 %v3206_v19, %v2432_v54 }
 0x8e3   : > { %v4038_v48 = vadd.f32 %v7769_v16, %v4018_v23 }
 0x8e5   : > { %v4054_v62 = vadd.f32 %v4966_v56, %v4038_v48  ;;  %v8081_v48 = vld [vmem:[#allocation49_spill] sm:$0xff] }
 0x8e6   : > { %v2435_v55 = vadd.f32 %v8081_v48, %v7742_v51  ;;  %v4973_v56 = vld [vmem:[%s5344_s18 + $0x50] sm:$0xff] }
 0x8e7   : > { %4070 = vst [vmem:[%s7778_s19 + $0x18] sm:$0xff] %v4054_v62 }
 0x8e8   : > { %v3979_v49 = vpop.f32.mrf.mxu2 }
 0x8e9   : > { %v4019_v6 = vadd.f32 %v3979_v49, %v3228_v42 }
 0x8eb   : > { %v4039_v18 = vadd.f32 %v7769_v16, %v4019_v6 }
 0x8ed   : > { %v4055_v57 = vadd.f32 %v4967_v0, %v4039_v18  ;;  %v4974_v0 = vld [vmem:[%s5344_s18 + $0x58] sm:$0xff] }
 0x8ef   : > { %4071 = vst [vmem:[%s7778_s19 + $0x20] sm:$0xff] %v4055_v57 }
 0x8f0   : > { %v3982_v1 = vpop.f32.mrf.mxu2 }
 0x8f1   : > { %v4020_v25 = vadd.f32 %v3982_v1, %v3229_v60 }
 0x8f3   : > { %v4040_v45 = vadd.f32 %v7769_v16, %v4020_v25 }
 0x8f5   : > { %v4056_v50 = vadd.f32 %v4968_v14, %v4040_v45  ;;  %v4975_v45 = vld [vmem:[%s5344_s18 + $0x60] sm:$0xff] }
 0x8f6   : > { %v8083_v14 = vld [vmem:[#allocation46_spill] sm:$0xff] }
 0x8f7   : > { %4072 = vst [vmem:[%s7778_s19 + $0x28] sm:$0xff] %v4056_v50  ;;  %v2441_v50 = vadd.f32 %v8083_v14, %v7751_v9 }
 0x8f8   : > { %v3985_v21 = vpop.f32.mrf.mxu2 }
 0x8f9   : > { %v4021_v5 = vadd.f32 %v3985_v21, %v3230_v44 }
 0x8fb   : > { %v4041_v37 = vadd.f32 %v7769_v16, %v4021_v5 }
 0x8fd   : > { %v4057_v24 = vadd.f32 %v4969_v30, %v4041_v37  ;;  %v4976_v37 = vld [vmem:[%s5344_s18 + $0x68] sm:$0xff] }
 0x8ff   : > { %4073 = vst [vmem:[%s7778_s19 + $0x30] sm:$0xff] %v4057_v24  ;;  %v8084_v24 = vld [vmem:[#allocation52_spill] sm:$0xff] }
 0x900   : > { %v3988_v52 = vpop.f32.mrf.mxu2  ;;  %v2444_v53 = vadd.f32 %v8084_v24, %v7754_v39 }
 0x901   : > { %v4022_v40 = vadd.f32 %v3988_v52, %v3231_v61 }
 0x903   : > { %v4042_v27 = vadd.f32 %v7769_v16, %v4022_v40 }
 0x905   : > { %v4058_v2 = vadd.f32 %v4970_v22, %v4042_v27  ;;  %v2447_v22 = vadd.f32 %v8085_v10, %v7757_v17 }
 0x907   : > { %4074 = vst [vmem:[%s7778_s19 + $0x38] sm:$0xff] %v4058_v2  ;;  %v4977_v2 = vld [vmem:[%s5344_s18 + $0x70] sm:$0xff] }
 0x908   : > { %v3991_v13 = vpop.f32.mrf.mxu2 }
 0x909   : > { %v4023_v7 = vadd.f32 %v3991_v13, %v3232_v26 }
 0x90b   : > { %v4043_v33 = vadd.f32 %v7769_v16, %v4023_v7 }
 0x90c   : > { %v3209_v23 = vpop.f32.mrf.mxu3 }
 0x90d   : > { %v4059_v31 = vadd.f32 %v4971_v47, %v4043_v33  ;;  %v3235_v42 = vadd.f32 %v3209_v23, %v2435_v55  ;;  %v4978_v33 = vld [vmem:[%s5344_s18 + $0x78] sm:$0xff] }
 0x90f   : > { %4075 = vst [vmem:[%s7778_s19 + $0x40] sm:$0xff] %v4059_v31 }
 0x910   : > { %v3994_v38 = vpop.f32.mrf.mxu2 }
 0x911   : > { %v4024_v4 = vadd.f32 %v3994_v38, %v3233_v29 }
 0x913   : > { %v4044_v46 = vadd.f32 %v7769_v16, %v4024_v4 }
 0x914   : > { %v3212_v18 = vpop.f32.mrf.mxu3 }
 0x915   : > { %v4060_v36 = vadd.f32 %v4972_v8, %v4044_v46  ;;  %v3236_v60 = vadd.f32 %v3212_v18, %v2438_v63 }
 0x917   : > { %4076 = vst [vmem:[%s7778_s19 + $0x48] sm:$0xff] %v4060_v36 }
 0x918   : > { %v3997_v3 = vpop.f32.mrf.mxu2 }
 0x919   : > { %v4025_v58 = vadd.f32 %v3997_v3, %v3234_v59 }
 0x91b   : > { %v4045_v34 = vadd.f32 %v7769_v16, %v4025_v58 }
 0x91d   : > { %v4061_v62 = vadd.f32 %v4973_v56, %v4045_v34 }
 0x91f   : > { %4077 = vst [vmem:[%s7778_s19 + $0x50] sm:$0xff] %v4061_v62 }
 0x920   : > { %v4000_v20 = vpop.f32.mrf.mxu2 }
 0x921   : > { %v4026_v49 = vadd.f32 %v4000_v20, %v3235_v42 }
 0x923   : > { %v4046_v6 = vadd.f32 %v7769_v16, %v4026_v49 }
 0x925   : > { %v4062_v57 = vadd.f32 %v4974_v0, %v4046_v6 }
 0x927   : > { %4078 = vst [vmem:[%s7778_s19 + $0x58] sm:$0xff] %v4062_v57 }
 0x928   : > { %v4003_v51 = vpop.f32.mrf.mxu2 }
 0x929   : > { %v4027_v1 = vadd.f32 %v4003_v51, %v3236_v60 }
 0x92b   : > { %v4047_v25 = vadd.f32 %v7769_v16, %v4027_v1 }
 0x92d   : > { %v4063_v28 = vadd.f32 %v4975_v45, %v4047_v25 }
 0x92f   : > { %4079 = vst [vmem:[%s7778_s19 + $0x60] sm:$0xff] %v4063_v28 }
 0x934   : > { %v3215_v43 = vpop.f32.mrf.mxu3 }
 0x935   : > { %v3237_v44 = vadd.f32 %v3215_v43, %v2441_v50 }
 0x936   : > { %v4006_v11 = vpop.f32.mrf.mxu2 }
 0x937   : > { %v4028_v21 = vadd.f32 %v4006_v11, %v3237_v44 }
 0x939   : > { %v4048_v5 = vadd.f32 %v7769_v16, %v4028_v21 }
 0x93b   : > { %v4064_v15 = vadd.f32 %v4976_v37, %v4048_v5 }
 0x93c   : > { %v3218_v30 = vpop.f32.mrf.mxu3 }
 0x93d   : > { %4080 = vst [vmem:[%s7778_s19 + $0x68] sm:$0xff] %v4064_v15  ;;  %v3238_v61 = vadd.f32 %v3218_v30, %v2444_v53 }
 0x944   : > { %v3221_v27 = vpop.f32.mrf.mxu3 }
 0x945   : > { %v3239_v39 = vadd.f32 %v3221_v27, %v2447_v22 }
 0x948   : > { %v4009_v52 = vpop.f32.mrf.mxu2 }
 0x949   : > { %v4029_v40 = vadd.f32 %v4009_v52, %v3238_v61 }
 0x94b   : > { %v4049_v9 = vadd.f32 %v7769_v16, %v4029_v40 }
 0x94d   : > { %v4065_v26 = vadd.f32 %v4977_v2, %v4049_v9 }
 0x94f   : > { %4081 = vst [vmem:[%s7778_s19 + $0x70] sm:$0xff] %v4065_v26 }
 0x950   : > { %v4012_v32 = vpop.f32.mrf.mxu2 }
 0x951   : > { %v4030_v13 = vadd.f32 %v4012_v32, %v3239_v39 }
 0x953   : > { %v4050_v7 = vadd.f32 %v7769_v16, %v4030_v13 }
 0x955   : > { %v4066_v17 = vadd.f32 %v4978_v33, %v4050_v7 }
 0x957   : > { %4082 = vst [vmem:[%s7778_s19 + $0x78] sm:$0xff] %v4066_v17 }
 0x958   : > { %5126 = shalt.err (!%p5123_p11)
}
 0x959   : > { %s5186_s16 = smov 128   ;;  %s5187_s18 = smov 8  }
 0x95a   : > { %4477 = dma.vmem_to_hbm [thread:$0]  (%p5308_p3), %s4097_s9, 2048, %s4099_s27, %s4084_s25, %s5186_s16, %s5186_s16, %s5187_s18  }
 0x95b PF: > { %s4113_s19 = sand.u32 1, %s5161_s21   ;;  %p8086_p12 = scmp.ge.s32.totalorder %s5173_s24, 2 }
 0x95c   : > { %s4114_s14 = scalar_lea.sflag [#allocation4], %s4113_s19 }
 0x95d   : > { %p4494_p13 = pnand %p8086_p12, %p5258_p6 }
 0x95f   : > { %p4495_p0 = pneg %p4494_p13 }
 0x961   : > { %5156 = dma.done.wait (%p4495_p0), %s4114_s14, 2048  }
 0x962   : > { %5158 = vsyncadd (%p4495_p0), %s4114_s14, 4294965248  ;;  %p21_p5 = scmp.ge.s32.totalorder %s5295_s10, 4   ;;  %s8087_s21 = smov %s5165_s22 }
 0x963   : > { %s8088_s22 = smov %s5169_s23  ;;  %s8089_s23 = smov %s5304_s13 }
 0x964   : > { %s8090_s24 = smov %s5295_s10  ;;  %23 = sbr.rel (!%p21_p5) target bundleno = 7 (0x7), region = 101 }
 0x969   :  { %4120 = vsyncpa [#allocation3], 1 }
 0x96a   :  { %4122 = vsyncpa [#allocation3 + $0x1], 1 }
 0x96b   :  { %4123 = vsyncpa [#allocation6], 1 }
 0x96c   :  { %4124 = vsyncpa [#allocation9], 1 }
 0x96d   :  { %4125 = vsyncpa [#allocation4], 1 }
 0x96e   :  { %4127 = vsyncpa [#allocation4 + $0x1], 1 }

// kernel: tpu_custom_call.1
= control target key start
LH: loop header
LB: loop body
LE: loop exit
PB: predicated region body
PF: predicated region fallthrough
CT: control target
= control target key end

     0   :  { %11 = vsyncpa [#allocation3], 0  ;;  %s7888_s0 = inlined_call_operand.hbm [shape: f32[2,128,128], index: 0, kind: input, shape index: {}]   ;;  %s7889_s1 = inlined_call_operand.hbm [shape: f32[1,128], index: 1, kind: input, shape index: {}]   ;;  %s7890_s2 = inlined_call_operand.vmem [shape: f32[1,128], index: 2, kind: input, shape index: {}]   ;;  %s7891_s3 = inlined_call_operand.hbm [shape: f32[128,384], index: 3, kind: input, shape index: {}]   ;;  %s7892_s4 = inlined_call_operand.hbm [shape: f32[128,128], index: 4, kind: input, shape index: {}]   ;;  %s7893_s5 = inlined_call_operand.vmem [shape: f32[1,128], index: 5, kind: input, shape index: {}]   ;;  %s7894_s6 = inlined_call_operand.hbm [shape: f32[2,128,128], index: 6, kind: output, shape index: {}]  }
   0x1   :  { %13 = vsyncpa [#allocation3 + $0x1], 0 }
   0x2   :  { %14 = vsyncpa [#allocation6], 0 }
   0x3   :  { %15 = vsyncpa [#allocation9], 0 }
   0x4   :  { %16 = vsyncpa [#allocation4], 0 }
   0x5   :  { %18 = vsyncpa [#allocation4 + $0x1], 0  ;;  %s5223_s21 = smov 0   ;;  %s5225_s22 = smov 0  }
   0x6   :  { %s5227_s23 = smov 0   ;;  %s5229_s24 = smov 0  }
   0x7 LB: > { %s5244_s25 = sadd.s32 4294967295, %s5173_s24   ;;  %s4201_s26 = sadd.s32 4294967294, %s5173_s24   ;;  %s5173_s24 = sphi %s5229_s24, %s8090_s24   ;;  %s5169_s23 = sphi %s5227_s23, %s8089_s23   ;;  %s5165_s22 = sphi %s5225_s22, %s8088_s22   ;;  %s5161_s21 = sphi %s5223_s21, %s8087_s21  }
   0x8   : > { %p44_p0 = scmp.ne.s32.totalorder %s5165_s22, %s5161_s21  ;;  %p45_p1 = scmp.eq.s32.totalorder %s5244_s25, 0 }
   0x9   : > { %p173_p2 = scmp.eq.s32.totalorder %s5244_s25, 1  ;;  %p179_p3 = scmp.eq.s32.totalorder %s4201_s26, 1 }
   0xa   : > { %p5253_p4 = por %p45_p1, %p44_p0  ;;  %p4202_p5 = scmp.ge.s32.totalorder %s5173_s24, 1 }
   0xb   : > { %p5258_p6 = por %p179_p3, %p44_p0  ;;  %p186_p7 = scmp.lt.s32.totalorder %s5173_s24, 3 }
   0xc   : > { %s198_s7 = sshll.u32 %s7889_s1, 4  ;;  %s5175_s9 = smov [#allocation5]   ;;  %s199_s7 = int_to_ptr.hbm [resolvable:$true] %s198_s7 }
   0xd   : > { %p5266_p8 = pnand %p4202_p5, %p186_p7  ;;  %s200_s10 = sshll.u32 %s5175_s9, 4  ;;  %s201_s10 = int_to_ptr.vmem [resolvable:$true] %s200_s10 }
   0xe   : > { %s212_s13 = sshll.u32 %s7891_s3, 4  ;;  %s5176_s15 = smov [#allocation7]   ;;  %s213_s13 = int_to_ptr.hbm [resolvable:$true] %s212_s13 }
   0xf   : > { %p4479_p10 = pneg %p5266_p8  ;;  %s214_s16 = sshll.u32 %s5176_s15, 4  ;;  %s215_s16 = int_to_ptr.vmem [resolvable:$true] %s214_s16 }
  0x10   : > { %s5177_s17 = smov 384   ;;  %s5178_s18 = smov 24  }
  0x11   : > { %p5278_p11 = pnand %p4479_p10, %p45_p1  ;;  %s226_s26 = sshll.u32 %s7892_s4, 4  ;;  %s227_s26 = int_to_ptr.hbm [resolvable:$true] %s226_s26 }
  0x12   : > { %s5179_s29 = smov [#allocation8]   ;;  %s7896_s9 = smov 8  }
  0x13   : > { %4482 = dma.hbm_to_vmem [thread:$0]  (!%p5278_p11), %s199_s7, 16, %s201_s10, [#allocation6]  }
  0x14   : > { %4485 = dma.hbm_to_vmem [thread:$0]  (!%p5278_p11), %s213_s13, 6144, %s215_s16, [#allocation6], %s5177_s17, %s5177_s17, %s5178_s18  }
  0x15   : > { %s228_s30 = sshll.u32 %s5179_s29, 4  ;;  %s7895_s7 = smov 128   ;;  %s229_s30 = int_to_ptr.vmem [resolvable:$true] %s228_s30 }
  0x16   : > { %4488 = dma.hbm_to_vmem [thread:$0]  (!%p5278_p11), %s227_s26, 2048, %s229_s30, [#allocation9], %s7895_s7, %s7895_s7, %s7896_s9  }
  0x17   : > { %s5295_s10 = sadd.s32 1, %s5173_s24   ;;  %s31_s12 = sadd.s32 1, %s5169_s23 }
  0x18   : > { %s28_s11 = ssub.s32 %s5173_s24, %s5295_s10  ;;  %p38_p13 = scmp.ne.s32.totalorder %s5169_s23, %s5165_s22 }
  0x19   : > { %p29_p12 = scmp.eq.s32.totalorder %s28_s11, 0  ;;  %p39_p0 = scmp.eq.s32.totalorder %s5173_s24, 0 }
  0x1a   : > { %p5308_p3 = por %p173_p2, %p38_p13  ;;  %p4500_p5 = scmp.lt.s32.totalorder %s5173_s24, 2 }
  0x1b   : > { %s5304_s13 = scalar_select %p29_p12, %s5169_s23, %s31_s12  }
  0x1c   : > { %s245_s14 = sand.u32 1, %s5169_s23   ;;  %s4413_s16 = sshll.u32 %s5173_s24, 7 }
  0x1d   : > { %p40_p7 = por %p39_p0, %p38_p13  ;;  %s4207_s17 = sshll.u32 %s245_s14, 7 }
  0x1e   : > { %s254_s20 = scalar_lea.hbm %s7888_s0, %s4413_s16  ;;  %s249_s29 = scalar_lea.vmem [#allocation2], %s4207_s17 }
  0x1f   : > { %s255_s26 = sshll.u32 %s254_s20, 4  ;;  %s257_s30 = sshll.u32 %s249_s29, 4  ;;  %s256_s26 = int_to_ptr.hbm [resolvable:$true] %s255_s26  ;;  %s258_s30 = int_to_ptr.vmem [resolvable:$true] %s257_s30 }
  0x20   : > { %p5318_p10 = pnand %p4500_p5, %p40_p7  ;;  %s246_s12 = scalar_lea.sflag [#allocation3], %s245_s14 }
  0x21   : > { %s5069_s7 = sshra.s32 %s256_s26, 4  ;;  %s5076_s17 = scalar_lea.hbm %s7888_s0, 256  ;;  %s5070_s7 = int_to_ptr.hbm [resolvable:$true] %s5069_s7 }
  0x22   : > { %s5071_s9 = scalar_lea.hbm %s5070_s7, 128  ;;  %p5073_p11 = pneg %p5318_p10 }
  0x23   : > { %p5072_p2 = scmp.ne.s32.totalorder %s5070_s7, %s5071_s9  ;;  %p5077_p0 = scmp.lt.s32.totalorder %s5070_s7, %s7888_s0 }
  0x24   : > { %p5078_p5 = scmp.lt.s32.totalorder %s5076_s17, %s5071_s9 }
  0x25   : > { %p5074_p12 = pnand %p5073_p11, %p5072_p2 }
  0x26   : > { %p5079_p7 = por %p5078_p5, %p5077_p0 }
  0x27   : > { %p5075_p13 = pneg %p5074_p12 }
  0x29   : > { %p5080_p9 = pnand %p5079_p7, %p5075_p13 }
  0x2b   : > { %5083 = shalt.err (!%p5080_p9)
}
  0x2c   : > { %s7932_s14 = smov 8   ;;  %s7933_s29 = smov 128  }
  0x2d   : > { %4492 = dma.hbm_to_vmem [thread:$0]  (!%p5318_p10), %s256_s26, 2048, %s258_s30, %s246_s12, %s7933_s29, %s7933_s29, %s7932_s14  }
  0x2e   : > { %269 = sbr.rel (%p5266_p8) target bundleno = 2395 (0x95b), region = 44 }
  0x33   : > { %s5338_s16 = sand.u32 1, %s5165_s22  }
  0x34   : > { %s4211_s7 = sshll.u32 %s5338_s16, 7  ;;  %s272_s9 = scalar_lea.sflag [#allocation3], %s5338_s16 }
  0x35   : > { %s5344_s18 = scalar_lea.vmem [#allocation2], %s4211_s7 }
  0x36   : > { %5144 = dma.done.wait (%p5253_p4), %s272_s9, 2048  }
  0x37   : > { %5146 = vsyncadd (%p5253_p4), %s272_s9, 4294965248 }
  0x38   : > { %5148 = dma.done.wait (%p45_p1), [#allocation6], 6160  }
  0x39   : > { %5150 = vsyncadd (%p45_p1), [#allocation6], 4294961136 }
  0x3a   : > { %5152 = dma.done.wait (%p45_p1), [#allocation9], 2048  }
  0x3b   : > { %5154 = vsyncadd (%p45_p1), [#allocation9], 4294965248  ;;  %v320_v0 = vld [vmem:[%s5344_s18] sm:$0xff]  ;;  %v321_v1 = vld [vmem:[%s5344_s18 + $0x8] sm:$0xff]  ;;  %v5182_v14 = vmov 128.0   ;;  %s5183_s26 = smov 96  }
  0x3c   : > { %336 = vadd.xlane.f32.xlu0 %v320_v0  ;;  %338 = vadd.xlane.f32.xlu1 %v321_v1  ;;  %v322_v2 = vld [vmem:[%s5344_s18 + $0x10] sm:$0xff]  ;;  %v328_v3 = vld [vmem:[%s5344_s18 + $0x40] sm:$0xff]  ;;  %v329_v4 = vld [vmem:[%s5344_s18 + $0x48] sm:$0xff]  ;;  %4673 = vrcp.f32 %v5182_v14  ;;  %s5184_s30 = smov 32   ;;  %s5185_s11 = smov 64  }
  0x3d   : > { %340 = vadd.xlane.f32.xlu2 %v322_v2  ;;  %v330_v5 = vld [vmem:[%s5344_s18 + $0x50] sm:$0xff]  ;;  %v323_v6 = vld [vmem:[%s5344_s18 + $0x18] sm:$0xff]  ;;  %v5369_v8 = vld [vmem:[%s5344_s18 + $0x60] sm:$0xff]  ;;  %s7778_s19 = scalar_lea.vmem [#allocation10], %s4211_s7  ;;  %s4414_s20 = sshll.u32 %s5244_s25, 7 }
  0x3e   : > { %v5366_v7 = vld [vmem:[%s5344_s18 + $0x58] sm:$0xff]  ;;  %v333_v9 = vld [vmem:[%s5344_s18 + $0x68] sm:$0xff]  ;;  %v5375_v10 = vld [vmem:[%s5344_s18 + $0x70] sm:$0xff]  ;;  %s4095_s7 = scalar_lea.hbm %s7894_s6, %s4414_s20  ;;  %s4096_s9 = sshll.u32 %s7778_s19, 4  ;;  %s4097_s9 = int_to_ptr.vmem [resolvable:$true] %s4096_s9 }
  0x3f   : > { %v5379_v11 = vld [vmem:[%s5344_s18 + $0x78] sm:$0xff]  ;;  %v5383_v12 = vld [vmem:[%s5344_s18 + $0x20] sm:$0xff]  ;;  %v5387_v13 = vld [vmem:[%s5344_s18 + $0x28] sm:$0xff]  ;;  %s4098_s27 = sshll.u32 %s4095_s7, 4  ;;  %s4084_s25 = scalar_lea.sflag [#allocation4], %s5338_s16  ;;  %s4099_s27 = int_to_ptr.hbm [resolvable:$true] %s4098_s27 }
  0x40   : > { %v748_v59 = vld [vmem:[#allocation7 + $0x168] sm:$0xff]  ;;  %v750_v60 = vld [vmem:[#allocation7 + $0x178] sm:$0xff]  ;;  %v745_v61 = vld [vmem:[#allocation7 + $0x150] sm:$0xff]  ;;  %s5113_s8 = sshra.s32 %s4099_s27, 4  ;;  %s5119_s12 = scalar_lea.hbm %s7894_s6, 256  ;;  %s5114_s8 = int_to_ptr.hbm [resolvable:$true] %s5113_s8 }
  0x41   : > { %751 = vmatpush.msra.mxu0 %v748_v59  ;;  %v747_v63 = vld [vmem:[#allocation7 + $0x160] sm:$0xff]  ;;  %881 = vmatpush.msra.mxu2 %v750_v60  ;;  %v714_v60 = vld [vmem:[#allocation7 + $0x58] sm:$0xff]  ;;  %p5120_p9 = scmp.lt.s32.totalorder %s5114_s8, %s7894_s6 }
  0x42   : > { %v4674_v15 = vpop.eup %4673  ;;  %4415 = vmatpush.msra.mxu3 %v748_v59  ;;  %v725_v59 = vld [vmem:[#allocation7 + $0xb0] sm:$0xff] }
  0x43   : > { %v369_v16 = vmul.f32 128.0, %v4674_v15  ;;  %vm373_vm0 = vweird.f32 %v4674_v15  ;;  %752 = vmatpush.msra.mxu0 %v745_v61  ;;  %882 = vmatpush.msra.mxu2 %v747_v63  ;;  %v711_v63 = vld [vmem:[#allocation7 + $0x40] sm:$0xff] }
  0x44   : > { %352 = vadd.xlane.f32.xlu0 %v328_v3  ;;  %354 = vadd.xlane.f32.xlu1 %v329_v4 }
  0x45   : > { %356 = vadd.xlane.f32.xlu2 %v330_v5  ;;  %v370_v17 = vsub.f32 1.0, %v369_v16  ;;  %4416 = vmatpush.msra.mxu3 %v745_v61  ;;  %v709_v61 = vld [vmem:[#allocation7 + $0x30] sm:$0xff] }
  0x47   : > { %v371_v18 = vmul.f32 %v4674_v15, %v370_v17 }
  0x49   : > { %v372_v19 = vadd.f32 %v4674_v15, %v371_v18 }
  0x4b   : > { %v5390_v20 = vsel %vm373_vm0, %v4674_v15, %v372_v19 }
  0x4c   : > { %342 = vadd.xlane.f32.xlu0 %v323_v6  ;;  %358 = vadd.xlane.f32.xlu1 %v5366_v7 }
  0x4d   : > { %360 = vadd.xlane.f32.xlu2 %v5369_v8 }
  0x54   : > { %362 = vadd.xlane.f32.xlu0 %v333_v9 }
  0x5c   : > { %364 = vadd.xlane.f32.xlu0 %v5375_v10 }
  0x64   : > { %366 = vadd.xlane.f32.xlu0 %v5379_v11 }
  0x6c   : > { %344 = vadd.xlane.f32.xlu0 %v5383_v12 }
  0x74   : > { %346 = vadd.xlane.f32.xlu0 %v5387_v13 }
  0xaf   : > { %v337_v21 = vpop.xlane.xlu0 %336  ;;  %v339_v22 = vpop.xlane.xlu1 %338 }
  0xb0   : > { %v375_v23 = vmul.f32 %v5390_v20, %v337_v21  ;;  %v376_v25 = vmul.f32 %v5390_v20, %v339_v22  ;;  %v341_v26 = vpop.xlane.xlu2 %340  ;;  %v742_v22 = vld [vmem:[#allocation7 + $0x138] sm:$0xff] }
  0xb1   : > { %v377_v34 = vmul.f32 %v5390_v20, %v341_v26  ;;  %753 = vmatpush.msra.mxu0 %v742_v22  ;;  %4417 = vmatpush.msra.mxu3 %v742_v22  ;;  %v736_v26 = vld [vmem:[#allocation7 + $0x108] sm:$0xff] }
  0xb2   : > { %v5393_v24 = vsub.f32 %v320_v0, %v375_v23  ;;  %v5398_v28 = vsub.f32 %v321_v1, %v376_v25  ;;  %v744_v23 = vld [vmem:[#allocation7 + $0x148] sm:$0xff]  ;;  %v741_v25 = vld [vmem:[#allocation7 + $0x130] sm:$0xff] }
  0xb3   : > { %v5409_v38 = vsub.f32 %v322_v2, %v377_v34  ;;  %883 = vmatpush.msra.mxu2 %v744_v23  ;;  %v5482_v34 = vld [vmem:[#allocation7 + $0x140] sm:$0xff] }
  0xb4   : > { %v407_v27 = vmul.f32 %v5393_v24, %v5393_v24  ;;  %v408_v32 = vmul.f32 %v5398_v28, %v5398_v28 }
  0xb5   : > { %v409_v43 = vmul.f32 %v5409_v38, %v5409_v38  ;;  %884 = vmatpush.msra.mxu2 %v741_v25 }
  0xb6   : > { %423 = vadd.xlane.f32.xlu1 %v407_v27  ;;  %v5476_v27 = vld [vmem:[#allocation7 + $0x170] sm:$0xff] }
  0xb7   : > { %v353_v29 = vpop.xlane.xlu0 %352  ;;  %v355_v30 = vpop.xlane.xlu1 %354  ;;  %4431 = vmatpush.msra.mxu1 %v5476_v27 }
  0xb8   : > { %v383_v31 = vmul.f32 %v5390_v20, %v353_v29  ;;  %v384_v35 = vmul.f32 %v5390_v20, %v355_v30  ;;  %v357_v37 = vpop.xlane.xlu2 %356  ;;  %v738_v29 = vld [vmem:[#allocation7 + $0x118] sm:$0xff] }
  0xb9   : > { %v385_v41 = vmul.f32 %v5390_v20, %v357_v37  ;;  %885 = vmatpush.msra.mxu2 %v738_v29  ;;  %v5479_v30 = vld [vmem:[#allocation7 + $0x158] sm:$0xff]  ;;  %v5485_v37 = vld [vmem:[#allocation7 + $0x128] sm:$0xff] }
  0xba   : > { %v5403_v33 = vsub.f32 %v328_v3, %v383_v31  ;;  %v5411_v39 = vsub.f32 %v329_v4, %v384_v35  ;;  %v735_v31 = vld [vmem:[#allocation7 + $0x100] sm:$0xff]  ;;  %4432 = vmatpush.msra.mxu1 %v5479_v30  ;;  %v732_v35 = vld [vmem:[#allocation7 + $0xe8] sm:$0xff] }
  0xbb   : > { %v5419_v45 = vsub.f32 %v330_v5, %v385_v41  ;;  %886 = vmatpush.msra.mxu2 %v735_v31  ;;  %v724_v41 = vld [vmem:[#allocation7 + $0xa8] sm:$0xff] }
  0xbc   : > { %v415_v36 = vmul.f32 %v5403_v33, %v5403_v33  ;;  %v416_v44 = vmul.f32 %v5411_v39, %v5411_v39  ;;  %4433 = vmatpush.msra.mxu1 %v5482_v34 }
  0xbd   : > { %v417_v51 = vmul.f32 %v5419_v45, %v5419_v45  ;;  %887 = vmatpush.msra.mxu2 %v732_v35 }
  0xbe   : > { %425 = vadd.xlane.f32.xlu1 %v408_v32  ;;  %439 = vadd.xlane.f32.xlu2 %v415_v36  ;;  %v730_v32 = vld [vmem:[#allocation7 + $0xd8] sm:$0xff]  ;;  %v727_v36 = vld [vmem:[#allocation7 + $0xc0] sm:$0xff] }
  0xbf   : > { %v343_v40 = vpop.xlane.xlu0 %342  ;;  %v359_v47 = vpop.xlane.xlu1 %358  ;;  %4434 = vmatpush.msra.mxu1 %v5485_v37 }
  0xc0   : > { %v378_v42 = vmul.f32 %v5390_v20, %v343_v40  ;;  %v361_v49 = vpop.xlane.xlu2 %360  ;;  %v386_v55 = vmul.f32 %v5390_v20, %v359_v47  ;;  %v729_v40 = vld [vmem:[#allocation7 + $0xd0] sm:$0xff]  ;;  %v5491_v47 = vld [vmem:[#allocation7 + $0xf8] sm:$0xff] }
  0xc1   : > { %v387_v54 = vmul.f32 %v5390_v20, %v361_v49  ;;  %888 = vmatpush.msra.mxu2 %v729_v40  ;;  %v718_v49 = vld [vmem:[#allocation7 + $0x78] sm:$0xff] }
  0xc2   : > { %v5421_v46 = vsub.f32 %v323_v6, %v378_v42  ;;  %v5435_v57 = vsub.f32 %v5366_v7, %v386_v55  ;;  %v5450_v6 = vld [vmem:[%s5344_s18 + $0x30] sm:$0xff]  ;;  %v5453_v7 = vld [vmem:[%s5344_s18 + $0x38] sm:$0xff] }
  0xc3   : > { %v5438_v58 = vsub.f32 %v5369_v8, %v387_v54  ;;  %v5488_v42 = vld [vmem:[#allocation7 + $0x110] sm:$0xff]  ;;  %v728_v54 = vld [vmem:[#allocation7 + $0xc8] sm:$0xff] }
  0xc4   : > { %v410_v52 = vmul.f32 %v5421_v46, %v5421_v46  ;;  %v418_v0 = vmul.f32 %v5435_v57, %v5435_v57  ;;  %4435 = vmatpush.msra.mxu1 %v5488_v42  ;;  %v717_v55 = vld [vmem:[#allocation7 + $0x70] sm:$0xff] }
  0xc5   : > { %v419_v1 = vmul.f32 %v5438_v58, %v5438_v58 }
  0xc6   : > { %427 = vadd.xlane.f32.xlu1 %v409_v43  ;;  %441 = vadd.xlane.f32.xlu2 %v416_v44  ;;  %v726_v43 = vld [vmem:[#allocation7 + $0xb8] sm:$0xff]  ;;  %v721_v44 = vld [vmem:[#allocation7 + $0x90] sm:$0xff] }
  0xc7   : > { %v363_v48 = vpop.xlane.xlu0 %362  ;;  %889 = vmatpush.msra.mxu2 %v726_v43  ;;  %4436 = vmatpush.msra.mxu1 %v5491_v47 }
  0xc8   : > { %v388_v50 = vmul.f32 %v5390_v20, %v363_v48  ;;  %v723_v48 = vld [vmem:[#allocation7 + $0xa0] sm:$0xff] }
  0xc9   : > { %890 = vmatpush.msra.mxu2 %v723_v48 }
  0xca   : > { %v5428_v53 = vsub.f32 %v333_v9, %v388_v50  ;;  %v5494_v50 = vld [vmem:[#allocation7 + $0xe0] sm:$0xff] }
  0xcb   : > { %4437 = vmatpush.msra.mxu1 %v5494_v50 }
  0xcc   : > { %v420_v56 = vmul.f32 %v5428_v53, %v5428_v53 }
  0xcd   : > { %4438 = vmatpush.msra.mxu1 %v728_v54 }
  0xce   : > { %443 = vadd.xlane.f32.xlu2 %v417_v51  ;;  %429 = vadd.xlane.f32.xlu1 %v410_v52  ;;  %v720_v51 = vld [vmem:[#allocation7 + $0x88] sm:$0xff]  ;;  %v715_v52 = vld [vmem:[#allocation7 + $0x60] sm:$0xff] }
  0xcf   : > { %449 = vadd.xlane.f32.xlu0 %v420_v56  ;;  %v365_v62 = vpop.xlane.xlu0 %364  ;;  %891 = vmatpush.msra.mxu2 %v720_v51  ;;  %v712_v56 = vld [vmem:[#allocation7 + $0x48] sm:$0xff] }
  0xd0   : > { %v389_v4 = vmul.f32 %v5390_v20, %v365_v62  ;;  %4439 = vmatpush.msra.mxu1 %v725_v59  ;;  %v722_v62 = vld [vmem:[#allocation7 + $0x98] sm:$0xff] }
  0xd1   : > { %892 = vmatpush.msra.mxu2 %v717_v55  ;;  %v5535_v55 = vld [vmem:[%s7890_s2] ss:$0 sm:$0xff] }
  0xd2   : > { %v5460_v9 = vsub.f32 %v5375_v10, %v389_v4  ;;  %4440 = vmatpush.msra.mxu1 %v722_v62  ;;  %v716_v4 = vld [vmem:[#allocation7 + $0x68] sm:$0xff] }
  0xd3   : > { %893 = vmatpush.msra.mxu2 %v714_v60 }
  0xd5   : > { %894 = vmatpush.msra.mxu2 %v711_v63 }
  0xd6   : > { %445 = vadd.xlane.f32.xlu2 %v418_v0  ;;  %447 = vadd.xlane.f32.xlu1 %v419_v1  ;;  %v706_v0 = vld [vmem:[#allocation7 + $0x18] sm:$0xff]  ;;  %v719_v1 = vld [vmem:[#allocation7 + $0x80] sm:$0xff] }
  0xd7   : > { %v367_v2 = vpop.xlane.xlu0 %366  ;;  %4441 = vmatpush.msra.mxu1 %v719_v1 }
  0xd8   : > { %v390_v3 = vmul.f32 %v5390_v20, %v367_v2  ;;  %v708_v2 = vld [vmem:[#allocation7 + $0x28] sm:$0xff] }
  0xd9   : > { %895 = vmatpush.msra.mxu2 %v708_v2  ;;  %4442 = vmatpush.msra.mxu1 %v716_v4 }
  0xda   : > { %v5447_v5 = vsub.f32 %v5379_v11, %v390_v3  ;;  %v421_v11 = vmul.f32 %v5460_v9, %v5460_v9  ;;  %v703_v3 = vld [vmem:[#allocation7] sm:$0xff] }
  0xdc   : > { %v422_v8 = vmul.f32 %v5447_v5, %v5447_v5 }
  0xde   : > { %348 = vadd.xlane.f32.xlu2 %v5450_v6  ;;  %350 = vadd.xlane.f32.xlu1 %v5453_v7 }
  0xdf   : > { %453 = vadd.xlane.f32.xlu0 %v422_v8  ;;  %v345_v14 = vpop.xlane.xlu0 %344  ;;  %v705_v8 = vld [vmem:[#allocation7 + $0x10] sm:$0xff] }
  0xe0   : > { %v379_v15 = vmul.f32 %v5390_v20, %v345_v14  ;;  %896 = vmatpush.msra.mxu2 %v705_v8  ;;  %v713_v14 = vld [vmem:[#allocation7 + $0x50] sm:$0xff] }
  0xe1   : > { %4443 = vmatpush.msra.mxu1 %v713_v14 }
  0xe2   : > { %v5466_v16 = vsub.f32 %v5383_v12, %v379_v15  ;;  %v739_v12 = vld [vmem:[#allocation7 + $0x120] sm:$0xff] }
  0xe3   : > { %754 = vmatpush.msra.mxu0 %v739_v12  ;;  %4418 = vmatpush.msra.mxu3 %v739_v12 }
  0xe4   : > { %v411_v17 = vmul.f32 %v5466_v16, %v5466_v16 }
  0xe5   : > { %755 = vmatpush.msra.mxu0 %v736_v26  ;;  %4419 = vmatpush.msra.mxu3 %v736_v26 }
  0xe6   : > { %451 = vadd.xlane.f32.xlu2 %v421_v11  ;;  %431 = vadd.xlane.f32.xlu1 %v411_v17  ;;  %v710_v17 = vld [vmem:[#allocation7 + $0x38] sm:$0xff] }
  0xe7   : > { %v347_v18 = vpop.xlane.xlu0 %346  ;;  %4444 = vmatpush.msra.mxu1 %v710_v17 }
  0xe8   : > { %v380_v19 = vmul.f32 %v5390_v20, %v347_v18 }
  0xea   : > { %v5472_v10 = vsub.f32 %v5387_v13, %v380_v19  ;;  %v733_v13 = vld [vmem:[#allocation7 + $0xf0] sm:$0xff]  ;;  %v5501_v19 = vld [vmem:[#allocation7 + $0x20] sm:$0xff] }
  0xeb   : > { %756 = vmatpush.msra.mxu0 %v733_v13  ;;  %4420 = vmatpush.msra.mxu3 %v733_v13 }
  0xec   : > { %v412_v21 = vmul.f32 %v5472_v10, %v5472_v10  ;;  %4445 = vmatpush.msra.mxu1 %v5501_v19 }
  0xed   : > { %757 = vmatpush.msra.mxu0 %v730_v32  ;;  %4421 = vmatpush.msra.mxu3 %v730_v32 }
  0xee   : > { %433 = vadd.xlane.f32.xlu2 %v412_v21  ;;  %v5505_v21 = vld [vmem:[#allocation7 + $0x8] sm:$0xff] }
  0xef   : > { %758 = vmatpush.msra.mxu0 %v727_v36  ;;  %4422 = vmatpush.msra.mxu3 %v727_v36 }
  0xf0   : > { %4446 = vmatpush.msra.mxu1 %v5505_v21 }
  0xf1   : > { %759 = vmatpush.msra.mxu0 %v724_v41  ;;  %4423 = vmatpush.msra.mxu3 %v724_v41 }
  0xf3   : > { %760 = vmatpush.msra.mxu0 %v721_v44  ;;  %4424 = vmatpush.msra.mxu3 %v721_v44 }
  0xf5   : > { %761 = vmatpush.msra.mxu0 %v718_v49  ;;  %4425 = vmatpush.msra.mxu3 %v718_v49  ;;  %v5528_v49 = vld [vmem:[#allocation5] ss:$0 sm:$0xff] }
  0xf7   : > { %762 = vmatpush.msra.mxu0 %v715_v52  ;;  %4426 = vmatpush.msra.mxu3 %v715_v52 }
  0xf9   : > { %763 = vmatpush.msra.mxu0 %v712_v56  ;;  %4427 = vmatpush.msra.mxu3 %v712_v56 }
  0xfb   : > { %764 = vmatpush.msra.mxu0 %v709_v61  ;;  %4428 = vmatpush.msra.mxu3 %v709_v61 }
  0xfd   : > { %765 = vmatpush.msra.mxu0 %v706_v0  ;;  %4429 = vmatpush.msra.mxu3 %v706_v0 }
  0xff   : > { %766 = vmatpush.msra.mxu0 %v703_v3  ;;  %4430 = vmatpush.msra.mxu3 %v703_v3 }
 0x101   : > { %816 = vmatpush.msrb.mxu0 %v5476_v27 }
 0x103   : > { %817 = vmatpush.msrb.mxu0 %v5479_v30 }
 0x105   : > { %818 = vmatpush.msrb.mxu0 %v5482_v34 }
 0x107   : > { %819 = vmatpush.msrb.mxu0 %v5485_v37 }
 0x109   : > { %820 = vmatpush.msrb.mxu0 %v5488_v42 }
 0x10b   : > { %821 = vmatpush.msrb.mxu0 %v5491_v47 }
 0x10d   : > { %822 = vmatpush.msrb.mxu0 %v5494_v50 }
 0x10f   : > { %823 = vmatpush.msrb.mxu0 %v728_v54 }
 0x111   : > { %824 = vmatpush.msrb.mxu0 %v725_v59 }
 0x113   : > { %825 = vmatpush.msrb.mxu0 %v722_v62 }
 0x115   : > { %826 = vmatpush.msrb.mxu0 %v719_v1 }
 0x117   : > { %827 = vmatpush.msrb.mxu0 %v716_v4 }
 0x119   : > { %828 = vmatpush.msrb.mxu0 %v713_v14 }
 0x11b   : > { %829 = vmatpush.msrb.mxu0 %v710_v17 }
 0x11d   : > { %830 = vmatpush.msrb.mxu0 %v5501_v19 }
 0x11f   : > { %831 = vmatpush.msrb.mxu0 %v5505_v21 }
 0x129   : > { %v424_v15 = vpop.xlane.xlu1 %423 }
 0x12a   : > { %v455_v11 = vmul.f32 %v424_v15, %v5390_v20 }
 0x12c   : > { %v471_v18 = vadd.f32 1e-05, %v455_v11 }
 0x12e   : > { %4675 = vrsqrt.f32 %v471_v18  ;;  %vm493_vm2 = vweird.f32 %v471_v18 }
 0x131   : > { %v426_v22 = vpop.xlane.xlu1 %425  ;;  %v440_v23 = vpop.xlane.xlu2 %439 }
 0x132   : > { %v456_v12 = vmul.f32 %v426_v22, %v5390_v20  ;;  %v463_v25 = vmul.f32 %v440_v23, %v5390_v20 }
 0x134   : > { %v4676_v26 = vpop.eup %4675  ;;  %v5512_v27 = vadd.f32 1e-05, %v456_v12  ;;  %v5514_v29 = vadd.f32 1e-05, %v463_v25 }
 0x135   : > { %v488_v13 = vmul.f32 %v4676_v26, %v471_v18  ;;  %vm494_vm1 = vweird.f32 %v4676_v26 }
 0x136   : > { %4677 = vrsqrt.f32 %v5512_v27  ;;  %vm495_vm3 = vmor %vm493_vm2, %vm494_vm1  ;;  %vm503_vm6 = vweird.f32 %v5512_v27  ;;  %vm573_vm8 = vweird.f32 %v5514_v29 }
 0x137   : > { %v489_v30 = vmul.f32 %v4676_v26, %v488_v13  ;;  %4679 = vrsqrt.f32 %v5514_v29 }
 0x139   : > { %v490_v31 = vmul.f32 0.5, %v489_v30  ;;  %v428_v32 = vpop.xlane.xlu1 %427  ;;  %v442_v34 = vpop.xlane.xlu2 %441 }
 0x13a   : > { %v457_v35 = vmul.f32 %v428_v32, %v5390_v20  ;;  %v464_v36 = vmul.f32 %v442_v34, %v5390_v20 }
 0x13b   : > { %v491_v37 = vsub.f32 1.5, %v490_v31 }
 0x13c   : > { %v4678_v40 = vpop.eup %4677  ;;  %v5521_v41 = vadd.f32 1e-05, %v457_v35  ;;  %v5523_v42 = vadd.f32 1e-05, %v464_v36 }
 0x13d   : > { %v4680_v43 = vpop.eup %4679  ;;  %v492_v44 = vmul.f32 %v4676_v26, %v491_v37  ;;  %v498_v47 = vmul.f32 %v4678_v40, %v5512_v27  ;;  %vm504_vm4 = vweird.f32 %v4678_v40 }
 0x13e   : > { %v568_v48 = vmul.f32 %v4680_v43, %v5514_v29  ;;  %4681 = vrsqrt.f32 %v5521_v41  ;;  %vm574_vm5 = vweird.f32 %v4680_v43  ;;  %vm505_vm7 = vmor %vm503_vm6, %vm504_vm4  ;;  %vm513_vm12 = vweird.f32 %v5521_v41 }
 0x13f   : > { %v499_v50 = vmul.f32 %v4678_v40, %v498_v47  ;;  %4683 = vrsqrt.f32 %v5523_v42  ;;  %v496_v51 = vsel %vm495_vm3, %v4676_v26, %v492_v44  ;;  %vm575_vm9 = vmor %vm573_vm8, %vm574_vm5  ;;  %vm583_vm14 = vweird.f32 %v5523_v42 }
 0x140   : > { %v569_v52 = vmul.f32 %v4680_v43, %v568_v48  ;;  %v647_v54 = vmul.f32 %v496_v51, %v5393_v24 }
 0x141   : > { %v500_v56 = vmul.f32 0.5, %v499_v50  ;;  %v444_v59 = vpop.xlane.xlu2 %443  ;;  %v430_v60 = vpop.xlane.xlu1 %429 }
 0x142   : > { %v570_v61 = vmul.f32 0.5, %v569_v52  ;;  %v465_v62 = vmul.f32 %v444_v59, %v5390_v20  ;;  %v458_v63 = vmul.f32 %v430_v60, %v5390_v20  ;;  %v450_v0 = vpop.xlane.xlu0 %449  ;;  %v667_v1 = vmul.f32 %v5528_v49, %v647_v54 }
 0x143   : > { %v501_v2 = vsub.f32 1.5, %v500_v56  ;;  %v468_v18 = vmul.f32 %v450_v0, %v5390_v20 }
 0x144   : > { %v5540_v24 = vpop.eup %4681  ;;  %v571_v3 = vsub.f32 1.5, %v570_v61  ;;  %v5542_v4 = vadd.f32 1e-05, %v465_v62  ;;  %v5544_v8 = vadd.f32 1e-05, %v458_v63  ;;  %v5547_v14 = vadd.f32 %v5535_v55, %v667_v1 }
 0x145   : > { %v5550_v15 = vpop.eup %4683  ;;  %v502_v11 = vmul.f32 %v4678_v40, %v501_v2  ;;  %v508_v17 = vmul.f32 %v5540_v24, %v5521_v41  ;;  %v5567_v27 = vadd.f32 1e-05, %v468_v18  ;;  %vm514_vm10 = vweird.f32 %v5540_v24 }
 0x146   : > { %v572_v22 = vmul.f32 %v4680_v43, %v571_v3  ;;  %v578_v23 = vmul.f32 %v5550_v15, %v5523_v42  ;;  %4685 = vrsqrt.f32 %v5542_v4  ;;  %767 = vmatmul.f32.vlgmr.msra.gmra.mxu0 %v5547_v14  ;;  %897 = vmatmul.f32.vlgmr.msra.gmra.mxu2 %v5547_v14  ;;  %vm584_vm11 = vweird.f32 %v5550_v15  ;;  %vm5599_vm13 = vmor %vm513_vm12, %vm514_vm10 }
 0x147   : > { %v509_v19 = vmul.f32 %v5540_v24, %v508_v17  ;;  %4687 = vrsqrt.f32 %v5544_v8  ;;  %v506_v25 = vsel %vm505_vm7, %v4678_v40, %v502_v11  ;;  %vm5609_vm15 = vmor %vm583_vm14, %vm584_vm11  ;;  %vm523_vm0 = vweird.f32 %v5544_v8 }
 0x148   : > { %v579_v12 = vmul.f32 %v5550_v15, %v578_v23  ;;  %v648_v31 = vmul.f32 %v506_v25, %v5398_v28  ;;  %v576_v32 = vsel %vm575_vm9, %v4680_v43, %v572_v22  ;;  %4689 = vrsqrt.f32 %v5567_v27 }
 0x149   : > { %v510_v26 = vmul.f32 0.5, %v509_v19  ;;  %v446_v13 = vpop.xlane.xlu2 %445  ;;  %v448_v30 = vpop.xlane.xlu1 %447  ;;  %v655_v36 = vmul.f32 %v576_v32, %v5403_v33  ;;  %vm593_vm4 = vweird.f32 %v5542_v4  ;;  %vm623_vm12 = vweird.f32 %v5567_v27 }
 0x14a   : > { %v580_v34 = vmul.f32 0.5, %v579_v12  ;;  %v466_v29 = vmul.f32 %v446_v13, %v5390_v20  ;;  %v467_v35 = vmul.f32 %v448_v30, %v5390_v20  ;;  %v668_v37 = vmul.f32 %v5528_v49, %v648_v31 }
 0x14b   : > { %v511_v21 = vsub.f32 1.5, %v510_v26  ;;  %v675_v43 = vmul.f32 %v5528_v49, %v655_v36 }
 0x14c   : > { %v5576_v40 = vpop.eup %4685  ;;  %v581_v44 = vsub.f32 1.5, %v580_v34  ;;  %v5578_v47 = vadd.f32 1e-05, %v466_v29  ;;  %v5580_v28 = vadd.f32 1e-05, %v467_v35  ;;  %v5590_v51 = vadd.f32 %v5535_v55, %v668_v37 }
 0x14d   : > { %v5583_v48 = vpop.eup %4687  ;;  %v512_v33 = vmul.f32 %v5540_v24, %v511_v21  ;;  %v588_v50 = vmul.f32 %v5576_v40, %v5542_v4  ;;  %v5616_v61 = vadd.f32 %v5535_v55, %v675_v43  ;;  %vm594_vm2 = vweird.f32 %v5576_v40 }
 0x14e   : > { %v582_v52 = vmul.f32 %v5550_v15, %v581_v44  ;;  %v518_v54 = vmul.f32 %v5583_v48, %v5544_v8  ;;  %4691 = vrsqrt.f32 %v5578_v47  ;;  %770 = vmatmul.f32.gmra.mxu0 %v5590_v51  ;;  %900 = vmatmul.f32.gmra.mxu2 %v5590_v51  ;;  %v5628_v18 = vpop.eup %4689  ;;  %vm524_vm1 = vweird.f32 %v5583_v48  ;;  %vm595_vm5 = vmor %vm593_vm4, %vm594_vm2 }
 0x14f   : > { %v589_v59 = vmul.f32 %v5576_v40, %v588_v50  ;;  %4693 = vrsqrt.f32 %v5580_v28  ;;  %v516_v0 = vsel %vm5599_vm13, %v5540_v24, %v512_v33  ;;  %856 = vmatmul.f32.vlgmr.msra.gmra.mxu1 %v5616_v61  ;;  %vm5645_vm3 = vmor %vm523_vm0, %vm524_vm1  ;;  %vm603_vm7 = vweird.f32 %v5578_v47 }
 0x150   : > { %v519_v60 = vmul.f32 %v5583_v48, %v518_v54  ;;  %v586_v1 = vsel %vm5609_vm15, %v5550_v15, %v582_v52  ;;  %v649_v17 = vmul.f32 %v516_v0, %v5409_v38  ;;  %vm613_vm9 = vweird.f32 %v5580_v28 }
 0x151   : > { %v590_v42 = vmul.f32 0.5, %v589_v59  ;;  %v349_v62 = vpop.xlane.xlu2 %348  ;;  %v351_v63 = vpop.xlane.xlu1 %350  ;;  %v656_v24 = vmul.f32 %v586_v1, %v5411_v39  ;;  %vm624_vm13 = vweird.f32 %v5628_v18 }
 0x152   : > { %v520_v2 = vmul.f32 0.5, %v519_v60  ;;  %v381_v3 = vmul.f32 %v5390_v20, %v349_v62  ;;  %v382_v11 = vmul.f32 %v5390_v20, %v351_v63  ;;  %v669_v19 = vmul.f32 %v5528_v49, %v649_v17  ;;  %v454_v26 = vpop.xlane.xlu0 %453  ;;  %vm5730_vm0 = vmor %vm623_vm12, %vm624_vm13 }
 0x153   : > { %v591_v22 = vsub.f32 1.5, %v590_v42  ;;  %v470_v29 = vmul.f32 %v454_v26, %v5390_v20 }
 0x154   : > { %v4692_v23 = vpop.eup %4691  ;;  %v521_v15 = vsub.f32 1.5, %v520_v2  ;;  %v5635_v12 = vsub.f32 %v5450_v6, %v381_v3  ;;  %v5639_v38 = vsub.f32 %v5453_v7, %v382_v11  ;;  %v5650_v30 = vadd.f32 %v5535_v55, %v669_v19 }
 0x155   : > { %v598_v25 = vmul.f32 %v4692_v23, %v5578_v47  ;;  %v5641_v13 = vpop.eup %4693  ;;  %v676_v6 = vmul.f32 %v5528_v49, %v656_v24  ;;  %v592_v31 = vmul.f32 %v5576_v40, %v591_v22  ;;  %v618_v7 = vmul.f32 %v5628_v18, %v5567_v27 }
 0x156   : > { %v522_v8 = vmul.f32 %v5583_v48, %v521_v15  ;;  %v608_v34 = vmul.f32 %v5641_v13, %v5580_v28  ;;  %773 = vmatmul.f32.gmra.mxu0 %v5650_v30  ;;  %903 = vmatmul.f32.gmra.mxu2 %v5650_v30  ;;  %v413_v36 = vmul.f32 %v5635_v12, %v5635_v12  ;;  %vm604_vm6 = vweird.f32 %v4692_v23 }
 0x157   : > { %v599_v32 = vmul.f32 %v4692_v23, %v598_v25  ;;  %v5662_v35 = vadd.f32 %v5535_v55, %v676_v6  ;;  %v414_v44 = vmul.f32 %v5639_v38, %v5639_v38  ;;  %v596_v41 = vsel %vm595_vm5, %v5576_v40, %v592_v31  ;;  %vm605_vm8 = vmor %vm603_vm7, %vm604_vm6 }
 0x158   : > { %v609_v37 = vmul.f32 %v5641_v13, %v608_v34  ;;  %v526_v33 = vsel %vm5645_vm3, %v5583_v48, %v522_v8  ;;  %435 = vadd.xlane.f32.xlu0 %v413_v36  ;;  %v657_v62 = vmul.f32 %v596_v41, %v5419_v45  ;;  %v5685_v0 = vadd.f32 1e-05, %v470_v29 }
 0x159   : > { %v600_v21 = vmul.f32 0.5, %v599_v32  ;;  %v452_v43 = vpop.xlane.xlu2 %451  ;;  %v432_v4 = vpop.xlane.xlu1 %431  ;;  %859 = vmatmul.f32.gmra.mxu1 %v5662_v35  ;;  %v650_v54 = vmul.f32 %v526_v33, %v5421_v46  ;;  %437 = vadd.xlane.f32.xlu1 %v414_v44  ;;  %v619_v1 = vmul.f32 %v5628_v18, %v618_v7  ;;  %vm614_vm10 = vweird.f32 %v5641_v13 }
 0x15a   : > { %v469_v50 = vmul.f32 %v452_v43, %v5390_v20  ;;  %v459_v52 = vmul.f32 %v432_v4, %v5390_v20  ;;  %v610_v59 = vmul.f32 0.5, %v609_v37  ;;  %v677_v2 = vmul.f32 %v5528_v49, %v657_v62  ;;  %vm5706_vm11 = vmor %vm613_vm9, %vm614_vm10 }
 0x15b   : > { %v601_v56 = vsub.f32 1.5, %v600_v21  ;;  %v670_v42 = vmul.f32 %v5528_v49, %v650_v54  ;;  %v620_v22 = vmul.f32 0.5, %v619_v1 }
 0x15c   : > { %v5680_v60 = vadd.f32 1e-05, %v469_v50  ;;  %v475_v48 = vadd.f32 1e-05, %v459_v52  ;;  %v611_v40 = vsub.f32 1.5, %v610_v59  ;;  %v5700_v11 = vadd.f32 %v5535_v55, %v677_v2 }
 0x15d   : > { %v602_v63 = vmul.f32 %v4692_v23, %v601_v56  ;;  %v5689_v46 = vadd.f32 %v5535_v55, %v670_v42  ;;  %v621_v8 = vsub.f32 1.5, %v620_v22 }
 0x15e   : > { %4695 = vrsqrt.f32 %v5680_v60  ;;  %v612_v24 = vmul.f32 %v5641_v13, %v611_v40  ;;  %vm533_vm14 = vweird.f32 %v475_v48  ;;  %vm633_vm2 = vweird.f32 %v5680_v60 }
 0x15f   : > { %4697 = vrsqrt.f32 %v475_v48  ;;  %776 = vmatmul.f32.gmra.mxu0 %v5689_v46  ;;  %906 = vmatmul.f32.gmra.mxu2 %v5689_v46  ;;  %v606_v45 = vsel %vm605_vm8, %v4692_v23, %v602_v63  ;;  %v622_v36 = vmul.f32 %v5628_v18, %v621_v8  ;;  %vm643_vm8 = vweird.f32 %v5685_v0 }
 0x160   : > { %v658_v3 = vmul.f32 %v606_v45, %v5435_v57  ;;  %4699 = vrsqrt.f32 %v5685_v0  ;;  %v616_v6 = vsel %vm5706_vm11, %v5641_v13, %v612_v24 }
 0x161   : > { %v434_v47 = vpop.xlane.xlu2 %433  ;;  %862 = vmatmul.f32.gmra.mxu1 %v5700_v11  ;;  %v659_v29 = vmul.f32 %v616_v6, %v5438_v58  ;;  %v626_v52 = vsel %vm5730_vm0, %v5628_v18, %v622_v36 }
 0x162   : > { %v460_v17 = vmul.f32 %v434_v47, %v5390_v20  ;;  %v678_v57 = vmul.f32 %v5528_v49, %v658_v3 }
 0x163   : > { %v679_v4 = vmul.f32 %v5528_v49, %v659_v29 }
 0x164   : > { %v5704_v15 = vpop.eup %4695  ;;  %v476_v28 = vadd.f32 1e-05, %v460_v17  ;;  %v5722_v32 = vadd.f32 %v5535_v55, %v678_v57 }
 0x165   : > { %v4698_v19 = vpop.eup %4697  ;;  %v628_v25 = vmul.f32 %v5704_v15, %v5680_v60  ;;  %vm634_vm3 = vweird.f32 %v5704_v15  ;;  %v5745_v41 = vadd.f32 %v5535_v55, %v679_v4 }
 0x166   : > { %v528_v26 = vmul.f32 %v4698_v19, %v475_v48  ;;  %4701 = vrsqrt.f32 %v476_v28  ;;  %v5718_v31 = vpop.eup %4699  ;;  %vm534_vm15 = vweird.f32 %v4698_v19  ;;  %vm543_vm4 = vweird.f32 %v476_v28  ;;  %vm5749_vm6 = vmor %vm633_vm2, %vm634_vm3 }
 0x167   : > { %v629_v39 = vmul.f32 %v5704_v15, %v628_v25  ;;  %832 = vmatmul.f32.vlgmr.msrb.gmra.mxu0 %v5547_v14  ;;  %v638_v13 = vmul.f32 %v5718_v31, %v5685_v0  ;;  %vm535_vm1 = vmor %vm533_vm14, %vm534_vm15  ;;  %v660_v48 = vmul.f32 %v626_v52, %v5428_v53  ;;  %vm644_vm9 = vweird.f32 %v5718_v31 }
 0x168   : > { %v529_v7 = vmul.f32 %v4698_v19, %v528_v26  ;;  %vm645_vm10 = vmor %vm643_vm8, %vm644_vm9 }
 0x169   : > { %v630_v21 = vmul.f32 0.5, %v629_v39  ;;  %865 = vmatmul.f32.gmra.mxu1 %v5722_v32  ;;  %v639_v58 = vmul.f32 %v5718_v31, %v638_v13  ;;  %v680_v1 = vmul.f32 %v5528_v49, %v660_v48 }
 0x16a   : > { %v530_v34 = vmul.f32 0.5, %v529_v7 }
 0x16b   : > { %v631_v33 = vsub.f32 1.5, %v630_v21  ;;  %v640_v42 = vmul.f32 0.5, %v639_v58  ;;  %v5765_v47 = vadd.f32 %v5535_v55, %v680_v1 }
 0x16c   : > { %v4702_v37 = vpop.eup %4701  ;;  %v531_v44 = vsub.f32 1.5, %v530_v34 }
 0x16d   : > { %v538_v27 = vmul.f32 %v4702_v37, %v476_v28  ;;  %vm544_vm5 = vweird.f32 %v4702_v37  ;;  %v632_v18 = vmul.f32 %v5704_v15, %v631_v33  ;;  %v641_v40 = vsub.f32 1.5, %v640_v42 }
 0x16e   : > { %v532_v43 = vmul.f32 %v4698_v19, %v531_v44  ;;  %vm545_vm7 = vmor %vm543_vm4, %vm544_vm5 }
 0x16f   : > { %v539_v50 = vmul.f32 %v4702_v37, %v538_v27  ;;  %835 = vmatmul.f32.gmra.mxu0 %v5590_v51  ;;  %v636_v2 = vsel %vm5749_vm6, %v5704_v15, %v632_v18  ;;  %v642_v22 = vmul.f32 %v5718_v31, %v641_v40 }
 0x170   : > { %v536_v54 = vsel %vm535_vm1, %v4698_v19, %v532_v43  ;;  %v661_v17 = vmul.f32 %v636_v2, %v5460_v9  ;;  %vm962_vm1 = vcmask 261120  }
 0x171   : > { %v540_v56 = vmul.f32 0.5, %v539_v50  ;;  %v651_v59 = vmul.f32 %v536_v54, %v5466_v16  ;;  %868 = vmatmul.f32.gmra.mxu1 %v5745_v41  ;;  %v646_v0 = vsel %vm645_vm10, %v5718_v31, %v642_v22 }
 0x172   : > { %v662_v9 = vmul.f32 %v646_v0, %v5447_v5 }
 0x173   : > { %v541_v62 = vsub.f32 1.5, %v540_v56  ;;  %v671_v51 = vmul.f32 %v5528_v49, %v651_v59 }
 0x174   : > { %v682_v15 = vmul.f32 %v5528_v49, %v662_v9 }
 0x175   : > { %v542_v63 = vmul.f32 %v4702_v37, %v541_v62  ;;  %v691_v16 = vadd.f32 %v5535_v55, %v671_v51 }
 0x176   : > { %v5782_v23 = vadd.f32 %v5535_v55, %v682_v15 }
 0x177   : > { %779 = vmatmul.f32.vlgmr.msra.gmra.mxu3 %v691_v16  ;;  %909 = vmatmul.f32.gmra.mxu2 %v691_v16  ;;  %v546_v53 = vsel %vm545_vm7, %v4702_v37, %v542_v63 }
 0x178   : > { %838 = vmatmul.f32.gmra.mxu0 %v5650_v30  ;;  %v652_v45 = vmul.f32 %v546_v53, %v5472_v10  ;;  %v681_v10 = vmul.f32 %v5528_v49, %v661_v17 }
 0x179   : > { %871 = vmatmul.f32.gmra.mxu1 %v5765_v47 }
 0x17a   : > { %v672_v3 = vmul.f32 %v5528_v49, %v652_v45  ;;  %v5776_v24 = vadd.f32 %v5535_v55, %v681_v10 }
 0x17c   : > { %v692_v30 = vadd.f32 %v5535_v55, %v672_v3 }
 0x17f   : > { %782 = vmatmul.f32.gmra.mxu3 %v692_v30  ;;  %912 = vmatmul.f32.gmra.mxu2 %v692_v30 }
 0x180   : > { %841 = vmatmul.f32.gmra.mxu0 %v5689_v46 }
 0x181   : > { %874 = vmatmul.f32.gmra.mxu1 %v5776_v24 }
 0x188   : > { %844 = vmatmul.f32.gmra.mxu0 %v691_v16 }
 0x189   : > { %877 = vmatmul.f32.gmra.mxu1 %v5782_v23 }
 0x190   : > { %847 = vmatmul.f32.gmra.mxu0 %v692_v30 }
 0x1c3   : > { %v768_v28 = vpop.f32.mrf.mxu0 }
 0x1c4   : > { %v5785_v57 = vmul.f32 0.17677669, %v768_v28 }
 0x1c6   : > { %1545 = vrot.lane.b32.xlu1 %v5785_v57, %s5183_s26 }
 0x1c9   : > { %v5797_v6 = vpop.f32.mrf.mxu2 }
 0x1cb   : > { %v436_v46 = vpop.xlane.xlu0 %435  ;;  %v771_v33 = vpop.f32.mrf.mxu0 }
 0x1cc   : > { %v438_v5 = vpop.xlane.xlu1 %437  ;;  %v461_v19 = vmul.f32 %v436_v46, %v5390_v20  ;;  %v5790_v25 = vpop.f32.mrf.mxu1  ;;  %v5856_v1 = vmul.f32 0.17677669, %v771_v33 }
 0x1cd   : > { %v462_v26 = vmul.f32 %v438_v5, %v5390_v20  ;;  %1593 = vrot.lane.b32.xlu0 %v5790_v25, %s5183_s26  ;;  %3288 = vrot.lane.b32.xlu2 %v5790_v25, %s5184_s30 }
 0x1ce   : > { %v477_v8 = vadd.f32 1e-05, %v461_v19 }
 0x1cf   : > { %v478_v39 = vadd.f32 1e-05, %v462_v26 }
 0x1d0   : > { %4703 = vrsqrt.f32 %v477_v8  ;;  %vm553_vm14 = vweird.f32 %v477_v8 }
 0x1d1   : > { %4705 = vrsqrt.f32 %v478_v39  ;;  %v5807_v21 = vpop.f32.mrf.mxu2  ;;  %vm563_vm12 = vweird.f32 %v478_v39 }
 0x1d2   : > { %v5811_v27 = vpack.i.bf16 %v5797_v6, %v5807_v21 }
 0x1d3   : > { %v774_v60 = vpop.f32.mrf.mxu0 }
 0x1d4   : > { %7946 = vst [vmem:[#allocation15_spill] sm:$0xff] %v5811_v27  ;;  %v5830_v62 = vmul.f32 0.17677669, %v774_v60 }
 0x1d5   : > { %2497 = vrot.lane.b32.xlu0 %v5790_v25, %s5185_s11 }
 0x1d6   : > { %v5799_v31 = vpop.f32.mrf.mxu1  ;;  %v4704_v7 = vpop.eup %4703 }
 0x1d7   : > { %1595 = vrot.lane.b32.xlu1 %v5799_v31, %s5183_s26  ;;  %v4706_v20 = vpop.eup %4705  ;;  %v548_v34 = vmul.f32 %v4704_v7, %v477_v8  ;;  %2499 = vrot.lane.b32.xlu2 %v5799_v31, %s5185_s11  ;;  %vm554_vm11 = vweird.f32 %v4704_v7 }
 0x1d8   : > { %v558_v29 = vmul.f32 %v4706_v20, %v478_v39  ;;  %vm564_vm13 = vweird.f32 %v4706_v20  ;;  %vm555_vm15 = vmor %vm553_vm14, %vm554_vm11 }
 0x1d9   : > { %v549_v36 = vmul.f32 %v4704_v7, %v548_v34  ;;  %vm565_vm0 = vmor %vm563_vm12, %vm564_vm13  ;;  %v5919_v2 = vpop.f32.mrf.mxu2 }
 0x1da   : > { %v559_v13 = vmul.f32 %v4706_v20, %v558_v29 }
 0x1db   : > { %v550_v37 = vmul.f32 0.5, %v549_v36 }
 0x1dc   : > { %v560_v14 = vmul.f32 0.5, %v559_v13 }
 0x1dd   : > { %v551_v44 = vsub.f32 1.5, %v550_v37  ;;  %2449 = vrot.lane.b32.xlu0 %v5785_v57, %s5185_s11 }
 0x1de   : > { %v561_v43 = vsub.f32 1.5, %v560_v14  ;;  %v5815_v58 = vpop.f32.mrf.mxu1 }
 0x1df   : > { %v552_v4 = vmul.f32 %v4704_v7, %v551_v44  ;;  %4551 = vrot.lane.b32.xlu2 %v5811_v27, %s5183_s26 }
 0x1e0   : > { %v562_v50 = vmul.f32 %v4706_v20, %v561_v43 }
 0x1e1   : > { %v556_v52 = vsel %vm555_vm15, %v4704_v7, %v552_v4 }
 0x1e2   : > { %v653_v54 = vmul.f32 %v556_v52, %v5635_v12  ;;  %v566_v56 = vsel %vm565_vm0, %v4706_v20, %v562_v50 }
 0x1e3   : > { %v654_v42 = vmul.f32 %v566_v56, %v5639_v38 }
 0x1e4   : > { %v673_v59 = vmul.f32 %v5528_v49, %v653_v54 }
 0x1e5   : > { %3240 = vrot.lane.b32.xlu0 %v5785_v57, %s5184_s30  ;;  %v674_v12 = vmul.f32 %v5528_v49, %v654_v42 }
 0x1e6   : > { %v693_v48 = vadd.f32 %v5535_v55, %v673_v59  ;;  %v5825_v18 = vpop.f32.mrf.mxu1 }
 0x1e7   : > { %1597 = vrot.lane.b32.xlu2 %v5815_v58, %s5183_s26  ;;  %v694_v51 = vadd.f32 %v5535_v55, %v674_v12 }
 0x1e8   : > { %785 = vmatmul.f32.gmra.mxu3 %v693_v48  ;;  %850 = vmatmul.f32.gmra.mxu0 %v693_v48 }
 0x1e9   : > { %915 = vmatmul.f32.gmra.mxu2 %v693_v48 }
 0x1ed   : > { %3290 = vrot.lane.b32.xlu0 %v5799_v31, %s5184_s30 }
 0x1ee   : > { %v5835_v63 = vpop.f32.mrf.mxu1 }
 0x1ef   : > { %1549 = vrot.lane.b32.xlu2 %v5830_v62, %s5183_s26 }
 0x1f0   : > { %788 = vmatmul.f32.gmra.mxu3 %v694_v51  ;;  %853 = vmatmul.f32.gmra.mxu0 %v694_v51 }
 0x1f1   : > { %918 = vmatmul.f32.gmra.mxu2 %v694_v51 }
 0x1f6   : > { %v5839_v38 = vpop.f32.mrf.mxu1 }
 0x1f7   : > { %3244 = vrot.lane.b32.xlu2 %v5830_v62, %s5184_s30 }
 0x1f8   : > { %791 = vmatmul.f32.gmra.mxu3 %v5616_v61 }
 0x1f9   : > { %921 = vmatmul.f32.gmra.mxu2 %v5616_v61 }
 0x1fa   : > { %v780_v49 = vpop.f32.mrf.mxu3 }
 0x1fb   : > { %v5845_v16 = vmul.f32 0.17677669, %v780_v49 }
 0x1fd   : > { %2457 = vrot.lane.b32.xlu0 %v5845_v16, %s5185_s11  ;;  %1553 = vrot.lane.b32.xlu1 %v5845_v16, %s5183_s26 }
 0x1fe   : > { %v5851_v55 = vpop.f32.mrf.mxu1 }
 0x1ff   : > { %2503 = vrot.lane.b32.xlu2 %v5825_v18, %s5185_s11 }
 0x200   : > { %794 = vmatmul.f32.gmra.mxu3 %v5662_v35 }
 0x201   : > { %924 = vmatmul.f32.gmra.mxu2 %v5662_v35  ;;  %v777_v35 = vpop.f32.mrf.mxu0 }
 0x202   : > { %v783_v61 = vpop.f32.mrf.mxu3  ;;  %v949_v28 = vmul.f32 0.17677669, %v777_v35 }
 0x203   : > { %v5867_v53 = vmul.f32 0.17677669, %v783_v61 }
 0x205   : > { %2451 = vrot.lane.b32.xlu0 %v5856_v1, %s5185_s11  ;;  %3248 = vrot.lane.b32.xlu1 %v5845_v16, %s5184_s30 }
 0x206   : > { %v5863_v40 = vpop.f32.mrf.mxu1 }
 0x207   : > { %4216 = vmatpush.xpose.msk.msrb.mxu3 %vm962_vm1, %v5863_v40 }
 0x208   : > { %797 = vmatmul.f32.gmra.mxu3 %v5700_v11 }
 0x209   : > { %927 = vmatmul.f32.gmra.mxu2 %v5700_v11  ;;  %v5907_v11 = vpop.f32.mrf.mxu0 }
 0x20b   : > { %4217 = vmatpush.xpose.msk.msrb.mxu3 %vm962_vm1, %v5851_v55 }
 0x20d   : > { %1547 = vrot.lane.b32.xlu1 %v5856_v1, %s5183_s26  ;;  %1555 = vrot.lane.b32.xlu0 %v5867_v53, %s5183_s26 }
 0x20f   : > { %4218 = vmatpush.xpose.msk.msrb.mxu3 %vm962_vm1, %v5839_v38 }
 0x210   : > { %800 = vmatmul.f32.gmra.mxu3 %v5722_v32 }
 0x211   : > { %930 = vmatmul.f32.gmra.mxu2 %v5722_v32  ;;  %v5915_v32 = vpop.f32.mrf.mxu0 }
 0x213   : > { %4219 = vmatpush.xpose.msk.msrb.mxu3 %vm962_vm1, %v5835_v63 }
 0x215   : > { %3242 = vrot.lane.b32.xlu1 %v5856_v1, %s5184_s30  ;;  %2501 = vrot.lane.b32.xlu0 %v5815_v58, %s5185_s11 }
 0x217   : > { %4220 = vmatpush.xpose.msk.msrb.mxu3 %vm962_vm1, %v5825_v18 }
 0x218   : > { %803 = vmatmul.f32.gmra.mxu3 %v5745_v41 }
 0x219   : > { %933 = vmatmul.f32.gmra.mxu2 %v5745_v41  ;;  %v5917_v41 = vpop.f32.mrf.mxu0 }
 0x21b   : > { %4221 = vmatpush.xpose.msk.msrb.mxu3 %vm962_vm1, %v5815_v58 }
 0x21d   : > { %3250 = vrot.lane.b32.xlu1 %v5867_v53, %s5184_s30  ;;  %3292 = vrot.lane.b32.xlu0 %v5815_v58, %s5184_s30 }
 0x21f   : > { %4222 = vmatpush.xpose.msk.msrb.mxu3 %vm962_vm1, %v5799_v31 }
 0x220   : > { %806 = vmatmul.f32.gmra.mxu3 %v5765_v47 }
 0x221   : > { %936 = vmatmul.f32.gmra.mxu2 %v5765_v47  ;;  %v5921_v45 = vpop.f32.mrf.mxu0  ;;  %v5923_v47 = vpop.f32.mrf.mxu2 }
 0x223   : > { %4223 = vmatpush.xpose.msk.msrb.mxu3 %vm962_vm1, %v5790_v25  ;;  %v5966_v25 = vpack.i.bf16 %v5919_v2, %v5923_v47 }
 0x225   : > { %2459 = vrot.lane.b32.xlu0 %v5867_v53, %s5185_s11  ;;  %7947 = vst [vmem:[#allocation16_spill] sm:$0xff] %v5966_v25 }
 0x227   : > { %v5991_v39 = vpop.permute.xlu2 %3288 }
 0x228   : > { %809 = vmatmul.f32.gmra.mxu3 %v5776_v24  ;;  %7948 = vst [vmem:[#allocation17_spill] sm:$0xff] %v5991_v39 }
 0x229   : > { %939 = vmatmul.f32.gmra.mxu2 %v5776_v24  ;;  %v5925_v3 = vpop.f32.mrf.mxu0  ;;  %v5927_v17 = vpop.f32.mrf.mxu2 }
 0x22d   : > { %2453 = vrot.lane.b32.xlu0 %v5830_v62, %s5185_s11 }
 0x230   : > { %812 = vmatmul.f32.gmra.mxu3 %v5782_v23 }
 0x231   : > { %942 = vmatmul.f32.gmra.mxu2 %v5782_v23  ;;  %v5929_v22 = vpop.f32.mrf.mxu0  ;;  %v5931_v30 = vpop.f32.mrf.mxu2 }
 0x232   : > { %v6008_v20 = vpop.permute.xlu2 %2499 }
 0x235   : > { %1599 = vrot.lane.b32.xlu0 %v5825_v18, %s5183_s26 }
 0x238   : > { %v6026_v29 = vpop.permute.xlu1 %1545 }
 0x23a   : > { %v6028_v36 = vpop.permute.xlu2 %4551 }
 0x23f   : > { %v6000_v31 = vpop.permute.xlu0 %1593 }
 0x242   : > { %v6043_v43 = vpop.permute.xlu2 %1597 }
 0x247   : > { %v6018_v34 = vpop.permute.xlu0 %2497 }
 0x249   : > { %v6039_v14 = vpop.permute.xlu1 %1595 }
 0x24a   : > { %v6060_v56 = vpop.permute.xlu2 %1549 }
 0x24f   : > { %v6041_v44 = vpop.permute.xlu0 %2449 }
 0x257   : > { %v6056_v52 = vpop.permute.xlu0 %3240 }
 0x258   : > { %7949 = vst [vmem:[#allocation18_spill] sm:$0xff] %v6056_v52 }
 0x25f   : > { %v6076_v42 = vpop.permute.xlu0 %3290 }
 0x260   : > { %7951 = vst [vmem:[#allocation20_spill] sm:$0xff] %v6076_v42 }
 0x265   : > { %v5933_v10 = vpop.f32.mrf.mxu0 }
 0x26b   : > { %v786_v0 = vpop.f32.mrf.mxu3 }
 0x26c   : > { %v5935_v24 = vmul.f32 0.17677669, %v786_v0  ;;  %v5937_v9 = vpop.f32.mrf.mxu2 }
 0x26d   : > { %v5939_v15 = vpop.f32.mrf.mxu0 }
 0x26e   : > { %4224 = vmatpush.xpose.msk.msrb.mxu3 %vm962_vm1, %v5939_v15  ;;  %3252 = vrot.lane.b32.xlu0 %v5935_v24, %s5184_s30 }
 0x26f   : > { %1557 = vrot.lane.b32.xlu1 %v5935_v24, %s5183_s26  ;;  %v6054_v33 = vpop.permute.xlu1 %1553  ;;  %v6091_v60 = vpop.permute.xlu0 %2457 }
 0x272   : > { %4225 = vmatpush.xpose.msk.msrb.mxu3 %vm962_vm1, %v5933_v10 }
 0x273   : > { %v789_v23 = vpop.f32.mrf.mxu3 }
 0x274   : > { %v5949_v46 = vmul.f32 0.17677669, %v789_v23  ;;  %v5951_v5 = vpop.f32.mrf.mxu2 }
 0x275   : > { %v6179_v23 = vpack.i.bf16 %v5937_v9, %v5951_v5 }
 0x276   : > { %4226 = vmatpush.xpose.msk.msrb.mxu3 %vm962_vm1, %v5929_v22  ;;  %2455 = vrot.lane.b32.xlu0 %v949_v28, %s5185_s11 }
 0x277   : > { %3294 = vrot.lane.b32.xlu1 %v5825_v18, %s5184_s30  ;;  %1559 = vrot.lane.b32.xlu2 %v5949_v46, %s5183_s26  ;;  %v6073_v59 = vpop.permute.xlu1 %3248  ;;  %v6083_v18 = vpop.permute.xlu2 %3244  ;;  %7961 = vst [vmem:[#allocation30_spill] sm:$0xff] %v6179_v23 }
 0x278   : > { %7950 = vst [vmem:[#allocation19_spill] sm:$0xff] %v6073_v59 }
 0x279   : > { %7952 = vst [vmem:[#allocation21_spill] sm:$0xff] %v6083_v18 }
 0x27a   : > { %4227 = vmatpush.xpose.msk.msrb.mxu3 %vm962_vm1, %v5925_v3 }
 0x27b   : > { %v792_v37 = vpop.f32.mrf.mxu3 }
 0x27c   : > { %v5962_v19 = vpop.f32.mrf.mxu2  ;;  %v954_v58 = vmul.f32 0.17677669, %v792_v37 }
 0x27e   : > { %4228 = vmatpush.xpose.msk.msrb.mxu3 %vm962_vm1, %v5921_v45  ;;  %4556 = vrot.lane.b32.xlu0 %v5966_v25, %s5183_s26 }
 0x27f   : > { %2461 = vrot.lane.b32.xlu1 %v5935_v24, %s5185_s11  ;;  %3272 = vrot.lane.b32.xlu2 %v5907_v11, %s5184_s30  ;;  %v6093_v12 = vpop.permute.xlu1 %1547  ;;  %v6104_v51 = vpop.permute.xlu2 %2503 }
 0x282   : > { %4229 = vmatpush.xpose.msk.msrb.mxu3 %vm962_vm1, %v5917_v41 }
 0x283   : > { %v795_v50 = vpop.f32.mrf.mxu3 }
 0x284   : > { %v5978_v26 = vpop.f32.mrf.mxu2 }
 0x286   : > { %4230 = vmatpush.xpose.msk.msrb.mxu3 %vm962_vm1, %v5915_v32  ;;  %1577 = vrot.lane.b32.xlu0 %v5907_v11, %s5183_s26 }
 0x287   : > { %1551 = vrot.lane.b32.xlu1 %v949_v28, %s5183_s26  ;;  %2463 = vrot.lane.b32.xlu2 %v5949_v46, %s5185_s11  ;;  %v6114_v49 = vpop.permute.xlu1 %3242 }
 0x288   : > { %7953 = vst [vmem:[#allocation22_spill] sm:$0xff] %v6114_v49 }
 0x28a   : > { %4231 = vmatpush.xpose.msk.msrb.mxu3 %vm962_vm1, %v5907_v11 }
 0x28b   : > { %v798_v48 = vpop.f32.mrf.mxu3 }
 0x28c   : > { %v5989_v8 = vpop.f32.mrf.mxu2 }
 0x28d   : > { %4232 = vmatmul.msk.f32.vlgmr.msrb.gmra.mxu3 %vm962_vm1, %v5785_v57 }
 0x28e   : > { %2505 = vrot.lane.b32.xlu0 %v5835_v63, %s5185_s11 }
 0x28f   : > { %3246 = vrot.lane.b32.xlu1 %v949_v28, %s5184_s30  ;;  %1579 = vrot.lane.b32.xlu2 %v5915_v32, %s5183_s26 }
 0x294   : > { %v6002_v7 = vpop.f32.mrf.mxu2 }
 0x295   : > { %4233 = vmatmul.msk.f32.gmra.mxu3 %vm962_vm1, %v5856_v1 }
 0x296   : > { %3254 = vrot.lane.b32.xlu0 %v5949_v46, %s5184_s30 }
 0x297   : > { %1601 = vrot.lane.b32.xlu1 %v5835_v63, %s5183_s26  ;;  %2507 = vrot.lane.b32.xlu2 %v5839_v38, %s5185_s11 }
 0x29c   : > { %v6014_v57 = vpop.f32.mrf.mxu2 }
 0x29d   : > { %4234 = vmatmul.msk.f32.gmra.mxu3 %vm962_vm1, %v5830_v62  ;;  %v801_v62 = vpop.f32.mrf.mxu3 }
 0x29e   : > { %1603 = vrot.lane.b32.xlu0 %v5839_v38, %s5183_s26 }
 0x29f   : > { %3296 = vrot.lane.b32.xlu1 %v5835_v63, %s5184_s30  ;;  %3298 = vrot.lane.b32.xlu2 %v5839_v38, %s5184_s30  ;;  %v6108_v63 = vmul.f32 0.17677669, %v801_v62  ;;  %v6112_v38 = vpop.permute.xlu0 %2451 }
 0x2a4   : > { %v6030_v13 = vpop.f32.mrf.mxu2 }
 0x2a5   : > { %4235 = vmatmul.msk.f32.gmra.mxu3 %vm962_vm1, %v949_v28  ;;  %v804_v1 = vpop.f32.mrf.mxu3 }
 0x2a6   : > { %1581 = vrot.lane.b32.xlu0 %v5917_v41, %s5183_s26  ;;  %v6131_v35 = vmul.f32 0.17677669, %v804_v1 }
 0x2a7   : > { %2481 = vrot.lane.b32.xlu1 %v5907_v11, %s5185_s11  ;;  %2483 = vrot.lane.b32.xlu2 %v5915_v32, %s5185_s11  ;;  %v6138_v11 = vpop.permute.xlu0 %1555 }
 0x2ac   : > { %v6045_v4 = vpop.f32.mrf.mxu2 }
 0x2ad   : > { %4236 = vmatmul.msk.f32.gmra.mxu3 %vm962_vm1, %v5845_v16  ;;  %v6118_v16 = vpack.i.bf16 %v5927_v17, %v5931_v30 }
 0x2ae   : > { %2509 = vrot.lane.b32.xlu0 %v5851_v55, %s5185_s11 }
 0x2af   : > { %3300 = vrot.lane.b32.xlu2 %v5851_v55, %s5184_s30  ;;  %1561 = vrot.lane.b32.xlu1 %v954_v58, %s5183_s26  ;;  %7954 = vst [vmem:[#allocation23_spill] sm:$0xff] %v6118_v16 }
 0x2b4   : > { %v6058_v54 = vpop.f32.mrf.mxu2 }
 0x2b5   : > { %1476 = vmatpush.msra.mxu0 %v6058_v54  ;;  %4237 = vmatmul.msk.f32.gmra.mxu3 %vm962_vm1, %v5867_v53  ;;  %v955_v53 = vmul.f32 0.17677669, %v795_v50 }
 0x2b6   : > { %3302 = vrot.lane.b32.xlu0 %v5863_v40, %s5184_s30 }
 0x2b7   : > { %1477 = vmatpush.msra.mxu0 %v6045_v4  ;;  %2485 = vrot.lane.b32.xlu2 %v5917_v41, %s5185_s11 }
 0x2b8   : > { %3274 = vrot.lane.b32.xlu1 %v5915_v32, %s5184_s30  ;;  %v6140_v32 = vpop.permute.xlu1 %3250 }
 0x2b9   : > { %1478 = vmatpush.msra.mxu0 %v6030_v13  ;;  %7955 = vst [vmem:[#allocation24_spill] sm:$0xff] %v6140_v32 }
 0x2bb   : > { %1479 = vmatpush.msra.mxu0 %v6014_v57 }
 0x2bd   : > { %1480 = vmatpush.msra.mxu0 %v6002_v7  ;;  %4238 = vmatmul.msk.f32.gmra.mxu3 %vm962_vm1, %v5935_v24  ;;  %v6173_v24 = vpack.i.bf16 %v6014_v57, %v6030_v13 }
 0x2be   : > { %2487 = vrot.lane.b32.xlu0 %v5921_v45, %s5185_s11 }
 0x2bf   : > { %1481 = vmatpush.msra.mxu0 %v5989_v8  ;;  %3276 = vrot.lane.b32.xlu2 %v5917_v41, %s5184_s30  ;;  %7960 = vst [vmem:[#allocation29_spill] sm:$0xff] %v6173_v24 }
 0x2c0   : > { %2465 = vrot.lane.b32.xlu1 %v954_v58, %s5185_s11 }
 0x2c1   : > { %1482 = vmatpush.msra.mxu0 %v5978_v26 }
 0x2c3   : > { %1483 = vmatpush.msra.mxu0 %v5962_v19 }
 0x2c5   : > { %1484 = vmatpush.msra.mxu0 %v5951_v5  ;;  %4239 = vmatmul.msk.f32.gmra.mxu3 %vm962_vm1, %v5949_v46 }
 0x2c6   : > { %2489 = vrot.lane.b32.xlu0 %v5925_v3, %s5185_s11 }
 0x2c7   : > { %1485 = vmatpush.msra.mxu0 %v5937_v9  ;;  %1607 = vrot.lane.b32.xlu2 %v5863_v40, %s5183_s26 }
 0x2c8   : > { %3256 = vrot.lane.b32.xlu1 %v954_v58, %s5184_s30 }
 0x2c9   : > { %1486 = vmatpush.msra.mxu0 %v5931_v30 }
 0x2cb   : > { %1487 = vmatpush.msra.mxu0 %v5927_v17 }
 0x2cd   : > { %1488 = vmatpush.msra.mxu0 %v5923_v47  ;;  %4240 = vmatmul.msk.f32.gmra.mxu3 %vm962_vm1, %v954_v58 }
 0x2ce   : > { %3262 = vrot.lane.b32.xlu0 %v6108_v63, %s5184_s30 }
 0x2cf   : > { %1489 = vmatpush.msra.mxu0 %v5919_v2  ;;  %1583 = vrot.lane.b32.xlu2 %v5921_v45, %s5183_s26 }
 0x2d0   : > { %4561 = vrot.lane.b32.xlu1 %v6118_v16, %s5183_s26 }
 0x2d1   : > { %1490 = vmatpush.msra.mxu0 %v5807_v21  ;;  %v6128_v61 = vpop.permute.xlu2 %1559  ;;  %v807_v21 = vpop.f32.mrf.mxu3 }
 0x2d2   : > { %v6146_v2 = vmul.f32 0.17677669, %v807_v21 }
 0x2d3   : > { %1491 = vmatpush.msra.mxu0 %v5797_v6  ;;  %v956_v6 = vmul.f32 0.17677669, %v798_v48 }
 0x2d4   : > { %7957 = vst [vmem:[#allocation26_spill] sm:$0xff] %v6146_v2 }
 0x2d5   : > { %4241 = vmatmul.msk.f32.gmra.mxu3 %vm962_vm1, %v955_v53 }
 0x2d6   : > { %3264 = vrot.lane.b32.xlu0 %v6131_v35, %s5184_s30 }
 0x2d7   : > { %2511 = vrot.lane.b32.xlu2 %v5863_v40, %s5185_s11 }
 0x2d8   : > { %1605 = vrot.lane.b32.xlu1 %v5851_v55, %s5183_s26  ;;  %v6157_v55 = vpop.permute.xlu0 %2501 }
 0x2d9   : > { %v6144_v41 = vpop.permute.xlu2 %3272  ;;  %v810_v13 = vpop.f32.mrf.mxu3 }
 0x2da   : > { %7956 = vst [vmem:[#allocation25_spill] sm:$0xff] %v6144_v41  ;;  %v6201_v37 = vmul.f32 0.17677669, %v810_v13 }
 0x2dc   : > { %7963 = vst [vmem:[#allocation32_spill] sm:$0xff] %v6201_v37 }
 0x2dd   : > { %4242 = vmatmul.msk.f32.gmra.mxu3 %vm962_vm1, %v956_v6 }
 0x2de   : > { %1571 = vrot.lane.b32.xlu0 %v6146_v2, %s5183_s26 }
 0x2df   : > { %2469 = vrot.lane.b32.xlu2 %v956_v6, %s5185_s11 }
 0x2e0   : > { %1563 = vrot.lane.b32.xlu1 %v955_v53, %s5183_s26  ;;  %v6169_v0 = vpop.permute.xlu0 %3292 }
 0x2e1   : > { %v6153_v40 = vpop.permute.xlu1 %1557  ;;  %v6155_v47 = vpop.permute.xlu2 %2463  ;;  %7959 = vst [vmem:[#allocation28_spill] sm:$0xff] %v6169_v0 }
 0x2e2   : > { %v813_v50 = vpop.f32.mrf.mxu3 }
 0x2e3   : > { %v6215_v1 = vmul.f32 0.17677669, %v813_v50 }
 0x2e5   : > { %4243 = vmatmul.msk.f32.gmra.mxu3 %vm962_vm1, %v6108_v63  ;;  %7965 = vst [vmem:[#allocation34_spill] sm:$0xff] %v6215_v1 }
 0x2e6   : > { %2475 = vrot.lane.b32.xlu0 %v6146_v2, %s5185_s11 }
 0x2e7   : > { %3260 = vrot.lane.b32.xlu2 %v956_v6, %s5184_s30 }
 0x2e8   : > { %2467 = vrot.lane.b32.xlu1 %v955_v53, %s5185_s11  ;;  %v6192_v57 = vpop.permute.xlu0 %2459 }
 0x2e9   : > { %v6165_v17 = vpop.permute.xlu1 %3294  ;;  %v6167_v30 = vpop.permute.xlu2 %1579 }
 0x2ea   : > { %7958 = vst [vmem:[#allocation27_spill] sm:$0xff] %v6165_v17 }
 0x2ed   : > { %4244 = vmatmul.msk.f32.gmra.mxu3 %vm962_vm1, %v6131_v35 }
 0x2ee   : > { %4581 = vrot.lane.b32.xlu0 %v6173_v24, %s5183_s26 }
 0x2ef   : > { %4566 = vrot.lane.b32.xlu2 %v6179_v23, %s5183_s26 }
 0x2f0   : > { %3258 = vrot.lane.b32.xlu1 %v955_v53, %s5184_s30  ;;  %v6207_v58 = vpop.permute.xlu0 %2453 }
 0x2f1   : > { %v6186_v28 = vpop.permute.xlu1 %2461  ;;  %v6188_v46 = vpop.permute.xlu2 %2507 }
 0x2f5   : > { %4245 = vmatmul.msk.f32.gmra.mxu3 %vm962_vm1, %v6146_v2 }
 0x2f7   : > { %3280 = vrot.lane.b32.xlu2 %v5925_v3, %s5184_s30 }
 0x2f8   : > { %1565 = vrot.lane.b32.xlu1 %v956_v6, %s5183_s26  ;;  %v1600_v6 = vpop.permute.xlu0 %1599 }
 0x2f9   : > { %v6197_v9 = vpop.permute.xlu1 %1551  ;;  %v6199_v5 = vpop.permute.xlu2 %3298 }
 0x2fa   : > { %7962 = vst [vmem:[#allocation31_spill] sm:$0xff] %v6199_v5 }
 0x2fd   : > { %4246 = vmatmul.msk.f32.gmra.mxu3 %vm962_vm1, %v6201_v37 }
 0x2ff   : > { %2471 = vrot.lane.b32.xlu2 %v6108_v63, %s5185_s11 }
 0x300   : > { %3278 = vrot.lane.b32.xlu1 %v5921_v45, %s5184_s30  ;;  %v6227_v45 = vpack.i.bf16 %v5962_v19, %v5978_v26 }
 0x301   : > { %v6211_v48 = vpop.permute.xlu1 %3246  ;;  %v6213_v62 = vpop.permute.xlu2 %2483 }
 0x302   : > { %7964 = vst [vmem:[#allocation33_spill] sm:$0xff] %v6211_v48 }
 0x303   : > { %7967 = vst [vmem:[#allocation36_spill] sm:$0xff] %v6227_v45 }
 0x305   : > { %4247 = vmatmul.msk.f32.gmra.mxu3 %vm962_vm1, %v6215_v1 }
 0x307   : > { %2473 = vrot.lane.b32.xlu2 %v6131_v35, %s5185_s11 }
 0x308   : > { %1585 = vrot.lane.b32.xlu1 %v5925_v3, %s5183_s26  ;;  %v6239_v3 = vpop.permute.xlu0 %3252 }
 0x309   : > { %v1602_v53 = vpop.permute.xlu1 %1601  ;;  %v6223_v21 = vpop.permute.xlu2 %3300  ;;  %7969 = vst [vmem:[#allocation38_spill] sm:$0xff] %v6239_v3 }
 0x30a   : > { %7966 = vst [vmem:[#allocation35_spill] sm:$0xff] %v6223_v21 }
 0x30f   : > { %4571 = vrot.lane.b32.xlu2 %v6227_v45, %s5183_s26 }
 0x310   : > { %1567 = vrot.lane.b32.xlu1 %v6108_v63, %s5183_s26  ;;  %v6233_v13 = vpop.f32.mrf.mxu3  ;;  %v6252_v63 = vpop.permute.xlu0 %2455 }
 0x311   : > { %v6235_v50 = vpop.permute.xlu1 %3296  ;;  %v6237_v32 = vpop.permute.xlu2 %2485 }
 0x312   : > { %7968 = vst [vmem:[#allocation37_spill] sm:$0xff] %v6235_v50 }
 0x317   : > { %3284 = vrot.lane.b32.xlu2 %v5933_v10, %s5184_s30 }
 0x318   : > { %1587 = vrot.lane.b32.xlu1 %v5929_v22, %s5183_s26  ;;  %v6245_v19 = vpop.f32.mrf.mxu3  ;;  %v6263_v49 = vpop.permute.xlu0 %4556 }
 0x319   : > { %v6247_v26 = vpop.permute.xlu1 %2481  ;;  %v6249_v59 = vpop.permute.xlu2 %3276  ;;  %1126 = vmax.xlane.f32.xlu0 %v6245_v19 }
 0x31a   : > { %7970 = vst [vmem:[#allocation39_spill] sm:$0xff] %v6249_v59 }
 0x31f   : > { %2495 = vrot.lane.b32.xlu2 %v5939_v15, %s5185_s11 }
 0x320   : > { %1569 = vrot.lane.b32.xlu1 %v6131_v35, %s5183_s26  ;;  %v6258_v3 = vpop.f32.mrf.mxu3  ;;  %v6275_v35 = vpack.i.bf16 %v5989_v8, %v6002_v7 }
 0x321   : > { %v1608_v48 = vpop.permute.xlu2 %1607  ;;  %v6260_v18 = vpop.permute.xlu1 %1561 }
 0x322   : > { %4248 = vmatpush.xpose.msk.msrb.mxu1 %vm962_vm1, %v1608_v48  ;;  %7972 = vst [vmem:[#allocation41_spill] sm:$0xff] %v6275_v35  ;;  %v6279_v48 = vpop.permute.xlu0 %1577 }
 0x327   : > { %1573 = vrot.lane.b32.xlu2 %v6201_v37, %s5183_s26 }
 0x328   : > { %2491 = vrot.lane.b32.xlu1 %v5929_v22, %s5185_s11  ;;  %v6269_v52 = vpop.f32.mrf.mxu3 }
 0x32a   : > { %v6271_v25 = vpop.permute.xlu1 %3274  ;;  %v6292_v8 = vpop.permute.xlu0 %2505 }
 0x32b   : > { %7971 = vst [vmem:[#allocation40_spill] sm:$0xff] %v6271_v25 }
 0x32f   : > { %4576 = vrot.lane.b32.xlu2 %v6275_v35, %s5183_s26 }
 0x330   : > { %3282 = vrot.lane.b32.xlu1 %v5929_v22, %s5184_s30  ;;  %v6283_v27 = vpop.f32.mrf.mxu3 }
 0x331   : > { %1132 = vmax.xlane.f32.xlu0 %v6283_v27 }
 0x332   : > { %v6286_v16 = vpop.permute.xlu1 %2465  ;;  %v6302_v24 = vpop.permute.xlu0 %3254 }
 0x333   : > { %7973 = vst [vmem:[#allocation42_spill] sm:$0xff] %v6286_v16 }
 0x334   : > { %7975 = vst [vmem:[#allocation44_spill] sm:$0xff] %v6302_v24 }
 0x338   : > { %1589 = vrot.lane.b32.xlu1 %v5933_v10, %s5183_s26  ;;  %v6290_v45 = vpop.f32.mrf.mxu3 }
 0x33a   : > { %v6294_v7 = vpop.permute.xlu1 %3256  ;;  %v1604_v25 = vpop.permute.xlu0 %1603 }
 0x33b   : > { %7974 = vst [vmem:[#allocation43_spill] sm:$0xff] %v6294_v7 }
 0x340   : > { %2493 = vrot.lane.b32.xlu1 %v5933_v10, %s5185_s11  ;;  %v6298_v23 = vpop.f32.mrf.mxu3 }
 0x342   : > { %v6300_v22 = vpop.permute.xlu1 %4561 }
 0x348   : > { %1591 = vrot.lane.b32.xlu1 %v5939_v15, %s5183_s26  ;;  %v6306_v35 = vpop.f32.mrf.mxu3 }
 0x349   : > { %7976 = vst [vmem:[#allocation45_spill] sm:$0xff] %v6306_v35 }
 0x34a   : > { %v1606_v41 = vpop.permute.xlu1 %1605 }
 0x34b   : > { %4249 = vmatpush.xpose.msk.msrb.mxu1 %vm962_vm1, %v1606_v41 }
 0x34f   : > { %4250 = vmatpush.xpose.msk.msrb.mxu1 %vm962_vm1, %v1604_v25 }
 0x350   : > { %3286 = vrot.lane.b32.xlu1 %v5939_v15, %s5184_s30  ;;  %v6312_v10 = vpop.f32.mrf.mxu3  ;;  %v6330_v15 = vpack.i.bf16 %v6045_v4, %v6058_v54 }
 0x351   : > { %1140 = vmax.xlane.f32.xlu0 %v6312_v10 }
 0x352   : > { %v6315_v7 = vpop.permute.xlu1 %1563  ;;  %7979 = vst [vmem:[#allocation48_spill] sm:$0xff] %v6330_v15 }
 0x353   : > { %4251 = vmatpush.xpose.msk.msrb.mxu1 %vm962_vm1, %v1602_v53  ;;  %v1584_v53 = vpop.permute.xlu2 %1583 }
 0x357   : > { %4252 = vmatpush.xpose.msk.msrb.mxu1 %vm962_vm1, %v1600_v6 }
 0x358   : > { %1575 = vrot.lane.b32.xlu1 %v6215_v1, %s5183_s26  ;;  %1124 = vmax.xlane.f32.xlu2 %v6233_v13  ;;  %v6322_v41 = vpop.f32.mrf.mxu3 }
 0x359   : > { %7977 = vst [vmem:[#allocation46_spill] sm:$0xff] %v6322_v41 }
 0x35a   : > { %v6324_v25 = vpop.permute.xlu1 %2467 }
 0x35b   : > { %7978 = vst [vmem:[#allocation47_spill] sm:$0xff] %v6324_v25  ;;  %4253 = vmatpush.xpose.msk.msrb.mxu1 %vm962_vm1, %v6043_v43 }
 0x35f   : > { %4254 = vmatpush.xpose.msk.msrb.mxu1 %vm962_vm1, %v6039_v14  ;;  %v2512_v14 = vpop.permute.xlu2 %2511 }
 0x360   : > { %4586 = vrot.lane.b32.xlu1 %v6330_v15, %s5183_s26  ;;  %1130 = vmax.xlane.f32.xlu2 %v6269_v52  ;;  %v6337_v6 = vpop.f32.mrf.mxu3  ;;  %s5115_s26 = scalar_lea.hbm %s5114_s8, 128 }
 0x361   : > { %7980 = vst [vmem:[#allocation49_spill] sm:$0xff] %v6337_v6  ;;  %p5116_p1 = scmp.ne.s32.totalorder %s5114_s8, %s5115_s26  ;;  %p5121_p10 = scmp.lt.s32.totalorder %s5119_s12, %s5115_s26 }
 0x362   : > { %v6339_v24 = vpop.permute.xlu1 %3258 }
 0x363   : > { %7981 = vst [vmem:[#allocation50_spill] sm:$0xff] %v6339_v24  ;;  %4255 = vmatpush.xpose.msk.msrb.mxu1 %vm962_vm1, %v6000_v31  ;;  %v1582_v24 = vpop.permute.xlu0 %1581  ;;  %p5117_p4 = pnand %p5116_p1, %p5308_p3  ;;  %p5122_p2 = por %p5121_p10, %p5120_p9 }
 0x365   : > { %p5118_p8 = pneg %p5117_p4 }
 0x367   : > { %v6354_v15 = vpop.permute.xlu2 %2469  ;;  %p5123_p11 = pnand %p5122_p2, %p5118_p8 }
 0x368   : > { %1136 = vmax.xlane.f32.xlu2 %v6298_v23  ;;  %v6344_v43 = vpop.f32.mrf.mxu3  ;;  %7985 = vst [vmem:[#allocation54_spill] sm:$0xff] %v6354_v15 }
 0x369   : > { %7982 = vst [vmem:[#allocation51_spill] sm:$0xff] %v6344_v43  ;;  %1146 = vmax.xlane.f32.xlu0 %v6344_v43 }
 0x36a   : > { %v6347_v4 = vpop.permute.xlu1 %1565 }
 0x36b   : > { %v2510_v50 = vpop.permute.xlu0 %2509 }
 0x36f   : > { %v6359_v42 = vpop.permute.xlu2 %3260 }
 0x370   : > { %1142 = vmax.xlane.f32.xlu2 %v6322_v41  ;;  %v6350_v54 = vpop.f32.mrf.mxu3  ;;  %7987 = vst [vmem:[#allocation56_spill] sm:$0xff] %v6359_v42 }
 0x371   : > { %7983 = vst [vmem:[#allocation52_spill] sm:$0xff] %v6350_v54 }
 0x372   : > { %v6352_v59 = vpop.permute.xlu1 %3278 }
 0x373   : > { %7984 = vst [vmem:[#allocation53_spill] sm:$0xff] %v6352_v59  ;;  %v6369_v21 = vpop.permute.xlu0 %3302 }
 0x374   : > { %7989 = vst [vmem:[#allocation58_spill] sm:$0xff] %v6369_v21 }
 0x377   : > { %v6366_v5 = vpop.permute.xlu2 %4566 }
 0x378   : > { %1148 = vmax.xlane.f32.xlu2 %v6350_v54  ;;  %v6357_v31 = vpop.f32.mrf.mxu3 }
 0x379   : > { %7986 = vst [vmem:[#allocation55_spill] sm:$0xff] %v6357_v31 }
 0x37a   : > { %v1586_v39 = vpop.permute.xlu1 %1585 }
 0x37b   : > { %v6376_v42 = vpop.permute.xlu0 %2487 }
 0x37f   : > { %v6371_v2 = vpop.permute.xlu2 %3280 }
 0x380   : > { %v6361_v0 = vpop.f32.mrf.mxu3  ;;  %7990 = vst [vmem:[#allocation59_spill] sm:$0xff] %v6371_v2 }
 0x381   : > { %7988 = vst [vmem:[#allocation57_spill] sm:$0xff] %v6361_v0  ;;  %1152 = vmax.xlane.f32.xlu0 %v6361_v0 }
 0x382   : > { %v6364_v17 = vpop.permute.xlu1 %1567 }
 0x383   : > { %v6383_v0 = vpop.permute.xlu0 %2489 }
 0x387   : > { %v6381_v15 = vpop.permute.xlu2 %2471 }
 0x388   : > { %7991 = vst [vmem:[#allocation60_spill] sm:$0xff] %v6381_v15  ;;  %v6393_v41 = vpop.f32.mrf.mxu3 }
 0x389   : > { %7995 = vst [vmem:[#allocation64_spill] sm:$0xff] %v6393_v41 }
 0x38a   : > { %v1588_v59 = vpop.permute.xlu1 %1587  ;;  %1128 = vmax.xlane.f32.xlu1 %v6258_v3 }
 0x38b   : > { %v6391_v25 = vpop.permute.xlu0 %3262 }
 0x38c   : > { %7994 = vst [vmem:[#allocation63_spill] sm:$0xff] %v6391_v25 }
 0x38f   : > { %v6388_v21 = vpop.permute.xlu2 %2473 }
 0x390   : > { %7993 = vst [vmem:[#allocation62_spill] sm:$0xff] %v6388_v21 }
 0x392   : > { %v6373_v1 = vpop.permute.xlu1 %1569  ;;  %1134 = vmax.xlane.f32.xlu1 %v6290_v45 }
 0x393   : > { %v6398_v15 = vpop.permute.xlu0 %3264 }
 0x394   : > { %7996 = vst [vmem:[#allocation65_spill] sm:$0xff] %v6398_v15 }
 0x397   : > { %v4572_v54 = vpop.permute.xlu2 %4571 }
 0x39a   : > { %v6378_v37 = vpop.permute.xlu1 %2491  ;;  %1138 = vmax.xlane.f32.xlu1 %v6306_v35 }
 0x39b   : > { %v6404_v21 = vpop.permute.xlu0 %1571 }
 0x39f   : > { %v6400_v35 = vpop.permute.xlu2 %3284 }
 0x3a0   : > { %7997 = vst [vmem:[#allocation66_spill] sm:$0xff] %v6400_v35 }
 0x3a2   : > { %v6385_v43 = vpop.permute.xlu1 %3282  ;;  %1144 = vmax.xlane.f32.xlu1 %v6337_v6 }
 0x3a3   : > { %7992 = vst [vmem:[#allocation61_spill] sm:$0xff] %v6385_v43  ;;  %v6410_v6 = vpop.permute.xlu0 %2475 }
 0x3a7   : > { %v2496_v25 = vpop.permute.xlu2 %2495 }
 0x3aa   : > { %v1590_v2 = vpop.permute.xlu1 %1589  ;;  %1150 = vmax.xlane.f32.xlu1 %v6357_v31 }
 0x3ab   : > { %v4582_v35 = vpop.permute.xlu0 %4581 }
 0x3af   : > { %v6415_v15 = vpop.permute.xlu2 %1573 }
 0x3b2   : > { %v6395_v16 = vpop.permute.xlu1 %2493  ;;  %1154 = vmax.xlane.f32.xlu1 %v6393_v41 }
 0x3ba   : > { %v1592_v43 = vpop.permute.xlu1 %1591 }
 0x3bb   : > { %4256 = vmatpush.xpose.msk.msrb.mxu1 %vm962_vm1, %v1592_v43 }
 0x3bf   : > { %4257 = vmatpush.xpose.msk.msrb.mxu1 %vm962_vm1, %v1590_v2 }
 0x3c2   : > { %v6406_v31 = vpop.permute.xlu1 %3286 }
 0x3c3   : > { %7998 = vst [vmem:[#allocation67_spill] sm:$0xff] %v6406_v31  ;;  %4258 = vmatpush.xpose.msk.msrb.mxu1 %vm962_vm1, %v1588_v59  ;;  %v4577_v31 = vpop.permute.xlu2 %4576 }
 0x3c7   : > { %4259 = vmatpush.xpose.msk.msrb.mxu1 %vm962_vm1, %v1586_v39  ;;  %v4583_v39 = vunpack.i.l.bf16 %v4582_v35 }
 0x3ca   : > { %v6412_v41 = vpop.permute.xlu1 %1575 }
 0x3cb   : > { %4260 = vmatpush.xpose.msk.msrb.mxu1 %vm962_vm1, %v1584_v53  ;;  %v4584_v53 = vunpack.i.h.bf16 %v4582_v35  ;;  %v4568_v35 = vunpack.i.l.bf16 %v6366_v5 }
 0x3cf   : > { %4261 = vmatpush.xpose.msk.msrb.mxu1 %vm962_vm1, %v1582_v24  ;;  %v4578_v24 = vunpack.i.l.bf16 %v4577_v31 }
 0x3d2   : > { %v4587_v2 = vpop.permute.xlu1 %4586 }
 0x3d3   : > { %4262 = vmatpush.xpose.msk.msrb.mxu1 %vm962_vm1, %v6167_v30  ;;  %v4588_v43 = vunpack.i.l.bf16 %v4587_v2  ;;  %v4589_v59 = vunpack.i.h.bf16 %v4587_v2  ;;  %v4579_v30 = vunpack.i.h.bf16 %v4577_v31  ;;  %v4573_v2 = vunpack.i.l.bf16 %v4572_v54 }
 0x3d5   : > { %2154 = vmatpush.msrb.mxu2 %v4588_v43  ;;  %v8000_v43 = vld [vmem:[#allocation49_spill] sm:$0xff] }
 0x3d7   : > { %4263 = vmatpush.xpose.msk.msrb.mxu1 %vm962_vm1, %v6279_v48  ;;  %2155 = vmatpush.msrb.mxu2 %v4589_v59  ;;  %v4574_v48 = vunpack.i.h.bf16 %v4572_v54  ;;  %v8001_v59 = vld [vmem:[#allocation42_spill] sm:$0xff] }
 0x3d9   : > { %2156 = vmatpush.msrb.mxu2 %v4583_v39 }
 0x3da   : > { %4264 = vmatmul.msk.f32.vlgmr.msrb.gmra.mxu1 %vm962_vm1, %v6026_v29  ;;  %v4569_v29 = vunpack.i.h.bf16 %v6366_v5  ;;  %v4559_v5 = vunpack.i.h.bf16 %v6263_v49 }
 0x3db   : > { %4312 = vmatpush.xpose.msk.msra.mxu1 %vm962_vm1, %v2512_v14  ;;  %2157 = vmatpush.msrb.mxu2 %v4584_v53 }
 0x3dd   : > { %2158 = vmatpush.msrb.mxu2 %v4578_v24 }
 0x3df   : > { %4313 = vmatpush.xpose.msk.msra.mxu1 %vm962_vm1, %v2510_v50  ;;  %2159 = vmatpush.msrb.mxu2 %v4579_v30  ;;  %v4563_v50 = vunpack.i.l.bf16 %v6300_v22 }
 0x3e1   : > { %2160 = vmatpush.msrb.mxu2 %v4573_v2 }
 0x3e2   : > { %4265 = vmatmul.msk.f32.gmra.mxu1 %vm962_vm1, %v6093_v12  ;;  %v4558_v12 = vunpack.i.l.bf16 %v6263_v49 }
 0x3e3   : > { %4314 = vmatpush.xpose.msk.msra.mxu1 %vm962_vm1, %v6188_v46  ;;  %2161 = vmatpush.msrb.mxu2 %v4574_v48  ;;  %v4564_v46 = vunpack.i.h.bf16 %v6300_v22  ;;  %v8002_v48 = vld [vmem:[#allocation46_spill] sm:$0xff] }
 0x3e5   : > { %2162 = vmatpush.msrb.mxu2 %v4568_v35 }
 0x3e7   : > { %4315 = vmatpush.xpose.msk.msra.mxu1 %vm962_vm1, %v6292_v8  ;;  %2163 = vmatpush.msrb.mxu2 %v4569_v29  ;;  %v4553_v8 = vunpack.i.l.bf16 %v6028_v36  ;;  %v8003_v29 = vld [vmem:[#allocation52_spill] sm:$0xff] }
 0x3e9   : > { %2164 = vmatpush.msrb.mxu2 %v4563_v50 }
 0x3ea   : > { %4266 = vmatmul.msk.f32.gmra.mxu1 %vm962_vm1, %v6060_v56 }
 0x3eb   : > { %4316 = vmatpush.xpose.msk.msra.mxu1 %vm962_vm1, %v6104_v51  ;;  %2165 = vmatpush.msrb.mxu2 %v4564_v46  ;;  %v4554_v51 = vunpack.i.h.bf16 %v6028_v36  ;;  %v8004_v46 = vld [vmem:[#allocation47_spill] sm:$0xff] }
 0x3ed   : > { %2166 = vmatpush.msrb.mxu2 %v4558_v12 }
 0x3ef   : > { %4317 = vmatpush.xpose.msk.msra.mxu1 %vm962_vm1, %v6157_v55  ;;  %2167 = vmatpush.msrb.mxu2 %v4559_v5 }
 0x3f1   : > { %2168 = vmatpush.msrb.mxu2 %v4553_v8 }
 0x3f2   : > { %4267 = vmatmul.msk.f32.gmra.mxu1 %vm962_vm1, %v6197_v9 }
 0x3f3   : > { %4318 = vmatpush.xpose.msk.msra.mxu1 %vm962_vm1, %v6008_v20  ;;  %2169 = vmatpush.msrb.mxu2 %v4554_v51  ;;  %v1125_v20 = vpop.xlane.xlu2 %1124 }
 0x3f4   : > { %v1156_v36 = vsub.f32 %v6233_v13, %v1125_v20 }
 0x3f7   : > { %4319 = vmatpush.xpose.msk.msra.mxu1 %vm962_vm1, %v6018_v34 }
 0x3fa   : > { %4268 = vmatmul.msk.f32.gmra.mxu1 %vm962_vm1, %v6054_v33  ;;  %v1172_v33 = vmul.f32 1.442695, %v1156_v36  ;;  %v8005_v36 = vld [vmem:[#allocation51_spill] sm:$0xff] }
 0x3fb   : > { %4320 = vmatpush.xpose.msk.msra.mxu1 %vm962_vm1, %v2496_v25 }
 0x3fc   : > { %4707 = vpow2.f32 %v1172_v33 }
 0x3fd   : > { %v1129_v56 = vpop.xlane.xlu1 %1128 }
 0x3ff   : > { %4321 = vmatpush.xpose.msk.msra.mxu1 %vm962_vm1, %v6395_v16  ;;  %v1127_v16 = vpop.xlane.xlu0 %1126 }
 0x402   : > { %4269 = vmatmul.msk.f32.gmra.mxu1 %vm962_vm1, %v6138_v11 }
 0x403   : > { %4322 = vmatpush.xpose.msk.msra.mxu1 %vm962_vm1, %v6378_v37 }
 0x407   : > { %4323 = vmatpush.xpose.msk.msra.mxu1 %vm962_vm1, %v6383_v0 }
 0x40a   : > { %4270 = vmatmul.msk.f32.gmra.mxu1 %vm962_vm1, %v6153_v40 }
 0x40b   : > { %4324 = vmatpush.xpose.msk.msra.mxu1 %vm962_vm1, %v6376_v42 }
 0x40f   : > { %4325 = vmatpush.xpose.msk.msra.mxu1 %vm962_vm1, %v6237_v32  ;;  %v1131_v32 = vpop.xlane.xlu2 %1130 }
 0x412   : > { %4271 = vmatmul.msk.f32.gmra.mxu1 %vm962_vm1, %v6128_v61  ;;  %v6503_v61 = vpop.eup %4707 }
 0x413   : > { %4326 = vmatpush.xpose.msk.msra.mxu1 %vm962_vm1, %v6213_v62 }
 0x417   : > { %4327 = vmatpush.xpose.msk.msra.mxu1 %vm962_vm1, %v6247_v26  ;;  %v1137_v9 = vpop.xlane.xlu2 %1136  ;;  %v1135_v26 = vpop.xlane.xlu1 %1134 }
 0x41a   : > { %4272 = vmatmul.msk.f32.gmra.mxu1 %vm962_vm1, %v6260_v18  ;;  %v1158_v18 = vsub.f32 %v6258_v3, %v1129_v56  ;;  %v8006_v56 = vld [vmem:[#allocation57_spill] sm:$0xff] }
 0x41c   : > { %v1176_v49 = vmul.f32 1.442695, %v1158_v18 }
 0x41e   : > { %4709 = vpow2.f32 %v1176_v49  ;;  %v8007_v49 = vld [vmem:[#allocation54_spill] sm:$0xff] }
 0x422   : > { %4273 = vmatmul.msk.f32.gmra.mxu1 %vm962_vm1, %v6315_v7  ;;  %v1139_v7 = vpop.xlane.xlu1 %1138 }
 0x424   : > { %v6512_v55 = vpop.eup %4709 }
 0x42a   : > { %4274 = vmatmul.msk.f32.gmra.mxu1 %vm962_vm1, %v6347_v4  ;;  %v1145_v14 = vpop.xlane.xlu1 %1144 }
 0x432   : > { %4275 = vmatmul.msk.f32.gmra.mxu1 %vm962_vm1, %v6364_v17  ;;  %v1159_v17 = vsub.f32 %v6269_v52, %v1131_v32 }
 0x434   : > { %v1178_v0 = vmul.f32 1.442695, %v1159_v17  ;;  %v8008_v17 = vld [vmem:[#allocation32_spill] sm:$0xff] }
 0x43a   : > { %4276 = vmatmul.msk.f32.gmra.mxu1 %vm962_vm1, %v6373_v1  ;;  %v1162_v1 = vsub.f32 %v6298_v23, %v1137_v9 }
 0x43c   : > { %v1184_v52 = vmul.f32 1.442695, %v1162_v1 }
 0x442   : > { %4277 = vmatmul.msk.f32.gmra.mxu1 %vm962_vm1, %v6404_v21 }
 0x44a   : > { %4278 = vmatmul.msk.f32.gmra.mxu1 %vm962_vm1, %v6415_v15  ;;  %v1143_v15 = vpop.xlane.xlu2 %1142 }
 0x44b   : > { %v1165_v35 = vsub.f32 %v8002_v48, %v1143_v15 }
 0x44d   : > { %v1190_v12 = vmul.f32 1.442695, %v1165_v35 }
 0x452   : > { %4279 = vmatmul.msk.f32.gmra.mxu1 %vm962_vm1, %v6412_v41  ;;  %v1149_v24 = vpop.xlane.xlu2 %1148 }
 0x453   : > { %v1168_v50 = vsub.f32 %v8003_v29, %v1149_v24 }
 0x455   : > { %v1196_v5 = vmul.f32 1.442695, %v1168_v50 }
 0x457   : > { %v6491_v34 = vpop.f32.mrf.mxu1 }
 0x458   : > { %1738 = vmax.xlane.f32.xlu2 %v6491_v34 }
 0x45a   : > { %4328 = vmatmul.msk.f32.vlgmr.msra.gmra.mxu1 %vm962_vm1, %v6041_v44  ;;  %v1157_v44 = vsub.f32 %v6245_v19, %v1127_v16 }
 0x45c   : > { %v1174_v40 = vmul.f32 1.442695, %v1157_v44 }
 0x45e   : > { %4711 = vpow2.f32 %v1174_v40 }
 0x45f   : > { %v6497_v42 = vpop.f32.mrf.mxu1  ;;  %4713 = vpow2.f32 %v1178_v0  ;;  %v8009_v0 = vld [vmem:[#allocation60_spill] sm:$0xff] }
 0x460   : > { %1740 = vmax.xlane.f32.xlu0 %v6497_v42  ;;  %4715 = vpow2.f32 %v1184_v52  ;;  %v1151_v52 = vpop.xlane.xlu1 %1150 }
 0x462   : > { %4329 = vmatmul.msk.f32.gmra.mxu1 %vm962_vm1, %v6112_v38 }
 0x464   : > { %v6521_v37 = vpop.eup %4711 }
 0x465   : > { %v6531_v3 = vpop.eup %4713 }
 0x467   : > { %v6505_v11 = vpop.f32.mrf.mxu1 }
 0x468   : > { %1204 = vadd.xlane.f32.xlu0 %v6503_v61  ;;  %1742 = vmax.xlane.f32.xlu1 %v6505_v11  ;;  %v1155_v15 = vpop.xlane.xlu1 %1154 }
 0x46a   : > { %4330 = vmatmul.msk.f32.gmra.mxu1 %vm962_vm1, %v6207_v58  ;;  %v1133_v58 = vpop.xlane.xlu0 %1132 }
 0x46b   : > { %v1160_v21 = vsub.f32 %v6283_v27, %v1133_v58  ;;  %v6539_v27 = vpop.eup %4715 }
 0x46d   : > { %v1180_v13 = vmul.f32 1.442695, %v1160_v21  ;;  %v8010_v21 = vld [vmem:[#allocation62_spill] sm:$0xff] }
 0x46f   : > { %v6514_v38 = vpop.f32.mrf.mxu1  ;;  %4717 = vpow2.f32 %v1180_v13 }
 0x470   : > { %1208 = vadd.xlane.f32.xlu1 %v6512_v55  ;;  %1744 = vmax.xlane.f32.xlu2 %v6514_v38 }
 0x472   : > { %4331 = vmatmul.msk.f32.gmra.mxu1 %vm962_vm1, %v6252_v63  ;;  %v1161_v63 = vsub.f32 %v6290_v45, %v1135_v26  ;;  %v1544_v26 = vld [vmem:[#allocation8 + $0x18] sm:$0xff] }
 0x473   : > { %2396 = vmatpush.msrb.mxu0 %v1544_v26 }
 0x474   : > { %v1182_v22 = vmul.f32 1.442695, %v1161_v63 }
 0x476   : > { %4719 = vpow2.f32 %v1182_v22  ;;  %v8011_v22 = vld [vmem:[#allocation55_spill] sm:$0xff] }
 0x477   : > { %v6523_v62 = vpop.f32.mrf.mxu1 }
 0x478   : > { %1746 = vmax.xlane.f32.xlu0 %v6523_v62  ;;  %1206 = vadd.xlane.f32.xlu2 %v6521_v37 }
 0x47a   : > { %4332 = vmatmul.msk.f32.gmra.mxu1 %vm962_vm1, %v6091_v60  ;;  %v6543_v60 = vpop.eup %4717 }
 0x47c   : > { %v6557_v4 = vpop.eup %4719 }
 0x47f   : > { %v6533_v19 = vpop.f32.mrf.mxu1 }
 0x480   : > { %1210 = vadd.xlane.f32.xlu0 %v6531_v3  ;;  %1748 = vmax.xlane.f32.xlu2 %v6533_v19 }
 0x482   : > { %4333 = vmatmul.msk.f32.gmra.mxu1 %vm962_vm1, %v6192_v57  ;;  %v1141_v57 = vpop.xlane.xlu0 %1140 }
 0x483   : > { %v1164_v25 = vsub.f32 %v6312_v10, %v1141_v57  ;;  %v1166_v10 = vsub.f32 %v8000_v43, %v1145_v14  ;;  %v1169_v57 = vsub.f32 %v8011_v22, %v1151_v52  ;;  %v8012_v43 = vld [vmem:[#allocation64_spill] sm:$0xff] }
 0x485   : > { %v1188_v45 = vmul.f32 1.442695, %v1164_v25  ;;  %v1192_v39 = vmul.f32 1.442695, %v1166_v10  ;;  %v1171_v10 = vsub.f32 %v8012_v43, %v1155_v15 }
 0x487   : > { %v6541_v23 = vpop.f32.mrf.mxu1  ;;  %4721 = vpow2.f32 %v1188_v45  ;;  %v1542_v45 = vld [vmem:[#allocation8 + $0x8] sm:$0xff] }
 0x488   : > { %1216 = vadd.xlane.f32.xlu0 %v6539_v27  ;;  %1750 = vmax.xlane.f32.xlu1 %v6541_v23 }
 0x489   : > { %1212 = vadd.xlane.f32.xlu2 %v6543_v60 }
 0x48a   : > { %4334 = vmatmul.msk.f32.gmra.mxu1 %vm962_vm1, %v6186_v28  ;;  %v7999_v28 = vld [vmem:[#allocation45_spill] sm:$0xff]  ;;  %v1147_v53 = vpop.xlane.xlu0 %1146 }
 0x48b   : > { %v1163_v31 = vsub.f32 %v7999_v28, %v1139_v7  ;;  %v1167_v33 = vsub.f32 %v8005_v36, %v1147_v53  ;;  %v1543_v7 = vld [vmem:[#allocation8 + $0x10] sm:$0xff] }
 0x48c   : > { %2397 = vmatpush.msrb.mxu0 %v1543_v7 }
 0x48d   : > { %v6567_v30 = vpop.eup %4721  ;;  %v1194_v16 = vmul.f32 1.442695, %v1167_v33 }
 0x48e   : > { %2398 = vmatpush.msrb.mxu0 %v1542_v45 }
 0x48f   : > { %v6551_v41 = vpop.f32.mrf.mxu1 }
 0x490   : > { %1752 = vmax.xlane.f32.xlu1 %v6551_v41 }
 0x492   : > { %4335 = vmatmul.msk.f32.gmra.mxu1 %vm962_vm1, %v6155_v47  ;;  %v1186_v47 = vmul.f32 1.442695, %v1163_v31  ;;  %v1153_v51 = vpop.xlane.xlu0 %1152  ;;  %v1541_v31 = vld [vmem:[#allocation8] sm:$0xff] }
 0x493   : > { %v1170_v18 = vsub.f32 %v8006_v56, %v1153_v51  ;;  %2399 = vmatpush.msrb.mxu0 %v1541_v31 }
 0x494   : > { %4723 = vpow2.f32 %v1186_v47 }
 0x495   : > { %4725 = vpow2.f32 %v1192_v39  ;;  %v1200_v44 = vmul.f32 1.442695, %v1170_v18  ;;  %v1202_v39 = vmul.f32 1.442695, %v1171_v10  ;;  %v8016_v10 = vld [vmem:[#allocation35_spill] sm:$0xff] }
 0x496   : > { %4727 = vpow2.f32 %v1190_v12 }
 0x497   : > { %v6559_v54 = vpop.f32.mrf.mxu1  ;;  %4729 = vpow2.f32 %v1196_v5 }
 0x498   : > { %1214 = vadd.xlane.f32.xlu1 %v6557_v4  ;;  %1754 = vmax.xlane.f32.xlu2 %v6559_v54  ;;  %4731 = vpow2.f32 %v1194_v16 }
 0x499   : > { %4733 = vpow2.f32 %v1200_v44 }
 0x49a   : > { %4336 = vmatmul.msk.f32.gmra.mxu1 %vm962_vm1, %v8001_v59  ;;  %v6577_v8 = vpop.eup %4723  ;;  %v8013_v59 = vld [vmem:[#allocation34_spill] sm:$0xff] }
 0x49b   : > { %v6579_v20 = vpop.eup %4725 }
 0x49c   : > { %v6587_v32 = vpop.eup %4727 }
 0x49d   : > { %v6589_v40 = vpop.eup %4729 }
 0x49e   : > { %v6597_v9 = vpop.eup %4731 }
 0x49f   : > { %v6569_v2 = vpop.f32.mrf.mxu1  ;;  %v6599_v58 = vpop.eup %4733 }
 0x4a0   : > { %1756 = vmax.xlane.f32.xlu0 %v6569_v2  ;;  %1220 = vadd.xlane.f32.xlu2 %v6567_v30 }
 0x4a2   : > { %4337 = vmatmul.msk.f32.gmra.mxu1 %vm962_vm1, %v8004_v46 }
 0x4a7   : > { %v6603_v1 = vpop.f32.mrf.mxu1 }
 0x4a8   : > { %1218 = vadd.xlane.f32.xlu0 %v6577_v8  ;;  %1224 = vadd.xlane.f32.xlu2 %v6579_v20 }
 0x4aa   : > { %4338 = vmatmul.msk.f32.gmra.mxu1 %vm962_vm1, %v8007_v49 }
 0x4af   : > { %v6609_v13 = vpop.f32.mrf.mxu1 }
 0x4b0   : > { %1222 = vadd.xlane.f32.xlu0 %v6587_v32  ;;  %1228 = vadd.xlane.f32.xlu2 %v6589_v40 }
 0x4b1   : > { %2477 = vrot.lane.b32.xlu1 %v8008_v17, %s5185_s11 }
 0x4b2   : > { %4339 = vmatmul.msk.f32.gmra.mxu1 %vm962_vm1, %v8009_v0 }
 0x4b7   : > { %v6613_v14 = vpop.f32.mrf.mxu1 }
 0x4b8   : > { %1226 = vadd.xlane.f32.xlu0 %v6597_v9  ;;  %1232 = vadd.xlane.f32.xlu2 %v6599_v58 }
 0x4ba   : > { %4340 = vmatmul.msk.f32.gmra.mxu1 %vm962_vm1, %v8010_v21 }
 0x4bf   : > { %v6622_v48 = vpop.f32.mrf.mxu1 }
 0x4c2   : > { %4341 = vmatmul.msk.f32.gmra.mxu1 %vm962_vm1, %v6410_v6  ;;  %v1198_v6 = vmul.f32 1.442695, %v1169_v57 }
 0x4c7   : > { %v6636_v5 = vpop.f32.mrf.mxu1 }
 0x4cb   : > { %v1739_v63 = vpop.xlane.xlu2 %1738 }
 0x4cc   : > { %v1770_v25 = vsub.f32 %v6491_v34, %v1739_v63 }
 0x4ce   : > { %v1786_v28 = vmul.f32 1.442695, %v1770_v25  ;;  %v8014_v25 = vld [vmem:[#allocation58_spill] sm:$0xff] }
 0x4cf   : > { %v6647_v63 = vpop.f32.mrf.mxu1 }
 0x4d0   : > { %4735 = vpow2.f32 %v1786_v28  ;;  %2479 = vrot.lane.b32.xlu2 %v8013_v59, %s5185_s11 }
 0x4d1   : > { %4737 = vpow2.f32 %v1198_v6  ;;  %v8015_v6 = vld [vmem:[#allocation26_spill] sm:$0xff] }
 0x4d2   : > { %4739 = vpow2.f32 %v1202_v39 }
 0x4d3   : > { %v1741_v47 = vpop.xlane.xlu0 %1740 }
 0x4d4   : > { %v1771_v34 = vsub.f32 %v6497_v42, %v1741_v47 }
 0x4d6   : > { %v6619_v53 = vpop.eup %4735  ;;  %v1788_v24 = vmul.f32 1.442695, %v1771_v34 }
 0x4d7   : > { %1818 = vadd.xlane.f32.xlu0 %v6619_v53  ;;  %v6626_v35 = vpop.eup %4737  ;;  %v6660_v47 = vpop.f32.mrf.mxu1 }
 0x4d8   : > { %3268 = vrot.lane.b32.xlu2 %v8008_v17, %s5184_s30  ;;  %4741 = vpow2.f32 %v1788_v24  ;;  %v6631_v42 = vpop.eup %4739 }
 0x4db   : > { %v6628_v29 = vpop.xlane.xlu1 %1742  ;;  %1230 = vadd.xlane.f32.xlu1 %v6626_v35  ;;  %v1205_v50 = vpop.xlane.xlu0 %1204 }
 0x4dc   : > { %4743 = vrcp.f32 %v1205_v50  ;;  %v1247_v18 = vand.u32 2147483648, %v1205_v50  ;;  %v1245_v16 = vand.u32 2147483647, %v1205_v50  ;;  %vm1241_vm3 = vweird.f32 %v1205_v50 }
 0x4de   : > { %v6634_v46 = vpop.eup %4741  ;;  %v1248_v17 = vor.u32 1.1754944e-38, %v1247_v18  ;;  %vm1246_vm5 = vcmp.eq.f32.partialorder %v1245_v16, 8.507059e+37 }
 0x4df   : > { %1234 = vadd.xlane.f32.xlu0 %v6631_v42 }
 0x4e2   : > { %v4744_v12 = vpop.eup %4743 }
 0x4e3   : > { %v1237_v51 = vmul.f32 %v4744_v12, %v1205_v50  ;;  %v6638_v36 = vpop.xlane.xlu1 %1208  ;;  %v6640_v33 = vpop.xlane.xlu2 %1744  ;;  %1820 = vadd.xlane.f32.xlu1 %v6634_v46  ;;  %vm1242_vm2 = vweird.f32 %v4744_v12 }
 0x4e4   : > { %4745 = vrcp.f32 %v6638_v36  ;;  %vm1243_vm4 = vmor %vm1241_vm3, %vm1242_vm2  ;;  %vm1271_vm11 = vweird.f32 %v6638_v36 }
 0x4e5   : > { %v1238_v56 = vsub.f32 1.0, %v1237_v51 }
 0x4e7   : > { %v1239_v49 = vmul.f32 %v4744_v12, %v1238_v56 }
 0x4e9   : > { %v1240_v44 = vadd.f32 %v4744_v12, %v1239_v49 }
 0x4ea   : > { %v4746_v26 = vpop.eup %4745 }
 0x4eb   : > { %v1207_v0 = vpop.xlane.xlu2 %1206  ;;  %1758 = vmax.xlane.f32.xlu1 %v6603_v1  ;;  %v6645_v21 = vpop.xlane.xlu0 %1746  ;;  %v1244_v52 = vsel %vm1243_vm4, %v4744_v12, %v1240_v44  ;;  %v1267_v57 = vmul.f32 %v4746_v26, %v6638_v36  ;;  %v8017_v12 = vld [vmem:[#allocation31_spill] sm:$0xff]  ;;  %vm1272_vm9 = vweird.f32 %v4746_v26 }
 0x4ec   : > { %4747 = vrcp.f32 %v1207_v0  ;;  %v1249_v7 = vsel %vm1246_vm5, %v1248_v17, %v1244_v52  ;;  %v1262_v39 = vand.u32 2147483648, %v1207_v0  ;;  %v1260_v50 = vand.u32 2147483647, %v1207_v0  ;;  %vm1273_vm12 = vmor %vm1271_vm11, %vm1272_vm9 }
 0x4ed   : > { %v1250_v22 = vmul.f32 %v6503_v61, %v1249_v7  ;;  %v1268_v45 = vsub.f32 1.0, %v1267_v57  ;;  %vm1256_vm7 = vweird.f32 %v1207_v0  ;;  %v8018_v7 = vld [vmem:[#allocation37_spill] sm:$0xff]  ;;  %v1277_v57 = vand.u32 2147483648, %v6638_v36 }
 0x4ee   : > { %v1263_v18 = vor.u32 1.1754944e-38, %v1262_v39  ;;  %vm1261_vm10 = vcmp.eq.f32.partialorder %v1260_v50, 8.507059e+37 }
 0x4ef   : > { %1492 = vmatmul.f32.vlgmr.msra.gmra.mxu0 %v1250_v22  ;;  %v1269_v34 = vmul.f32 %v4746_v26, %v1268_v45  ;;  %v1275_v45 = vand.u32 2147483647, %v6638_v36 }
 0x4f0   : > { %4360 = vmatpush.xpose.msk.msra.mxu0 %vm962_vm1, %v8014_v25 }
 0x4f1   : > { %v1270_v17 = vadd.f32 %v4746_v26, %v1269_v34  ;;  %vm1276_vm13 = vcmp.eq.f32.partialorder %v1275_v45, 8.507059e+37  ;;  %v8022_v45 = vld [vmem:[#allocation17_spill] sm:$0xff] }
 0x4f2   : > { %v4748_v15 = vpop.eup %4747 }
 0x4f3   : > { %v1252_v28 = vmul.f32 %v4748_v15, %v1207_v0  ;;  %v6653_v31 = vpop.xlane.xlu2 %1748  ;;  %3266 = vrot.lane.b32.xlu0 %v8015_v6, %s5184_s30  ;;  %1760 = vmax.xlane.f32.xlu1 %v6609_v13  ;;  %v1211_v43 = vpop.xlane.xlu0 %1210  ;;  %vm1257_vm6 = vweird.f32 %v4748_v15 }
 0x4f4   : > { %4361 = vmatpush.xpose.msk.msra.mxu0 %vm962_vm1, %v8016_v10  ;;  %4749 = vrcp.f32 %v1211_v43  ;;  %vm1258_vm8 = vmor %vm1256_vm7, %vm1257_vm6  ;;  %v6673_v6 = vpop.f32.mrf.mxu1  ;;  %v8019_v10 = vld [vmem:[#allocation27_spill] sm:$0xff]  ;;  %vm1286_vm15 = vweird.f32 %v1211_v43 }
 0x4f5   : > { %v1253_v61 = vsub.f32 1.0, %v1252_v28  ;;  %v1274_v28 = vsel %vm1273_vm12, %v4746_v26, %v1270_v17  ;;  %v1292_v26 = vand.u32 2147483648, %v1211_v43 }
 0x4f7   : > { %v1254_v24 = vmul.f32 %v4748_v15, %v1253_v61  ;;  %v1278_v61 = vor.u32 1.1754944e-38, %v1277_v57 }
 0x4f8   : > { %4362 = vmatpush.xpose.msk.msra.mxu0 %vm962_vm1, %v8017_v12  ;;  %v8020_v12 = vld [vmem:[#allocation28_spill] sm:$0xff] }
 0x4f9   : > { %v1255_v51 = vadd.f32 %v4748_v15, %v1254_v24  ;;  %v1279_v39 = vsel %vm1276_vm13, %v1278_v61, %v1274_v28 }
 0x4fa   : > { %v4750_v56 = vpop.eup %4749 }
 0x4fb   : > { %v1282_v49 = vmul.f32 %v4750_v56, %v1211_v43  ;;  %v6664_v16 = vpop.xlane.xlu1 %1750  ;;  %v1259_v44 = vsel %vm1258_vm8, %v4748_v15, %v1255_v51  ;;  %v6678_v24 = vpop.xlane.xlu0 %1216  ;;  %vm1287_vm14 = vweird.f32 %v4750_v56  ;;  %v1280_v51 = vmul.f32 %v6512_v55, %v1279_v39  ;;  %v8023_v39 = vld [vmem:[#allocation67_spill] sm:$0xff] }
 0x4fc   : > { %v1213_v52 = vpop.xlane.xlu2 %1212  ;;  %4363 = vmatpush.xpose.msk.msra.mxu0 %vm962_vm1, %v8018_v7  ;;  %v1264_v22 = vsel %vm1261_vm10, %v1263_v18, %v1259_v44  ;;  %v1290_v18 = vand.u32 2147483647, %v1211_v43  ;;  %vm1288_vm0 = vmor %vm1286_vm15, %vm1287_vm14  ;;  %v8021_v7 = vld [vmem:[#allocation20_spill] sm:$0xff]  ;;  %vm1331_vm12 = vweird.f32 %v6678_v24 }
 0x4fd   : > { %v1283_v0 = vsub.f32 1.0, %v1282_v49  ;;  %4751 = vrcp.f32 %v1213_v52  ;;  %v1265_v25 = vmul.f32 %v6521_v37, %v1264_v22  ;;  %v1293_v22 = vor.u32 1.1754944e-38, %v1292_v26 }
 0x4fe   : > { %4753 = vrcp.f32 %v6678_v24  ;;  %vm1291_vm2 = vcmp.eq.f32.partialorder %v1290_v18, 8.507059e+37  ;;  %vm1301_vm4 = vweird.f32 %v1213_v52  ;;  %v1305_v28 = vand.u32 2147483647, %v1213_v52 }
 0x4ff   : > { %v1284_v15 = vmul.f32 %v4750_v56, %v1283_v0  ;;  %1495 = vmatmul.f32.gmra.mxu0 %v1265_v25 }
 0x500   : > { %4364 = vmatpush.xpose.msk.msra.mxu0 %vm962_vm1, %v8019_v10  ;;  %vm1306_vm6 = vcmp.eq.f32.partialorder %v1305_v28, 8.507059e+37  ;;  %v8026_v28 = vld [vmem:[#allocation59_spill] sm:$0xff] }
 0x501   : > { %2644 = vmax.xlane.f32.xlu2 %v6673_v6  ;;  %v1285_v36 = vadd.f32 %v4750_v56, %v1284_v15 }
 0x503   : > { %v4752_v34 = vpop.eup %4751  ;;  %v6680_v37 = vpop.xlane.xlu1 %1752  ;;  %v1289_v44 = vsel %vm1288_vm0, %v4750_v56, %v1285_v36  ;;  %v1307_v56 = vand.u32 2147483648, %v1213_v52 }
 0x504   : > { %v1297_v50 = vmul.f32 %v4752_v34, %v1213_v52  ;;  %4365 = vmatpush.xpose.msk.msra.mxu0 %vm962_vm1, %v8020_v12  ;;  %v1294_v57 = vsel %vm1291_vm2, %v1293_v22, %v1289_v44  ;;  %vm1302_vm3 = vweird.f32 %v4752_v34  ;;  %v4754_v43 = vpop.eup %4753  ;;  %v8025_v22 = vld [vmem:[#allocation61_spill] sm:$0xff] }
 0x505   : > { %v1295_v15 = vmul.f32 %v6531_v3, %v1294_v57  ;;  %vm1303_vm5 = vmor %vm1301_vm4, %vm1302_vm3  ;;  %v1327_v10 = vmul.f32 %v4754_v43, %v6678_v24  ;;  %v1308_v36 = vor.u32 1.1754944e-38, %v1307_v56  ;;  %v8024_v3 = vld [vmem:[#allocation66_spill] sm:$0xff]  ;;  %vm1332_vm11 = vweird.f32 %v4754_v43 }
 0x506   : > { %v1298_v49 = vsub.f32 1.0, %v1297_v50  ;;  %vm1333_vm13 = vmor %vm1331_vm12, %vm1332_vm11 }
 0x507   : > { %1498 = vmatmul.f32.gmra.mxu0 %v1280_v51  ;;  %v1328_v26 = vsub.f32 1.0, %v1327_v10 }
 0x508   : > { %v1299_v17 = vmul.f32 %v4752_v34, %v1298_v49  ;;  %4366 = vmatpush.xpose.msk.msra.mxu0 %vm962_vm1, %v8021_v7 }
 0x509   : > { %1768 = vmax.xlane.f32.xlu2 %v6647_v63  ;;  %v1329_v44 = vmul.f32 %v4754_v43, %v1328_v26 }
 0x50a   : > { %v1300_v55 = vadd.f32 %v4752_v34, %v1299_v17 }
 0x50b   : > { %v1215_v0 = vpop.xlane.xlu1 %1214  ;;  %v6689_v25 = vpop.xlane.xlu2 %1754 }
 0x50c   : > { %4755 = vrcp.f32 %v1215_v0  ;;  %4367 = vmatpush.xpose.msk.msra.mxu0 %vm962_vm1, %v8022_v45  ;;  %3270 = vrot.lane.b32.xlu1 %v8013_v59, %s5184_s30  ;;  %v1304_v61 = vsel %vm1303_vm5, %v4752_v34, %v1300_v55  ;;  %v1322_v34 = vand.u32 2147483648, %v1215_v0  ;;  %v1320_v7 = vand.u32 2147483647, %v1215_v0 }
 0x50d   : > { %v1309_v12 = vsel %vm1306_vm6, %v1308_v36, %v1304_v61  ;;  %vm1316_vm8 = vweird.f32 %v1215_v0  ;;  %v1337_v61 = vand.u32 2147483648, %v6678_v24 }
 0x50e   : > { %v1310_v49 = vmul.f32 %v6543_v60, %v1309_v12  ;;  %v1323_v55 = vor.u32 1.1754944e-38, %v1322_v34  ;;  %vm1321_vm10 = vcmp.eq.f32.partialorder %v1320_v7, 8.507059e+37  ;;  %v1330_v60 = vadd.f32 %v4754_v43, %v1329_v44  ;;  %v8027_v12 = vld [vmem:[#allocation53_spill] sm:$0xff]  ;;  %v8029_v44 = vld [vmem:[#allocation39_spill] sm:$0xff] }
 0x50f   : > { %1501 = vmatmul.f32.gmra.mxu0 %v1295_v15  ;;  %v1338_v26 = vor.u32 1.1754944e-38, %v1337_v61 }
 0x510   : > { %4368 = vmatpush.xpose.msk.msra.mxu0 %vm962_vm1, %v8023_v39  ;;  %v1335_v39 = vand.u32 2147483647, %v6678_v24 }
 0x512   : > { %v4756_v50 = vpop.eup %4755  ;;  %vm1336_vm14 = vcmp.eq.f32.partialorder %v1335_v39, 8.507059e+37  ;;  %v8031_v39 = vld [vmem:[#allocation25_spill] sm:$0xff] }
 0x513   : > { %v1312_v51 = vmul.f32 %v4756_v50, %v1215_v0  ;;  %v6699_v59 = vpop.xlane.xlu2 %1220  ;;  %v6701_v18 = vpop.xlane.xlu0 %1756  ;;  %vm1317_vm7 = vweird.f32 %v4756_v50 }
 0x514   : > { %4369 = vmatpush.xpose.msk.msra.mxu0 %vm962_vm1, %v8024_v3  ;;  %4757 = vrcp.f32 %v6699_v59  ;;  %vm1318_vm9 = vmor %vm1316_vm8, %vm1317_vm7  ;;  %v8028_v3 = vld [vmem:[#allocation48_spill] sm:$0xff]  ;;  %vm1361_vm5 = vweird.f32 %v6699_v59 }
 0x515   : > { %v1313_v52 = vsub.f32 1.0, %v1312_v51 }
 0x517   : > { %v1314_v17 = vmul.f32 %v4756_v50, %v1313_v52  ;;  %1504 = vmatmul.f32.gmra.mxu0 %v1310_v49 }
 0x518   : > { %4370 = vmatpush.xpose.msk.msra.mxu0 %vm962_vm1, %v8025_v22 }
 0x519   : > { %v1315_v57 = vadd.f32 %v4756_v50, %v1314_v17 }
 0x51a   : > { %v6718_v36 = vpop.eup %4757 }
 0x51b   : > { %v6709_v45 = vpop.xlane.xlu2 %1224  ;;  %v1219_v56 = vpop.xlane.xlu0 %1218  ;;  %v1319_v15 = vsel %vm1318_vm9, %v4756_v50, %v1315_v57  ;;  %v1334_v50 = vsel %vm1333_vm13, %v4754_v43, %v1330_v60  ;;  %v1357_v51 = vmul.f32 %v6718_v36, %v6699_v59  ;;  %vm1362_vm4 = vweird.f32 %v6718_v36 }
 0x51c   : > { %4371 = vmatpush.xpose.msk.msra.mxu0 %vm962_vm1, %v8026_v28  ;;  %v1324_v10 = vsel %vm1321_vm10, %v1323_v55, %v1319_v15  ;;  %4759 = vrcp.f32 %v1219_v56  ;;  %v8030_v55 = vld [vmem:[#allocation40_spill] sm:$0xff]  ;;  %v1352_v15 = vand.u32 2147483648, %v1219_v56  ;;  %v1350_v28 = vand.u32 2147483647, %v1219_v56  ;;  %vm1363_vm6 = vmor %vm1361_vm5, %vm1362_vm4 }
 0x51d   : > { %1762 = vmax.xlane.f32.xlu0 %v6613_v14  ;;  %v1325_v0 = vmul.f32 %v6557_v4, %v1324_v10  ;;  %v1339_v4 = vsel %vm1336_vm14, %v1338_v26, %v1334_v50  ;;  %v1358_v17 = vsub.f32 1.0, %v1357_v51  ;;  %vm1346_vm0 = vweird.f32 %v1219_v56 }
 0x51e   : > { %v1340_v7 = vmul.f32 %v6539_v27, %v1339_v4  ;;  %v1353_v50 = vor.u32 1.1754944e-38, %v1352_v15  ;;  %vm1351_vm3 = vcmp.eq.f32.partialorder %v1350_v28, 8.507059e+37  ;;  %vm1391_vm13 = vweird.f32 %v6709_v45 }
 0x51f   : > { %1507 = vmatmul.f32.gmra.mxu0 %v1325_v0  ;;  %v1359_v60 = vmul.f32 %v6718_v36, %v1358_v17 }
 0x520   : > { %4372 = vmatpush.xpose.msk.msra.mxu0 %vm962_vm1, %v8027_v12 }
 0x521   : > { %4591 = vrot.lane.b32.xlu2 %v8028_v3, %s5185_s11  ;;  %v1360_v51 = vadd.f32 %v6718_v36, %v1359_v60 }
 0x522   : > { %v4760_v52 = vpop.eup %4759 }
 0x523   : > { %v2478_v49 = vpop.permute.xlu1 %2477  ;;  %v6726_v24 = vpop.xlane.xlu2 %1228  ;;  %v1342_v34 = vmul.f32 %v4760_v52, %v1219_v56  ;;  %vm1347_vm15 = vweird.f32 %v4760_v52 }
 0x524   : > { %4373 = vmatpush.xpose.msk.msra.mxu0 %vm962_vm1, %v8029_v44  ;;  %v6730_v43 = vpop.xlane.xlu0 %1222  ;;  %4342 = vmatmul.msk.f32.gmra.mxu1 %vm962_vm1, %v2478_v49  ;;  %vm1348_vm2 = vmor %vm1346_vm0, %vm1347_vm15  ;;  %v1772_v44 = vsub.f32 %v6505_v11, %v6628_v29 }
 0x525   : > { %4761 = vrcp.f32 %v6730_v43  ;;  %1764 = vmax.xlane.f32.xlu0 %v6622_v48  ;;  %v1343_v22 = vsub.f32 1.0, %v1342_v34  ;;  %v1367_v34 = vand.u32 2147483648, %v6699_v59  ;;  %v1382_v28 = vand.u32 2147483648, %v6730_v43 }
 0x526   : > { %4763 = vrcp.f32 %v6709_v45  ;;  %v1790_v15 = vmul.f32 1.442695, %v1772_v44  ;;  %vm1376_vm9 = vweird.f32 %v6730_v43  ;;  %v1397_v44 = vand.u32 2147483648, %v6709_v45 }
 0x527   : > { %1510 = vmatmul.f32.gmra.mxu0 %v1340_v7  ;;  %v1344_v57 = vmul.f32 %v4760_v52, %v1343_v22 }
 0x528   : > { %4374 = vmatpush.xpose.msk.msra.mxu0 %vm962_vm1, %v8030_v55  ;;  %v1368_v55 = vor.u32 1.1754944e-38, %v1367_v34 }
 0x529   : > { %v1345_v10 = vadd.f32 %v4760_v52, %v1344_v57  ;;  %v1364_v57 = vsel %vm1363_vm6, %v6718_v36, %v1360_v51  ;;  %v1380_v36 = vand.u32 2147483647, %v6730_v43  ;;  %v1773_v51 = vsub.f32 %v6514_v38, %v6640_v33 }
 0x52a   : > { %v1395_v38 = vand.u32 2147483647, %v6709_v45  ;;  %vm1421_vm6 = vweird.f32 %v6726_v24 }
 0x52b   : > { %v4762_v61 = vpop.eup %4761  ;;  %v6740_v0 = vpop.xlane.xlu2 %1232  ;;  %v1349_v26 = vsel %vm1348_vm2, %v4760_v52, %v1345_v10  ;;  %v1365_v52 = vand.u32 2147483647, %v6699_v59  ;;  %vm1381_vm11 = vcmp.eq.f32.partialorder %v1380_v36, 8.507059e+37 }
 0x52c   : > { %v1372_v27 = vmul.f32 %v4762_v61, %v6730_v43  ;;  %4375 = vmatpush.xpose.msk.msra.mxu0 %vm962_vm1, %v8031_v39  ;;  %v6745_v12 = vpop.xlane.xlu0 %1226  ;;  %v6750_v4 = vpop.eup %4763  ;;  %v1354_v49 = vsel %vm1351_vm3, %v1353_v50, %v1349_v26  ;;  %vm1377_vm8 = vweird.f32 %v4762_v61  ;;  %v1383_v26 = vor.u32 1.1754944e-38, %v1382_v28 }
 0x52d   : > { %1766 = vmax.xlane.f32.xlu0 %v6636_v5  ;;  %v1355_v17 = vmul.f32 %v6577_v8, %v1354_v49  ;;  %4765 = vrcp.f32 %v6745_v12  ;;  %v1387_v7 = vmul.f32 %v6750_v4, %v6709_v45  ;;  %vm1366_vm7 = vcmp.eq.f32.partialorder %v1365_v52, 8.507059e+37  ;;  %vm1378_vm10 = vmor %vm1376_vm9, %vm1377_vm8 }
 0x52e   : > { %v1373_v56 = vsub.f32 1.0, %v1372_v27  ;;  %v1369_v11 = vsel %vm1366_vm7, %v1368_v55, %v1364_v57  ;;  %4767 = vpow2.f32 %v1790_v15  ;;  %vm1392_vm12 = vweird.f32 %v6750_v4 }
 0x52f   : > { %1513 = vmatmul.f32.gmra.mxu0 %v1355_v17  ;;  %v1388_v8 = vsub.f32 1.0, %v1387_v7  ;;  %v1370_v10 = vmul.f32 %v6567_v30, %v1369_v11  ;;  %4769 = vrcp.f32 %v6726_v24  ;;  %vm1393_vm14 = vmor %vm1391_vm13, %vm1392_vm12  ;;  %v8032_v7 = vld [vmem:[#allocation41_spill] sm:$0xff]  ;;  %v1775_v57 = vsub.f32 %v6533_v19, %v6653_v31 }
 0x530   : > { %v1374_v22 = vmul.f32 %v4762_v61, %v1373_v56  ;;  %v1398_v55 = vor.u32 1.1754944e-38, %v1397_v44  ;;  %vm1396_vm15 = vcmp.eq.f32.partialorder %v1395_v38, 8.507059e+37  ;;  %v1412_v11 = vand.u32 2147483648, %v6745_v12 }
 0x531   : > { %v1389_v27 = vmul.f32 %v6750_v4, %v1388_v8  ;;  %vm1406_vm2 = vweird.f32 %v6745_v12 }
 0x532   : > { %v1375_v29 = vadd.f32 %v4762_v61, %v1374_v22 }
 0x533   : > { %v2480_v60 = vpop.permute.xlu2 %2479  ;;  %v4766_v59 = vpop.eup %4765  ;;  %v1390_v43 = vadd.f32 %v6750_v4, %v1389_v27 }
 0x534   : > { %4343 = vmatmul.msk.f32.gmra.mxu1 %vm962_vm1, %v2480_v60  ;;  %v1402_v39 = vmul.f32 %v4766_v59, %v6745_v12  ;;  %v1379_v50 = vsel %vm1378_vm10, %v4762_v61, %v1375_v29  ;;  %v6773_v30 = vpop.eup %4767  ;;  %v1792_v61 = vmul.f32 1.442695, %v1773_v51  ;;  %vm1407_vm0 = vweird.f32 %v4766_v59 }
 0x535   : > { %v1384_v56 = vsel %vm1381_vm11, %v1383_v26, %v1379_v50  ;;  %v6777_v34 = vpop.eup %4769  ;;  %v1394_v22 = vsel %vm1393_vm14, %v6750_v4, %v1390_v43  ;;  %v1796_v60 = vmul.f32 1.442695, %v1775_v57  ;;  %v1410_v4 = vand.u32 2147483647, %v6745_v12  ;;  %vm1408_vm3 = vmor %vm1406_vm2, %vm1407_vm0 }
 0x536   : > { %2642 = vmax.xlane.f32.xlu1 %v6660_v47  ;;  %v1403_v49 = vsub.f32 1.0, %v1402_v39  ;;  %v1385_v17 = vmul.f32 %v6587_v32, %v1384_v56  ;;  %v1417_v33 = vmul.f32 %v6777_v34, %v6726_v24  ;;  %4771 = vpow2.f32 %v1792_v61 }
 0x537   : > { %1516 = vmatmul.f32.gmra.mxu0 %v1370_v10  ;;  %v1399_v32 = vsel %vm1396_vm15, %v1398_v55, %v1394_v22  ;;  %4773 = vrcp.f32 %v6740_v0  ;;  %v1413_v10 = vor.u32 1.1754944e-38, %v1412_v11  ;;  %vm1411_vm4 = vcmp.eq.f32.partialorder %v1410_v4, 8.507059e+37 }
 0x538   : > { %v1404_v52 = vmul.f32 %v4766_v59, %v1403_v49  ;;  %v1418_v15 = vsub.f32 1.0, %v1417_v33  ;;  %v1400_v8 = vmul.f32 %v6579_v20, %v1399_v32  ;;  %4775 = vpow2.f32 %v1796_v60 }
 0x539   : > { %vm1422_vm5 = vweird.f32 %v6777_v34  ;;  %v1427_v12 = vand.u32 2147483648, %v6726_v24  ;;  %v1425_v50 = vand.u32 2147483647, %v6726_v24 }
 0x53a   : > { %v1405_v45 = vadd.f32 %v4766_v59, %v1404_v52  ;;  %v1419_v31 = vmul.f32 %v6777_v34, %v1418_v15  ;;  %vm1423_vm7 = vmor %vm1421_vm6, %vm1422_vm5 }
 0x53b   : > { %v1428_v43 = vor.u32 1.1754944e-38, %v1427_v12  ;;  %vm1426_vm8 = vcmp.eq.f32.partialorder %v1425_v50, 8.507059e+37 }
 0x53c   : > { %v6796_v19 = vpop.eup %4771  ;;  %v1409_v29 = vsel %vm1408_vm3, %v4766_v59, %v1405_v45  ;;  %v1420_v27 = vadd.f32 %v6777_v34, %v1419_v31  ;;  %vm1451_vm3 = vweird.f32 %v6740_v0 }
 0x53d   : > { %v1414_v36 = vsel %vm1411_vm4, %v1413_v10, %v1409_v29  ;;  %v6800_v20 = vpop.eup %4773 }
 0x53e   : > { %1822 = vadd.xlane.f32.xlu1 %v6773_v30  ;;  %v1415_v59 = vmul.f32 %v6597_v9, %v1414_v36  ;;  %v6808_v26 = vpop.eup %4775  ;;  %v1447_v51 = vmul.f32 %v6800_v20, %v6740_v0  ;;  %v1424_v49 = vsel %vm1423_vm7, %v6777_v34, %v1420_v27  ;;  %v8033_v34 = vld [vmem:[#allocation29_spill] sm:$0xff]  ;;  %vm1452_vm0 = vweird.f32 %v6800_v20 }
 0x53f   : > { %1519 = vmatmul.f32.gmra.mxu0 %v1385_v17  ;;  %v1429_v17 = vsel %vm1426_vm8, %v1428_v43, %v1424_v49  ;;  %vm1453_vm4 = vmor %vm1451_vm3, %vm1452_vm0 }
 0x540   : > { %v1448_v9 = vsub.f32 1.0, %v1447_v51  ;;  %v1430_v32 = vmul.f32 %v6589_v40, %v1429_v17 }
 0x541   : > { %4601 = vrot.lane.b32.xlu0 %v8032_v7, %s5185_s11 }
 0x542   : > { %v1449_v15 = vmul.f32 %v6800_v20, %v1448_v9 }
 0x544   : > { %v1450_v50 = vadd.f32 %v6800_v20, %v1449_v15 }
 0x546   : > { %v1454_v17 = vsel %vm1453_vm4, %v6800_v20, %v1450_v50 }
 0x547   : > { %1522 = vmatmul.f32.gmra.mxu0 %v1400_v8 }
 0x54a   : > { %1824 = vadd.xlane.f32.xlu2 %v6796_v19  ;;  %v1819_v28 = vpop.xlane.xlu0 %1818 }
 0x54b   : > { %4777 = vrcp.f32 %v1819_v28  ;;  %v1861_v33 = vand.u32 2147483648, %v1819_v28  ;;  %v1859_v52 = vand.u32 2147483647, %v1819_v28  ;;  %vm1855_vm10 = vweird.f32 %v1819_v28 }
 0x54d   : > { %v1862_v8 = vor.u32 1.1754944e-38, %v1861_v33  ;;  %vm1860_vm12 = vcmp.eq.f32.partialorder %v1859_v52, 8.507059e+37 }
 0x54e   : > { %v1231_v39 = vpop.xlane.xlu1 %1230 }
 0x54f   : > { %4779 = vrcp.f32 %v1231_v39  ;;  %1525 = vmatmul.f32.gmra.mxu0 %v1415_v59  ;;  %v1442_v4 = vand.u32 2147483648, %v1231_v39  ;;  %v1440_v31 = vand.u32 2147483647, %v1231_v39  ;;  %vm1436_vm14 = vweird.f32 %v1231_v39 }
 0x551   : > { %v4778_v56 = vpop.eup %4777  ;;  %v1443_v59 = vor.u32 1.1754944e-38, %v1442_v4  ;;  %vm1441_vm2 = vcmp.eq.f32.partialorder %v1440_v31, 8.507059e+37 }
 0x552   : > { %v1851_v44 = vmul.f32 %v4778_v56, %v1819_v28  ;;  %1828 = vadd.xlane.f32.xlu2 %v6808_v26  ;;  %v6814_v61 = vpop.xlane.xlu0 %1234  ;;  %vm1856_vm9 = vweird.f32 %v4778_v56 }
 0x553   : > { %4781 = vrcp.f32 %v6814_v61  ;;  %vm1857_vm11 = vmor %vm1855_vm10, %vm1856_vm9  ;;  %v1472_v20 = vand.u32 2147483648, %v6814_v61  ;;  %v1470_v31 = vand.u32 2147483647, %v6814_v61 }
 0x554   : > { %v1852_v24 = vsub.f32 1.0, %v1851_v44 }
 0x555   : > { %v4780_v38 = vpop.eup %4779 }
 0x556   : > { %v1853_v22 = vmul.f32 %v4778_v56, %v1852_v24  ;;  %v1432_v57 = vmul.f32 %v4780_v38, %v1231_v39  ;;  %v1821_v55 = vpop.xlane.xlu1 %1820  ;;  %vm1437_vm13 = vweird.f32 %v4780_v38  ;;  %v8034_v39 = vld [vmem:[#allocation30_spill] sm:$0xff]  ;;  %v1455_v24 = vand.u32 2147483647, %v6740_v0 }
 0x557   : > { %4783 = vrcp.f32 %v1821_v55  ;;  %4596 = vrot.lane.b32.xlu1 %v8033_v34, %s5185_s11  ;;  %1528 = vmatmul.f32.gmra.mxu0 %v1430_v32  ;;  %vm1438_vm15 = vmor %vm1436_vm14, %vm1437_vm13  ;;  %v1876_v33 = vand.u32 2147483648, %v1821_v55  ;;  %vm1870_vm7 = vweird.f32 %v1821_v55  ;;  %vm1471_vm13 = vcmp.eq.f32.partialorder %v1470_v31, 8.507059e+37 }
 0x558   : > { %v1433_v45 = vsub.f32 1.0, %v1432_v57  ;;  %v1854_v60 = vadd.f32 %v4778_v56, %v1853_v22  ;;  %v1874_v22 = vand.u32 2147483647, %v1821_v55  ;;  %vm1456_vm6 = vcmp.eq.f32.partialorder %v1455_v24, 8.507059e+37 }
 0x559   : > { %v6821_v11 = vpop.eup %4781 }
 0x55a   : > { %v1434_v29 = vmul.f32 %v4780_v38, %v1433_v45  ;;  %v1462_v10 = vmul.f32 %v6821_v11, %v6814_v61  ;;  %v1858_v36 = vsel %vm1857_vm11, %v4778_v56, %v1854_v60  ;;  %v1457_v56 = vand.u32 2147483648, %v6740_v0 }
 0x55b   : > { %v1863_v40 = vsel %vm1860_vm12, %v1862_v8, %v1858_v36  ;;  %v1877_v45 = vor.u32 1.1754944e-38, %v1876_v33  ;;  %vm1875_vm9 = vcmp.eq.f32.partialorder %v1874_v22, 8.507059e+37  ;;  %vm1467_vm10 = vweird.f32 %v6821_v11  ;;  %v6839_v8 = vpop.f32.mrf.mxu1 }
 0x55c   : > { %v1864_v28 = vmul.f32 %v6619_v53, %v1863_v40  ;;  %v1435_v27 = vadd.f32 %v4780_v38, %v1434_v29  ;;  %v1463_v51 = vsub.f32 1.0, %v1462_v10  ;;  %v1458_v57 = vor.u32 1.1754944e-38, %v1457_v56  ;;  %v8035_v29 = vld [vmem:[#allocation36_spill] sm:$0xff] }
 0x55d   : > { %v4784_v12 = vpop.eup %4783  ;;  %vm1466_vm11 = vweird.f32 %v6814_v61  ;;  %v1473_v36 = vor.u32 1.1754944e-38, %v1472_v20  ;;  %v1774_v40 = vsub.f32 %v6523_v62, %v6645_v21  ;;  %v1776_v62 = vsub.f32 %v6541_v23, %v6664_v16 }
 0x55e   : > { %v1866_v49 = vmul.f32 %v4784_v12, %v1821_v55  ;;  %2170 = vmatmul.f32.vlgmr.msrb.gmra.mxu2 %v1864_v28  ;;  %v1439_v43 = vsel %vm1438_vm15, %v4780_v38, %v1435_v27  ;;  %v1464_v38 = vmul.f32 %v6821_v11, %v1463_v51  ;;  %vm1871_vm5 = vweird.f32 %v4784_v12  ;;  %vm1468_vm12 = vmor %vm1466_vm11, %vm1467_vm10  ;;  %v6851_v28 = vpop.permute.xlu2 %3268 }
 0x55f   : > { %4611 = vrot.lane.b32.xlu1 %v8034_v39, %s5185_s11  ;;  %v1444_v53 = vsel %vm1441_vm2, %v1443_v59, %v1439_v43  ;;  %v1459_v15 = vsel %vm1456_vm6, %v1458_v57, %v1454_v17  ;;  %vm1872_vm8 = vmor %vm1870_vm7, %vm1871_vm5  ;;  %v1798_v50 = vmul.f32 1.442695, %v1776_v62  ;;  %v1779_v43 = vsub.f32 %v6569_v2, %v6701_v18 }
 0x560   : > { %v1867_v44 = vsub.f32 1.0, %v1866_v49  ;;  %v1445_v9 = vmul.f32 %v6626_v35, %v1444_v53  ;;  %v1465_v0 = vadd.f32 %v6821_v11, %v1464_v38  ;;  %v1460_v4 = vmul.f32 %v6599_v58, %v1459_v15 }
 0x561   : > { %v1777_v49 = vsub.f32 %v6551_v41, %v6680_v37  ;;  %v1804_v24 = vmul.f32 1.442695, %v1779_v43  ;;  %v1778_v2 = vsub.f32 %v6559_v54, %v6689_v25 }
 0x562   : > { %v1868_v52 = vmul.f32 %v4784_v12, %v1867_v44  ;;  %1531 = vmatmul.f32.gmra.mxu0 %v1445_v9  ;;  %v1469_v10 = vsel %vm1468_vm12, %v6821_v11, %v1465_v0  ;;  %v1759_v44 = vpop.xlane.xlu1 %1758 }
 0x563   : > { %v1474_v58 = vsel %vm1471_vm13, %v1473_v36, %v1469_v10  ;;  %v6854_v27 = vpop.f32.mrf.mxu1  ;;  %v1800_v16 = vmul.f32 1.442695, %v1777_v49  ;;  %v1780_v37 = vsub.f32 %v6603_v1, %v1759_v44  ;;  %v1802_v33 = vmul.f32 1.442695, %v1778_v2  ;;  %v2221_v44 = vld [vmem:[#allocation8 + $0x30] sm:$0xff] }
 0x564   : > { %v1869_v32 = vadd.f32 %v4784_v12, %v1868_v52  ;;  %v1475_v61 = vmul.f32 %v6631_v42, %v1474_v58 }
 0x565   : > { %v6875_v17 = vpop.permute.xlu0 %3266  ;;  %v1806_v38 = vmul.f32 1.442695, %v1780_v37 }
 0x566   : > { %v1873_v35 = vsel %vm1872_vm8, %v4784_v12, %v1869_v32 }
 0x567   : > { %v1878_v60 = vsel %vm1875_vm9, %v1877_v45, %v1873_v35 }
 0x568   : > { %v1879_v55 = vmul.f32 %v6634_v46, %v1878_v60  ;;  %v1794_v46 = vmul.f32 1.442695, %v1774_v40 }
 0x56a   : > { %4606 = vrot.lane.b32.xlu2 %v8035_v29, %s5185_s11  ;;  %1534 = vmatmul.f32.gmra.mxu0 %v1460_v4  ;;  %4785 = vpow2.f32 %v1794_v46  ;;  %v1761_v57 = vpop.xlane.xlu1 %1760 }
 0x56b   : > { %2173 = vmatmul.f32.gmra.mxu2 %v1879_v55  ;;  %2646 = vmax.xlane.f32.xlu0 %v6839_v8  ;;  %v6867_v51 = vpop.f32.mrf.mxu1  ;;  %4787 = vpow2.f32 %v1798_v50  ;;  %v1781_v54 = vsub.f32 %v6609_v13, %v1761_v57 }
 0x56c   : > { %v1493_v11 = vpop.f32.mrf.mxu0  ;;  %4789 = vpow2.f32 %v1800_v16  ;;  %v2222_v16 = vld [vmem:[#allocation8 + $0x38] sm:$0xff] }
 0x56d   : > { %4791 = vpow2.f32 %v1804_v24  ;;  %v1808_v25 = vmul.f32 1.442695, %v1781_v54  ;;  %2283 = vmatpush.msra.mxu3 %v2222_v16  ;;  %v2220_v54 = vld [vmem:[#allocation8 + $0x28] sm:$0xff] }
 0x56e   : > { %4793 = vpow2.f32 %v1802_v33 }
 0x56f   : > { %4795 = vpow2.f32 %v1806_v38  ;;  %2284 = vmatpush.msra.mxu3 %v2221_v44 }
 0x570   : > { %v6859_v59 = vpop.eup %4785  ;;  %4797 = vpow2.f32 %v1808_v25  ;;  %v2219_v25 = vld [vmem:[#allocation8 + $0x20] sm:$0xff] }
 0x571   : > { %v6877_v41 = vpop.eup %4787  ;;  %2285 = vmatpush.msra.mxu3 %v2220_v54 }
 0x572   : > { %1537 = vmatmul.f32.gmra.mxu0 %v1475_v61  ;;  %v6884_v22 = vpop.eup %4789 }
 0x573   : > { %2648 = vmax.xlane.f32.xlu0 %v6854_v27  ;;  %v6886_v32 = vpop.eup %4791  ;;  %2286 = vmatpush.msra.mxu3 %v2219_v25 }
 0x574   : > { %v6857_v12 = vpop.xlane.xlu2 %2644  ;;  %v6892_v45 = vpop.eup %4793 }
 0x575   : > { %v6894_v35 = vpop.eup %4795 }
 0x576   : > { %v6903_v31 = vpop.eup %4797 }
 0x57a   : > { %4296 = vmatmul.msk.f32.vlgmr.msrb.gmra.mxu0 %vm962_vm1, %v1493_v11 }
 0x57b   : > { %1826 = vadd.xlane.f32.xlu0 %v6859_v59 }
 0x57c   : > { %v6865_v21 = vpop.xlane.xlu2 %1768  ;;  %v1496_v42 = vpop.f32.mrf.mxu0 }
 0x57e   : > { %v6900_v13 = vpop.permute.xlu1 %3270 }
 0x582   : > { %4297 = vmatmul.msk.f32.gmra.mxu0 %vm962_vm1, %v1496_v42 }
 0x583   : > { %2650 = vmax.xlane.f32.xlu0 %v6867_v51 }
 0x584   : > { %v4592_v56 = vpop.permute.xlu2 %4591  ;;  %v1499_v53 = vpop.f32.mrf.mxu0 }
 0x585   : > { %v4593_v23 = vunpack.i.l.bf16 %v4592_v56  ;;  %v4594_v9 = vunpack.i.h.bf16 %v4592_v56 }
 0x587   : > { %3042 = vmatpush.msrb.mxu1 %v4593_v23  ;;  %4447 = vmatpush.msra.mxu2 %v4593_v23 }
 0x589   : > { %3043 = vmatpush.msrb.mxu1 %v4594_v9  ;;  %4448 = vmatpush.msra.mxu2 %v4594_v9 }
 0x58a   : > { %4298 = vmatmul.msk.f32.gmra.mxu0 %vm962_vm1, %v1499_v53  ;;  %v6928_v53 = vpop.f32.mrf.mxu1 }
 0x58b   : > { %1830 = vadd.xlane.f32.xlu0 %v6877_v41 }
 0x58c   : > { %v1502_v18 = vpop.f32.mrf.mxu0 }
 0x590   : > { %v1763_v52 = vpop.xlane.xlu0 %1762 }
 0x591   : > { %v1782_v0 = vsub.f32 %v6613_v14, %v1763_v52  ;;  %v1785_v14 = vsub.f32 %v6647_v63, %v6865_v21 }
 0x592   : > { %4299 = vmatmul.msk.f32.gmra.mxu0 %vm962_vm1, %v1502_v18 }
 0x593   : > { %1832 = vadd.xlane.f32.xlu0 %v6884_v22  ;;  %1836 = vadd.xlane.f32.xlu2 %v6886_v32  ;;  %v1810_v60 = vmul.f32 1.442695, %v1782_v0  ;;  %v1816_v46 = vmul.f32 1.442695, %v1785_v14  ;;  %v6934_v0 = vpop.f32.mrf.mxu1 }
 0x594   : > { %v1505_v1 = vpop.f32.mrf.mxu0 }
 0x595   : > { %4799 = vpow2.f32 %v1810_v60 }
 0x598   : > { %v1765_v15 = vpop.xlane.xlu0 %1764 }
 0x599   : > { %v1783_v36 = vsub.f32 %v6622_v48, %v1765_v15 }
 0x59a   : > { %4300 = vmatmul.msk.f32.gmra.mxu0 %vm962_vm1, %v1505_v1 }
 0x59b   : > { %1834 = vadd.xlane.f32.xlu0 %v6892_v45  ;;  %1838 = vadd.xlane.f32.xlu2 %v6894_v35  ;;  %v1812_v58 = vmul.f32 1.442695, %v1783_v36  ;;  %v6910_v11 = vpop.eup %4799 }
 0x59c   : > { %v1508_v20 = vpop.f32.mrf.mxu0 }
 0x5a0   : > { %v1767_v4 = vpop.xlane.xlu0 %1766 }
 0x5a1   : > { %v1784_v55 = vsub.f32 %v6636_v5, %v1767_v4 }
 0x5a2   : > { %4301 = vmatmul.msk.f32.gmra.mxu0 %vm962_vm1, %v1508_v20 }
 0x5a3   : > { %v1814_v10 = vmul.f32 1.442695, %v1784_v55  ;;  %1840 = vadd.xlane.f32.xlu0 %v6903_v31 }
 0x5a4   : > { %v1511_v40 = vpop.f32.mrf.mxu0 }
 0x5a5   : > { %4801 = vpow2.f32 %v1814_v10  ;;  %v8036_v10 = vld [vmem:[#allocation23_spill] sm:$0xff] }
 0x5a6   : > { %4803 = vpow2.f32 %v1812_v58 }
 0x5a7   : > { %4805 = vpow2.f32 %v1816_v46 }
 0x5a9   : > { %v2643_v61 = vpop.xlane.xlu1 %2642 }
 0x5aa   : > { %v2674_v5 = vsub.f32 %v6660_v47, %v2643_v61  ;;  %4302 = vmatmul.msk.f32.gmra.mxu0 %vm962_vm1, %v1511_v40 }
 0x5ab   : > { %v6914_v62 = vpop.eup %4801  ;;  %1842 = vadd.xlane.f32.xlu0 %v6910_v11 }
 0x5ac   : > { %v2690_v48 = vmul.f32 1.442695, %v2674_v5  ;;  %1846 = vadd.xlane.f32.xlu2 %v6914_v62  ;;  %v1514_v63 = vpop.f32.mrf.mxu0  ;;  %v6918_v42 = vpop.eup %4803 }
 0x5ad   : > { %v6921_v47 = vpop.eup %4805 }
 0x5ae   : > { %4807 = vpow2.f32 %v2690_v48  ;;  %v8037_v48 = vld [vmem:[#allocation15_spill] sm:$0xff] }
 0x5b1   : > { %v1823_v21 = vpop.xlane.xlu1 %1822 }
 0x5b2   : > { %4809 = vrcp.f32 %v1823_v21  ;;  %4303 = vmatmul.msk.f32.gmra.mxu0 %vm962_vm1, %v1514_v63  ;;  %v1891_v9 = vand.u32 2147483648, %v1823_v21  ;;  %v1889_v37 = vand.u32 2147483647, %v1823_v21  ;;  %vm1885_vm15 = vweird.f32 %v1823_v21 }
 0x5b3   : > { %1844 = vadd.xlane.f32.xlu0 %v6918_v42  ;;  %v4602_v46 = vpop.permute.xlu0 %4601 }
 0x5b4   : > { %v6924_v50 = vpop.eup %4807  ;;  %1848 = vadd.xlane.f32.xlu2 %v6921_v47  ;;  %v1517_v49 = vpop.f32.mrf.mxu0  ;;  %v1892_v38 = vor.u32 1.1754944e-38, %v1891_v9  ;;  %vm1890_vm2 = vcmp.eq.f32.partialorder %v1889_v37, 8.507059e+37  ;;  %v4604_v9 = vunpack.i.h.bf16 %v4602_v46 }
 0x5b5   : > { %2722 = vadd.xlane.f32.xlu1 %v6924_v50 }
 0x5b8   : > { %v4810_v43 = vpop.eup %4809 }
 0x5b9   : > { %v1881_v56 = vmul.f32 %v4810_v43, %v1823_v21  ;;  %vm1886_vm14 = vweird.f32 %v4810_v43 }
 0x5ba   : > { %4304 = vmatmul.msk.f32.gmra.mxu0 %vm962_vm1, %v1517_v49  ;;  %vm1887_vm0 = vmor %vm1885_vm15, %vm1886_vm14  ;;  %v4603_v49 = vunpack.i.l.bf16 %v4602_v46 }
 0x5bb   : > { %v1882_v23 = vsub.f32 1.0, %v1881_v56 }
 0x5bc   : > { %v1520_v18 = vpop.f32.mrf.mxu0 }
 0x5bd   : > { %v1883_v24 = vmul.f32 %v4810_v43, %v1882_v23  ;;  %v1825_v2 = vpop.xlane.xlu2 %1824  ;;  %2652 = vmax.xlane.f32.xlu1 %v6928_v53  ;;  %v8038_v23 = vld [vmem:[#allocation16_spill] sm:$0xff] }
 0x5be   : > { %4811 = vrcp.f32 %v1825_v2  ;;  %v1906_v36 = vand.u32 2147483648, %v1825_v2  ;;  %v1904_v14 = vand.u32 2147483647, %v1825_v2  ;;  %vm1900_vm4 = vweird.f32 %v1825_v2 }
 0x5bf   : > { %v1884_v33 = vadd.f32 %v4810_v43, %v1883_v24 }
 0x5c0   : > { %v1907_v63 = vor.u32 1.1754944e-38, %v1906_v36  ;;  %vm1905_vm6 = vcmp.eq.f32.partialorder %v1904_v14, 8.507059e+37 }
 0x5c1   : > { %v1888_v52 = vsel %vm1887_vm0, %v4810_v43, %v1884_v33 }
 0x5c2   : > { %4305 = vmatmul.msk.f32.gmra.mxu0 %vm962_vm1, %v1520_v18  ;;  %v1893_v57 = vsel %vm1890_vm2, %v1892_v38, %v1888_v52 }
 0x5c3   : > { %v1894_v1 = vmul.f32 %v6773_v30, %v1893_v57 }
 0x5c4   : > { %v4812_v15 = vpop.eup %4811  ;;  %v1523_v60 = vpop.f32.mrf.mxu0 }
 0x5c5   : > { %v1896_v20 = vmul.f32 %v4812_v15, %v1825_v2  ;;  %2654 = vmax.xlane.f32.xlu1 %v6934_v0  ;;  %2176 = vmatmul.f32.gmra.mxu2 %v1894_v1  ;;  %v6937_v4 = vpop.xlane.xlu2 %1828  ;;  %vm1901_vm3 = vweird.f32 %v4812_v15 }
 0x5c6   : > { %vm1902_vm5 = vmor %vm1900_vm4, %vm1901_vm3  ;;  %4813 = vrcp.f32 %v6937_v4  ;;  %vm1930_vm12 = vweird.f32 %v6937_v4 }
 0x5c7   : > { %v1897_v55 = vsub.f32 1.0, %v1896_v20  ;;  %4616 = vrot.lane.b32.xlu0 %v8036_v10, %s5185_s11 }
 0x5c9   : > { %v1898_v40 = vmul.f32 %v4812_v15, %v1897_v55  ;;  %v4597_v30 = vpop.permute.xlu1 %4596 }
 0x5ca   : > { %v4598_v58 = vunpack.i.l.bf16 %v4597_v30  ;;  %4306 = vmatmul.msk.f32.gmra.mxu0 %vm962_vm1, %v1523_v60  ;;  %v4599_v5 = vunpack.i.h.bf16 %v4597_v30 }
 0x5cb   : > { %v1899_v61 = vadd.f32 %v4812_v15, %v1898_v40 }
 0x5cc   : > { %3044 = vmatpush.msrb.mxu1 %v4598_v58  ;;  %4626 = vrot.lane.b32.xlu2 %v8037_v48, %s5185_s11  ;;  %v1526_v43 = vpop.f32.mrf.mxu0  ;;  %v4814_v40 = vpop.eup %4813 }
 0x5cd   : > { %4449 = vmatpush.msra.mxu2 %v4598_v58  ;;  %v1903_v21 = vsel %vm1902_vm5, %v4812_v15, %v1899_v61  ;;  %v4607_v44 = vpop.permute.xlu2 %4606  ;;  %v2675_v15 = vsub.f32 %v6673_v6, %v6857_v12  ;;  %v1926_v30 = vmul.f32 %v4814_v40, %v6937_v4  ;;  %vm1931_vm11 = vweird.f32 %v4814_v40 }
 0x5ce   : > { %3045 = vmatpush.msrb.mxu1 %v4599_v5  ;;  %v1908_v56 = vsel %vm1905_vm6, %v1907_v63, %v1903_v21  ;;  %v4608_v24 = vunpack.i.l.bf16 %v4607_v44  ;;  %v4609_v37 = vunpack.i.h.bf16 %v4607_v44  ;;  %vm1932_vm13 = vmor %vm1930_vm12, %vm1931_vm11 }
 0x5cf   : > { %4450 = vmatpush.msra.mxu2 %v4599_v5  ;;  %4621 = vrot.lane.b32.xlu0 %v8038_v23, %s5185_s11  ;;  %v1909_v16 = vmul.f32 %v6796_v19, %v1908_v56  ;;  %v1927_v58 = vsub.f32 1.0, %v1926_v30  ;;  %v8039_v56 = vld [vmem:[#allocation18_spill] sm:$0xff] }
 0x5d0   : > { %3046 = vmatpush.msrb.mxu1 %v4603_v49 }
 0x5d1   : > { %4451 = vmatpush.msra.mxu2 %v4603_v49  ;;  %v4612_v2 = vpop.permute.xlu1 %4611  ;;  %v1928_v49 = vmul.f32 %v4814_v40, %v1927_v58 }
 0x5d2   : > { %2179 = vmatmul.f32.gmra.mxu2 %v1909_v16  ;;  %4307 = vmatmul.msk.f32.gmra.mxu0 %vm962_vm1, %v1526_v43  ;;  %v4613_v18 = vunpack.i.l.bf16 %v4612_v2  ;;  %v4614_v38 = vunpack.i.h.bf16 %v4612_v2 }
 0x5d3   : > { %3047 = vmatpush.msrb.mxu1 %v4604_v9  ;;  %4452 = vmatpush.msra.mxu2 %v4604_v9 }
 0x5d4   : > { %v1529_v33 = vpop.f32.mrf.mxu0 }
 0x5d5   : > { %3048 = vmatpush.msrb.mxu1 %v4608_v24  ;;  %4453 = vmatpush.msra.mxu2 %v4608_v24 }
 0x5d7   : > { %3049 = vmatpush.msrb.mxu1 %v4609_v37  ;;  %4454 = vmatpush.msra.mxu2 %v4609_v37 }
 0x5d9   : > { %3050 = vmatpush.msrb.mxu1 %v4613_v18  ;;  %4455 = vmatpush.msra.mxu2 %v4613_v18  ;;  %v1929_v18 = vadd.f32 %v4814_v40, %v1928_v49 }
 0x5da   : > { %4308 = vmatmul.msk.f32.gmra.mxu0 %vm962_vm1, %v1529_v33 }
 0x5db   : > { %3051 = vmatpush.msrb.mxu1 %v4614_v38  ;;  %4456 = vmatpush.msra.mxu2 %v4614_v38 }
 0x5de   : > { %4631 = vrot.lane.b32.xlu1 %v8028_v3, %s5184_s30  ;;  %v2647_v19 = vpop.xlane.xlu0 %2646  ;;  %v2692_v3 = vmul.f32 1.442695, %v2675_v15 }
 0x5df   : > { %v1532_v52 = vpop.f32.mrf.mxu0  ;;  %v2676_v54 = vsub.f32 %v6839_v8, %v2647_v19  ;;  %v1936_v19 = vand.u32 2147483648, %v6937_v4 }
 0x5e1   : > { %v2171_v57 = vpop.f32.mrf.mxu2  ;;  %v2694_v20 = vmul.f32 1.442695, %v2676_v54  ;;  %v8040_v54 = vld [vmem:[#allocation22_spill] sm:$0xff] }
 0x5e2   : > { %4280 = vmatmul.msk.f32.vlgmr.msra.gmra.mxu3 %vm962_vm1, %v2171_v57  ;;  %4309 = vmatmul.msk.f32.gmra.mxu0 %vm962_vm1, %v1532_v52  ;;  %v1934_v57 = vand.u32 2147483647, %v6937_v4 }
 0x5e3   : > { %4815 = vpow2.f32 %v2694_v20 }
 0x5e4   : > { %vm1935_vm14 = vcmp.eq.f32.partialorder %v1934_v57, 8.507059e+37 }
 0x5e6   : > { %v2649_v1 = vpop.xlane.xlu0 %2648 }
 0x5e7   : > { %v1535_v25 = vpop.f32.mrf.mxu0  ;;  %v2677_v60 = vsub.f32 %v6854_v27, %v2649_v1  ;;  %v1933_v1 = vsel %vm1932_vm13, %v4814_v40, %v1929_v18  ;;  %v8041_v40 = vld [vmem:[#allocation21_spill] sm:$0xff] }
 0x5e9   : > { %v2696_v14 = vmul.f32 1.442695, %v2677_v60  ;;  %v6962_v6 = vpop.eup %4815 }
 0x5ea   : > { %4310 = vmatmul.msk.f32.gmra.mxu0 %vm962_vm1, %v1535_v25  ;;  %v1937_v25 = vor.u32 1.1754944e-38, %v1936_v19 }
 0x5ec   : > { %v1938_v20 = vsel %vm1935_vm14, %v1937_v25, %v1933_v1 }
 0x5ed   : > { %v1939_v4 = vmul.f32 %v6808_v26, %v1938_v20 }
 0x5ee   : > { %v2174_v55 = vpop.f32.mrf.mxu2  ;;  %v1827_v36 = vpop.xlane.xlu0 %1826 }
 0x5ef   : > { %4817 = vrcp.f32 %v1827_v36  ;;  %4281 = vmatmul.msk.f32.gmra.mxu3 %vm962_vm1, %v2174_v55  ;;  %v1538_v8 = vpop.f32.mrf.mxu0  ;;  %v1921_v21 = vand.u32 2147483648, %v1827_v36  ;;  %v1919_v16 = vand.u32 2147483647, %v1827_v36  ;;  %vm1915_vm8 = vweird.f32 %v1827_v36 }
 0x5f0   : > { %4819 = vpow2.f32 %v2692_v3 }
 0x5f1   : > { %4821 = vpow2.f32 %v2696_v14  ;;  %v1922_v24 = vor.u32 1.1754944e-38, %v1921_v21  ;;  %vm1920_vm10 = vcmp.eq.f32.partialorder %v1919_v16, 8.507059e+37 }
 0x5f2   : > { %4311 = vmatmul.msk.f32.gmra.mxu0 %vm962_vm1, %v1538_v8 }
 0x5f5   : > { %v4818_v12 = vpop.eup %4817  ;;  %2726 = vadd.xlane.f32.xlu2 %v6962_v6 }
 0x5f6   : > { %v1911_v27 = vmul.f32 %v4818_v12, %v1827_v36  ;;  %v6965_v46 = vpop.xlane.xlu0 %2650  ;;  %v6969_v5 = vpop.eup %4819  ;;  %vm1916_vm7 = vweird.f32 %v4818_v12 }
 0x5f7   : > { %v6967_v61 = vpop.f32.mrf.mxu0  ;;  %v6974_v44 = vpop.eup %4821  ;;  %vm1917_vm9 = vmor %vm1915_vm8, %vm1916_vm7 }
 0x5f8   : > { %v1912_v63 = vsub.f32 1.0, %v1911_v27  ;;  %v6987_v36 = vpop.f32.mrf.mxu1 }
 0x5f9   : > { %2724 = vadd.xlane.f32.xlu0 %v6969_v5 }
 0x5fa   : > { %v1913_v43 = vmul.f32 %v4818_v12, %v1912_v63  ;;  %4376 = vmatmul.msk.f32.vlgmr.msra.gmra.mxu0 %vm962_vm1, %v8039_v56 }
 0x5fc   : > { %v1914_v9 = vadd.f32 %v4818_v12, %v1913_v43 }
 0x5fd   : > { %2728 = vadd.xlane.f32.xlu2 %v6974_v44 }
 0x5fe   : > { %v1831_v2 = vpop.xlane.xlu0 %1830  ;;  %v1918_v37 = vsel %vm1917_vm9, %v4818_v12, %v1914_v9 }
 0x5ff   : > { %4823 = vrcp.f32 %v1831_v2  ;;  %v6977_v33 = vpop.f32.mrf.mxu0  ;;  %v1923_v38 = vsel %vm1920_vm10, %v1922_v24, %v1918_v37  ;;  %v1951_v14 = vand.u32 2147483648, %v1831_v2  ;;  %vm1945_vm0 = vweird.f32 %v1831_v2  ;;  %v8042_v37 = vld [vmem:[#allocation33_spill] sm:$0xff] }
 0x600   : > { %v1924_v52 = vmul.f32 %v6859_v59, %v1923_v38  ;;  %v1949_v58 = vand.u32 2147483647, %v1831_v2 }
 0x601   : > { %v1952_v43 = vor.u32 1.1754944e-38, %v1951_v14 }
 0x602   : > { %2182 = vmatmul.f32.gmra.mxu2 %v1924_v52  ;;  %4377 = vmatmul.msk.f32.gmra.mxu0 %vm962_vm1, %v8040_v54  ;;  %vm1950_vm3 = vcmp.eq.f32.partialorder %v1949_v58, 8.507059e+37 }
 0x605   : > { %v4824_v15 = vpop.eup %4823 }
 0x606   : > { %v1941_v3 = vmul.f32 %v4824_v15, %v1831_v2  ;;  %v6985_v60 = vpop.xlane.xlu2 %1836  ;;  %v1833_v55 = vpop.xlane.xlu0 %1832  ;;  %vm1946_vm15 = vweird.f32 %v4824_v15 }
 0x607   : > { %v6989_v59 = vpop.f32.mrf.mxu0  ;;  %4825 = vrcp.f32 %v1833_v55  ;;  %vm1947_vm2 = vmor %vm1945_vm0, %vm1946_vm15  ;;  %v1966_v18 = vand.u32 2147483648, %v1833_v55  ;;  %v1964_v19 = vand.u32 2147483647, %v1833_v55  ;;  %vm1960_vm5 = vweird.f32 %v1833_v55 }
 0x608   : > { %v1942_v8 = vsub.f32 1.0, %v1941_v3  ;;  %2656 = vmax.xlane.f32.xlu1 %v6987_v36  ;;  %4827 = vrcp.f32 %v6985_v60  ;;  %vm1990_vm13 = vweird.f32 %v6985_v60 }
 0x609   : > { %v1967_v25 = vor.u32 1.1754944e-38, %v1966_v18  ;;  %vm1965_vm7 = vcmp.eq.f32.partialorder %v1964_v19, 8.507059e+37  ;;  %v1994_v18 = vand.u32 2147483647, %v6985_v60 }
 0x60a   : > { %v1943_v30 = vmul.f32 %v4824_v15, %v1942_v8  ;;  %2185 = vmatmul.f32.gmra.mxu2 %v1939_v4  ;;  %4378 = vmatmul.msk.f32.gmra.mxu0 %vm962_vm1, %v8041_v40 }
 0x60b   : > { %vm1995_vm15 = vcmp.eq.f32.partialorder %v1994_v18, 8.507059e+37 }
 0x60c   : > { %v1944_v12 = vadd.f32 %v4824_v15, %v1943_v30 }
 0x60d   : > { %4636 = vrot.lane.b32.xlu0 %v8033_v34, %s5184_s30  ;;  %v4826_v27 = vpop.eup %4825 }
 0x60e   : > { %v1835_v63 = vpop.xlane.xlu0 %1834  ;;  %v1948_v21 = vsel %vm1947_vm2, %v4824_v15, %v1944_v12  ;;  %v1956_v26 = vmul.f32 %v4826_v27, %v1833_v55  ;;  %v7000_v56 = vpop.xlane.xlu2 %1838  ;;  %vm1961_vm4 = vweird.f32 %v4826_v27 }
 0x60f   : > { %v6998_v49 = vpop.f32.mrf.mxu0  ;;  %4829 = vrcp.f32 %v1835_v63  ;;  %v7002_v16 = vpop.eup %4827  ;;  %v1953_v24 = vsel %vm1950_vm3, %v1952_v43, %v1948_v21  ;;  %vm1962_vm6 = vmor %vm1960_vm5, %vm1961_vm4  ;;  %v1981_v40 = vand.u32 2147483648, %v1835_v63  ;;  %v1979_v12 = vand.u32 2147483647, %v1835_v63 }
 0x610   : > { %v1957_v9 = vsub.f32 1.0, %v1956_v26  ;;  %v1954_v2 = vmul.f32 %v6877_v41, %v1953_v24  ;;  %4831 = vrcp.f32 %v7000_v56  ;;  %v1986_v38 = vmul.f32 %v7002_v16, %v6985_v60 }
 0x611   : > { %vm1975_vm9 = vweird.f32 %v1835_v63  ;;  %vm1980_vm11 = vcmp.eq.f32.partialorder %v1979_v12, 8.507059e+37  ;;  %vm1991_vm12 = vweird.f32 %v7002_v16  ;;  %vm2005_vm2 = vweird.f32 %v7000_v56 }
 0x612   : > { %4379 = vmatmul.msk.f32.gmra.mxu0 %vm962_vm1, %v8042_v37  ;;  %v1958_v34 = vmul.f32 %v4826_v27, %v1957_v9  ;;  %2188 = vmatmul.f32.gmra.mxu2 %v1954_v2  ;;  %v1987_v15 = vsub.f32 1.0, %v1986_v38  ;;  %v1996_v2 = vand.u32 2147483648, %v6985_v60  ;;  %vm1992_vm14 = vmor %vm1990_vm13, %vm1991_vm12 }
 0x614   : > { %v1959_v41 = vadd.f32 %v4826_v27, %v1958_v34  ;;  %v1988_v55 = vmul.f32 %v7002_v16, %v1987_v15  ;;  %v8044_v34 = vld [vmem:[#allocation24_spill] sm:$0xff] }
 0x615   : > { %4646 = vrot.lane.b32.xlu0 %v8035_v29, %s5184_s30  ;;  %4641 = vrot.lane.b32.xlu2 %v8032_v7, %s5184_s30  ;;  %v4830_v52 = vpop.eup %4829  ;;  %v8043_v7 = vld [vmem:[#allocation19_spill] sm:$0xff] }
 0x616   : > { %v7014_v57 = vpop.xlane.xlu0 %1840  ;;  %v1971_v54 = vmul.f32 %v4830_v52, %v1835_v63  ;;  %v1963_v20 = vsel %vm1962_vm6, %v4826_v27, %v1959_v41  ;;  %v7018_v3 = vpop.eup %4831  ;;  %vm1976_vm8 = vweird.f32 %v4830_v52  ;;  %v1989_v9 = vadd.f32 %v7002_v16, %v1988_v55 }
 0x617   : > { %v7016_v1 = vpop.f32.mrf.mxu0  ;;  %v1968_v29 = vsel %vm1965_vm7, %v1967_v25, %v1963_v20  ;;  %4833 = vrcp.f32 %v7014_v57  ;;  %v2001_v14 = vmul.f32 %v7018_v3, %v7000_v56  ;;  %vm1977_vm10 = vmor %vm1975_vm9, %vm1976_vm8  ;;  %v1997_v41 = vor.u32 1.1754944e-38, %v1996_v2 }
 0x618   : > { %v1972_v8 = vsub.f32 1.0, %v1971_v54  ;;  %v1969_v4 = vmul.f32 %v6884_v22, %v1968_v29  ;;  %v1982_v22 = vor.u32 1.1754944e-38, %v1981_v40  ;;  %vm2006_vm0 = vweird.f32 %v7018_v3  ;;  %v8045_v29 = vld [vmem:[#allocation38_spill] sm:$0xff] }
 0x619   : > { %v2002_v43 = vsub.f32 1.0, %v2001_v14  ;;  %vm2007_vm3 = vmor %vm2005_vm2, %vm2006_vm0  ;;  %vm2020_vm6 = vweird.f32 %v7014_v57 }
 0x61a   : > { %4380 = vmatmul.msk.f32.gmra.mxu0 %vm962_vm1, %v8043_v7  ;;  %v1973_v30 = vmul.f32 %v4830_v52, %v1972_v8  ;;  %2191 = vmatmul.f32.gmra.mxu2 %v1969_v4  ;;  %v2011_v8 = vand.u32 2147483648, %v7000_v56  ;;  %v2009_v4 = vand.u32 2147483647, %v7000_v56 }
 0x61b   : > { %v2003_v38 = vmul.f32 %v7018_v3, %v2002_v43  ;;  %v8046_v43 = vld [vmem:[#allocation44_spill] sm:$0xff] }
 0x61c   : > { %v1974_v58 = vadd.f32 %v4830_v52, %v1973_v30  ;;  %v2012_v40 = vor.u32 1.1754944e-38, %v2011_v8  ;;  %vm2010_vm4 = vcmp.eq.f32.partialorder %v2009_v4, 8.507059e+37  ;;  %v7109_v4 = vpop.f32.mrf.mxu1 }
 0x61d   : > { %v7033_v24 = vpop.eup %4833  ;;  %v2004_v15 = vadd.f32 %v7018_v3, %v2003_v38 }
 0x61e   : > { %v7027_v27 = vpop.xlane.xlu0 %1842  ;;  %v1978_v26 = vsel %vm1977_vm10, %v4830_v52, %v1974_v58  ;;  %v2016_v19 = vmul.f32 %v7033_v24, %v7014_v57  ;;  %vm2021_vm5 = vweird.f32 %v7033_v24 }
 0x61f   : > { %v7029_v21 = vpop.f32.mrf.mxu0  ;;  %v1983_v63 = vsel %vm1980_vm11, %v1982_v22, %v1978_v26  ;;  %4835 = vrcp.f32 %v7027_v27  ;;  %v7072_v55 = vpop.xlane.xlu2 %1846  ;;  %v2026_v26 = vand.u32 2147483648, %v7014_v57  ;;  %vm2022_vm7 = vmor %vm2020_vm6, %vm2021_vm5  ;;  %vm2035_vm10 = vweird.f32 %v7027_v27 }
 0x620   : > { %v1984_v37 = vmul.f32 %v6892_v45, %v1983_v63  ;;  %v2017_v54 = vsub.f32 1.0, %v2016_v19 }
 0x621   : > { %4651 = vrot.lane.b32.xlu1 %v8034_v39, %s5184_s30  ;;  %v1993_v39 = vsel %vm1992_vm14, %v7002_v16, %v1989_v9  ;;  %v2024_v9 = vand.u32 2147483647, %v7014_v57  ;;  %v2027_v18 = vor.u32 1.1754944e-38, %v2026_v26 }
 0x622   : > { %4381 = vmatmul.msk.f32.gmra.mxu0 %vm962_vm1, %v8044_v34  ;;  %2194 = vmatmul.f32.gmra.mxu2 %v1984_v37  ;;  %v1998_v45 = vsel %vm1995_vm15, %v1997_v41, %v1993_v39  ;;  %v2018_v7 = vmul.f32 %v7033_v24, %v2017_v54  ;;  %v2041_v54 = vand.u32 2147483648, %v7027_v27 }
 0x623   : > { %v1999_v16 = vmul.f32 %v6886_v32, %v1998_v45  ;;  %vm2025_vm8 = vcmp.eq.f32.partialorder %v2024_v9, 8.507059e+37 }
 0x624   : > { %v2019_v58 = vadd.f32 %v7033_v24, %v2018_v7 }
 0x625   : > { %v7056_v20 = vpop.eup %4835 }
 0x626   : > { %v7050_v25 = vpop.xlane.xlu0 %1844  ;;  %v2031_v30 = vmul.f32 %v7056_v20, %v7027_v27  ;;  %v2023_v34 = vsel %vm2022_vm7, %v7033_v24, %v2019_v58  ;;  %vm2036_vm9 = vweird.f32 %v7056_v20  ;;  %vm2065_vm7 = vweird.f32 %v7072_v55 }
 0x627   : > { %v7048_v52 = vpop.f32.mrf.mxu0  ;;  %v2028_v19 = vsel %vm2025_vm8, %v2027_v18, %v2023_v34  ;;  %v7099_v41 = vpop.xlane.xlu2 %1848  ;;  %vm7115_vm11 = vmor %vm2035_vm10, %vm2036_vm9  ;;  %vm2050_vm0 = vweird.f32 %v7050_v25 }
 0x628   : > { %v7052_v60 = vpop.xlane.xlu1 %2722  ;;  %v2032_v56 = vsub.f32 1.0, %v2031_v30  ;;  %v2029_v8 = vmul.f32 %v6903_v31, %v2028_v19 }
 0x629   : > { %4656 = vrot.lane.b32.xlu1 %v8036_v10, %s5184_s30  ;;  %4837 = vrcp.f32 %v7052_v60  ;;  %v2008_v10 = vsel %vm2007_vm3, %v7018_v3, %v2004_v15  ;;  %v2765_v9 = vand.u32 2147483648, %v7052_v60  ;;  %vm2759_vm15 = vweird.f32 %v7052_v60 }
 0x62a   : > { %4382 = vmatmul.msk.f32.gmra.mxu0 %vm962_vm1, %v8045_v29  ;;  %4839 = vrcp.f32 %v7050_v25  ;;  %2197 = vmatmul.f32.gmra.mxu2 %v1999_v16  ;;  %v2013_v14 = vsel %vm2010_vm4, %v2012_v40, %v2008_v10  ;;  %v2033_v63 = vmul.f32 %v7056_v20, %v2032_v56  ;;  %v8047_v16 = vld [vmem:[#allocation43_spill] sm:$0xff]  ;;  %v2039_v29 = vand.u32 2147483647, %v7027_v27 }
 0x62b   : > { %4841 = vrcp.f32 %v7072_v55  ;;  %v2014_v3 = vmul.f32 %v6894_v35, %v2013_v14  ;;  %v2042_v14 = vor.u32 1.1754944e-38, %v2041_v54 }
 0x62c   : > { %v2034_v45 = vadd.f32 %v7056_v20, %v2033_v63  ;;  %4843 = vrcp.f32 %v7099_v41  ;;  %vm2040_vm12 = vcmp.eq.f32.partialorder %v2039_v29, 8.507059e+37  ;;  %v2056_v63 = vand.u32 2147483648, %v7050_v25  ;;  %v7162_v29 = vpop.f32.mrf.mxu1 }
 0x62e   : > { %v2038_v27 = vsel %vm7115_vm11, %v7056_v20, %v2034_v45  ;;  %v2054_v45 = vand.u32 2147483647, %v7050_v25  ;;  %vm2080_vm11 = vweird.f32 %v7099_v41 }
 0x62f   : > { %v7074_v32 = vpop.f32.mrf.mxu0  ;;  %v7076_v12 = vpop.eup %4837 }
 0x630   : > { %v7080_v22 = vpop.eup %4839  ;;  %v2755_v2 = vmul.f32 %v7076_v12, %v7052_v60  ;;  %v7123_v56 = vpop.xlane.xlu1 %2652  ;;  %vm2760_vm13 = vweird.f32 %v7076_v12  ;;  %vm2055_vm5 = vcmp.eq.f32.partialorder %v2054_v45, 8.507059e+37 }
 0x631   : > { %v2046_v37 = vmul.f32 %v7080_v22, %v7050_v25  ;;  %v7097_v39 = vpop.eup %4841  ;;  %vm2051_vm14 = vweird.f32 %v7080_v22  ;;  %vm7139_vm2 = vmor %vm2759_vm15, %vm2760_vm13 }
 0x632   : > { %4383 = vmatmul.msk.f32.gmra.mxu0 %vm962_vm1, %v8046_v43  ;;  %2200 = vmatmul.f32.gmra.mxu2 %v2014_v3  ;;  %v2756_v35 = vsub.f32 1.0, %v2755_v2  ;;  %v2061_v7 = vmul.f32 %v7097_v39, %v7072_v55  ;;  %v2043_v43 = vsel %vm2040_vm12, %v2042_v14, %v2038_v27  ;;  %v7133_v2 = vpop.eup %4843  ;;  %vm7153_vm3 = vmor %vm2050_vm0, %vm2051_vm14  ;;  %vm2066_vm6 = vweird.f32 %v7097_v39 }
 0x633   : > { %v2047_v57 = vsub.f32 1.0, %v2046_v37  ;;  %v2763_v37 = vand.u32 2147483647, %v7052_v60  ;;  %v2044_v19 = vmul.f32 %v6910_v11, %v2043_v43  ;;  %v2076_v11 = vmul.f32 %v7133_v2, %v7099_v41  ;;  %vm2067_vm8 = vmor %vm2065_vm7, %vm2066_vm6 }
 0x634   : > { %v2757_v30 = vmul.f32 %v7076_v12, %v2756_v35  ;;  %v2062_v58 = vsub.f32 1.0, %v2061_v7  ;;  %vm2081_vm10 = vweird.f32 %v7133_v2 }
 0x635   : > { %v2048_v31 = vmul.f32 %v7080_v22, %v2047_v57  ;;  %v8052_v57 = vld [vmem:[#allocation50_spill] sm:$0xff]  ;;  %vm2764_vm4 = vcmp.eq.f32.partialorder %v2763_v37, 8.507059e+37  ;;  %vm2082_vm12 = vmor %vm2080_vm11, %vm2081_vm10 }
 0x636   : > { %v2758_v26 = vadd.f32 %v7076_v12, %v2757_v30  ;;  %v2063_v54 = vmul.f32 %v7097_v39, %v2062_v58 }
 0x637   : > { %v7095_v38 = vpop.f32.mrf.mxu0  ;;  %v2049_v20 = vadd.f32 %v7080_v22, %v2048_v31 }
 0x638   : > { %v2762_v60 = vsel %vm7139_vm2, %v7076_v12, %v2758_v26  ;;  %v2057_v12 = vor.u32 1.1754944e-38, %v2056_v63  ;;  %v7167_v14 = vpop.xlane.xlu1 %2654  ;;  %v2064_v58 = vadd.f32 %v7097_v39, %v2063_v54  ;;  %v2071_v26 = vand.u32 2147483648, %v7072_v55  ;;  %v8058_v54 = vld [vmem:[#allocation63_spill] sm:$0xff] }
 0x639   : > { %v4617_v15 = vpop.permute.xlu0 %4616  ;;  %v2053_v25 = vsel %vm7153_vm3, %v7080_v22, %v2049_v20  ;;  %v8056_v20 = vld [vmem:[#allocation56_spill] sm:$0xff]  ;;  %v2069_v63 = vand.u32 2147483647, %v7072_v55  ;;  %v2086_v55 = vand.u32 2147483648, %v7099_v41 }
 0x63a   : > { %v4618_v24 = vunpack.i.l.bf16 %v4617_v15  ;;  %4384 = vmatmul.msk.f32.gmra.mxu0 %vm962_vm1, %v8047_v16  ;;  %v4619_v40 = vunpack.i.h.bf16 %v4617_v15  ;;  %2203 = vmatmul.f32.gmra.mxu2 %v2029_v8  ;;  %v4627_v15 = vpop.permute.xlu2 %4626  ;;  %v2766_v8 = vor.u32 1.1754944e-38, %v2765_v9  ;;  %v2058_v31 = vsel %vm2055_vm5, %v2057_v12, %v2053_v25  ;;  %v8060_v25 = vld [vmem:[#allocation65_spill] sm:$0xff] }
 0x63b   : > { %v4628_v30 = vunpack.i.l.bf16 %v4627_v15  ;;  %v4629_v27 = vunpack.i.h.bf16 %v4627_v15  ;;  %v2059_v9 = vmul.f32 %v6918_v42, %v2058_v31  ;;  %v2072_v18 = vor.u32 1.1754944e-38, %v2071_v26 }
 0x63c   : > { %3052 = vmatpush.msrb.mxu1 %v4618_v24  ;;  %4457 = vmatpush.msra.mxu2 %v4618_v24  ;;  %v2767_v7 = vsel %vm2764_vm4, %v2766_v8, %v2762_v60  ;;  %vm2070_vm9 = vcmp.eq.f32.partialorder %v2069_v63, 8.507059e+37  ;;  %v2087_v24 = vor.u32 1.1754944e-38, %v2086_v55 }
 0x63d   : > { %v2768_v43 = vmul.f32 %v6924_v50, %v2767_v7 }
 0x63e   : > { %2658 = vmax.xlane.f32.xlu2 %v7109_v4  ;;  %3053 = vmatpush.msrb.mxu1 %v4619_v40 }
 0x63f   : > { %4458 = vmatpush.msra.mxu2 %v4619_v40  ;;  %v7128_v3 = vpop.f32.mrf.mxu0  ;;  %v2077_v40 = vsub.f32 1.0, %v2076_v11 }
 0x641   : > { %v4622_v34 = vpop.permute.xlu0 %4621  ;;  %v2078_v37 = vmul.f32 %v7133_v2, %v2077_v40 }
 0x642   : > { %v4623_v35 = vunpack.i.l.bf16 %v4622_v34  ;;  %4385 = vmatmul.msk.f32.gmra.mxu0 %vm962_vm1, %v8052_v57  ;;  %v4624_v16 = vunpack.i.h.bf16 %v4622_v34  ;;  %2206 = vmatmul.f32.gmra.mxu2 %v2044_v19  ;;  %v2068_v34 = vsel %vm2067_vm8, %v7097_v39, %v2064_v58  ;;  %v2084_v39 = vand.u32 2147483647, %v7099_v41 }
 0x643   : > { %v2079_v19 = vadd.f32 %v7133_v2, %v2078_v37 }
 0x644   : > { %3054 = vmatpush.msrb.mxu1 %v4623_v35  ;;  %4459 = vmatpush.msra.mxu2 %v4623_v35  ;;  %v2073_v35 = vsel %vm2070_vm9, %v2072_v18, %v2068_v34  ;;  %vm2085_vm13 = vcmp.eq.f32.partialorder %v2084_v39, 8.507059e+37 }
 0x645   : > { %v2074_v45 = vmul.f32 %v6914_v62, %v2073_v35  ;;  %v2083_v15 = vsel %vm2082_vm12, %v7133_v2, %v2079_v19 }
 0x646   : > { %2660 = vmax.xlane.f32.xlu2 %v7162_v29  ;;  %3055 = vmatpush.msrb.mxu1 %v4624_v16  ;;  %v2088_v62 = vsel %vm2085_vm13, %v2087_v24, %v2083_v15 }
 0x647   : > { %4460 = vmatpush.msra.mxu2 %v4624_v16  ;;  %v7165_v10 = vpop.f32.mrf.mxu0  ;;  %v2089_v16 = vmul.f32 %v6921_v47, %v2088_v62 }
 0x648   : > { %8055 = vst [vmem:[#allocation45_spill] sm:$0xff] %v7165_v10  ;;  %v2177_v22 = vpop.f32.mrf.mxu2  ;;  %3056 = vmatpush.msrb.mxu1 %v4628_v30 }
 0x649   : > { %4461 = vmatpush.msra.mxu2 %v4628_v30  ;;  %4282 = vmatmul.msk.f32.gmra.mxu3 %vm962_vm1, %v2177_v22 }
 0x64a   : > { %3057 = vmatpush.msrb.mxu1 %v4629_v27  ;;  %4386 = vmatmul.msk.f32.gmra.mxu0 %vm962_vm1, %v8056_v20 }
 0x64b   : > { %4462 = vmatpush.msra.mxu2 %v4629_v27  ;;  %3058 = vmatmul.f32.vlgmr.msrb.gmra.mxu1 %v2768_v43 }
 0x64c   : > { %2209 = vmatmul.f32.gmra.mxu2 %v2059_v9 }
 0x64f   : > { %v7181_v50 = vpop.f32.mrf.mxu0 }
 0x650   : > { %8057 = vst [vmem:[#allocation49_spill] sm:$0xff] %v7181_v50  ;;  %v4632_v42 = vpop.permute.xlu1 %4631 }
 0x651   : > { %v4633_v57 = vunpack.i.l.bf16 %v4632_v42  ;;  %v4634_v60 = vunpack.i.h.bf16 %v4632_v42 }
 0x652   : > { %4387 = vmatmul.msk.f32.gmra.mxu0 %vm962_vm1, %v8058_v54 }
 0x653   : > { %3833 = vmatpush.msra.mxu1 %v4633_v57 }
 0x654   : > { %2212 = vmatmul.f32.gmra.mxu2 %v2074_v45 }
 0x655   : > { %v2180_v11 = vpop.f32.mrf.mxu2  ;;  %3834 = vmatpush.msra.mxu1 %v4634_v60 }
 0x656   : > { %4283 = vmatmul.msk.f32.gmra.mxu3 %vm962_vm1, %v2180_v11 }
 0x657   : > { %v7193_v8 = vpop.f32.mrf.mxu0 }
 0x658   : > { %8059 = vst [vmem:[#allocation42_spill] sm:$0xff] %v7193_v8 }
 0x65a   : > { %4388 = vmatmul.msk.f32.gmra.mxu0 %vm962_vm1, %v8060_v25 }
 0x65c   : > { %2215 = vmatmul.f32.gmra.mxu2 %v2089_v16 }
 0x65f   : > { %v7198_v41 = vpop.f32.mrf.mxu0 }
 0x660   : > { %8061 = vst [vmem:[#allocation46_spill] sm:$0xff] %v7198_v41 }
 0x662   : > { %4389 = vmatmul.msk.f32.gmra.mxu0 %vm962_vm1, %v6875_v17 }
 0x667   : > { %v7202_v2 = vpop.f32.mrf.mxu0 }
 0x668   : > { %8062 = vst [vmem:[#allocation52_spill] sm:$0xff] %v7202_v2  ;;  %v2727_v12 = vpop.xlane.xlu2 %2726 }
 0x669   : > { %4845 = vrcp.f32 %v2727_v12  ;;  %v2795_v19 = vand.u32 2147483648, %v2727_v12  ;;  %vm2789_vm4 = vweird.f32 %v2727_v12  ;;  %v2793_v45 = vand.u32 2147483647, %v2727_v12 }
 0x66a   : > { %4390 = vmatmul.msk.f32.gmra.mxu0 %vm962_vm1, %v6851_v28 }
 0x66b   : > { %v2796_v11 = vor.u32 1.1754944e-38, %v2795_v19  ;;  %vm2794_vm6 = vcmp.eq.f32.partialorder %v2793_v45, 8.507059e+37 }
 0x66c   : > { %v2725_v7 = vpop.xlane.xlu0 %2724 }
 0x66d   : > { %4847 = vrcp.f32 %v2725_v7  ;;  %v2780_v28 = vand.u32 2147483648, %v2725_v7  ;;  %v2778_v9 = vand.u32 2147483647, %v2725_v7  ;;  %vm2774_vm15 = vweird.f32 %v2725_v7 }
 0x66f   : > { %v4846_v30 = vpop.eup %4845  ;;  %v7206_v47 = vpop.f32.mrf.mxu0  ;;  %v2781_v34 = vor.u32 1.1754944e-38, %v2780_v28  ;;  %vm2779_vm2 = vcmp.eq.f32.partialorder %v2778_v9, 8.507059e+37 }
 0x670   : > { %8063 = vst [vmem:[#allocation47_spill] sm:$0xff] %v7206_v47  ;;  %v2785_v31 = vmul.f32 %v4846_v30, %v2727_v12  ;;  %v7208_v40 = vpop.xlane.xlu2 %2728  ;;  %vm2790_vm3 = vweird.f32 %v4846_v30 }
 0x671   : > { %4849 = vrcp.f32 %v7208_v40  ;;  %vm2791_vm5 = vmor %vm2789_vm4, %vm2790_vm3  ;;  %v2810_v12 = vand.u32 2147483648, %v7208_v40  ;;  %vm2804_vm8 = vweird.f32 %v7208_v40 }
 0x672   : > { %4391 = vmatmul.msk.f32.gmra.mxu0 %vm962_vm1, %v6900_v13  ;;  %v2786_v27 = vsub.f32 1.0, %v2785_v31 }
 0x673   : > { %v4848_v17 = vpop.eup %4847 }
 0x674   : > { %v2770_v22 = vmul.f32 %v4848_v17, %v2725_v7  ;;  %v2787_v20 = vmul.f32 %v4846_v30, %v2786_v27  ;;  %vm2775_vm14 = vweird.f32 %v4848_v17 }
 0x675   : > { %vm2776_vm0 = vmor %vm2774_vm15, %vm2775_vm14 }
 0x676   : > { %v2771_v58 = vsub.f32 1.0, %v2770_v22  ;;  %v2788_v42 = vadd.f32 %v4846_v30, %v2787_v20  ;;  %v2811_v20 = vor.u32 1.1754944e-38, %v2810_v12  ;;  %v3110_v12 = vld [vmem:[#allocation8 + $0x58] sm:$0xff] }
 0x677   : > { %v7213_v26 = vpop.eup %4849  ;;  %v7215_v43 = vpop.f32.mrf.mxu0  ;;  %3171 = vmatpush.msrb.mxu3 %v3110_v12 }
 0x678   : > { %v2772_v63 = vmul.f32 %v4848_v17, %v2771_v58  ;;  %v2800_v37 = vmul.f32 %v7213_v26, %v7208_v40  ;;  %3433 = vmax.xlane.f32.xlu1 %v7215_v43  ;;  %v2792_v24 = vsel %vm2791_vm5, %v4846_v30, %v2788_v42  ;;  %v4642_v62 = vpop.permute.xlu2 %4641  ;;  %vm2805_vm7 = vweird.f32 %v7213_v26 }
 0x679   : > { %v2797_v25 = vsel %vm2794_vm6, %v2796_v11, %v2792_v24  ;;  %v4643_v7 = vunpack.i.l.bf16 %v4642_v62  ;;  %v4644_v27 = vunpack.i.h.bf16 %v4642_v62  ;;  %vm2806_vm9 = vmor %vm2804_vm8, %vm2805_vm7  ;;  %v7259_v62 = vpop.f32.mrf.mxu1 }
 0x67a   : > { %v2773_v13 = vadd.f32 %v4848_v17, %v2772_v63  ;;  %v2801_v18 = vsub.f32 1.0, %v2800_v37  ;;  %v2798_v30 = vmul.f32 %v6962_v6, %v2797_v25 }
 0x67b   : > { %v7236_v63 = vpop.xlane.xlu1 %2656 }
 0x67c   : > { %v2777_v35 = vsel %vm2776_vm0, %v4848_v17, %v2773_v13  ;;  %v2802_v60 = vmul.f32 %v7213_v26, %v2801_v18  ;;  %v2808_v17 = vand.u32 2147483647, %v7208_v40 }
 0x67d   : > { %v2782_v55 = vsel %vm2779_vm2, %v2781_v34, %v2777_v35 }
 0x67e   : > { %v2783_v57 = vmul.f32 %v6969_v5, %v2782_v55  ;;  %v2803_v5 = vadd.f32 %v7213_v26, %v2802_v60  ;;  %vm2809_vm10 = vcmp.eq.f32.partialorder %v2808_v17, 8.507059e+37  ;;  %v2679_v17 = vsub.f32 %v6928_v53, %v7123_v56 }
 0x67f   : > { %v7221_v54 = vpop.f32.mrf.mxu0  ;;  %v4637_v39 = vpop.permute.xlu0 %4636  ;;  %v2680_v53 = vsub.f32 %v6934_v0, %v7167_v14 }
 0x680   : > { %v4638_v15 = vunpack.i.l.bf16 %v4637_v39  ;;  %3435 = vmax.xlane.f32.xlu1 %v7221_v54  ;;  %3061 = vmatmul.f32.gmra.mxu1 %v2783_v57  ;;  %v4639_v16 = vunpack.i.h.bf16 %v4637_v39  ;;  %v2807_v9 = vsel %vm2806_vm9, %v7213_v26, %v2803_v5 }
 0x681   : > { %v2812_v6 = vsel %vm2809_vm10, %v2811_v20, %v2807_v9 }
 0x682   : > { %3835 = vmatpush.msra.mxu1 %v4638_v15  ;;  %v2813_v13 = vmul.f32 %v6974_v44, %v2812_v6 }
 0x684   : > { %3836 = vmatpush.msra.mxu1 %v4639_v16 }
 0x685   : > { %v2183_v31 = vpop.f32.mrf.mxu2 }
 0x686   : > { %4284 = vmatmul.msk.f32.gmra.mxu3 %vm962_vm1, %v2183_v31  ;;  %3837 = vmatpush.msra.mxu1 %v4643_v7  ;;  %v3109_v31 = vld [vmem:[#allocation8 + $0x50] sm:$0xff] }
 0x687   : > { %v7232_v22 = vpop.f32.mrf.mxu0  ;;  %v4647_v58 = vpop.permute.xlu0 %4646  ;;  %3172 = vmatpush.msrb.mxu3 %v3109_v31 }
 0x688   : > { %v4648_v28 = vunpack.i.l.bf16 %v4647_v58  ;;  %3437 = vmax.xlane.f32.xlu2 %v7232_v22  ;;  %3064 = vmatmul.f32.gmra.mxu1 %v2798_v30  ;;  %v4649_v37 = vunpack.i.h.bf16 %v4647_v58  ;;  %v3108_v30 = vld [vmem:[#allocation8 + $0x48] sm:$0xff]  ;;  %v3107_v58 = vld [vmem:[#allocation8 + $0x40] sm:$0xff] }
 0x689   : > { %3838 = vmatpush.msra.mxu1 %v4644_v27  ;;  %3173 = vmatpush.msrb.mxu3 %v3108_v30 }
 0x68b   : > { %3839 = vmatpush.msra.mxu1 %v4648_v28  ;;  %3174 = vmatpush.msrb.mxu3 %v3107_v58 }
 0x68d   : > { %3840 = vmatpush.msra.mxu1 %v4649_v37  ;;  %v2186_v40 = vpop.f32.mrf.mxu2 }
 0x68e   : > { %4285 = vmatmul.msk.f32.gmra.mxu3 %vm962_vm1, %v2186_v40  ;;  %v2702_v40 = vmul.f32 1.442695, %v2680_v53 }
 0x68f   : > { %v7240_v34 = vpop.f32.mrf.mxu0 }
 0x690   : > { %3439 = vmax.xlane.f32.xlu0 %v7240_v34  ;;  %3067 = vmatmul.f32.gmra.mxu1 %v2813_v13 }
 0x693   : > { %v4652_v26 = vpop.permute.xlu1 %4651 }
 0x694   : > { %v4653_v18 = vunpack.i.l.bf16 %v4652_v26  ;;  %v4654_v35 = vunpack.i.h.bf16 %v4652_v26 }
 0x695   : > { %v2189_v42 = vpop.f32.mrf.mxu2 }
 0x696   : > { %3841 = vmatpush.msra.mxu1 %v4653_v18  ;;  %4286 = vmatmul.msk.f32.gmra.mxu3 %vm962_vm1, %v2189_v42 }
 0x697   : > { %v7243_v19 = vpop.f32.mrf.mxu0 }
 0x698   : > { %3441 = vmax.xlane.f32.xlu0 %v7243_v19  ;;  %3842 = vmatpush.msra.mxu1 %v4654_v35 }
 0x69b   : > { %v4657_v55 = vpop.permute.xlu1 %4656 }
 0x69c   : > { %v4658_v57 = vunpack.i.l.bf16 %v4657_v55  ;;  %v4659_v44 = vunpack.i.h.bf16 %v4657_v55 }
 0x69d   : > { %v2192_v45 = vpop.f32.mrf.mxu2 }
 0x69e   : > { %3843 = vmatpush.msra.mxu1 %v4658_v57  ;;  %4287 = vmatmul.msk.f32.gmra.mxu3 %vm962_vm1, %v2192_v45 }
 0x69f   : > { %v7247_v39 = vpop.f32.mrf.mxu0 }
 0x6a0   : > { %3443 = vmax.xlane.f32.xlu1 %v7247_v39  ;;  %4661 = vrot.lane.b32.xlu2 %v8038_v23, %s5184_s30  ;;  %v7267_v23 = vpop.f32.mrf.mxu1 }
 0x6a1   : > { %3844 = vmatpush.msra.mxu1 %v4659_v44 }
 0x6a5   : > { %v2195_v60 = vpop.f32.mrf.mxu2 }
 0x6a6   : > { %4288 = vmatmul.msk.f32.gmra.mxu3 %vm962_vm1, %v2195_v60 }
 0x6a7   : > { %v7253_v15 = vpop.f32.mrf.mxu0 }
 0x6a8   : > { %3445 = vmax.xlane.f32.xlu0 %v7253_v15  ;;  %v7277_v27 = vpop.f32.mrf.mxu1 }
 0x6ad   : > { %v2198_v24 = vpop.f32.mrf.mxu2 }
 0x6ae   : > { %4289 = vmatmul.msk.f32.gmra.mxu3 %vm962_vm1, %v2198_v24 }
 0x6af   : > { %v7257_v11 = vpop.f32.mrf.mxu0 }
 0x6b0   : > { %3447 = vmax.xlane.f32.xlu1 %v7257_v11  ;;  %v7281_v9 = vpop.f32.mrf.mxu1 }
 0x6b1   : > { %v7304_v14 = vpop.xlane.xlu2 %2658 }
 0x6b5   : > { %v2201_v16 = vpop.f32.mrf.mxu2 }
 0x6b6   : > { %4290 = vmatmul.msk.f32.gmra.mxu3 %vm962_vm1, %v2201_v16 }
 0x6b7   : > { %v7263_v25 = vpop.f32.mrf.mxu0 }
 0x6b8   : > { %3449 = vmax.xlane.f32.xlu1 %v7263_v25  ;;  %v7291_v6 = vpop.f32.mrf.mxu1 }
 0x6b9   : > { %v7311_v60 = vpop.xlane.xlu2 %2660 }
 0x6bc   : > { %4666 = vrot.lane.b32.xlu0 %v8037_v48, %s5184_s30  ;;  %v2700_v48 = vmul.f32 1.442695, %v2679_v17 }
 0x6bd   : > { %v2204_v7 = vpop.f32.mrf.mxu2 }
 0x6be   : > { %4291 = vmatmul.msk.f32.gmra.mxu3 %vm962_vm1, %v2204_v7  ;;  %4851 = vpow2.f32 %v2700_v48 }
 0x6bf   : > { %v7271_v5 = vpop.f32.mrf.mxu0  ;;  %4853 = vpow2.f32 %v2702_v40 }
 0x6c0   : > { %3451 = vmax.xlane.f32.xlu1 %v7271_v5  ;;  %v7295_v26 = vpop.f32.mrf.mxu1 }
 0x6c4   : > { %v7284_v37 = vpop.eup %4851 }
 0x6c5   : > { %v2207_v28 = vpop.f32.mrf.mxu2  ;;  %v7300_v42 = vpop.eup %4853 }
 0x6c6   : > { %4292 = vmatmul.msk.f32.gmra.mxu3 %vm962_vm1, %v2207_v28 }
 0x6c7   : > { %v7289_v56 = vpop.f32.mrf.mxu0 }
 0x6c8   : > { %v3059_v0 = vpop.f32.mrf.mxu1 }
 0x6c9   : > { %2662 = vmax.xlane.f32.xlu2 %v7259_v62 }
 0x6cf   : > { %v2210_v20 = vpop.f32.mrf.mxu2  ;;  %v7297_v18 = vpop.f32.mrf.mxu0 }
 0x6d0   : > { %4293 = vmatmul.msk.f32.gmra.mxu3 %vm962_vm1, %v2210_v20 }
 0x6d1   : > { %2732 = vadd.xlane.f32.xlu2 %v7284_v37 }
 0x6d7   : > { %v2213_v13 = vpop.f32.mrf.mxu2  ;;  %v7306_v55 = vpop.f32.mrf.mxu0 }
 0x6d8   : > { %4294 = vmatmul.msk.f32.gmra.mxu3 %vm962_vm1, %v2213_v13 }
 0x6d9   : > { %2666 = vmax.xlane.f32.xlu2 %v7277_v27 }
 0x6df   : > { %v2216_v35 = vpop.f32.mrf.mxu2 }
 0x6e0   : > { %4295 = vmatmul.msk.f32.gmra.mxu3 %vm962_vm1, %v2216_v35  ;;  %v2681_v35 = vsub.f32 %v6987_v36, %v7236_v63 }
 0x6e1   : > { %2734 = vadd.xlane.f32.xlu2 %v7300_v42 }
 0x6e8   : > { %4344 = vmatmul.msk.f32.vlgmr.msrb.gmra.mxu3 %vm962_vm1, %v3059_v0 }
 0x6e9   : > { %3457 = vmax.xlane.f32.xlu2 %v7306_v55 }
 0x6eb   : > { %v3434_v57 = vpop.xlane.xlu1 %3433 }
 0x6ec   : > { %v3465_v44 = vsub.f32 %v7215_v43, %v3434_v57 }
 0x6ee   : > { %v3481_v45 = vmul.f32 1.442695, %v3465_v44 }
 0x6f0   : > { %4855 = vpow2.f32 %v3481_v45 }
 0x6f1   : > { %2670 = vmax.xlane.f32.xlu2 %v7291_v6 }
 0x6f3   : > { %v3436_v24 = vpop.xlane.xlu1 %3435 }
 0x6f4   : > { %v3466_v16 = vsub.f32 %v7221_v54, %v3436_v24  ;;  %v2678_v54 = vsub.f32 %v6867_v51, %v6965_v46  ;;  %v2704_v46 = vmul.f32 1.442695, %v2681_v35 }
 0x6f6   : > { %v7314_v7 = vpop.eup %4855  ;;  %v3483_v12 = vmul.f32 1.442695, %v3466_v16  ;;  %v2698_v20 = vmul.f32 1.442695, %v2678_v54 }
 0x6f7   : > { %3513 = vadd.xlane.f32.xlu1 %v7314_v7 }
 0x6f8   : > { %4857 = vpow2.f32 %v3483_v12 }
 0x6fb   : > { %v3438_v31 = vpop.xlane.xlu2 %3437 }
 0x6fc   : > { %v3467_v30 = vsub.f32 %v7232_v22, %v3438_v31 }
 0x6fd   : > { %v3062_v17 = vpop.f32.mrf.mxu1 }
 0x6fe   : > { %v7318_v43 = vpop.eup %4857  ;;  %v3485_v58 = vmul.f32 1.442695, %v3467_v30  ;;  %4345 = vmatmul.msk.f32.gmra.mxu3 %vm962_vm1, %v3062_v17 }
 0x6ff   : > { %2664 = vmax.xlane.f32.xlu1 %v7267_v23  ;;  %3515 = vadd.xlane.f32.xlu0 %v7318_v43 }
 0x700   : > { %4859 = vpow2.f32 %v3485_v58 }
 0x701   : > { %4861 = vpow2.f32 %v2698_v20 }
 0x702   : > { %4863 = vpow2.f32 %v2704_v46 }
 0x703   : > { %v4662_v48 = vpop.permute.xlu2 %4661  ;;  %v3440_v28 = vpop.xlane.xlu0 %3439 }
 0x704   : > { %v4663_v53 = vunpack.i.l.bf16 %v4662_v48  ;;  %v4664_v13 = vunpack.i.h.bf16 %v4662_v48  ;;  %v3468_v51 = vsub.f32 %v7240_v34, %v3440_v28  ;;  %v7354_v28 = vpop.f32.mrf.mxu0 }
 0x705   : > { %v3065_v40 = vpop.f32.mrf.mxu1 }
 0x706   : > { %v7325_v22 = vpop.eup %4859  ;;  %4346 = vmatmul.msk.f32.gmra.mxu3 %vm962_vm1, %v3065_v40  ;;  %3845 = vmatpush.msra.mxu1 %v4663_v53  ;;  %v3487_v0 = vmul.f32 1.442695, %v3468_v51  ;;  %v2683_v53 = vsub.f32 %v7162_v29, %v7311_v60  ;;  %v2682_v40 = vsub.f32 %v7109_v4, %v7304_v14 }
 0x707   : > { %3453 = vmax.xlane.f32.xlu1 %v7289_v56  ;;  %3517 = vadd.xlane.f32.xlu0 %v7325_v22  ;;  %v7333_v45 = vpop.eup %4861 }
 0x708   : > { %3846 = vmatpush.msra.mxu1 %v4664_v13  ;;  %4865 = vpow2.f32 %v3487_v0  ;;  %v7340_v16 = vpop.eup %4863  ;;  %v2706_v35 = vmul.f32 1.442695, %v2682_v40 }
 0x70b   : > { %v3442_v57 = vpop.xlane.xlu0 %3441 }
 0x70c   : > { %v3469_v24 = vsub.f32 %v7243_v19, %v3442_v57 }
 0x70d   : > { %v3068_v44 = vpop.f32.mrf.mxu1 }
 0x70e   : > { %4347 = vmatmul.msk.f32.gmra.mxu3 %vm962_vm1, %v3068_v44  ;;  %v3489_v36 = vmul.f32 1.442695, %v3469_v24  ;;  %v7342_v12 = vpop.eup %4865 }
 0x70f   : > { %3455 = vmax.xlane.f32.xlu1 %v7297_v18  ;;  %2730 = vadd.xlane.f32.xlu0 %v7333_v45 }
 0x710   : > { %4867 = vpow2.f32 %v3489_v36 }
 0x713   : > { %v3444_v63 = vpop.xlane.xlu1 %3443 }
 0x714   : > { %v3470_v34 = vsub.f32 %v7247_v39, %v3444_v63  ;;  %v7380_v63 = vpop.f32.mrf.mxu0 }
 0x716   : > { %v3491_v31 = vmul.f32 1.442695, %v3470_v34  ;;  %v7346_v19 = vpop.eup %4867 }
 0x717   : > { %2736 = vadd.xlane.f32.xlu0 %v7340_v16  ;;  %3519 = vadd.xlane.f32.xlu1 %v7342_v12 }
 0x718   : > { %4869 = vpow2.f32 %v3491_v31 }
 0x71b   : > { %v3446_v17 = vpop.xlane.xlu0 %3445 }
 0x71c   : > { %v3471_v39 = vsub.f32 %v7253_v15, %v3446_v17  ;;  %v2708_v15 = vmul.f32 1.442695, %v2683_v53 }
 0x71e   : > { %v7348_v30 = vpop.eup %4869  ;;  %v3493_v48 = vmul.f32 1.442695, %v3471_v39 }
 0x71f   : > { %3523 = vadd.xlane.f32.xlu0 %v7348_v30  ;;  %3521 = vadd.xlane.f32.xlu1 %v7346_v19 }
 0x723   : > { %v3448_v58 = vpop.xlane.xlu1 %3447 }
 0x724   : > { %v3472_v54 = vsub.f32 %v7257_v11, %v3448_v58  ;;  %v7389_v58 = vpop.f32.mrf.mxu0 }
 0x726   : > { %v3495_v20 = vmul.f32 1.442695, %v3472_v54 }
 0x727   : > { %3459 = vmax.xlane.f32.xlu0 %v7354_v28  ;;  %2668 = vmax.xlane.f32.xlu1 %v7281_v9 }
 0x728   : > { %4871 = vpow2.f32 %v3495_v20 }
 0x729   : > { %4873 = vpow2.f32 %v3493_v48 }
 0x72a   : > { %4875 = vpow2.f32 %v2708_v15 }
 0x72b   : > { %v3450_v13 = vpop.xlane.xlu1 %3449 }
 0x72c   : > { %v3473_v11 = vsub.f32 %v7263_v25, %v3450_v13 }
 0x72e   : > { %v7363_v51 = vpop.eup %4871  ;;  %v3497_v46 = vmul.f32 1.442695, %v3473_v11  ;;  %v4667_v0 = vpop.permute.xlu0 %4666 }
 0x72f   : > { %v7365_v57 = vpop.eup %4873  ;;  %v4668_v29 = vunpack.i.l.bf16 %v4667_v0  ;;  %3527 = vadd.xlane.f32.xlu2 %v7363_v51  ;;  %2672 = vmax.xlane.f32.xlu0 %v7295_v26  ;;  %v4669_v4 = vunpack.i.h.bf16 %v4667_v0 }
 0x730   : > { %4877 = vpow2.f32 %v3497_v46  ;;  %3525 = vadd.xlane.f32.xlu1 %v7365_v57  ;;  %v7371_v60 = vpop.eup %4875 }
 0x731   : > { %4879 = vpow2.f32 %v2706_v35  ;;  %3847 = vmatpush.msra.mxu1 %v4668_v29 }
 0x733   : > { %v3452_v25 = vpop.xlane.xlu1 %3451  ;;  %3848 = vmatpush.msra.mxu1 %v4669_v4 }
 0x734   : > { %v3474_v14 = vsub.f32 %v7271_v5, %v3452_v25 }
 0x736   : > { %v7373_v44 = vpop.eup %4877  ;;  %v3499_v24 = vmul.f32 1.442695, %v3474_v14 }
 0x737   : > { %v7375_v36 = vpop.eup %4879  ;;  %2740 = vadd.xlane.f32.xlu2 %v7371_v60  ;;  %3529 = vadd.xlane.f32.xlu0 %v7373_v44 }
 0x738   : > { %4881 = vpow2.f32 %v3499_v24  ;;  %2738 = vadd.xlane.f32.xlu1 %v7375_v36 }
 0x73c   : > { %v2663_v34 = vpop.xlane.xlu2 %2662 }
 0x73d   : > { %v2684_v5 = vsub.f32 %v7259_v62, %v2663_v34 }
 0x73e   : > { %v7382_v31 = vpop.eup %4881 }
 0x73f   : > { %3531 = vadd.xlane.f32.xlu0 %v7382_v31  ;;  %v2710_v17 = vmul.f32 1.442695, %v2684_v5 }
 0x740   : > { %3461 = vmax.xlane.f32.xlu1 %v7380_v63 }
 0x741   : > { %4883 = vpow2.f32 %v2710_v17 }
 0x744   : > { %v7387_v39 = vpop.xlane.xlu2 %2732 }
 0x747   : > { %v7391_v54 = vpop.eup %4883 }
 0x748   : > { %3463 = vmax.xlane.f32.xlu1 %v7389_v58  ;;  %2742 = vadd.xlane.f32.xlu2 %v7391_v54 }
 0x74c   : > { %v2667_v48 = vpop.xlane.xlu2 %2666 }
 0x74d   : > { %v2686_v20 = vsub.f32 %v7277_v27, %v2667_v48 }
 0x74f   : > { %v2714_v62 = vmul.f32 1.442695, %v2686_v20 }
 0x751   : > { %4885 = vpow2.f32 %v2714_v62 }
 0x754   : > { %v7396_v53 = vpop.xlane.xlu2 %2734 }
 0x757   : > { %v7398_v40 = vpop.eup %4885 }
 0x758   : > { %2746 = vadd.xlane.f32.xlu0 %v7398_v40 }
 0x75c   : > { %v3458_v15 = vpop.xlane.xlu2 %3457 }
 0x75d   : > { %v3477_v13 = vsub.f32 %v7306_v55, %v3458_v15 }
 0x75f   : > { %v3505_v11 = vmul.f32 1.442695, %v3477_v13 }
 0x761   : > { %4887 = vpow2.f32 %v3505_v11 }
 0x767   : > { %v7402_v35 = vpop.eup %4887 }
 0x768   : > { %3537 = vadd.xlane.f32.xlu0 %v7402_v35 }
 0x76a   : > { %v3514_v46 = vpop.xlane.xlu1 %3513 }
 0x76b   : > { %4889 = vrcp.f32 %v3514_v46  ;;  %v3556_v24 = vand.u32 2147483648, %v3514_v46  ;;  %v3554_v55 = vand.u32 2147483647, %v3514_v46  ;;  %vm3550_vm12 = vweird.f32 %v3514_v46 }
 0x76d   : > { %v3557_v20 = vor.u32 1.1754944e-38, %v3556_v24  ;;  %vm3555_vm14 = vcmp.eq.f32.partialorder %v3554_v55, 8.507059e+37 }
 0x771   : > { %v4890_v27 = vpop.eup %4889 }
 0x772   : > { %v3546_v0 = vmul.f32 %v4890_v27, %v3514_v46  ;;  %v2665_v29 = vpop.xlane.xlu1 %2664  ;;  %v3516_v4 = vpop.xlane.xlu0 %3515  ;;  %vm3551_vm11 = vweird.f32 %v4890_v27 }
 0x773   : > { %v2685_v25 = vsub.f32 %v7267_v23, %v2665_v29  ;;  %4891 = vrcp.f32 %v3516_v4  ;;  %vm3552_vm13 = vmor %vm3550_vm12, %vm3551_vm11  ;;  %vm3565_vm0 = vweird.f32 %v3516_v4  ;;  %vm2834_vm12 = vweird.f32 %v7387_v39 }
 0x774   : > { %v3547_v14 = vsub.f32 1.0, %v3546_v0 }
 0x775   : > { %v2712_v34 = vmul.f32 1.442695, %v2685_v25 }
 0x776   : > { %v3548_v5 = vmul.f32 %v4890_v27, %v3547_v14 }
 0x777   : > { %4893 = vpow2.f32 %v2712_v34 }
 0x778   : > { %v3549_v17 = vadd.f32 %v4890_v27, %v3548_v5  ;;  %4895 = vrcp.f32 %v7387_v39  ;;  %v3571_v5 = vand.u32 2147483648, %v3516_v4 }
 0x779   : > { %v4892_v48 = vpop.eup %4891 }
 0x77a   : > { %v3553_v62 = vsel %vm3552_vm13, %v4890_v27, %v3549_v17  ;;  %v3561_v15 = vmul.f32 %v4892_v48, %v3516_v4  ;;  %v3454_v13 = vpop.xlane.xlu1 %3453  ;;  %v3518_v23 = vpop.xlane.xlu0 %3517  ;;  %vm3566_vm15 = vweird.f32 %v4892_v48  ;;  %v3569_v27 = vand.u32 2147483647, %v3516_v4 }
 0x77b   : > { %v3558_v11 = vsel %vm3555_vm14, %v3557_v20, %v3553_v62  ;;  %v3475_v0 = vsub.f32 %v7289_v56, %v3454_v13  ;;  %4897 = vrcp.f32 %v3518_v23  ;;  %vm3567_vm2 = vmor %vm3565_vm0, %vm3566_vm15  ;;  %v3586_v2 = vand.u32 2147483648, %v3518_v23 }
 0x77c   : > { %v3562_v29 = vsub.f32 1.0, %v3561_v15  ;;  %v3559_v25 = vmul.f32 %v7314_v7, %v3558_v11  ;;  %v3572_v7 = vor.u32 1.1754944e-38, %v3571_v5  ;;  %vm3570_vm3 = vcmp.eq.f32.partialorder %v3569_v27, 8.507059e+37 }
 0x77d   : > { %v7409_v14 = vpop.eup %4893  ;;  %v3501_v46 = vmul.f32 1.442695, %v3475_v0  ;;  %v2671_v0 = vpop.xlane.xlu2 %2670  ;;  %vm3580_vm5 = vweird.f32 %v3518_v23 }
 0x77e   : > { %v3563_v34 = vmul.f32 %v4892_v48, %v3562_v29  ;;  %2744 = vadd.xlane.f32.xlu1 %v7409_v14  ;;  %3849 = vmatmul.f32.vlgmr.msra.gmra.mxu1 %v3559_v25  ;;  %v7412_v24 = vpop.eup %4895 }
 0x77f   : > { %4899 = vpow2.f32 %v3501_v46  ;;  %v2830_v11 = vmul.f32 %v7412_v24, %v7387_v39  ;;  %vm2835_vm10 = vweird.f32 %v7412_v24 }
 0x780   : > { %4901 = vrcp.f32 %v7396_v53  ;;  %v3564_v56 = vadd.f32 %v4892_v48, %v3563_v34  ;;  %vm7453_vm14 = vmor %vm2834_vm12, %vm2835_vm10 }
 0x781   : > { %v4898_v55 = vpop.eup %4897  ;;  %v2831_v27 = vsub.f32 1.0, %v2830_v11 }
 0x782   : > { %v3576_v17 = vmul.f32 %v4898_v55, %v3518_v23  ;;  %v3456_v20 = vpop.xlane.xlu1 %3455  ;;  %v2731_v62 = vpop.xlane.xlu0 %2730  ;;  %v3568_v15 = vsel %vm3567_vm2, %v4892_v48, %v3564_v56  ;;  %vm3581_vm4 = vweird.f32 %v4898_v55  ;;  %v3584_v48 = vand.u32 2147483647, %v3518_v23 }
 0x783   : > { %v3476_v13 = vsub.f32 %v7297_v18, %v3456_v20  ;;  %4903 = vrcp.f32 %v2731_v62  ;;  %v3573_v25 = vsel %vm3570_vm3, %v3572_v7, %v3568_v15  ;;  %v2688_v18 = vsub.f32 %v7291_v6, %v2671_v0  ;;  %vm3582_vm6 = vmor %vm3580_vm5, %vm3581_vm4 }
 0x784   : > { %v3577_v29 = vsub.f32 1.0, %v3576_v17  ;;  %v3574_v34 = vmul.f32 %v7318_v43, %v3573_v25  ;;  %v3587_v43 = vor.u32 1.1754944e-38, %v3586_v2  ;;  %vm3585_vm7 = vcmp.eq.f32.partialorder %v3584_v48, 8.507059e+37 }
 0x785   : > { %v7418_v46 = vpop.eup %4899  ;;  %v3503_v4 = vmul.f32 1.442695, %v3476_v13  ;;  %v2718_v25 = vmul.f32 1.442695, %v2688_v18  ;;  %v2832_v6 = vmul.f32 %v7412_v24, %v2831_v27  ;;  %v2823_v41 = vand.u32 2147483647, %v2731_v62 }
 0x786   : > { %v7421_v5 = vpop.eup %4901  ;;  %v3578_v47 = vmul.f32 %v4898_v55, %v3577_v29  ;;  %3533 = vadd.xlane.f32.xlu2 %v7418_v46  ;;  %3852 = vmatmul.f32.gmra.mxu1 %v3574_v34  ;;  %vm2819_vm9 = vweird.f32 %v2731_v62  ;;  %vm2849_vm2 = vweird.f32 %v7396_v53 }
 0x787   : > { %4905 = vpow2.f32 %v3503_v4  ;;  %v2845_v17 = vmul.f32 %v7421_v5, %v7396_v53  ;;  %v2825_v4 = vand.u32 2147483648, %v2731_v62  ;;  %v2833_v18 = vadd.f32 %v7412_v24, %v2832_v6 }
 0x788   : > { %v3579_v56 = vadd.f32 %v4898_v55, %v3578_v47  ;;  %vm2824_vm13 = vcmp.eq.f32.partialorder %v2823_v41, 8.507059e+37  ;;  %v2838_v41 = vand.u32 2147483647, %v7387_v39  ;;  %vm2850_vm15 = vweird.f32 %v7421_v5 }
 0x789   : > { %v4904_v7 = vpop.eup %4903  ;;  %v2846_v0 = vsub.f32 1.0, %v2845_v17  ;;  %vm7476_vm5 = vmor %vm2849_vm2, %vm2850_vm15 }
 0x78a   : > { %v2815_v20 = vmul.f32 %v4904_v7, %v2731_v62  ;;  %v7427_v15 = vpop.xlane.xlu1 %3519  ;;  %v7429_v13 = vpop.xlane.xlu0 %2736  ;;  %v3583_v29 = vsel %vm3582_vm6, %v4898_v55, %v3579_v56  ;;  %vm2820_vm8 = vweird.f32 %v4904_v7  ;;  %v2826_v56 = vor.u32 1.1754944e-38, %v2825_v4 }
 0x78b   : > { %4907 = vrcp.f32 %v7427_v15  ;;  %v3588_v47 = vsel %vm3585_vm7, %v3587_v43, %v3583_v29  ;;  %v2847_v27 = vmul.f32 %v7421_v5, %v2846_v0  ;;  %vm2821_vm11 = vmor %vm2819_vm9, %vm2820_vm8  ;;  %v2840_v29 = vand.u32 2147483648, %v7387_v39 }
 0x78c   : > { %v2816_v23 = vsub.f32 1.0, %v2815_v20  ;;  %4909 = vrcp.f32 %v7429_v13  ;;  %v3589_v2 = vmul.f32 %v7325_v22, %v3588_v47  ;;  %v2837_v47 = vsel %vm7453_vm14, %v7412_v24, %v2833_v18 }
 0x78d   : > { %v7433_v11 = vpop.eup %4905  ;;  %4911 = vpow2.f32 %v2718_v25  ;;  %v3601_v4 = vand.u32 2147483648, %v7427_v15  ;;  %v2841_v24 = vor.u32 1.1754944e-38, %v2840_v29  ;;  %v2853_v18 = vand.u32 2147483647, %v7396_v53 }
 0x78e   : > { %v2817_v34 = vmul.f32 %v4904_v7, %v2816_v23  ;;  %3535 = vadd.xlane.f32.xlu1 %v7433_v11  ;;  %3855 = vmatmul.f32.gmra.mxu1 %v3589_v2  ;;  %vm3595_vm3 = vweird.f32 %v7427_v15  ;;  %vm2839_vm4 = vcmp.eq.f32.partialorder %v2838_v41, 8.507059e+37 }
 0x78f   : > { %v2842_v6 = vsel %vm2839_vm4, %v2841_v24, %v2837_v47  ;;  %vm2854_vm8 = vcmp.eq.f32.partialorder %v2853_v18, 8.507059e+37 }
 0x790   : > { %v2818_v55 = vadd.f32 %v4904_v7, %v2817_v34  ;;  %v2848_v34 = vadd.f32 %v7421_v5, %v2847_v27  ;;  %v2843_v24 = vmul.f32 %v7284_v37, %v2842_v6 }
 0x791   : > { %v4908_v48 = vpop.eup %4907 }
 0x792   : > { %v2822_v22 = vsel %vm2821_vm11, %v4904_v7, %v2818_v55  ;;  %v3591_v17 = vmul.f32 %v4908_v48, %v7427_v15  ;;  %v7443_v43 = vpop.xlane.xlu1 %3521  ;;  %v7445_v20 = vpop.xlane.xlu0 %3523  ;;  %v2855_v7 = vand.u32 2147483648, %v7396_v53  ;;  %vm3596_vm0 = vweird.f32 %v4908_v48 }
 0x793   : > { %v7447_v62 = vpop.eup %4909  ;;  %v2827_v25 = vsel %vm2824_vm13, %v2826_v56, %v2822_v22  ;;  %4913 = vrcp.f32 %v7443_v43  ;;  %v3599_v56 = vand.u32 2147483647, %v7427_v15  ;;  %vm3597_vm6 = vmor %vm3595_vm3, %vm3596_vm0  ;;  %v2852_v29 = vsel %vm7476_vm5, %v7421_v5, %v2848_v34 }
 0x794   : > { %v3592_v23 = vsub.f32 1.0, %v3591_v17  ;;  %4915 = vrcp.f32 %v7445_v20  ;;  %v7463_v0 = vpop.eup %4911  ;;  %v2828_v2 = vmul.f32 %v7333_v45, %v2827_v25  ;;  %v2860_v55 = vmul.f32 %v7447_v62, %v7429_v13 }
 0x795   : > { %v2856_v17 = vor.u32 1.1754944e-38, %v2855_v7  ;;  %v3602_v25 = vor.u32 1.1754944e-38, %v3601_v4  ;;  %vm3600_vm7 = vcmp.eq.f32.partialorder %v3599_v56, 8.507059e+37  ;;  %vm3610_vm10 = vweird.f32 %v7443_v43 }
 0x796   : > { %v3593_v39 = vmul.f32 %v4908_v48, %v3592_v23  ;;  %2750 = vadd.xlane.f32.xlu1 %v7463_v0  ;;  %3070 = vmatmul.f32.vlgmr.msra.gmra.mxu2 %v2828_v2  ;;  %v2861_v53 = vsub.f32 1.0, %v2860_v55  ;;  %v3616_v55 = vand.u32 2147483648, %v7443_v43  ;;  %vm2864_vm11 = vweird.f32 %v7429_v13 }
 0x797   : > { %v2857_v34 = vsel %vm2854_vm8, %v2856_v17, %v2852_v29  ;;  %vm2865_vm13 = vweird.f32 %v7447_v62  ;;  %vm3625_vm0 = vweird.f32 %v7445_v20 }
 0x798   : > { %v3594_v45 = vadd.f32 %v4908_v48, %v3593_v39  ;;  %v2862_v56 = vmul.f32 %v7447_v62, %v2861_v53  ;;  %v2858_v37 = vmul.f32 %v7300_v42, %v2857_v34  ;;  %v3617_v18 = vor.u32 1.1754944e-38, %v3616_v55  ;;  %vm7527_vm2 = vmor %vm2864_vm11, %vm2865_vm13 }
 0x799   : > { %v4914_v22 = vpop.eup %4913 }
 0x79a   : > { %v7483_v23 = vpop.eup %4915  ;;  %v3606_v15 = vmul.f32 %v4914_v22, %v7443_v43  ;;  %v2669_v41 = vpop.xlane.xlu1 %2668  ;;  %v3598_v39 = vsel %vm3597_vm6, %v4908_v48, %v3594_v45  ;;  %v3614_v48 = vand.u32 2147483647, %v7443_v43  ;;  %vm3611_vm9 = vweird.f32 %v4914_v22 }
 0x79b   : > { %v3460_v2 = vpop.xlane.xlu0 %3459  ;;  %v3621_v8 = vmul.f32 %v7483_v23, %v7445_v20  ;;  %v2687_v7 = vsub.f32 %v7281_v9, %v2669_v41  ;;  %v3603_v47 = vsel %vm3600_vm7, %v3602_v25, %v3598_v39  ;;  %vm7500_vm12 = vmor %vm3610_vm10, %vm3611_vm9  ;;  %v2863_v42 = vadd.f32 %v7447_v62, %v2862_v56 }
 0x79c   : > { %v3607_v4 = vsub.f32 1.0, %v3606_v15  ;;  %v3604_v5 = vmul.f32 %v7342_v12, %v3603_v47  ;;  %v3478_v10 = vsub.f32 %v7354_v28, %v3460_v2  ;;  %vm3615_vm14 = vcmp.eq.f32.partialorder %v3614_v48, 8.507059e+37 }
 0x79d   : > { %v3622_v27 = vsub.f32 1.0, %v3621_v8  ;;  %v2716_v50 = vmul.f32 1.442695, %v2687_v7  ;;  %v2870_v8 = vand.u32 2147483648, %v7429_v13  ;;  %vm3626_vm15 = vweird.f32 %v7483_v23 }
 0x79e   : > { %v3608_v45 = vmul.f32 %v4914_v22, %v3607_v4  ;;  %3858 = vmatmul.f32.gmra.mxu1 %v3604_v5  ;;  %3073 = vmatmul.f32.gmra.mxu2 %v2843_v24  ;;  %v3507_v28 = vmul.f32 1.442695, %v3478_v10  ;;  %v3631_v10 = vand.u32 2147483648, %v7445_v20  ;;  %v3629_v7 = vand.u32 2147483647, %v7445_v20  ;;  %vm7533_vm3 = vmor %vm3625_vm0, %vm3626_vm15 }
 0x79f   : > { %v3623_v9 = vmul.f32 %v7483_v23, %v3622_v27  ;;  %4917 = vpow2.f32 %v2716_v50  ;;  %v2871_v4 = vor.u32 1.1754944e-38, %v2870_v8 }
 0x7a0   : > { %v3609_v12 = vadd.f32 %v4914_v22, %v3608_v45  ;;  %v3632_v20 = vor.u32 1.1754944e-38, %v3631_v10  ;;  %vm3630_vm5 = vcmp.eq.f32.partialorder %v3629_v7, 8.507059e+37 }
 0x7a1   : > { %v3624_v53 = vadd.f32 %v7483_v23, %v3623_v9 }
 0x7a2   : > { %v7505_v25 = vpop.xlane.xlu2 %3527  ;;  %v3613_v43 = vsel %vm7500_vm12, %v4914_v22, %v3609_v12  ;;  %v2868_v22 = vand.u32 2147483647, %v7429_v13 }
 0x7a3   : > { %v2673_v50 = vpop.xlane.xlu0 %2672  ;;  %4919 = vrcp.f32 %v7505_v25  ;;  %v7511_v6 = vpop.xlane.xlu1 %3525  ;;  %v3618_v15 = vsel %vm3615_vm14, %v3617_v18, %v3613_v43  ;;  %v3628_v13 = vsel %vm7533_vm3, %v7483_v23, %v3624_v53  ;;  %vm3655_vm11 = vweird.f32 %v7505_v25 }
 0x7a4   : > { %v2689_v29 = vsub.f32 %v7295_v26, %v2673_v50  ;;  %4921 = vrcp.f32 %v7511_v6  ;;  %v3619_v39 = vmul.f32 %v7346_v19, %v3618_v15  ;;  %v2867_v19 = vsel %vm7527_vm2, %v7447_v62, %v2863_v42 }
 0x7a5   : > { %v7519_v41 = vpop.eup %4917  ;;  %4923 = vpow2.f32 %v3507_v28  ;;  %vm2869_vm4 = vcmp.eq.f32.partialorder %v2868_v22, 8.507059e+37  ;;  %v3633_v62 = vsel %vm3630_vm5, %v3632_v20, %v3628_v13  ;;  %v3646_v17 = vand.u32 2147483648, %v7511_v6 }
 0x7a6   : > { %v2720_v2 = vmul.f32 1.442695, %v2689_v29  ;;  %2748 = vadd.xlane.f32.xlu2 %v7519_v41  ;;  %3076 = vmatmul.f32.gmra.mxu2 %v2858_v37  ;;  %v2872_v48 = vsel %vm2869_vm4, %v2871_v4, %v2867_v19  ;;  %v3634_v18 = vmul.f32 %v7348_v30, %v3633_v62  ;;  %v3644_v28 = vand.u32 2147483647, %v7511_v6 }
 0x7a7   : > { %3861 = vmatmul.f32.gmra.mxu1 %v3619_v39  ;;  %v2873_v8 = vmul.f32 %v7340_v16, %v2872_v48  ;;  %v3661_v16 = vand.u32 2147483648, %v7505_v25  ;;  %vm3640_vm7 = vweird.f32 %v7511_v6  ;;  %v3647_v53 = vor.u32 1.1754944e-38, %v3646_v17 }
 0x7a8   : > { %4925 = vpow2.f32 %v2720_v2  ;;  %vm7576_vm8 = vcmp.eq.f32.partialorder %v3644_v28, 8.507059e+37  ;;  %v3659_v2 = vand.u32 2147483647, %v7505_v25 }
 0x7a9   : > { %v7543_v24 = vpop.eup %4919 }
 0x7aa   : > { %v4922_v5 = vpop.eup %4921  ;;  %v3651_v34 = vmul.f32 %v7543_v24, %v7505_v25  ;;  %v7547_v55 = vpop.xlane.xlu2 %2740  ;;  %vm3656_vm10 = vweird.f32 %v7543_v24  ;;  %vm3660_vm14 = vcmp.eq.f32.partialorder %v3659_v2, 8.507059e+37 }
 0x7ab   : > { %v7549_v27 = vpop.xlane.xlu0 %3529  ;;  %v3636_v56 = vmul.f32 %v4922_v5, %v7511_v6  ;;  %4927 = vrcp.f32 %v7547_v55  ;;  %v7553_v23 = vpop.xlane.xlu1 %2738  ;;  %vm3641_vm6 = vweird.f32 %v4922_v5  ;;  %vm7600_vm13 = vmor %vm3655_vm11, %vm3656_vm10  ;;  %vm2894_vm15 = vweird.f32 %v7547_v55 }
 0x7ac   : > { %v7555_v45 = vpop.eup %4923  ;;  %v3652_v9 = vsub.f32 1.0, %v3651_v34  ;;  %4929 = vrcp.f32 %v7553_v23  ;;  %vm3642_vm9 = vmor %vm3640_vm7, %vm3641_vm6  ;;  %v2885_v34 = vand.u32 2147483648, %v7553_v23  ;;  %v2900_v28 = vand.u32 2147483648, %v7547_v55 }
 0x7ad   : > { %v3637_v12 = vsub.f32 1.0, %v3636_v56  ;;  %4931 = vrcp.f32 %v7549_v27  ;;  %vm2879_vm0 = vweird.f32 %v7553_v23  ;;  %vm3670_vm6 = vweird.f32 %v7549_v27 }
 0x7ae   : > { %v7558_v37 = vpop.eup %4925  ;;  %3539 = vadd.xlane.f32.xlu2 %v7555_v45  ;;  %v3653_v50 = vmul.f32 %v7543_v24, %v3652_v9  ;;  %3079 = vmatmul.f32.gmra.mxu2 %v2873_v8  ;;  %v3662_v8 = vor.u32 1.1754944e-38, %v3661_v16 }
 0x7af   : > { %2752 = vadd.xlane.f32.xlu0 %v7558_v37  ;;  %v3638_v43 = vmul.f32 %v4922_v5, %v3637_v12  ;;  %3864 = vmatmul.f32.gmra.mxu1 %v3634_v18  ;;  %v2883_v12 = vand.u32 2147483647, %v7553_v23 }
 0x7b0   : > { %v3654_v6 = vadd.f32 %v7543_v24, %v3653_v50 }
 0x7b1   : > { %v7568_v42 = vpop.eup %4927  ;;  %v3639_v30 = vadd.f32 %v4922_v5, %v3638_v43  ;;  %v2886_v43 = vor.u32 1.1754944e-38, %v2885_v34  ;;  %vm2884_vm3 = vcmp.eq.f32.partialorder %v2883_v12, 8.507059e+37 }
 0x7b2   : > { %v4930_v29 = vpop.eup %4929  ;;  %v2890_v10 = vmul.f32 %v7568_v42, %v7547_v55  ;;  %vm2895_vm4 = vweird.f32 %v7568_v42 }
 0x7b3   : > { %v7574_v15 = vpop.xlane.xlu0 %3531  ;;  %v7581_v39 = vpop.eup %4931  ;;  %v2875_v26 = vmul.f32 %v4930_v29, %v7553_v23  ;;  %v3643_v4 = vsel %vm3642_vm9, %v4922_v5, %v3639_v30  ;;  %vm2880_vm12 = vweird.f32 %v4930_v29  ;;  %vm2896_vm7 = vmor %vm2894_vm15, %vm2895_vm4 }
 0x7b4   : > { %v3462_v7 = vpop.xlane.xlu1 %3461  ;;  %4933 = vrcp.f32 %v7574_v15  ;;  %v2891_v47 = vsub.f32 1.0, %v2890_v10  ;;  %v3666_v19 = vmul.f32 %v7581_v39, %v7549_v27  ;;  %v3648_v48 = vsel %vm7576_vm8, %v3647_v53, %v3643_v4  ;;  %vm2881_vm2 = vmor %vm2879_vm0, %vm2880_vm12 }
 0x7b5   : > { %v3479_v13 = vsub.f32 %v7380_v63, %v3462_v7  ;;  %v2876_v20 = vsub.f32 1.0, %v2875_v26  ;;  %v3649_v9 = vmul.f32 %v7365_v57, %v3648_v48  ;;  %v3658_v57 = vsel %vm7600_vm13, %v7543_v24, %v3654_v6 }
 0x7b6   : > { %v3667_v62 = vsub.f32 1.0, %v3666_v19  ;;  %v2892_v18 = vmul.f32 %v7568_v42, %v2891_v47  ;;  %v3663_v53 = vsel %vm3660_vm14, %v3662_v8, %v3658_v57  ;;  %vm3671_vm5 = vweird.f32 %v7581_v39 }
 0x7b7   : > { %v3509_v56 = vmul.f32 1.442695, %v3479_v13  ;;  %v2877_v17 = vmul.f32 %v4930_v29, %v2876_v20  ;;  %3867 = vmatmul.f32.gmra.mxu1 %v3649_v9  ;;  %v3676_v6 = vand.u32 2147483648, %v7549_v27  ;;  %v2898_v19 = vand.u32 2147483647, %v7547_v55  ;;  %vm3672_vm8 = vmor %vm3670_vm6, %vm3671_vm5 }
 0x7b8   : > { %v3668_v25 = vmul.f32 %v7581_v39, %v3667_v62  ;;  %v2893_v10 = vadd.f32 %v7568_v42, %v2892_v18  ;;  %v3664_v4 = vmul.f32 %v7363_v51, %v3663_v53  ;;  %v2901_v20 = vor.u32 1.1754944e-38, %v2900_v28  ;;  %v3901_v53 = vld [vmem:[#allocation8 + $0x78] sm:$0xff] }
 0x7b9   : > { %4935 = vpow2.f32 %v3509_v56  ;;  %v2878_v50 = vadd.f32 %v4930_v29, %v2877_v17  ;;  %v3677_v48 = vor.u32 1.1754944e-38, %v3676_v6  ;;  %vm2899_vm9 = vcmp.eq.f32.partialorder %v2898_v19, 8.507059e+37  ;;  %3962 = vmatpush.msrb.mxu2 %v3901_v53 }
 0x7ba   : > { %v7608_v5 = vpop.eup %4933  ;;  %v3669_v7 = vadd.f32 %v7581_v39, %v3668_v25  ;;  %vm3685_vm12 = vweird.f32 %v7574_v15  ;;  %v3689_v17 = vand.u32 2147483647, %v7574_v15 }
 0x7bb   : > { %v3681_v16 = vmul.f32 %v7608_v5, %v7574_v15  ;;  %v2882_v24 = vsel %vm2881_vm2, %v4930_v29, %v2878_v50  ;;  %v2743_v23 = vpop.xlane.xlu2 %2742  ;;  %vm3686_vm11 = vweird.f32 %v7608_v5 }
 0x7bc   : > { %v3464_v30 = vpop.xlane.xlu1 %3463  ;;  %v2887_v26 = vsel %vm2884_vm3, %v2886_v43, %v2882_v24  ;;  %4937 = vrcp.f32 %v2743_v23  ;;  %v3673_v51 = vsel %vm3672_vm8, %v7581_v39, %v3669_v7  ;;  %v2915_v63 = vand.u32 2147483648, %v2743_v23  ;;  %vm3687_vm13 = vmor %vm3685_vm12, %vm3686_vm11 }
 0x7bd   : > { %v3682_v22 = vsub.f32 1.0, %v3681_v16  ;;  %v3480_v2 = vsub.f32 %v7389_v58, %v3464_v30  ;;  %v2888_v47 = vmul.f32 %v7375_v36, %v2887_v26  ;;  %v3674_v58 = vand.u32 2147483647, %v7549_v27 }
 0x7be   : > { %v2897_v36 = vsel %vm2896_vm7, %v7568_v42, %v2893_v10  ;;  %v3691_v42 = vand.u32 2147483648, %v7574_v15  ;;  %vm2909_vm15 = vweird.f32 %v2743_v23  ;;  %vm3690_vm0 = vcmp.eq.f32.partialorder %v3689_v17, 8.507059e+37 }
 0x7bf   : > { %v7623_v29 = vpop.eup %4935  ;;  %v3511_v13 = vmul.f32 1.442695, %v3480_v2  ;;  %3082 = vmatmul.f32.gmra.mxu2 %v2888_v47  ;;  %v3683_v34 = vmul.f32 %v7608_v5, %v3682_v22  ;;  %3870 = vmatmul.f32.gmra.mxu1 %v3664_v4  ;;  %v2902_v55 = vsel %vm2899_vm9, %v2901_v20, %v2897_v36  ;;  %vm3675_vm10 = vcmp.eq.f32.partialorder %v3674_v58, 8.507059e+37 }
 0x7c0   : > { %3541 = vadd.xlane.f32.xlu1 %v7623_v29  ;;  %v3678_v62 = vsel %vm3675_vm10, %v3677_v48, %v3673_v51  ;;  %v2903_v12 = vmul.f32 %v7371_v60, %v2902_v55  ;;  %v2913_v60 = vand.u32 2147483647, %v2743_v23  ;;  %v3692_v28 = vor.u32 1.1754944e-38, %v3691_v42 }
 0x7c1   : > { %4939 = vpow2.f32 %v3511_v13  ;;  %v3684_v9 = vadd.f32 %v7608_v5, %v3683_v34  ;;  %v3679_v18 = vmul.f32 %v7373_v44, %v3678_v62  ;;  %v2916_v43 = vor.u32 1.1754944e-38, %v2915_v63 }
 0x7c2   : > { %v4938_v27 = vpop.eup %4937  ;;  %vm2914_vm3 = vcmp.eq.f32.partialorder %v2913_v60, 8.507059e+37 }
 0x7c3   : > { %v2905_v56 = vmul.f32 %v4938_v27, %v2743_v23  ;;  %v3688_v57 = vsel %vm3687_vm13, %v7608_v5, %v3684_v9  ;;  %vm2910_vm14 = vweird.f32 %v4938_v27  ;;  %v3900_v23 = vld [vmem:[#allocation8 + $0x70] sm:$0xff] }
 0x7c4   : > { %v3693_v16 = vsel %vm3690_vm0, %v3692_v28, %v3688_v57  ;;  %vm2911_vm2 = vmor %vm2909_vm15, %vm2910_vm14  ;;  %3963 = vmatpush.msrb.mxu2 %v3900_v23 }
 0x7c5   : > { %v2906_v39 = vsub.f32 1.0, %v2905_v56  ;;  %v3694_v30 = vmul.f32 %v7382_v31, %v3693_v16 }
 0x7c7   : > { %v7642_v8 = vpop.eup %4939  ;;  %3085 = vmatmul.f32.gmra.mxu2 %v2903_v12  ;;  %v2907_v25 = vmul.f32 %v4938_v27, %v2906_v39  ;;  %3873 = vmatmul.f32.gmra.mxu1 %v3679_v18 }
 0x7c8   : > { %3543 = vadd.xlane.f32.xlu2 %v7642_v8 }
 0x7c9   : > { %v2908_v50 = vadd.f32 %v4938_v27, %v2907_v25 }
 0x7cb   : > { %v2912_v44 = vsel %vm2911_vm2, %v4938_v27, %v2908_v50  ;;  %v2747_v5 = vpop.xlane.xlu0 %2746 }
 0x7cc   : > { %v2917_v15 = vsel %vm2914_vm3, %v2916_v43, %v2912_v44  ;;  %4941 = vrcp.f32 %v2747_v5  ;;  %vm2939_vm9 = vweird.f32 %v2747_v5  ;;  %v2945_v56 = vand.u32 2147483648, %v2747_v5 }
 0x7cd   : > { %v2918_v24 = vmul.f32 %v7391_v54, %v2917_v15  ;;  %v2943_v18 = vand.u32 2147483647, %v2747_v5 }
 0x7ce   : > { %v2946_v28 = vor.u32 1.1754944e-38, %v2945_v56 }
 0x7cf   : > { %3876 = vmatmul.f32.gmra.mxu1 %v3694_v30  ;;  %3088 = vmatmul.f32.gmra.mxu2 %v2918_v24  ;;  %vm2944_vm13 = vcmp.eq.f32.partialorder %v2943_v18, 8.507059e+37 }
 0x7d2   : > { %v4942_v10 = vpop.eup %4941 }
 0x7d3   : > { %v2935_v2 = vmul.f32 %v4942_v10, %v2747_v5  ;;  %vm2940_vm7 = vweird.f32 %v4942_v10 }
 0x7d4   : > { %vm7657_vm10 = vmor %vm2939_vm9, %vm2940_vm7 }
 0x7d5   : > { %v2936_v7 = vsub.f32 1.0, %v2935_v2 }
 0x7d7   : > { %v2937_v19 = vmul.f32 %v4942_v10, %v2936_v7 }
 0x7d9   : > { %v2938_v51 = vadd.f32 %v4942_v10, %v2937_v19 }
 0x7db   : > { %v7651_v6 = vpop.xlane.xlu0 %3537  ;;  %v2942_v63 = vsel %vm7657_vm10, %v4942_v10, %v2938_v51 }
 0x7dc   : > { %v2947_v16 = vsel %vm2944_vm13, %v2946_v28, %v2942_v63 }
 0x7dd   : > { %v2948_v5 = vmul.f32 %v7398_v40, %v2947_v16 }
 0x7f1   : > { %v2745_v22 = vpop.xlane.xlu1 %2744 }
 0x7f2   : > { %4943 = vrcp.f32 %v2745_v22  ;;  %v2930_v13 = vand.u32 2147483648, %v2745_v22  ;;  %v2928_v58 = vand.u32 2147483647, %v2745_v22  ;;  %vm2924_vm5 = vweird.f32 %v2745_v22 }
 0x7f4   : > { %v2931_v34 = vor.u32 1.1754944e-38, %v2930_v13  ;;  %vm2929_vm8 = vcmp.eq.f32.partialorder %v2928_v58, 8.507059e+37  ;;  %v3734_v58 = vand.u32 2147483647, %v7651_v6 }
 0x7f8   : > { %v4944_v26 = vpop.eup %4943 }
 0x7f9   : > { %v2920_v47 = vmul.f32 %v4944_v26, %v2745_v22  ;;  %v3534_v31 = vpop.xlane.xlu2 %3533  ;;  %vm2925_vm4 = vweird.f32 %v4944_v26 }
 0x7fa   : > { %4945 = vrcp.f32 %v3534_v31  ;;  %vm2926_vm6 = vmor %vm2924_vm5, %vm2925_vm4  ;;  %v3706_v17 = vand.u32 2147483648, %v3534_v31  ;;  %v3704_v60 = vand.u32 2147483647, %v3534_v31  ;;  %vm3700_vm12 = vweird.f32 %v3534_v31 }
 0x7fb   : > { %v2921_v54 = vsub.f32 1.0, %v2920_v47  ;;  %4947 = vrcp.f32 %v7651_v6 }
 0x7fc   : > { %v3707_v43 = vor.u32 1.1754944e-38, %v3706_v17  ;;  %vm3705_vm15 = vcmp.eq.f32.partialorder %v3704_v60, 8.507059e+37 }
 0x7fd   : > { %v2922_v4 = vmul.f32 %v4944_v26, %v2921_v54 }
 0x7ff   : > { %v2923_v36 = vadd.f32 %v4944_v26, %v2922_v4 }
 0x800   : > { %v4946_v20 = vpop.eup %4945 }
 0x801   : > { %v3696_v48 = vmul.f32 %v4946_v20, %v3534_v31  ;;  %v3536_v55 = vpop.xlane.xlu1 %3535  ;;  %v2927_v27 = vsel %vm2926_vm6, %v4944_v26, %v2923_v36  ;;  %v7654_v62 = vpop.eup %4947  ;;  %vm3701_vm11 = vweird.f32 %v4946_v20  ;;  %v3899_v31 = vld [vmem:[#allocation8 + $0x68] sm:$0xff]  ;;  %vm3730_vm6 = vweird.f32 %v7651_v6 }
 0x802   : > { %4949 = vrcp.f32 %v3536_v55  ;;  %v2932_v9 = vsel %vm2929_vm8, %v2931_v34, %v2927_v27  ;;  %v3726_v25 = vmul.f32 %v7654_v62, %v7651_v6  ;;  %vm3702_vm14 = vmor %vm3700_vm12, %vm3701_vm11  ;;  %v3721_v22 = vand.u32 2147483648, %v3536_v55  ;;  %3964 = vmatpush.msrb.mxu2 %v3899_v31  ;;  %v7682_v27 = vpop.f32.mrf.mxu3 }
 0x803   : > { %v3697_v42 = vsub.f32 1.0, %v3696_v48  ;;  %v2933_v12 = vmul.f32 %v7409_v14, %v2932_v9  ;;  %v3719_v26 = vand.u32 2147483647, %v3536_v55  ;;  %vm3715_vm2 = vweird.f32 %v3536_v55 }
 0x804   : > { %v3727_v44 = vsub.f32 1.0, %v3726_v25  ;;  %v3722_v47 = vor.u32 1.1754944e-38, %v3721_v22  ;;  %vm3731_vm5 = vweird.f32 %v7654_v62  ;;  %vm3735_vm8 = vcmp.eq.f32.partialorder %v3734_v58, 8.507059e+37 }
 0x805   : > { %v3698_v57 = vmul.f32 %v4946_v20, %v3697_v42  ;;  %3091 = vmatmul.f32.gmra.mxu2 %v2933_v12  ;;  %vm3720_vm4 = vcmp.eq.f32.partialorder %v3719_v26, 8.507059e+37  ;;  %vm3732_vm7 = vmor %vm3730_vm6, %vm3731_vm5 }
 0x806   : > { %v3728_v2 = vmul.f32 %v7654_v62, %v3727_v44 }
 0x807   : > { %v3699_v14 = vadd.f32 %v4946_v20, %v3698_v57 }
 0x808   : > { %v4950_v50 = vpop.eup %4949  ;;  %v3729_v40 = vadd.f32 %v7654_v62, %v3728_v2 }
 0x809   : > { %v3711_v15 = vmul.f32 %v4950_v50, %v3536_v55  ;;  %v3703_v30 = vsel %vm3702_vm14, %v4946_v20, %v3699_v14  ;;  %vm3716_vm0 = vweird.f32 %v4950_v50  ;;  %v7668_v54 = vpop.xlane.xlu1 %2750 }
 0x80a   : > { %v3708_v24 = vsel %vm3705_vm15, %v3707_v43, %v3703_v30  ;;  %vm3717_vm3 = vmor %vm3715_vm2, %vm3716_vm0  ;;  %4951 = vrcp.f32 %v7668_v54  ;;  %v3733_v36 = vsel %vm3732_vm7, %v7654_v62, %v3729_v40  ;;  %v2975_v30 = vand.u32 2147483648, %v7668_v54 }
 0x80b   : > { %v3712_v53 = vsub.f32 1.0, %v3711_v15  ;;  %v3709_v10 = vmul.f32 %v7418_v46, %v3708_v24  ;;  %v3736_v46 = vand.u32 2147483648, %v7651_v6  ;;  %vm2969_vm14 = vweird.f32 %v7668_v54 }
 0x80c   : > { %v2973_v2 = vand.u32 2147483647, %v7668_v54  ;;  %v2976_v40 = vor.u32 1.1754944e-38, %v2975_v30 }
 0x80d   : > { %v3713_v23 = vmul.f32 %v4950_v50, %v3712_v53  ;;  %3094 = vmatmul.f32.gmra.mxu2 %v2948_v5  ;;  %3879 = vmatmul.f32.gmra.mxu1 %v3709_v10  ;;  %v3737_v20 = vor.u32 1.1754944e-38, %v3736_v46 }
 0x80f   : > { %v3714_v7 = vadd.f32 %v4950_v50, %v3713_v23  ;;  %v3738_v34 = vsel %vm3735_vm8, %v3737_v20, %v3733_v36 }
 0x810   : > { %v7678_v48 = vpop.eup %4951 }
 0x811   : > { %v3718_v19 = vsel %vm3717_vm3, %v4950_v50, %v3714_v7  ;;  %v2965_v6 = vmul.f32 %v7678_v48, %v7668_v54  ;;  %vm2970_vm12 = vweird.f32 %v7678_v48  ;;  %v3898_v50 = vld [vmem:[#allocation8 + $0x60] sm:$0xff]  ;;  %vm2974_vm3 = vcmp.eq.f32.partialorder %v2973_v2, 8.507059e+37 }
 0x812   : > { %v3723_v13 = vsel %vm3720_vm4, %v3722_v47, %v3718_v19  ;;  %3965 = vmatpush.msrb.mxu2 %v3898_v50  ;;  %vm2971_vm15 = vmor %vm2969_vm14, %vm2970_vm12 }
 0x813   : > { %v3724_v4 = vmul.f32 %v7433_v11, %v3723_v13  ;;  %v3739_v11 = vmul.f32 %v7402_v35, %v3738_v34  ;;  %v2966_v62 = vsub.f32 1.0, %v2965_v6  ;;  %v7690_v35 = vpop.f32.mrf.mxu3  ;;  %v3850_v13 = vpop.f32.mrf.mxu1 }
 0x815   : > { %3882 = vmatmul.f32.gmra.mxu1 %v3724_v4  ;;  %v2967_v63 = vmul.f32 %v7678_v48, %v2966_v62 }
 0x817   : > { %v2968_v15 = vadd.f32 %v7678_v48, %v2967_v63 }
 0x819   : > { %v2749_v51 = vpop.xlane.xlu2 %2748  ;;  %v3071_v55 = vpop.f32.mrf.mxu2  ;;  %v2972_v31 = vsel %vm2971_vm15, %v7678_v48, %v2968_v15 }
 0x81a   : > { %4953 = vrcp.f32 %v2749_v51  ;;  %4348 = vmatmul.msk.f32.gmra.mxu3 %vm962_vm1, %v3071_v55  ;;  %v2960_v17 = vand.u32 2147483648, %v2749_v51  ;;  %v2958_v57 = vand.u32 2147483647, %v2749_v51  ;;  %vm2954_vm10 = vweird.f32 %v2749_v51 }
 0x81b   : > { %v7701_v23 = vpop.f32.mrf.mxu3  ;;  %v2977_v4 = vsel %vm2974_vm3, %v2976_v40, %v2972_v31 }
 0x81c   : > { %v2961_v14 = vor.u32 1.1754944e-38, %v2960_v17  ;;  %vm2959_vm13 = vcmp.eq.f32.partialorder %v2958_v57, 8.507059e+37 }
 0x81d   : > { %3885 = vmatmul.f32.gmra.mxu1 %v3739_v11  ;;  %v2978_v11 = vmul.f32 %v7463_v0, %v2977_v4 }
 0x820   : > { %v4954_v56 = vpop.eup %4953 }
 0x821   : > { %v2950_v9 = vmul.f32 %v4954_v56, %v2749_v51  ;;  %v3540_v42 = vpop.xlane.xlu2 %3539  ;;  %v3074_v39 = vpop.f32.mrf.mxu2  ;;  %vm2955_vm9 = vweird.f32 %v4954_v56 }
 0x822   : > { %v7686_v12 = vpop.xlane.xlu0 %2752  ;;  %4955 = vrcp.f32 %v3540_v42  ;;  %4349 = vmatmul.msk.f32.gmra.mxu3 %vm962_vm1, %v3074_v39  ;;  %vm2956_vm11 = vmor %vm2954_vm10, %vm2955_vm9  ;;  %v3751_v26 = vand.u32 2147483648, %v3540_v42  ;;  %v3749_v19 = vand.u32 2147483647, %v3540_v42  ;;  %vm3745_vm2 = vweird.f32 %v3540_v42 }
 0x823   : > { %v2951_v18 = vsub.f32 1.0, %v2950_v9  ;;  %4957 = vrcp.f32 %v7686_v12  ;;  %v2990_v20 = vand.u32 2147483648, %v7686_v12  ;;  %vm2984_vm7 = vweird.f32 %v7686_v12  ;;  %v7711_v6 = vpop.f32.mrf.mxu3 }
 0x824   : > { %v3752_v54 = vor.u32 1.1754944e-38, %v3751_v26  ;;  %vm3750_vm6 = vcmp.eq.f32.partialorder %v3749_v19, 8.507059e+37  ;;  %v2988_v55 = vand.u32 2147483647, %v7686_v12 }
 0x825   : > { %v2952_v25 = vmul.f32 %v4954_v56, %v2951_v18  ;;  %v2991_v9 = vor.u32 1.1754944e-38, %v2990_v20  ;;  %v3853_v18 = vpop.f32.mrf.mxu1 }
 0x826   : > { %vm2989_vm9 = vcmp.eq.f32.partialorder %v2988_v55, 8.507059e+37 }
 0x827   : > { %v2953_v60 = vadd.f32 %v4954_v56, %v2952_v25 }
 0x828   : > { %v4956_v28 = vpop.eup %4955 }
 0x829   : > { %v4958_v43 = vpop.eup %4957  ;;  %v3741_v16 = vmul.f32 %v4956_v28, %v3540_v42  ;;  %v2957_v44 = vsel %vm2956_vm11, %v4954_v56, %v2953_v60  ;;  %v3077_v53 = vpop.f32.mrf.mxu2  ;;  %vm3746_vm0 = vweird.f32 %v4956_v28 }
 0x82a   : > { %v2980_v24 = vmul.f32 %v4958_v43, %v7686_v12  ;;  %v2962_v5 = vsel %vm2959_vm13, %v2961_v14, %v2957_v44  ;;  %4350 = vmatmul.msk.f32.gmra.mxu3 %vm962_vm1, %v3077_v53  ;;  %vm3747_vm4 = vmor %vm3745_vm2, %vm3746_vm0  ;;  %vm2985_vm5 = vweird.f32 %v4958_v43 }
 0x82b   : > { %v3742_v10 = vsub.f32 1.0, %v3741_v16  ;;  %v2963_v22 = vmul.f32 %v7519_v41, %v2962_v5  ;;  %vm2986_vm8 = vmor %vm2984_vm7, %vm2985_vm5  ;;  %v7715_v25 = vpop.f32.mrf.mxu3 }
 0x82c   : > { %v2981_v7 = vsub.f32 1.0, %v2980_v24 }
 0x82d   : > { %v3743_v47 = vmul.f32 %v4956_v28, %v3742_v10  ;;  %3097 = vmatmul.f32.gmra.mxu2 %v2963_v22  ;;  %v3856_v15 = vpop.f32.mrf.mxu1 }
 0x82e   : > { %v2982_v46 = vmul.f32 %v4958_v43, %v2981_v7 }
 0x82f   : > { %v3744_v41 = vadd.f32 %v4956_v28, %v3743_v47 }
 0x830   : > { %v2983_v58 = vadd.f32 %v4958_v43, %v2982_v46 }
 0x831   : > { %v3748_v36 = vsel %vm3747_vm4, %v4956_v28, %v3744_v41  ;;  %v3080_v51 = vpop.f32.mrf.mxu2 }
 0x832   : > { %v3753_v48 = vsel %vm3750_vm6, %v3752_v54, %v3748_v36  ;;  %4351 = vmatmul.msk.f32.gmra.mxu3 %vm962_vm1, %v3080_v51  ;;  %v2987_v62 = vsel %vm2986_vm8, %v4958_v43, %v2983_v58 }
 0x833   : > { %v3542_v34 = vpop.xlane.xlu1 %3541  ;;  %v3754_v56 = vmul.f32 %v7555_v45, %v3753_v48  ;;  %v2992_v42 = vsel %vm2989_vm9, %v2991_v9, %v2987_v62  ;;  %v7720_v5 = vpop.f32.mrf.mxu3 }
 0x834   : > { %4959 = vrcp.f32 %v3542_v34  ;;  %v2993_v63 = vmul.f32 %v7558_v37, %v2992_v42  ;;  %v3766_v57 = vand.u32 2147483648, %v3542_v34  ;;  %v3764_v45 = vand.u32 2147483647, %v3542_v34 }
 0x835   : > { %3100 = vmatmul.f32.gmra.mxu2 %v2978_v11  ;;  %3888 = vmatmul.f32.gmra.mxu1 %v3754_v56  ;;  %vm3760_vm11 = vweird.f32 %v3542_v34 }
 0x836   : > { %v3767_v50 = vor.u32 1.1754944e-38, %v3766_v57  ;;  %vm3765_vm13 = vcmp.eq.f32.partialorder %v3764_v45, 8.507059e+37 }
 0x83a   : > { %v4960_v39 = vpop.eup %4959 }
 0x83b   : > { %v3756_v17 = vmul.f32 %v4960_v39, %v3542_v34  ;;  %v3544_v12 = vpop.xlane.xlu2 %3543  ;;  %vm3761_vm10 = vweird.f32 %v4960_v39  ;;  %v7725_v40 = vpop.f32.mrf.mxu3 }
 0x83c   : > { %4961 = vrcp.f32 %v3544_v12  ;;  %vm3762_vm12 = vmor %vm3760_vm11, %vm3761_vm10  ;;  %v3781_v53 = vand.u32 2147483648, %v3544_v12  ;;  %v3779_v22 = vand.u32 2147483647, %v3544_v12  ;;  %vm3775_vm15 = vweird.f32 %v3544_v12 }
 0x83d   : > { %v3757_v0 = vsub.f32 1.0, %v3756_v17  ;;  %3103 = vmatmul.f32.gmra.mxu2 %v2993_v63 }
 0x83e   : > { %v3782_v26 = vor.u32 1.1754944e-38, %v3781_v53  ;;  %vm3780_vm2 = vcmp.eq.f32.partialorder %v3779_v22, 8.507059e+37  ;;  %v4963_v53 = vld [vmem:[%s5344_s18] sm:$0xff] }
 0x83f   : > { %v3758_v60 = vmul.f32 %v4960_v39, %v3757_v0 }
 0x841   : > { %v3759_v28 = vadd.f32 %v4960_v39, %v3758_v60 }
 0x842   : > { %v4962_v14 = vpop.eup %4961  ;;  %v3083_v16 = vpop.f32.mrf.mxu2 }
 0x843   : > { %v3771_v43 = vmul.f32 %v4962_v14, %v3544_v12  ;;  %v3763_v44 = vsel %vm3762_vm12, %v4960_v39, %v3759_v28  ;;  %4352 = vmatmul.msk.f32.gmra.mxu3 %vm962_vm1, %v3083_v16  ;;  %vm3776_vm14 = vweird.f32 %v4962_v14  ;;  %v7769_v16 = vld [vmem:[%s7893_s5] ss:$0 sm:$0xff] }
 0x844   : > { %v3768_v37 = vsel %vm3765_vm13, %v3767_v50, %v3763_v44  ;;  %vm3777_vm0 = vmor %vm3775_vm15, %vm3776_vm14 }
 0x845   : > { %v3772_v30 = vsub.f32 1.0, %v3771_v43  ;;  %v3769_v24 = vmul.f32 %v7623_v29, %v3768_v37  ;;  %4392 = vmatmul.msk.f32.vlgmr.msrb.gmra.mxu2 %vm962_vm1, %v3850_v13  ;;  %v3859_v29 = vpop.f32.mrf.mxu1  ;;  %v7729_v13 = vpop.f32.mrf.mxu3 }
 0x847   : > { %v3773_v10 = vmul.f32 %v4962_v14, %v3772_v30  ;;  %3891 = vmatmul.f32.gmra.mxu1 %v3769_v24  ;;  %v2405_v24 = vadd.f32 %v6977_v33, %v7690_v35  ;;  %v4964_v33 = vld [vmem:[%s5344_s18 + $0x8] sm:$0xff] }
 0x849   : > { %v3774_v2 = vadd.f32 %v4962_v14, %v3773_v10 }
 0x84a   : > { %v3086_v7 = vpop.f32.mrf.mxu2 }
 0x84b   : > { %v3778_v47 = vsel %vm3777_vm0, %v4962_v14, %v3774_v2  ;;  %4353 = vmatmul.msk.f32.gmra.mxu3 %vm962_vm1, %v3086_v7  ;;  %v2402_v14 = vadd.f32 %v6967_v61, %v7682_v27  ;;  %v2408_v7 = vadd.f32 %v6989_v59, %v7701_v23 }
 0x84c   : > { %v3783_v31 = vsel %vm3780_vm2, %v3782_v26, %v3778_v47 }
 0x84d   : > { %v3784_v19 = vmul.f32 %v7642_v8, %v3783_v31  ;;  %4393 = vmatmul.msk.f32.gmra.mxu2 %vm962_vm1, %v3853_v18  ;;  %v3862_v41 = vpop.f32.mrf.mxu1  ;;  %v7732_v4 = vpop.f32.mrf.mxu3 }
 0x84f   : > { %3894 = vmatmul.f32.gmra.mxu1 %v3784_v19 }
 0x852   : > { %v3089_v46 = vpop.f32.mrf.mxu2 }
 0x853   : > { %4354 = vmatmul.msk.f32.gmra.mxu3 %vm962_vm1, %v3089_v46 }
 0x855   : > { %4394 = vmatmul.msk.f32.gmra.mxu2 %vm962_vm1, %v3856_v15  ;;  %v3865_v54 = vpop.f32.mrf.mxu1  ;;  %v7736_v58 = vpop.f32.mrf.mxu3 }
 0x85d   : > { %4395 = vmatmul.msk.f32.gmra.mxu2 %vm962_vm1, %v3859_v29  ;;  %v3868_v8 = vpop.f32.mrf.mxu1  ;;  %v7739_v20 = vpop.f32.mrf.mxu3 }
 0x865   : > { %4396 = vmatmul.msk.f32.gmra.mxu2 %vm962_vm1, %v3862_v41  ;;  %v3871_v36 = vpop.f32.mrf.mxu1  ;;  %v7742_v51 = vpop.f32.mrf.mxu3  ;;  %v2411_v41 = vadd.f32 %v6998_v49, %v7711_v6 }
 0x86d   : > { %4397 = vmatmul.msk.f32.gmra.mxu2 %vm962_vm1, %v3865_v54  ;;  %v3874_v34 = vpop.f32.mrf.mxu1  ;;  %v7746_v11 = vpop.f32.mrf.mxu3  ;;  %v4965_v54 = vld [vmem:[%s5344_s18 + $0x10] sm:$0xff] }
 0x875   : > { %4398 = vmatmul.msk.f32.gmra.mxu2 %vm962_vm1, %v3868_v8  ;;  %v3877_v48 = vpop.f32.mrf.mxu1  ;;  %v7751_v9 = vpop.f32.mrf.mxu3 }
 0x87d   : > { %4399 = vmatmul.msk.f32.gmra.mxu2 %vm962_vm1, %v3871_v36  ;;  %v7754_v39 = vpop.f32.mrf.mxu3 }
 0x885   : > { %4400 = vmatmul.msk.f32.gmra.mxu2 %vm962_vm1, %v3874_v34  ;;  %v7757_v17 = vpop.f32.mrf.mxu3 }
 0x888   : > { %v3092_v55 = vpop.f32.mrf.mxu2 }
 0x889   : > { %4355 = vmatmul.msk.f32.gmra.mxu3 %vm962_vm1, %v3092_v55  ;;  %v2414_v55 = vadd.f32 %v7016_v1, %v7715_v25 }
 0x88a   : > { %v3880_v56 = vpop.f32.mrf.mxu1 }
 0x88d   : > { %4401 = vmatmul.msk.f32.gmra.mxu2 %vm962_vm1, %v3877_v48  ;;  %v3176_v0 = vpop.f32.mrf.mxu3 }
 0x88e   : > { %v3224_v43 = vadd.f32 %v3176_v0, %v2402_v14  ;;  %v4967_v0 = vld [vmem:[%s5344_s18 + $0x20] sm:$0xff]  ;;  %v4968_v14 = vld [vmem:[%s5344_s18 + $0x28] sm:$0xff] }
 0x890   : > { %v3095_v62 = vpop.f32.mrf.mxu2 }
 0x891   : > { %4356 = vmatmul.msk.f32.gmra.mxu3 %vm962_vm1, %v3095_v62 }
 0x892   : > { %v3883_v42 = vpop.f32.mrf.mxu1 }
 0x895   : > { %4402 = vmatmul.msk.f32.gmra.mxu2 %vm962_vm1, %v3880_v56  ;;  %v3179_v60 = vpop.f32.mrf.mxu3  ;;  %v4966_v56 = vld [vmem:[%s5344_s18 + $0x18] sm:$0xff] }
 0x896   : > { %v3225_v27 = vadd.f32 %v3179_v60, %v2405_v24 }
 0x89a   : > { %v3886_v18 = vpop.f32.mrf.mxu1 }
 0x89d   : > { %4403 = vmatmul.msk.f32.gmra.mxu2 %vm962_vm1, %v3883_v42  ;;  %v3182_v50 = vpop.f32.mrf.mxu3 }
 0x89e   : > { %v3226_v47 = vadd.f32 %v3182_v50, %v2408_v7 }
 0x8a5   : > { %4404 = vmatmul.msk.f32.gmra.mxu2 %vm962_vm1, %v3886_v18  ;;  %v3185_v10 = vpop.f32.mrf.mxu3 }
 0x8a6   : > { %v3227_v36 = vadd.f32 %v3185_v10, %v2411_v41  ;;  %v2426_v10 = vadd.f32 %v7095_v38, %v7732_v4  ;;  %v8080_v41 = vld [vmem:[#allocation45_spill] sm:$0xff] }
 0x8ad   : > { %v3188_v31 = vpop.f32.mrf.mxu3 }
 0x8ae   : > { %v3228_v42 = vadd.f32 %v3188_v31, %v2414_v55 }
 0x8b0   : > { %v3098_v12 = vpop.f32.mrf.mxu2 }
 0x8b1   : > { %4357 = vmatmul.msk.f32.gmra.mxu3 %vm962_vm1, %v3098_v12 }
 0x8b2   : > { %v3889_v63 = vpop.f32.mrf.mxu1 }
 0x8b3   : > { %4405 = vmatmul.msk.f32.gmra.mxu2 %vm962_vm1, %v3889_v63  ;;  %v2417_v63 = vadd.f32 %v7029_v21, %v7720_v5 }
 0x8b5   : > { %v3191_v34 = vpop.f32.mrf.mxu3 }
 0x8b6   : > { %v3229_v60 = vadd.f32 %v3191_v34, %v2417_v63 }
 0x8b8   : > { %v3101_v57 = vpop.f32.mrf.mxu2 }
 0x8b9   : > { %4358 = vmatmul.msk.f32.gmra.mxu3 %vm962_vm1, %v3101_v57 }
 0x8bd   : > { %v3194_v12 = vpop.f32.mrf.mxu3 }
 0x8c0   : > { %v3104_v45 = vpop.f32.mrf.mxu2 }
 0x8c1   : > { %4359 = vmatmul.msk.f32.gmra.mxu3 %vm962_vm1, %v3104_v45 }
 0x8c4   : > { %v3892_v28 = vpop.f32.mrf.mxu1 }
 0x8c5   : > { %4406 = vmatmul.msk.f32.gmra.mxu2 %vm962_vm1, %v3892_v28  ;;  %v2420_v28 = vadd.f32 %v7048_v52, %v7725_v40 }
 0x8c8   : > { %v3967_v44 = vpop.f32.mrf.mxu2 }
 0x8c9   : > { %v4015_v37 = vadd.f32 %v3967_v44, %v3224_v43  ;;  %v3197_v43 = vpop.f32.mrf.mxu3  ;;  %v3230_v44 = vadd.f32 %v3194_v12, %v2420_v28  ;;  %v8082_v12 = vld [vmem:[#allocation42_spill] sm:$0xff] }
 0x8ca   : > { %v2438_v63 = vadd.f32 %v8082_v12, %v7746_v11 }
 0x8cb   : > { %v4035_v15 = vadd.f32 %v7769_v16, %v4015_v37 }
 0x8cc   : > { %v3895_v30 = vpop.f32.mrf.mxu1 }
 0x8cd   : > { %4407 = vmatmul.msk.f32.gmra.mxu2 %vm962_vm1, %v3895_v30  ;;  %v4051_v61 = vadd.f32 %v4963_v53, %v4035_v15  ;;  %v2423_v15 = vadd.f32 %v7074_v32, %v7729_v13  ;;  %v4969_v30 = vld [vmem:[%s5344_s18 + $0x30] sm:$0xff] }
 0x8cf   : > { %4067 = vst [vmem:[%s7778_s19] sm:$0xff] %v4051_v61  ;;  %v3231_v61 = vadd.f32 %v3197_v43, %v2423_v15 }
 0x8d0   : > { %v3970_v22 = vpop.f32.mrf.mxu2 }
 0x8d1   : > { %v4016_v2 = vadd.f32 %v3970_v22, %v3225_v27  ;;  %v3200_v53 = vpop.f32.mrf.mxu3  ;;  %v4970_v22 = vld [vmem:[%s5344_s18 + $0x38] sm:$0xff] }
 0x8d3   : > { %v4036_v26 = vadd.f32 %v7769_v16, %v4016_v2 }
 0x8d5   : > { %v4052_v35 = vadd.f32 %v4964_v33, %v4036_v26  ;;  %v3232_v26 = vadd.f32 %v3200_v53, %v2426_v10  ;;  %v8085_v10 = vld [vmem:[#allocation47_spill] sm:$0xff] }
 0x8d7   : > { %4068 = vst [vmem:[%s7778_s19 + $0x8] sm:$0xff] %v4052_v35  ;;  %v2429_v35 = vadd.f32 %v7128_v3, %v7736_v58 }
 0x8d8   : > { %v3973_v29 = vpop.f32.mrf.mxu2 }
 0x8d9   : > { %v4017_v19 = vadd.f32 %v3973_v29, %v3226_v47  ;;  %v3203_v32 = vpop.f32.mrf.mxu3  ;;  %v4971_v47 = vld [vmem:[%s5344_s18 + $0x40] sm:$0xff] }
 0x8da   : > { %v3233_v29 = vadd.f32 %v3203_v32, %v2429_v35 }
 0x8db   : > { %v4037_v46 = vadd.f32 %v7769_v16, %v4017_v19 }
 0x8dd   : > { %v4053_v8 = vadd.f32 %v4965_v54, %v4037_v46  ;;  %v2432_v54 = vadd.f32 %v8080_v41, %v7739_v20 }
 0x8df   : > { %4069 = vst [vmem:[%s7778_s19 + $0x10] sm:$0xff] %v4053_v8  ;;  %v4972_v8 = vld [vmem:[%s5344_s18 + $0x48] sm:$0xff] }
 0x8e0   : > { %v3976_v59 = vpop.f32.mrf.mxu2 }
 0x8e1   : > { %v4018_v23 = vadd.f32 %v3976_v59, %v3227_v36  ;;  %v3206_v19 = vpop.f32.mrf.mxu3 }
 0x8e2   : > { %v3234_v59 = vadd.f32 %v3206_v19, %v2432_v54 }
 0x8e3   : > { %v4038_v48 = vadd.f32 %v7769_v16, %v4018_v23 }
 0x8e5   : > { %v4054_v62 = vadd.f32 %v4966_v56, %v4038_v48  ;;  %v8081_v48 = vld [vmem:[#allocation49_spill] sm:$0xff] }
 0x8e6   : > { %v2435_v55 = vadd.f32 %v8081_v48, %v7742_v51  ;;  %v4973_v56 = vld [vmem:[%s5344_s18 + $0x50] sm:$0xff] }
 0x8e7   : > { %4070 = vst [vmem:[%s7778_s19 + $0x18] sm:$0xff] %v4054_v62 }
 0x8e8   : > { %v3979_v49 = vpop.f32.mrf.mxu2 }
 0x8e9   : > { %v4019_v6 = vadd.f32 %v3979_v49, %v3228_v42 }
 0x8eb   : > { %v4039_v18 = vadd.f32 %v7769_v16, %v4019_v6 }
 0x8ed   : > { %v4055_v57 = vadd.f32 %v4967_v0, %v4039_v18  ;;  %v4974_v0 = vld [vmem:[%s5344_s18 + $0x58] sm:$0xff] }
 0x8ef   : > { %4071 = vst [vmem:[%s7778_s19 + $0x20] sm:$0xff] %v4055_v57 }
 0x8f0   : > { %v3982_v1 = vpop.f32.mrf.mxu2 }
 0x8f1   : > { %v4020_v25 = vadd.f32 %v3982_v1, %v3229_v60 }
 0x8f3   : > { %v4040_v45 = vadd.f32 %v7769_v16, %v4020_v25 }
 0x8f5   : > { %v4056_v50 = vadd.f32 %v4968_v14, %v4040_v45  ;;  %v4975_v45 = vld [vmem:[%s5344_s18 + $0x60] sm:$0xff] }
 0x8f6   : > { %v8083_v14 = vld [vmem:[#allocation46_spill] sm:$0xff] }
 0x8f7   : > { %4072 = vst [vmem:[%s7778_s19 + $0x28] sm:$0xff] %v4056_v50  ;;  %v2441_v50 = vadd.f32 %v8083_v14, %v7751_v9 }
 0x8f8   : > { %v3985_v21 = vpop.f32.mrf.mxu2 }
 0x8f9   : > { %v4021_v5 = vadd.f32 %v3985_v21, %v3230_v44 }
 0x8fb   : > { %v4041_v37 = vadd.f32 %v7769_v16, %v4021_v5 }
 0x8fd   : > { %v4057_v24 = vadd.f32 %v4969_v30, %v4041_v37  ;;  %v4976_v37 = vld [vmem:[%s5344_s18 + $0x68] sm:$0xff] }
 0x8ff   : > { %4073 = vst [vmem:[%s7778_s19 + $0x30] sm:$0xff] %v4057_v24  ;;  %v8084_v24 = vld [vmem:[#allocation52_spill] sm:$0xff] }
 0x900   : > { %v3988_v52 = vpop.f32.mrf.mxu2  ;;  %v2444_v53 = vadd.f32 %v8084_v24, %v7754_v39 }
 0x901   : > { %v4022_v40 = vadd.f32 %v3988_v52, %v3231_v61 }
 0x903   : > { %v4042_v27 = vadd.f32 %v7769_v16, %v4022_v40 }
 0x905   : > { %v4058_v2 = vadd.f32 %v4970_v22, %v4042_v27  ;;  %v2447_v22 = vadd.f32 %v8085_v10, %v7757_v17 }
 0x907   : > { %4074 = vst [vmem:[%s7778_s19 + $0x38] sm:$0xff] %v4058_v2  ;;  %v4977_v2 = vld [vmem:[%s5344_s18 + $0x70] sm:$0xff] }
 0x908   : > { %v3991_v13 = vpop.f32.mrf.mxu2 }
 0x909   : > { %v4023_v7 = vadd.f32 %v3991_v13, %v3232_v26 }
 0x90b   : > { %v4043_v33 = vadd.f32 %v7769_v16, %v4023_v7 }
 0x90c   : > { %v3209_v23 = vpop.f32.mrf.mxu3 }
 0x90d   : > { %v4059_v31 = vadd.f32 %v4971_v47, %v4043_v33  ;;  %v3235_v42 = vadd.f32 %v3209_v23, %v2435_v55  ;;  %v4978_v33 = vld [vmem:[%s5344_s18 + $0x78] sm:$0xff] }
 0x90f   : > { %4075 = vst [vmem:[%s7778_s19 + $0x40] sm:$0xff] %v4059_v31 }
 0x910   : > { %v3994_v38 = vpop.f32.mrf.mxu2 }
 0x911   : > { %v4024_v4 = vadd.f32 %v3994_v38, %v3233_v29 }
 0x913   : > { %v4044_v46 = vadd.f32 %v7769_v16, %v4024_v4 }
 0x914   : > { %v3212_v18 = vpop.f32.mrf.mxu3 }
 0x915   : > { %v4060_v36 = vadd.f32 %v4972_v8, %v4044_v46  ;;  %v3236_v60 = vadd.f32 %v3212_v18, %v2438_v63 }
 0x917   : > { %4076 = vst [vmem:[%s7778_s19 + $0x48] sm:$0xff] %v4060_v36 }
 0x918   : > { %v3997_v3 = vpop.f32.mrf.mxu2 }
 0x919   : > { %v4025_v58 = vadd.f32 %v3997_v3, %v3234_v59 }
 0x91b   : > { %v4045_v34 = vadd.f32 %v7769_v16, %v4025_v58 }
 0x91d   : > { %v4061_v62 = vadd.f32 %v4973_v56, %v4045_v34 }
 0x91f   : > { %4077 = vst [vmem:[%s7778_s19 + $0x50] sm:$0xff] %v4061_v62 }
 0x920   : > { %v4000_v20 = vpop.f32.mrf.mxu2 }
 0x921   : > { %v4026_v49 = vadd.f32 %v4000_v20, %v3235_v42 }
 0x923   : > { %v4046_v6 = vadd.f32 %v7769_v16, %v4026_v49 }
 0x925   : > { %v4062_v57 = vadd.f32 %v4974_v0, %v4046_v6 }
 0x927   : > { %4078 = vst [vmem:[%s7778_s19 + $0x58] sm:$0xff] %v4062_v57 }
 0x928   : > { %v4003_v51 = vpop.f32.mrf.mxu2 }
 0x929   : > { %v4027_v1 = vadd.f32 %v4003_v51, %v3236_v60 }
 0x92b   : > { %v4047_v25 = vadd.f32 %v7769_v16, %v4027_v1 }
 0x92d   : > { %v4063_v28 = vadd.f32 %v4975_v45, %v4047_v25 }
 0x92f   : > { %4079 = vst [vmem:[%s7778_s19 + $0x60] sm:$0xff] %v4063_v28 }
 0x934   : > { %v3215_v43 = vpop.f32.mrf.mxu3 }
 0x935   : > { %v3237_v44 = vadd.f32 %v3215_v43, %v2441_v50 }
 0x936   : > { %v4006_v11 = vpop.f32.mrf.mxu2 }
 0x937   : > { %v4028_v21 = vadd.f32 %v4006_v11, %v3237_v44 }
 0x939   : > { %v4048_v5 = vadd.f32 %v7769_v16, %v4028_v21 }
 0x93b   : > { %v4064_v15 = vadd.f32 %v4976_v37, %v4048_v5 }
 0x93c   : > { %v3218_v30 = vpop.f32.mrf.mxu3 }
 0x93d   : > { %4080 = vst [vmem:[%s7778_s19 + $0x68] sm:$0xff] %v4064_v15  ;;  %v3238_v61 = vadd.f32 %v3218_v30, %v2444_v53 }
 0x944   : > { %v3221_v27 = vpop.f32.mrf.mxu3 }
 0x945   : > { %v3239_v39 = vadd.f32 %v3221_v27, %v2447_v22 }
 0x948   : > { %v4009_v52 = vpop.f32.mrf.mxu2 }
 0x949   : > { %v4029_v40 = vadd.f32 %v4009_v52, %v3238_v61 }
 0x94b   : > { %v4049_v9 = vadd.f32 %v7769_v16, %v4029_v40 }
 0x94d   : > { %v4065_v26 = vadd.f32 %v4977_v2, %v4049_v9 }
 0x94f   : > { %4081 = vst [vmem:[%s7778_s19 + $0x70] sm:$0xff] %v4065_v26 }
 0x950   : > { %v4012_v32 = vpop.f32.mrf.mxu2 }
 0x951   : > { %v4030_v13 = vadd.f32 %v4012_v32, %v3239_v39 }
 0x953   : > { %v4050_v7 = vadd.f32 %v7769_v16, %v4030_v13 }
 0x955   : > { %v4066_v17 = vadd.f32 %v4978_v33, %v4050_v7 }
 0x957   : > { %4082 = vst [vmem:[%s7778_s19 + $0x78] sm:$0xff] %v4066_v17 }
 0x958   : > { %5126 = shalt.err (!%p5123_p11)
}
 0x959   : > { %s5186_s16 = smov 128   ;;  %s5187_s18 = smov 8  }
 0x95a   : > { %4477 = dma.vmem_to_hbm [thread:$0]  (%p5308_p3), %s4097_s9, 2048, %s4099_s27, %s4084_s25, %s5186_s16, %s5186_s16, %s5187_s18  }
 0x95b PF: > { %s4113_s19 = sand.u32 1, %s5161_s21   ;;  %p8086_p12 = scmp.ge.s32.totalorder %s5173_s24, 2 }
 0x95c   : > { %s4114_s14 = scalar_lea.sflag [#allocation4], %s4113_s19 }
 0x95d   : > { %p4494_p13 = pnand %p8086_p12, %p5258_p6 }
 0x95f   : > { %p4495_p0 = pneg %p4494_p13 }
 0x961   : > { %5156 = dma.done.wait (%p4495_p0), %s4114_s14, 2048  }
 0x962   : > { %5158 = vsyncadd (%p4495_p0), %s4114_s14, 4294965248  ;;  %p21_p5 = scmp.ge.s32.totalorder %s5295_s10, 4   ;;  %s8087_s21 = smov %s5165_s22 }
 0x963   : > { %s8088_s22 = smov %s5169_s23  ;;  %s8089_s23 = smov %s5304_s13 }
 0x964   : > { %s8090_s24 = smov %s5295_s10  ;;  %23 = sbr.rel (!%p21_p5) target bundleno = 7 (0x7), region = 101 }
 0x969   :  { %4120 = vsyncpa [#allocation3], 1 }
 0x96a   :  { %4122 = vsyncpa [#allocation3 + $0x1], 1 }
 0x96b   :  { %4123 = vsyncpa [#allocation6], 1 }
 0x96c   :  { %4124 = vsyncpa [#allocation9], 1 }
 0x96d   :  { %4125 = vsyncpa [#allocation4], 1 }
 0x96e   :  { %4127 = vsyncpa [#allocation4 + $0x1], 1 }

</bundles_post_ra>
